<compile_context>
chip_gen: v7x
topology: tpu7x:2x2x1
jax: 0.10.0
libtpu: 0.0.40
codegen_flags: <defaults>
</compile_context>

<pallas_src>
import functools

import numpy as np
import jax
import jax.numpy as jnp
from jax import lax
from jax.experimental import pallas as pl
from jax.experimental.pallas import tpu as pltpu

LRELU_SLOPE = 0.2
IN_EPS = 1e-5
KW = 4            # conv kernel size
PADW = 2          # int(ceil((4 - 1) / 2))
TILE_HO = 16      # conv: max output rows per grid step
TILE_HO_POOL = 8  # pool: output rows per grid step (multiple of 8 keeps blocks legal)


def _ceil_div(a, b):
    return -(-a // b)


def _band(extent, tile):
    """Balanced banding: nb bands of T rows each, T <= tile, nb*T >= extent."""
    nb = _ceil_div(extent, tile)
    return nb, _ceil_div(extent, nb)


@functools.lru_cache(maxsize=1)
def _vmem_cap_bytes():
    try:
        return int(pltpu.get_tpu_info().vmem_capacity_bytes)
    except Exception:
        return 64 * 1024 * 1024          # conservative fallback (v7x per-TC VMEM)


def _vmem_limit(block_bytes):
    cap = (3 * _vmem_cap_bytes()) // 4   # leave headroom for the compiler
    need = 2 * block_bytes + (2 << 20)   # double-buffered blocks + slack
    return int(min(max(8 << 20, need), cap))


def _phase_split_nhwc(x, pad, s, hh_min, wh_min):
    """Zero-pad spatially and split H and W into s phases.

    Returns y of shape (N, s*s, Hh, Wh, C) with
      y[n, ph*s + pw, hq, wq, c] == x_padded[n, hq*s + ph, wq*s + pw, c],
    so a stride-s conv tap becomes a contiguous (rows, cols, C) slab read in-kernel.
    """
    N, H, W, C = x.shape
    Hh = max(_ceil_div(H + 2 * pad, s), hh_min)
    Wh = max(_ceil_div(W + 2 * pad, s), wh_min)
    xp = jnp.pad(x, ((0, 0), (pad, s * Hh - H - pad), (pad, s * Wh - W - pad), (0, 0)))
    x6 = xp.reshape(N, Hh, s, Wh, s, C)
    x6 = jnp.transpose(x6, (0, 2, 4, 1, 3, 5))
    return x6.reshape(N, s * s, Hh, Wh, C)


def _phase_split_bhw(x, pad, s, hh_min, wh_min):
    """Same as above for (B, H, W) (channel-independent pooling layout)."""
    B, H, W = x.shape
    Hh = max(_ceil_div(H + 2 * pad, s), hh_min)
    Wh = max(_ceil_div(W + 2 * pad, s), wh_min)
    xp = jnp.pad(x, ((0, 0), (pad, s * Hh - H - pad), (pad, s * Wh - W - pad)))
    x5 = xp.reshape(B, Hh, s, Wh, s)
    x5 = jnp.transpose(x5, (0, 2, 4, 1, 3))
    return x5.reshape(B, s * s, Hh, Wh)


# ------------------------------------------------------------------
# Conv2d kernel: a band of T output rows per grid step, taps unrolled as K loop
# ------------------------------------------------------------------

def _conv_band_kernel(x_ref, w_ref, b_ref, o_ref, *, s, t_rows, wo, fuse_rows,
                      apply_lrelu):
    """x_ref: (1, s*s, Hh, Wh, Cin) bf16 (resident per image)
       w_ref: (KW*KW, Cin, tcout) bf16
       b_ref: (1, tcout) f32
       o_ref: (1, t_rows, wo, tcout)
    """
    band = pl.program_id(2)
    r0 = band * t_rows
    bias = b_ref[...]                                        # (1, tcout)
    tcout = w_ref.shape[-1]

    def epilogue(acc):
        out = acc + bias
        if apply_lrelu:
            out = jnp.where(out >= 0, out, LRELU_SLOPE * out)
        return out.astype(o_ref.dtype)

    if fuse_rows:
        # Whole band shares one (T*Wo, Cin) x (Cin, tcout) matmul per tap (large M).
        acc = jnp.zeros((t_rows * wo, tcout), jnp.float32)
        for dy in range(KW):
            ph, qy = dy % s, dy // s
            for dx in range(KW):
                pw, qx = dx % s, dx // s
                a = x_ref[0, ph * s + pw, pl.ds(r0 + qy, t_rows), pl.ds(qx, wo), :]
                acc = acc + jnp.dot(a.reshape(t_rows * wo, a.shape[-1]),
                                    w_ref[dy * KW + dx],
                                    preferred_element_type=jnp.float32)
        o_ref[0] = epilogue(acc).reshape(t_rows, wo, tcout)
    else:
        # Safe path for unaligned Wo: per-row (Wo, Cin) x (Cin, tcout) dots.
        for t in range(t_rows):
            acc = jnp.zeros((wo, tcout), jnp.float32)
            for dy in range(KW):
                ph, qy = dy % s, dy // s
                for dx in range(KW):
                    pw, qx = dx % s, dx // s
                    a = x_ref[0, ph * s + pw, r0 + t + qy, pl.ds(qx, wo), :]
                    acc = acc + jnp.dot(a, w_ref[dy * KW + dx],
                                        preferred_element_type=jnp.float32)
            o_ref[0, t] = epilogue(acc)


def conv2d_nhwc(x, wk, bk, stride, apply_lrelu, out_dtype):
    """x: (N,H,W,Cin); wk: (KW*KW,Cin,Cout) bf16; bk: (1,Cout) f32 -> (N,Ho,Wo,Cout)."""
    N, H, W, Cin = x.shape
    _, _, Cout = wk.shape
    Ho = (H + 2 * PADW - KW) // stride + 1
    Wo = (W + 2 * PADW - KW) // stride + 1

    nb, T = _band(Ho, TILE_HO)
    qmax = (KW - 1) // stride
    # Pad so in-kernel reads for (possibly over-extended) bands stay in-bounds.
    xph = _phase_split_nhwc(x.astype(jnp.bfloat16), PADW, stride,
                            hh_min=nb * T + qmax, wh_min=Wo + qmax)
    _, P, Hh, Wh, _ = xph.shape

    # Cout tiling toward native MXU width (256 on v6e/v7x, 128 on v5e).
    if Cout % 256 == 0:
        tcout = 256
    elif Cout % 128 == 0:
        tcout = 128
    else:
        tcout = Cout
    n_ct = Cout // tcout

    # Fused (big-M) path only when the reshape is sublane-aligned for bf16/f32 tiles.
    fuse_rows = (Wo % 16 == 0) and (T > 1)

    out_bytes = jnp.dtype(out_dtype).itemsize
    block_bytes = (P * Hh * Wh * Cin * 2 + KW * KW * Cin * tcout * 2
                   + tcout * 4 + T * Wo * tcout * out_bytes)
    flops = 2 * N * Ho * Wo * Cout * Cin * KW * KW
    bytes_accessed = (xph.size * 2 + wk.size * 2 + bk.size * 4
                      + N * Ho * Wo * Cout * out_bytes)

    return pl.pallas_call(
        functools.partial(_conv_band_kernel, s=stride, t_rows=T, wo=Wo,
                          fuse_rows=fuse_rows, apply_lrelu=apply_lrelu),
        out_shape=jax.ShapeDtypeStruct((N, Ho, Wo, Cout), out_dtype),
        grid_spec=pltpu.PrefetchScalarGridSpec(
            num_scalar_prefetch=0,
            grid=(N, n_ct, nb),                 # bands innermost: image slab + weight
            in_specs=[                          # tile stay resident across bands.
                pl.BlockSpec((1, P, Hh, Wh, Cin), lambda n, j, b: (n, 0, 0, 0, 0)),
                pl.BlockSpec((KW * KW, Cin, tcout), lambda n, j, b: (0, 0, j)),
                pl.BlockSpec((1, tcout), lambda n, j, b: (0, j)),
            ],
            out_specs=pl.BlockSpec((1, T, Wo, tcout), lambda n, j, b: (n, b, 0, j)),
        ),
        compiler_params=pltpu.CompilerParams(
            dimension_semantics=("parallel", "parallel", "parallel"),
            vmem_limit_bytes=_vmem_limit(block_bytes),
        ),
        cost_estimate=pl.CostEstimate(flops=flops, transcendentals=0,
                                      bytes_accessed=bytes_accessed),
    )(xph, wk, bk)


# ------------------------------------------------------------------
# InstanceNorm2d (affine=False) + LeakyReLU, channel-last, bf16 in/out, f32 stats
# ------------------------------------------------------------------

def _inorm_lrelu_kernel(x_ref, o_ref, *, inv_hw):
    x = x_ref[0].astype(jnp.float32)                          # (HW, tc)
    mean = jnp.sum(x, axis=0, keepdims=True) * inv_hw
    xc = x - mean
    var = jnp.sum(xc * xc, axis=0, keepdims=True) * inv_hw    # biased, two-pass
    y = xc * lax.rsqrt(var + IN_EPS)
    o_ref[0] = jnp.where(y >= 0, y, LRELU_SLOPE * y).astype(o_ref.dtype)


def instance_norm_lrelu_nhwc(x):
    """x: (N, H, W, C) -> same shape/dtype (bf16 between layers)."""
    N, H, W, C = x.shape
    hw = H * W
    tc = 128 if C % 128 == 0 else C
    x2 = x.reshape(N, hw, C)
    out = pl.pallas_call(
        functools.partial(_inorm_lrelu_kernel, inv_hw=1.0 / hw),
        out_shape=jax.ShapeDtypeStruct((N, hw, C), x.dtype),
        grid_spec=pltpu.PrefetchScalarGridSpec(
            num_scalar_prefetch=0,
            grid=(N, C // tc),
            in_specs=[pl.BlockSpec((1, hw, tc), lambda n, c: (n, 0, c))],
            out_specs=pl.BlockSpec((1, hw, tc), lambda n, c: (n, 0, c)),
        ),
        compiler_params=pltpu.CompilerParams(
            dimension_semantics=("parallel", "parallel"),
            vmem_limit_bytes=_vmem_limit(2 * hw * tc * x.dtype.itemsize),
        ),
    )(x2)
    return out.reshape(N, H, W, C)


# ------------------------------------------------------------------
# AvgPool2d(3, stride=2, padding=1, count_include_pad=False) on (N*C, H, W)
# (channel-independent -> W in lanes, lane-dense stores)
# ------------------------------------------------------------------

def _avgpool_band_kernel(x_ref, inv_ref, o_ref, *, t_rows, wo):
    """x_ref: (1, 4, Hh, Wh) bf16; inv_ref: (1, t_rows, wo) f32; o_ref: (1, t_rows, wo)."""
    band = pl.program_id(1)
    r0 = band * t_rows
    acc = jnp.zeros((t_rows, wo), jnp.float32)
    for dy in range(3):
        ph, qy = dy % 2, dy // 2
        for dx in range(3):
            pw, qx = dx % 2, dx // 2
            acc = acc + x_ref[0, ph * 2 + pw, pl.ds(r0 + qy, t_rows),
                              pl.ds(qx, wo)].astype(jnp.float32)
    o_ref[0] = (acc * inv_ref[0]).astype(o_ref.dtype)


def avg_pool_3x3_s2_bhw(x):
    """x: (B, H, W) bf16 -> (B, Ho, Wo) bf16."""
    B, H, W = x.shape
    Ho = (H + 2 - 3) // 2 + 1
    Wo = (W + 2 - 3) // 2 + 1
    if Ho <= TILE_HO_POOL:
        nb, T = 1, Ho                       # block 2nd-to-last dim == full extent
    else:
        nb, T = _ceil_div(Ho, TILE_HO_POOL), TILE_HO_POOL   # multiple of 8
    xph = _phase_split_bhw(x, 1, 2, hh_min=nb * T + 1, wh_min=Wo + 1)
    _, P, Hh, Wh = xph.shape

    # 1 / (# valid taps) per output position -- static geometry, host-side.
    hi = 2 * np.arange(nb * T)[:, None] + np.arange(3)[None, :] - 1
    wi = 2 * np.arange(Wo)[:, None] + np.arange(3)[None, :] - 1
    cnt = (((hi >= 0) & (hi < H)).sum(1)[:, None]
           * ((wi >= 0) & (wi < W)).sum(1)[None, :])
    inv = jnp.asarray((1.0 / np.maximum(cnt, 1)).astype(np.float32).reshape(nb, T, Wo))

    return pl.pallas_call(
        functools.partial(_avgpool_band_kernel, t_rows=T, wo=Wo),
        out_shape=jax.ShapeDtypeStruct((B, Ho, Wo), x.dtype),
        grid_spec=pltpu.PrefetchScalarGridSpec(
            num_scalar_prefetch=0,
            grid=(B, nb),
            in_specs=[
                pl.BlockSpec((1, P, Hh, Wh), lambda b, k: (b, 0, 0, 0)),
                pl.BlockSpec((1, T, Wo), lambda b, k: (k, 0, 0)),
            ],
            out_specs=pl.BlockSpec((1, T, Wo), lambda b, k: (b, k, 0)),
        ),
        compiler_params=pltpu.CompilerParams(
            dimension_semantics=("parallel", "parallel"),
            vmem_limit_bytes=_vmem_limit(P * Hh * Wh * x.dtype.itemsize
                                         + 2 * T * Wo * 4),
        ),
    )(xph, inv)


# ------------------------------------------------------------------
# Model: parameters + forward
# ------------------------------------------------------------------

def nlayer_config(input_nc, ndf, n_layers):
    """(cin, cout, stride, has_norm, has_act) per conv, mirroring NLayerDiscriminator."""
    cfg = [(input_nc, ndf, 2, False, True)]
    nf = ndf
    for _ in range(1, n_layers):
        nf_prev, nf = nf, min(nf * 2, 512)
        cfg.append((nf_prev, nf, 2, True, True))
    nf_prev, nf = nf, min(nf * 2, 512)
    cfg.append((nf_prev, nf, 1, True, True))
    cfg.append((nf, 1, 1, False, False))
    return cfg


def init_nlayer_params(key, input_nc, ndf, n_layers):
    params = []
    for (cin, cout, stride, norm, act) in nlayer_config(input_nc, ndf, n_layers):
        key, k1, k2 = jax.random.split(key, 3)
        wscale = 1.0 / np.sqrt(cin * KW * KW)
        w = jax.random.normal(k1, (cout, cin, KW, KW), jnp.float32) * wscale
        b = jax.random.normal(k2, (cout,), jnp.float32) * 0.01
        params.append({
            "w": w, "b": b,                                   # reference (OIHW) layout
            # kernel layout prepared once at init (no per-call transposes):
            "wk": jnp.transpose(w, (2, 3, 1, 0)).reshape(KW * KW, cin, cout)
                     .astype(jnp.bfloat16),
            "bk": b.reshape(1, cout),
            "stride": stride, "norm": norm, "act": act,
        })
    return params, key


def nlayer_forward(params, x_nhwc):
    h = x_nhwc
    last = len(params) - 1
    for li, p in enumerate(params):
        fuse_act = p["act"] and not p["norm"]                 # first conv: fused LeakyReLU
        out_dtype = jnp.float32 if li == last else jnp.bfloat16
        h = conv2d_nhwc(h, p["wk"], p["bk"], p["stride"], fuse_act, out_dtype)
        if p["norm"]:                                         # norm layers -> LeakyReLU
            h = instance_norm_lrelu_nhwc(h)
    return h


def multiscale_forward(all_params, x_nchw):
    """Matches MultiscaleDiscriminator.forward: list of [single output] per scale (NCHW)."""
    num_D = len(all_params)
    N, C, H, W = x_nchw.shape
    # Downsampling pyramid kept as (N*C, H, W) bf16: lane-dense pooling, and the
    # first conv casts to bf16 anyway.
    pyr = x_nchw.astype(jnp.bfloat16).reshape(N * C, H, W)
    result = []
    for i in range(num_D):
        _, h, w = pyr.shape
        x_nhwc = jnp.transpose(pyr.reshape(N, C, h, w), (0, 2, 3, 1))
        out = nlayer_forward(all_params[num_D - 1 - i], x_nhwc)
        result.append([jnp.transpose(out, (0, 3, 1, 2))])     # back to NCHW at boundary
        if i != num_D - 1:
            pyr = avg_pool_3x3_s2_bhw(pyr)
    return result


# ------------------------------------------------------------------
# Pure-JAX f32 reference (for correctness check only)
# ------------------------------------------------------------------

def _conv_ref(x, w, b, s, pad):
    out = lax.conv_general_dilated(x, w, (s, s), [(pad, pad), (pad, pad)],
                                   dimension_numbers=("NCHW", "OIHW", "NCHW"))
    return out + b[None, :, None, None]


def _inorm_lrelu_ref(x):
    mean = x.mean(axis=(2, 3), keepdims=True)
    var = ((x - mean) ** 2).mean(axis=(2, 3), keepdims=True)
    y = (x - mean) / jnp.sqrt(var + IN_EPS)
    return jnp.where(y >= 0, y, LRELU_SLOPE * y)


def _lrelu_ref(x):
    return jnp.where(x >= 0, x, LRELU_SLOPE * x)


def _avgpool_ref(x):
    pads = [(0, 0), (0, 0), (1, 1), (1, 1)]
    sums = lax.reduce_window(x, 0.0, lax.add, (1, 1, 3, 3), (1, 1, 2, 2), pads)
    cnt = lax.reduce_window(jnp.ones_like(x), 0.0, lax.add, (1, 1, 3, 3), (1, 1, 2, 2), pads)
    return sums / cnt


def _nlayer_ref(params, x):
    h = x
    for p in params:
        h = _conv_ref(h, p["w"], p["b"], p["stride"], PADW)
        if p["norm"]:
            h = _inorm_lrelu_ref(h)
        elif p["act"]:
            h = _lrelu_ref(h)
    return h


def _multiscale_ref(all_params, x):
    num_D = len(all_params)
    result = []
    xd = x
    for i in range(num_D):
        result.append([_nlayer_ref(all_params[num_D - 1 - i], xd)])
        if i != num_D - 1:
            xd = _avgpool_ref(xd)
    return result


# ------------------------------------------------------------------

if __name__ == "__main__":
    input_nc, ndf, n_layers, num_D = 4, 8, 3, 3
    N, H, W = 2, 16, 16

    key = jax.random.PRNGKey(0)
    key, kx = jax.random.split(key)
    x = jax.random.normal(kx, (N, input_nc, H, W), jnp.float32)

    all_params = []
    for _ in range(num_D):
        p, key = init_nlayer_params(key, input_nc, ndf, n_layers)
        all_params.append(p)

    outs = multiscale_forward(all_params, x)
    outs = jax.block_until_ready(outs)

    # Convs and inter-layer activations are bf16 end-to-end (f32 accumulation /
    # statistics), so compare against the f32 reference with a relaxed tolerance.
    refs = _multiscale_ref(all_params, x)
    for o, r in zip(outs, refs):
        assert o[0].shape == r[0].shape, (o[0].shape, r[0].shape)
        np.testing.assert_allclose(np.asarray(o[0]), np.asarray(r[0]),
                                   rtol=7.5e-2, atol=7.5e-2)

    print("KERNEL_OK")
</pallas_src>

<mosaic_0001>
module attributes {stable_mosaic.version = 11 : i64} {
  func.func @_conv_band_kernel(%arg0: i32, %arg1: i32, %arg2: i32, %arg3: memref<1x4x10x10x4xbf16, #tpu.memory_space<vmem>>, %arg4: memref<16x4x8xbf16, #tpu.memory_space<vmem>>, %arg5: memref<1x8xf32, #tpu.memory_space<vmem>>, %arg6: memref<1x9x9x8xbf16, #tpu.memory_space<vmem>>) attributes {dimension_semantics = [#tpu.dimension_semantics<parallel>, #tpu.dimension_semantics<parallel>, #tpu.dimension_semantics<parallel>], iteration_bounds = array<i64: 2, 1, 1>, scalar_prefetch = 0 : i64, scratch_operands = 0 : i64, tpu.core_type = #tpu.core_type<tc>, window_params = [{transform_indices = @transform_0, window_bounds = array<i64: 1, 4, 10, 10, 4>}, {transform_indices = @transform_1, window_bounds = array<i64: 16, 4, 8>}, {transform_indices = @transform_2, window_bounds = array<i64: 1, 8>}, {transform_indices = @transform_3, window_bounds = array<i64: 1, 9, 9, 8>}]} {
    %c9_i32 = arith.constant 9 : i32
    %0 = arith.muli %arg2, %c9_i32 : i32
    %c0 = arith.constant 0 : index
    %c0_0 = arith.constant 0 : index
    %1 = vector.load %arg5[%c0, %c0_0] : memref<1x8xf32, #tpu.memory_space<vmem>>, vector<1x8xf32>
    %cst = arith.constant 0.000000e+00 : f32
    %2 = vector.broadcast %cst : f32 to vector<9x8xf32>
    %c0_i32 = arith.constant 0 : i32
    %3 = arith.addi %0, %c0_i32 : i32
    %c0_i32_1 = arith.constant 0 : i32
    %4 = arith.addi %3, %c0_i32_1 : i32
    %c0_2 = arith.constant 0 : index
    %c0_3 = arith.constant 0 : index
    %5 = arith.index_cast %4 : i32 to index
    %c0_4 = arith.constant 0 : index
    %c0_5 = arith.constant 0 : index
    %6 = vector.load %arg3[%c0_2, %c0_3, %5, %c0_4, %c0_5] : memref<1x4x10x10x4xbf16, #tpu.memory_space<vmem>>, vector<1x1x1x9x4xbf16>
    %7 = vector.shape_cast %6 : vector<1x1x1x9x4xbf16> to vector<9x4xbf16>
    %c0_6 = arith.constant 0 : index
    %c0_7 = arith.constant 0 : index
    %c0_8 = arith.constant 0 : index
    %8 = vector.load %arg4[%c0_6, %c0_7, %c0_8] : memref<16x4x8xbf16, #tpu.memory_space<vmem>>, vector<1x4x8xbf16>
    %9 = vector.shape_cast %8 : vector<1x4x8xbf16> to vector<4x8xbf16>
    %cst_9 = arith.constant dense<0.000000e+00> : vector<9x8xf32>
    %10 = tpu.matmul %7, %9, %cst_9 {dimension_numbers = #tpu.dot_dimension_numbers<[1], [0], [0], [1], [0, 0, 1, 1], [], []>} : vector<9x4xbf16>, vector<4x8xbf16>, vector<9x8xf32> -> vector<9x8xf32>
    %11 = arith.addf %2, %10 : vector<9x8xf32>
    %c0_i32_10 = arith.constant 0 : i32
    %12 = arith.addi %0, %c0_i32_10 : i32
    %c0_i32_11 = arith.constant 0 : i32
    %13 = arith.addi %12, %c0_i32_11 : i32
    %c0_12 = arith.constant 0 : index
    %c1 = arith.constant 1 : index
    %14 = arith.index_cast %13 : i32 to index
    %c0_13 = arith.constant 0 : index
    %c0_14 = arith.constant 0 : index
    %15 = vector.load %arg3[%c0_12, %c1, %14, %c0_13, %c0_14] : memref<1x4x10x10x4xbf16, #tpu.memory_space<vmem>>, vector<1x1x1x9x4xbf16>
    %16 = vector.shape_cast %15 : vector<1x1x1x9x4xbf16> to vector<9x4xbf16>
    %c1_15 = arith.constant 1 : index
    %c0_16 = arith.constant 0 : index
    %c0_17 = arith.constant 0 : index
    %17 = vector.load %arg4[%c1_15, %c0_16, %c0_17] : memref<16x4x8xbf16, #tpu.memory_space<vmem>>, vector<1x4x8xbf16>
    %18 = vector.shape_cast %17 : vector<1x4x8xbf16> to vector<4x8xbf16>
    %cst_18 = arith.constant dense<0.000000e+00> : vector<9x8xf32>
    %19 = tpu.matmul %16, %18, %cst_18 {dimension_numbers = #tpu.dot_dimension_numbers<[1], [0], [0], [1], [0, 0, 1, 1], [], []>} : vector<9x4xbf16>, vector<4x8xbf16>, vector<9x8xf32> -> vector<9x8xf32>
    %20 = arith.addf %11, %19 : vector<9x8xf32>
    %c0_i32_19 = arith.constant 0 : i32
    %21 = arith.addi %0, %c0_i32_19 : i32
    %c0_i32_20 = arith.constant 0 : i32
    %22 = arith.addi %21, %c0_i32_20 : i32
    %c0_21 = arith.constant 0 : index
    %c0_22 = arith.constant 0 : index
    %23 = arith.index_cast %22 : i32 to index
    %c1_23 = arith.constant 1 : index
    %c0_24 = arith.constant 0 : index
    %24 = vector.load %arg3[%c0_21, %c0_22, %23, %c1_23, %c0_24] : memref<1x4x10x10x4xbf16, #tpu.memory_space<vmem>>, vector<1x1x1x9x4xbf16>
    %25 = vector.shape_cast %24 : vector<1x1x1x9x4xbf16> to vector<9x4xbf16>
    %c2 = arith.constant 2 : index
    %c0_25 = arith.constant 0 : index
    %c0_26 = arith.constant 0 : index
    %26 = vector.load %arg4[%c2, %c0_25, %c0_26] : memref<16x4x8xbf16, #tpu.memory_space<vmem>>, vector<1x4x8xbf16>
    %27 = vector.shape_cast %26 : vector<1x4x8xbf16> to vector<4x8xbf16>
    %cst_27 = arith.constant dense<0.000000e+00> : vector<9x8xf32>
    %28 = tpu.matmul %25, %27, %cst_27 {dimension_numbers = #tpu.dot_dimension_numbers<[1], [0], [0], [1], [0, 0, 1, 1], [], []>} : vector<9x4xbf16>, vector<4x8xbf16>, vector<9x8xf32> -> vector<9x8xf32>
    %29 = arith.addf %20, %28 : vector<9x8xf32>
    %c0_i32_28 = arith.constant 0 : i32
    %30 = arith.addi %0, %c0_i32_28 : i32
    %c0_i32_29 = arith.constant 0 : i32
    %31 = arith.addi %30, %c0_i32_29 : i32
    %c0_30 = arith.constant 0 : index
    %c1_31 = arith.constant 1 : index
    %32 = arith.index_cast %31 : i32 to index
    %c1_32 = arith.constant 1 : index
    %c0_33 = arith.constant 0 : index
    %33 = vector.load %arg3[%c0_30, %c1_31, %32, %c1_32, %c0_33] : memref<1x4x10x10x4xbf16, #tpu.memory_space<vmem>>, vector<1x1x1x9x4xbf16>
    %34 = vector.shape_cast %33 : vector<1x1x1x9x4xbf16> to vector<9x4xbf16>
    %c3 = arith.constant 3 : index
    %c0_34 = arith.constant 0 : index
    %c0_35 = arith.constant 0 : index
    %35 = vector.load %arg4[%c3, %c0_34, %c0_35] : memref<16x4x8xbf16, #tpu.memory_space<vmem>>, vector<1x4x8xbf16>
    %36 = vector.shape_cast %35 : vector<1x4x8xbf16> to vector<4x8xbf16>
    %cst_36 = arith.constant dense<0.000000e+00> : vector<9x8xf32>
    %37 = tpu.matmul %34, %36, %cst_36 {dimension_numbers = #tpu.dot_dimension_numbers<[1], [0], [0], [1], [0, 0, 1, 1], [], []>} : vector<9x4xbf16>, vector<4x8xbf16>, vector<9x8xf32> -> vector<9x8xf32>
    %38 = arith.addf %29, %37 : vector<9x8xf32>
    %c0_i32_37 = arith.constant 0 : i32
    %39 = arith.addi %0, %c0_i32_37 : i32
    %c0_i32_38 = arith.constant 0 : i32
    %40 = arith.addi %39, %c0_i32_38 : i32
    %c0_39 = arith.constant 0 : index
    %c2_40 = arith.constant 2 : index
    %41 = arith.index_cast %40 : i32 to index
    %c0_41 = arith.constant 0 : index
    %c0_42 = arith.constant 0 : index
    %42 = vector.load %arg3[%c0_39, %c2_40, %41, %c0_41, %c0_42] : memref<1x4x10x10x4xbf16, #tpu.memory_space<vmem>>, vector<1x1x1x9x4xbf16>
    %43 = vector.shape_cast %42 : vector<1x1x1x9x4xbf16> to vector<9x4xbf16>
    %c4 = arith.constant 4 : index
    %c0_43 = arith.constant 0 : index
    %c0_44 = arith.constant 0 : index
    %44 = vector.load %arg4[%c4, %c0_43, %c0_44] : memref<16x4x8xbf16, #tpu.memory_space<vmem>>, vector<1x4x8xbf16>
    %45 = vector.shape_cast %44 : vector<1x4x8xbf16> to vector<4x8xbf16>
    %cst_45 = arith.constant dense<0.000000e+00> : vector<9x8xf32>
    %46 = tpu.matmul %43, %45, %cst_45 {dimension_numbers = #tpu.dot_dimension_numbers<[1], [0], [0], [1], [0, 0, 1, 1], [], []>} : vector<9x4xbf16>, vector<4x8xbf16>, vector<9x8xf32> -> vector<9x8xf32>
    %47 = arith.addf %38, %46 : vector<9x8xf32>
    %c0_i32_46 = arith.constant 0 : i32
    %48 = arith.addi %0, %c0_i32_46 : i32
    %c0_i32_47 = arith.constant 0 : i32
    %49 = arith.addi %48, %c0_i32_47 : i32
    %c0_48 = arith.constant 0 : index
    %c3_49 = arith.constant 3 : index
    %50 = arith.index_cast %49 : i32 to index
    %c0_50 = arith.constant 0 : index
    %c0_51 = arith.constant 0 : index
    %51 = vector.load %arg3[%c0_48, %c3_49, %50, %c0_50, %c0_51] : memref<1x4x10x10x4xbf16, #tpu.memory_space<vmem>>, vector<1x1x1x9x4xbf16>
    %52 = vector.shape_cast %51 : vector<1x1x1x9x4xbf16> to vector<9x4xbf16>
    %c5 = arith.constant 5 : index
    %c0_52 = arith.constant 0 : index
    %c0_53 = arith.constant 0 : index
    %53 = vector.load %arg4[%c5, %c0_52, %c0_53] : memref<16x4x8xbf16, #tpu.memory_space<vmem>>, vector<1x4x8xbf16>
    %54 = vector.shape_cast %53 : vector<1x4x8xbf16> to vector<4x8xbf16>
    %cst_54 = arith.constant dense<0.000000e+00> : vector<9x8xf32>
    %55 = tpu.matmul %52, %54, %cst_54 {dimension_numbers = #tpu.dot_dimension_numbers<[1], [0], [0], [1], [0, 0, 1, 1], [], []>} : vector<9x4xbf16>, vector<4x8xbf16>, vector<9x8xf32> -> vector<9x8xf32>
    %56 = arith.addf %47, %55 : vector<9x8xf32>
    %c0_i32_55 = arith.constant 0 : i32
    %57 = arith.addi %0, %c0_i32_55 : i32
    %c0_i32_56 = arith.constant 0 : i32
    %58 = arith.addi %57, %c0_i32_56 : i32
    %c0_57 = arith.constant 0 : index
    %c2_58 = arith.constant 2 : index
    %59 = arith.index_cast %58 : i32 to index
    %c1_59 = arith.constant 1 : index
    %c0_60 = arith.constant 0 : index
    %60 = vector.load %arg3[%c0_57, %c2_58, %59, %c1_59, %c0_60] : memref<1x4x10x10x4xbf16, #tpu.memory_space<vmem>>, vector<1x1x1x9x4xbf16>
    %61 = vector.shape_cast %60 : vector<1x1x1x9x4xbf16> to vector<9x4xbf16>
    %c6 = arith.constant 6 : index
    %c0_61 = arith.constant 0 : index
    %c0_62 = arith.constant 0 : index
    %62 = vector.load %arg4[%c6, %c0_61, %c0_62] : memref<16x4x8xbf16, #tpu.memory_space<vmem>>, vector<1x4x8xbf16>
    %63 = vector.shape_cast %62 : vector<1x4x8xbf16> to vector<4x8xbf16>
    %cst_63 = arith.constant dense<0.000000e+00> : vector<9x8xf32>
    %64 = tpu.matmul %61, %63, %cst_63 {dimension_numbers = #tpu.dot_dimension_numbers<[1], [0], [0], [1], [0, 0, 1, 1], [], []>} : vector<9x4xbf16>, vector<4x8xbf16>, vector<9x8xf32> -> vector<9x8xf32>
    %65 = arith.addf %56, %64 : vector<9x8xf32>
    %c0_i32_64 = arith.constant 0 : i32
    %66 = arith.addi %0, %c0_i32_64 : i32
    %c0_i32_65 = arith.constant 0 : i32
    %67 = arith.addi %66, %c0_i32_65 : i32
    %c0_66 = arith.constant 0 : index
    %c3_67 = arith.constant 3 : index
    %68 = arith.index_cast %67 : i32 to index
    %c1_68 = arith.constant 1 : index
    %c0_69 = arith.constant 0 : index
    %69 = vector.load %arg3[%c0_66, %c3_67, %68, %c1_68, %c0_69] : memref<1x4x10x10x4xbf16, #tpu.memory_space<vmem>>, vector<1x1x1x9x4xbf16>
    %70 = vector.shape_cast %69 : vector<1x1x1x9x4xbf16> to vector<9x4xbf16>
    %c7 = arith.constant 7 : index
    %c0_70 = arith.constant 0 : index
    %c0_71 = arith.constant 0 : index
    %71 = vector.load %arg4[%c7, %c0_70, %c0_71] : memref<16x4x8xbf16, #tpu.memory_space<vmem>>, vector<1x4x8xbf16>
    %72 = vector.shape_cast %71 : vector<1x4x8xbf16> to vector<4x8xbf16>
    %cst_72 = arith.constant dense<0.000000e+00> : vector<9x8xf32>
    %73 = tpu.matmul %70, %72, %cst_72 {dimension_numbers = #tpu.dot_dimension_numbers<[1], [0], [0], [1], [0, 0, 1, 1], [], []>} : vector<9x4xbf16>, vector<4x8xbf16>, vector<9x8xf32> -> vector<9x8xf32>
    %74 = arith.addf %65, %73 : vector<9x8xf32>
    %c0_i32_73 = arith.constant 0 : i32
    %75 = arith.addi %0, %c0_i32_73 : i32
    %c1_i32 = arith.constant 1 : i32
    %76 = arith.addi %75, %c1_i32 : i32
    %c0_74 = arith.constant 0 : index
    %c0_75 = arith.constant 0 : index
    %77 = arith.index_cast %76 : i32 to index
    %c0_76 = arith.constant 0 : index
    %c0_77 = arith.constant 0 : index
    %78 = vector.load %arg3[%c0_74, %c0_75, %77, %c0_76, %c0_77] : memref<1x4x10x10x4xbf16, #tpu.memory_space<vmem>>, vector<1x1x1x9x4xbf16>
    %79 = vector.shape_cast %78 : vector<1x1x1x9x4xbf16> to vector<9x4xbf16>
    %c8 = arith.constant 8 : index
    %c0_78 = arith.constant 0 : index
    %c0_79 = arith.constant 0 : index
    %80 = vector.load %arg4[%c8, %c0_78, %c0_79] : memref<16x4x8xbf16, #tpu.memory_space<vmem>>, vector<1x4x8xbf16>
    %81 = vector.shape_cast %80 : vector<1x4x8xbf16> to vector<4x8xbf16>
    %cst_80 = arith.constant dense<0.000000e+00> : vector<9x8xf32>
    %82 = tpu.matmul %79, %81, %cst_80 {dimension_numbers = #tpu.dot_dimension_numbers<[1], [0], [0], [1], [0, 0, 1, 1], [], []>} : vector<9x4xbf16>, vector<4x8xbf16>, vector<9x8xf32> -> vector<9x8xf32>
    %83 = arith.addf %74, %82 : vector<9x8xf32>
    %c0_i32_81 = arith.constant 0 : i32
    %84 = arith.addi %0, %c0_i32_81 : i32
    %c1_i32_82 = arith.constant 1 : i32
    %85 = arith.addi %84, %c1_i32_82 : i32
    %c0_83 = arith.constant 0 : index
    %c1_84 = arith.constant 1 : index
    %86 = arith.index_cast %85 : i32 to index
    %c0_85 = arith.constant 0 : index
    %c0_86 = arith.constant 0 : index
    %87 = vector.load %arg3[%c0_83, %c1_84, %86, %c0_85, %c0_86] : memref<1x4x10x10x4xbf16, #tpu.memory_space<vmem>>, vector<1x1x1x9x4xbf16>
    %88 = vector.shape_cast %87 : vector<1x1x1x9x4xbf16> to vector<9x4xbf16>
    %c9 = arith.constant 9 : index
    %c0_87 = arith.constant 0 : index
    %c0_88 = arith.constant 0 : index
    %89 = vector.load %arg4[%c9, %c0_87, %c0_88] : memref<16x4x8xbf16, #tpu.memory_space<vmem>>, vector<1x4x8xbf16>
    %90 = vector.shape_cast %89 : vector<1x4x8xbf16> to vector<4x8xbf16>
    %cst_89 = arith.constant dense<0.000000e+00> : vector<9x8xf32>
    %91 = tpu.matmul %88, %90, %cst_89 {dimension_numbers = #tpu.dot_dimension_numbers<[1], [0], [0], [1], [0, 0, 1, 1], [], []>} : vector<9x4xbf16>, vector<4x8xbf16>, vector<9x8xf32> -> vector<9x8xf32>
    %92 = arith.addf %83, %91 : vector<9x8xf32>
    %c0_i32_90 = arith.constant 0 : i32
    %93 = arith.addi %0, %c0_i32_90 : i32
    %c1_i32_91 = arith.constant 1 : i32
    %94 = arith.addi %93, %c1_i32_91 : i32
    %c0_92 = arith.constant 0 : index
    %c0_93 = arith.constant 0 : index
    %95 = arith.index_cast %94 : i32 to index
    %c1_94 = arith.constant 1 : index
    %c0_95 = arith.constant 0 : index
    %96 = vector.load %arg3[%c0_92, %c0_93, %95, %c1_94, %c0_95] : memref<1x4x10x10x4xbf16, #tpu.memory_space<vmem>>, vector<1x1x1x9x4xbf16>
    %97 = vector.shape_cast %96 : vector<1x1x1x9x4xbf16> to vector<9x4xbf16>
    %c10 = arith.constant 10 : index
    %c0_96 = arith.constant 0 : index
    %c0_97 = arith.constant 0 : index
    %98 = vector.load %arg4[%c10, %c0_96, %c0_97] : memref<16x4x8xbf16, #tpu.memory_space<vmem>>, vector<1x4x8xbf16>
    %99 = vector.shape_cast %98 : vector<1x4x8xbf16> to vector<4x8xbf16>
    %cst_98 = arith.constant dense<0.000000e+00> : vector<9x8xf32>
    %100 = tpu.matmul %97, %99, %cst_98 {dimension_numbers = #tpu.dot_dimension_numbers<[1], [0], [0], [1], [0, 0, 1, 1], [], []>} : vector<9x4xbf16>, vector<4x8xbf16>, vector<9x8xf32> -> vector<9x8xf32>
    %101 = arith.addf %92, %100 : vector<9x8xf32>
    %c0_i32_99 = arith.constant 0 : i32
    %102 = arith.addi %0, %c0_i32_99 : i32
    %c1_i32_100 = arith.constant 1 : i32
    %103 = arith.addi %102, %c1_i32_100 : i32
    %c0_101 = arith.constant 0 : index
    %c1_102 = arith.constant 1 : index
    %104 = arith.index_cast %103 : i32 to index
    %c1_103 = arith.constant 1 : index
    %c0_104 = arith.constant 0 : index
    %105 = vector.load %arg3[%c0_101, %c1_102, %104, %c1_103, %c0_104] : memref<1x4x10x10x4xbf16, #tpu.memory_space<vmem>>, vector<1x1x1x9x4xbf16>
    %106 = vector.shape_cast %105 : vector<1x1x1x9x4xbf16> to vector<9x4xbf16>
    %c11 = arith.constant 11 : index
    %c0_105 = arith.constant 0 : index
    %c0_106 = arith.constant 0 : index
    %107 = vector.load %arg4[%c11, %c0_105, %c0_106] : memref<16x4x8xbf16, #tpu.memory_space<vmem>>, vector<1x4x8xbf16>
    %108 = vector.shape_cast %107 : vector<1x4x8xbf16> to vector<4x8xbf16>
    %cst_107 = arith.constant dense<0.000000e+00> : vector<9x8xf32>
    %109 = tpu.matmul %106, %108, %cst_107 {dimension_numbers = #tpu.dot_dimension_numbers<[1], [0], [0], [1], [0, 0, 1, 1], [], []>} : vector<9x4xbf16>, vector<4x8xbf16>, vector<9x8xf32> -> vector<9x8xf32>
    %110 = arith.addf %101, %109 : vector<9x8xf32>
    %c0_i32_108 = arith.constant 0 : i32
    %111 = arith.addi %0, %c0_i32_108 : i32
    %c1_i32_109 = arith.constant 1 : i32
    %112 = arith.addi %111, %c1_i32_109 : i32
    %c0_110 = arith.constant 0 : index
    %c2_111 = arith.constant 2 : index
    %113 = arith.index_cast %112 : i32 to index
    %c0_112 = arith.constant 0 : index
    %c0_113 = arith.constant 0 : index
    %114 = vector.load %arg3[%c0_110, %c2_111, %113, %c0_112, %c0_113] : memref<1x4x10x10x4xbf16, #tpu.memory_space<vmem>>, vector<1x1x1x9x4xbf16>
    %115 = vector.shape_cast %114 : vector<1x1x1x9x4xbf16> to vector<9x4xbf16>
    %c12 = arith.constant 12 : index
    %c0_114 = arith.constant 0 : index
    %c0_115 = arith.constant 0 : index
    %116 = vector.load %arg4[%c12, %c0_114, %c0_115] : memref<16x4x8xbf16, #tpu.memory_space<vmem>>, vector<1x4x8xbf16>
    %117 = vector.shape_cast %116 : vector<1x4x8xbf16> to vector<4x8xbf16>
    %cst_116 = arith.constant dense<0.000000e+00> : vector<9x8xf32>
    %118 = tpu.matmul %115, %117, %cst_116 {dimension_numbers = #tpu.dot_dimension_numbers<[1], [0], [0], [1], [0, 0, 1, 1], [], []>} : vector<9x4xbf16>, vector<4x8xbf16>, vector<9x8xf32> -> vector<9x8xf32>
    %119 = arith.addf %110, %118 : vector<9x8xf32>
    %c0_i32_117 = arith.constant 0 : i32
    %120 = arith.addi %0, %c0_i32_117 : i32
    %c1_i32_118 = arith.constant 1 : i32
    %121 = arith.addi %120, %c1_i32_118 : i32
    %c0_119 = arith.constant 0 : index
    %c3_120 = arith.constant 3 : index
    %122 = arith.index_cast %121 : i32 to index
    %c0_121 = arith.constant 0 : index
    %c0_122 = arith.constant 0 : index
    %123 = vector.load %arg3[%c0_119, %c3_120, %122, %c0_121, %c0_122] : memref<1x4x10x10x4xbf16, #tpu.memory_space<vmem>>, vector<1x1x1x9x4xbf16>
    %124 = vector.shape_cast %123 : vector<1x1x1x9x4xbf16> to vector<9x4xbf16>
    %c13 = arith.constant 13 : index
    %c0_123 = arith.constant 0 : index
    %c0_124 = arith.constant 0 : index
    %125 = vector.load %arg4[%c13, %c0_123, %c0_124] : memref<16x4x8xbf16, #tpu.memory_space<vmem>>, vector<1x4x8xbf16>
    %126 = vector.shape_cast %125 : vector<1x4x8xbf16> to vector<4x8xbf16>
    %cst_125 = arith.constant dense<0.000000e+00> : vector<9x8xf32>
    %127 = tpu.matmul %124, %126, %cst_125 {dimension_numbers = #tpu.dot_dimension_numbers<[1], [0], [0], [1], [0, 0, 1, 1], [], []>} : vector<9x4xbf16>, vector<4x8xbf16>, vector<9x8xf32> -> vector<9x8xf32>
    %128 = arith.addf %119, %127 : vector<9x8xf32>
    %c0_i32_126 = arith.constant 0 : i32
    %129 = arith.addi %0, %c0_i32_126 : i32
    %c1_i32_127 = arith.constant 1 : i32
    %130 = arith.addi %129, %c1_i32_127 : i32
    %c0_128 = arith.constant 0 : index
    %c2_129 = arith.constant 2 : index
    %131 = arith.index_cast %130 : i32 to index
    %c1_130 = arith.constant 1 : index
    %c0_131 = arith.constant 0 : index
    %132 = vector.load %arg3[%c0_128, %c2_129, %131, %c1_130, %c0_131] : memref<1x4x10x10x4xbf16, #tpu.memory_space<vmem>>, vector<1x1x1x9x4xbf16>
    %133 = vector.shape_cast %132 : vector<1x1x1x9x4xbf16> to vector<9x4xbf16>
    %c14 = arith.constant 14 : index
    %c0_132 = arith.constant 0 : index
    %c0_133 = arith.constant 0 : index
    %134 = vector.load %arg4[%c14, %c0_132, %c0_133] : memref<16x4x8xbf16, #tpu.memory_space<vmem>>, vector<1x4x8xbf16>
    %135 = vector.shape_cast %134 : vector<1x4x8xbf16> to vector<4x8xbf16>
    %cst_134 = arith.constant dense<0.000000e+00> : vector<9x8xf32>
    %136 = tpu.matmul %133, %135, %cst_134 {dimension_numbers = #tpu.dot_dimension_numbers<[1], [0], [0], [1], [0, 0, 1, 1], [], []>} : vector<9x4xbf16>, vector<4x8xbf16>, vector<9x8xf32> -> vector<9x8xf32>
    %137 = arith.addf %128, %136 : vector<9x8xf32>
    %c0_i32_135 = arith.constant 0 : i32
    %138 = arith.addi %0, %c0_i32_135 : i32
    %c1_i32_136 = arith.constant 1 : i32
    %139 = arith.addi %138, %c1_i32_136 : i32
    %c0_137 = arith.constant 0 : index
    %c3_138 = arith.constant 3 : index
    %140 = arith.index_cast %139 : i32 to index
    %c1_139 = arith.constant 1 : index
    %c0_140 = arith.constant 0 : index
    %141 = vector.load %arg3[%c0_137, %c3_138, %140, %c1_139, %c0_140] : memref<1x4x10x10x4xbf16, #tpu.memory_space<vmem>>, vector<1x1x1x9x4xbf16>
    %142 = vector.shape_cast %141 : vector<1x1x1x9x4xbf16> to vector<9x4xbf16>
    %c15 = arith.constant 15 : index
    %c0_141 = arith.constant 0 : index
    %c0_142 = arith.constant 0 : index
    %143 = vector.load %arg4[%c15, %c0_141, %c0_142] : memref<16x4x8xbf16, #tpu.memory_space<vmem>>, vector<1x4x8xbf16>
    %144 = vector.shape_cast %143 : vector<1x4x8xbf16> to vector<4x8xbf16>
    %cst_143 = arith.constant dense<0.000000e+00> : vector<9x8xf32>
    %145 = tpu.matmul %142, %144, %cst_143 {dimension_numbers = #tpu.dot_dimension_numbers<[1], [0], [0], [1], [0, 0, 1, 1], [], []>} : vector<9x4xbf16>, vector<4x8xbf16>, vector<9x8xf32> -> vector<9x8xf32>
    %146 = arith.addf %137, %145 : vector<9x8xf32>
    %147 = vector.broadcast %1 : vector<1x8xf32> to vector<9x8xf32>
    %148 = arith.addf %146, %147 : vector<9x8xf32>
    %cst_144 = arith.constant 0.000000e+00 : f32
    %149 = vector.broadcast %cst_144 : f32 to vector<9x8xf32>
    %150 = arith.cmpf oge, %148, %149 : vector<9x8xf32>
    %cst_145 = arith.constant 2.000000e-01 : f32
    %151 = vector.broadcast %cst_145 : f32 to vector<9x8xf32>
    %152 = arith.mulf %151, %148 : vector<9x8xf32>
    %153 = arith.select %150, %148, %152 : vector<9x8xi1>, vector<9x8xf32>
    %154 = arith.truncf %153 : vector<9x8xf32> to vector<9x8xbf16>
    %c0_146 = arith.constant 0 : index
    %c0_147 = arith.constant 0 : index
    %c0_148 = arith.constant 0 : index
    %c0_149 = arith.constant 0 : index
    %155 = vector.load %arg6[%c0_146, %c0_147, %c0_148, %c0_149] : memref<1x9x9x8xbf16, #tpu.memory_space<vmem>>, vector<1x1x9x8xbf16>
    %156 = vector.shape_cast %155 : vector<1x1x9x8xbf16> to vector<9x8xbf16>
    %157 = vector.shape_cast %154 : vector<9x8xbf16> to vector<1x1x9x8xbf16>
    tpu.vector_store %arg6[%c0_146, %c0_147, %c0_148, %c0_149], %157 {strides = array<i32>} : memref<1x9x9x8xbf16, #tpu.memory_space<vmem>>, vector<1x1x9x8xbf16>,
    %cst_150 = arith.constant 0.000000e+00 : f32
    %158 = vector.broadcast %cst_150 : f32 to vector<9x8xf32>
    %c1_i32_151 = arith.constant 1 : i32
    %159 = arith.addi %0, %c1_i32_151 : i32
    %c0_i32_152 = arith.constant 0 : i32
    %160 = arith.addi %159, %c0_i32_152 : i32
    %c0_153 = arith.constant 0 : index
    %c0_154 = arith.constant 0 : index
    %161 = arith.index_cast %160 : i32 to index
    %c0_155 = arith.constant 0 : index
    %c0_156 = arith.constant 0 : index
    %162 = vector.load %arg3[%c0_153, %c0_154, %161, %c0_155, %c0_156] : memref<1x4x10x10x4xbf16, #tpu.memory_space<vmem>>, vector<1x1x1x9x4xbf16>
    %163 = vector.shape_cast %162 : vector<1x1x1x9x4xbf16> to vector<9x4xbf16>
    %c0_157 = arith.constant 0 : index
    %c0_158 = arith.constant 0 : index
    %c0_159 = arith.constant 0 : index
    %164 = vector.load %arg4[%c0_157, %c0_158, %c0_159] : memref<16x4x8xbf16, #tpu.memory_space<vmem>>, vector<1x4x8xbf16>
    %165 = vector.shape_cast %164 : vector<1x4x8xbf16> to vector<4x8xbf16>
    %cst_160 = arith.constant dense<0.000000e+00> : vector<9x8xf32>
    %166 = tpu.matmul %163, %165, %cst_160 {dimension_numbers = #tpu.dot_dimension_numbers<[1], [0], [0], [1], [0, 0, 1, 1], [], []>} : vector<9x4xbf16>, vector<4x8xbf16>, vector<9x8xf32> -> vector<9x8xf32>
    %167 = arith.addf %158, %166 : vector<9x8xf32>
    %c1_i32_161 = arith.constant 1 : i32
    %168 = arith.addi %0, %c1_i32_161 : i32
    %c0_i32_162 = arith.constant 0 : i32
    %169 = arith.addi %168, %c0_i32_162 : i32
    %c0_163 = arith.constant 0 : index
    %c1_164 = arith.constant 1 : index
    %170 = arith.index_cast %169 : i32 to index
    %c0_165 = arith.constant 0 : index
    %c0_166 = arith.constant 0 : index
    %171 = vector.load %arg3[%c0_163, %c1_164, %170, %c0_165, %c0_166] : memref<1x4x10x10x4xbf16, #tpu.memory_space<vmem>>, vector<1x1x1x9x4xbf16>
    %172 = vector.shape_cast %171 : vector<1x1x1x9x4xbf16> to vector<9x4xbf16>
    %c1_167 = arith.constant 1 : index
    %c0_168 = arith.constant 0 : index
    %c0_169 = arith.constant 0 : index
    %173 = vector.load %arg4[%c1_167, %c0_168, %c0_169] : memref<16x4x8xbf16, #tpu.memory_space<vmem>>, vector<1x4x8xbf16>
    %174 = vector.shape_cast %173 : vector<1x4x8xbf16> to vector<4x8xbf16>
    %cst_170 = arith.constant dense<0.000000e+00> : vector<9x8xf32>
    %175 = tpu.matmul %172, %174, %cst_170 {dimension_numbers = #tpu.dot_dimension_numbers<[1], [0], [0], [1], [0, 0, 1, 1], [], []>} : vector<9x4xbf16>, vector<4x8xbf16>, vector<9x8xf32> -> vector<9x8xf32>
    %176 = arith.addf %167, %175 : vector<9x8xf32>
    %c1_i32_171 = arith.constant 1 : i32
    %177 = arith.addi %0, %c1_i32_171 : i32
    %c0_i32_172 = arith.constant 0 : i32
    %178 = arith.addi %177, %c0_i32_172 : i32
    %c0_173 = arith.constant 0 : index
    %c0_174 = arith.constant 0 : index
    %179 = arith.index_cast %178 : i32 to index
    %c1_175 = arith.constant 1 : index
    %c0_176 = arith.constant 0 : index
    %180 = vector.load %arg3[%c0_173, %c0_174, %179, %c1_175, %c0_176] : memref<1x4x10x10x4xbf16, #tpu.memory_space<vmem>>, vector<1x1x1x9x4xbf16>
    %181 = vector.shape_cast %180 : vector<1x1x1x9x4xbf16> to vector<9x4xbf16>
    %c2_177 = arith.constant 2 : index
    %c0_178 = arith.constant 0 : index
    %c0_179 = arith.constant 0 : index
    %182 = vector.load %arg4[%c2_177, %c0_178, %c0_179] : memref<16x4x8xbf16, #tpu.memory_space<vmem>>, vector<1x4x8xbf16>
    %183 = vector.shape_cast %182 : vector<1x4x8xbf16> to vector<4x8xbf16>
    %cst_180 = arith.constant dense<0.000000e+00> : vector<9x8xf32>
    %184 = tpu.matmul %181, %183, %cst_180 {dimension_numbers = #tpu.dot_dimension_numbers<[1], [0], [0], [1], [0, 0, 1, 1], [], []>} : vector<9x4xbf16>, vector<4x8xbf16>, vector<9x8xf32> -> vector<9x8xf32>
    %185 = arith.addf %176, %184 : vector<9x8xf32>
    %c1_i32_181 = arith.constant 1 : i32
    %186 = arith.addi %0, %c1_i32_181 : i32
    %c0_i32_182 = arith.constant 0 : i32
    %187 = arith.addi %186, %c0_i32_182 : i32
    %c0_183 = arith.constant 0 : index
    %c1_184 = arith.constant 1 : index
    %188 = arith.index_cast %187 : i32 to index
    %c1_185 = arith.constant 1 : index
    %c0_186 = arith.constant 0 : index
    %189 = vector.load %arg3[%c0_183, %c1_184, %188, %c1_185, %c0_186] : memref<1x4x10x10x4xbf16, #tpu.memory_space<vmem>>, vector<1x1x1x9x4xbf16>
    %190 = vector.shape_cast %189 : vector<1x1x1x9x4xbf16> to vector<9x4xbf16>
    %c3_187 = arith.constant 3 : index
    %c0_188 = arith.constant 0 : index
    %c0_189 = arith.constant 0 : index
    %191 = vector.load %arg4[%c3_187, %c0_188, %c0_189] : memref<16x4x8xbf16, #tpu.memory_space<vmem>>, vector<1x4x8xbf16>
    %192 = vector.shape_cast %191 : vector<1x4x8xbf16> to vector<4x8xbf16>
    %cst_190 = arith.constant dense<0.000000e+00> : vector<9x8xf32>
    %193 = tpu.matmul %190, %192, %cst_190 {dimension_numbers = #tpu.dot_dimension_numbers<[1], [0], [0], [1], [0, 0, 1, 1], [], []>} : vector<9x4xbf16>, vector<4x8xbf16>, vector<9x8xf32> -> vector<9x8xf32>
    %194 = arith.addf %185, %193 : vector<9x8xf32>
    %c1_i32_191 = arith.constant 1 : i32
    %195 = arith.addi %0, %c1_i32_191 : i32
    %c0_i32_192 = arith.constant 0 : i32
    %196 = arith.addi %195, %c0_i32_192 : i32
    %c0_193 = arith.constant 0 : index
    %c2_194 = arith.constant 2 : index
    %197 = arith.index_cast %196 : i32 to index
    %c0_195 = arith.constant 0 : index
    %c0_196 = arith.constant 0 : index
    %198 = vector.load %arg3[%c0_193, %c2_194, %197, %c0_195, %c0_196] : memref<1x4x10x10x4xbf16, #tpu.memory_space<vmem>>, vector<1x1x1x9x4xbf16>
    %199 = vector.shape_cast %198 : vector<1x1x1x9x4xbf16> to vector<9x4xbf16>
    %c4_197 = arith.constant 4 : index
    %c0_198 = arith.constant 0 : index
    %c0_199 = arith.constant 0 : index
    %200 = vector.load %arg4[%c4_197, %c0_198, %c0_199] : memref<16x4x8xbf16, #tpu.memory_space<vmem>>, vector<1x4x8xbf16>
    %201 = vector.shape_cast %200 : vector<1x4x8xbf16> to vector<4x8xbf16>
    %cst_200 = arith.constant dense<0.000000e+00> : vector<9x8xf32>
    %202 = tpu.matmul %199, %201, %cst_200 {dimension_numbers = #tpu.dot_dimension_numbers<[1], [0], [0], [1], [0, 0, 1, 1], [], []>} : vector<9x4xbf16>, vector<4x8xbf16>, vector<9x8xf32> -> vector<9x8xf32>
    %203 = arith.addf %194, %202 : vector<9x8xf32>
    %c1_i32_201 = arith.constant 1 : i32
    %204 = arith.addi %0, %c1_i32_201 : i32
    %c0_i32_202 = arith.constant 0 : i32
    %205 = arith.addi %204, %c0_i32_202 : i32
    %c0_203 = arith.constant 0 : index
    %c3_204 = arith.constant 3 : index
    %206 = arith.index_cast %205 : i32 to index
    %c0_205 = arith.constant 0 : index
    %c0_206 = arith.constant 0 : index
    %207 = vector.load %arg3[%c0_203, %c3_204, %206, %c0_205, %c0_206] : memref<1x4x10x10x4xbf16, #tpu.memory_space<vmem>>, vector<1x1x1x9x4xbf16>
    %208 = vector.shape_cast %207 : vector<1x1x1x9x4xbf16> to vector<9x4xbf16>
    %c5_207 = arith.constant 5 : index
    %c0_208 = arith.constant 0 : index
    %c0_209 = arith.constant 0 : index
    %209 = vector.load %arg4[%c5_207, %c0_208, %c0_209] : memref<16x4x8xbf16, #tpu.memory_space<vmem>>, vector<1x4x8xbf16>
    %210 = vector.shape_cast %209 : vector<1x4x8xbf16> to vector<4x8xbf16>
    %cst_210 = arith.constant dense<0.000000e+00> : vector<9x8xf32>
    %211 = tpu.matmul %208, %210, %cst_210 {dimension_numbers = #tpu.dot_dimension_numbers<[1], [0], [0], [1], [0, 0, 1, 1], [], []>} : vector<9x4xbf16>, vector<4x8xbf16>, vector<9x8xf32> -> vector<9x8xf32>
    %212 = arith.addf %203, %211 : vector<9x8xf32>
    %c1_i32_211 = arith.constant 1 : i32
    %213 = arith.addi %0, %c1_i32_211 : i32
    %c0_i32_212 = arith.constant 0 : i32
    %214 = arith.addi %213, %c0_i32_212 : i32
    %c0_213 = arith.constant 0 : index
    %c2_214 = arith.constant 2 : index
    %215 = arith.index_cast %214 : i32 to index
    %c1_215 = arith.constant 1 : index
    %c0_216 = arith.constant 0 : index
    %216 = vector.load %arg3[%c0_213, %c2_214, %215, %c1_215, %c0_216] : memref<1x4x10x10x4xbf16, #tpu.memory_space<vmem>>, vector<1x1x1x9x4xbf16>
    %217 = vector.shape_cast %216 : vector<1x1x1x9x4xbf16> to vector<9x4xbf16>
    %c6_217 = arith.constant 6 : index
    %c0_218 = arith.constant 0 : index
    %c0_219 = arith.constant 0 : index
    %218 = vector.load %arg4[%c6_217, %c0_218, %c0_219] : memref<16x4x8xbf16, #tpu.memory_space<vmem>>, vector<1x4x8xbf16>
    %219 = vector.shape_cast %218 : vector<1x4x8xbf16> to vector<4x8xbf16>
    %cst_220 = arith.constant dense<0.000000e+00> : vector<9x8xf32>
    %220 = tpu.matmul %217, %219, %cst_220 {dimension_numbers = #tpu.dot_dimension_numbers<[1], [0], [0], [1], [0, 0, 1, 1], [], []>} : vector<9x4xbf16>, vector<4x8xbf16>, vector<9x8xf32> -> vector<9x8xf32>
    %221 = arith.addf %212, %220 : vector<9x8xf32>
    %c1_i32_221 = arith.constant 1 : i32
    %222 = arith.addi %0, %c1_i32_221 : i32
    %c0_i32_222 = arith.constant 0 : i32
    %223 = arith.addi %222, %c0_i32_222 : i32
    %c0_223 = arith.constant 0 : index
    %c3_224 = arith.constant 3 : index
    %224 = arith.index_cast %223 : i32 to index
    %c1_225 = arith.constant 1 : index
    %c0_226 = arith.constant 0 : index
    %225 = vector.load %arg3[%c0_223, %c3_224, %224, %c1_225, %c0_226] : memref<1x4x10x10x4xbf16, #tpu.memory_space<vmem>>, vector<1x1x1x9x4xbf16>
    %226 = vector.shape_cast %225 : vector<1x1x1x9x4xbf16> to vector<9x4xbf16>
    %c7_227 = arith.constant 7 : index
    %c0_228 = arith.constant 0 : index
    %c0_229 = arith.constant 0 : index
    %227 = vector.load %arg4[%c7_227, %c0_228, %c0_229] : memref<16x4x8xbf16, #tpu.memory_space<vmem>>, vector<1x4x8xbf16>
    %228 = vector.shape_cast %227 : vector<1x4x8xbf16> to vector<4x8xbf16>
    %cst_230 = arith.constant dense<0.000000e+00> : vector<9x8xf32>
    %229 = tpu.matmul %226, %228, %cst_230 {dimension_numbers = #tpu.dot_dimension_numbers<[1], [0], [0], [1], [0, 0, 1, 1], [], []>} : vector<9x4xbf16>, vector<4x8xbf16>, vector<9x8xf32> -> vector<9x8xf32>
    %230 = arith.addf %221, %229 : vector<9x8xf32>
    %c1_i32_231 = arith.constant 1 : i32
    %231 = arith.addi %0, %c1_i32_231 : i32
    %c1_i32_232 = arith.constant 1 : i32
    %232 = arith.addi %231, %c1_i32_232 : i32
    %c0_233 = arith.constant 0 : index
    %c0_234 = arith.constant 0 : index
    %233 = arith.index_cast %232 : i32 to index
    %c0_235 = arith.constant 0 : index
    %c0_236 = arith.constant 0 : index
    %234 = vector.load %arg3[%c0_233, %c0_234, %233, %c0_235, %c0_236] : memref<1x4x10x10x4xbf16, #tpu.memory_space<vmem>>, vector<1x1x1x9x4xbf16>
    %235 = vector.shape_cast %234 : vector<1x1x1x9x4xbf16> to vector<9x4xbf16>
    %c8_237 = arith.constant 8 : index
    %c0_238 = arith.constant 0 : index
    %c0_239 = arith.constant 0 : index
    %236 = vector.load %arg4[%c8_237, %c0_238, %c0_239] : memref<16x4x8xbf16, #tpu.memory_space<vmem>>, vector<1x4x8xbf16>
    %237 = vector.shape_cast %236 : vector<1x4x8xbf16> to vector<4x8xbf16>
    %cst_240 = arith.constant dense<0.000000e+00> : vector<9x8xf32>
    %238 = tpu.matmul %235, %237, %cst_240 {dimension_numbers = #tpu.dot_dimension_numbers<[1], [0], [0], [1], [0, 0, 1, 1], [], []>} : vector<9x4xbf16>, vector<4x8xbf16>, vector<9x8xf32> -> vector<9x8xf32>
    %239 = arith.addf %230, %238 : vector<9x8xf32>
    %c1_i32_241 = arith.constant 1 : i32
    %240 = arith.addi %0, %c1_i32_241 : i32
    %c1_i32_242 = arith.constant 1 : i32
    %241 = arith.addi %240, %c1_i32_242 : i32
    %c0_243 = arith.constant 0 : index
    %c1_244 = arith.constant 1 : index
    %242 = arith.index_cast %241 : i32 to index
    %c0_245 = arith.constant 0 : index
    %c0_246 = arith.constant 0 : index
    %243 = vector.load %arg3[%c0_243, %c1_244, %242, %c0_245, %c0_246] : memref<1x4x10x10x4xbf16, #tpu.memory_space<vmem>>, vector<1x1x1x9x4xbf16>
    %244 = vector.shape_cast %243 : vector<1x1x1x9x4xbf16> to vector<9x4xbf16>
    %c9_247 = arith.constant 9 : index
    %c0_248 = arith.constant 0 : index
    %c0_249 = arith.constant 0 : index
    %245 = vector.load %arg4[%c9_247, %c0_248, %c0_249] : memref<16x4x8xbf16, #tpu.memory_space<vmem>>, vector<1x4x8xbf16>
    %246 = vector.shape_cast %245 : vector<1x4x8xbf16> to vector<4x8xbf16>
    %cst_250 = arith.constant dense<0.000000e+00> : vector<9x8xf32>
    %247 = tpu.matmul %244, %246, %cst_250 {dimension_numbers = #tpu.dot_dimension_numbers<[1], [0], [0], [1], [0, 0, 1, 1], [], []>} : vector<9x4xbf16>, vector<4x8xbf16>, vector<9x8xf32> -> vector<9x8xf32>
    %248 = arith.addf %239, %247 : vector<9x8xf32>
    %c1_i32_251 = arith.constant 1 : i32
    %249 = arith.addi %0, %c1_i32_251 : i32
    %c1_i32_252 = arith.constant 1 : i32
    %250 = arith.addi %249, %c1_i32_252 : i32
    %c0_253 = arith.constant 0 : index
    %c0_254 = arith.constant 0 : index
    %251 = arith.index_cast %250 : i32 to index
    %c1_255 = arith.constant 1 : index
    %c0_256 = arith.constant 0 : index
    %252 = vector.load %arg3[%c0_253, %c0_254, %251, %c1_255, %c0_256] : memref<1x4x10x10x4xbf16, #tpu.memory_space<vmem>>, vector<1x1x1x9x4xbf16>
    %253 = vector.shape_cast %252 : vector<1x1x1x9x4xbf16> to vector<9x4xbf16>
    %c10_257 = arith.constant 10 : index
    %c0_258 = arith.constant 0 : index
    %c0_259 = arith.constant 0 : index
    %254 = vector.load %arg4[%c10_257, %c0_258, %c0_259] : memref<16x4x8xbf16, #tpu.memory_space<vmem>>, vector<1x4x8xbf16>
    %255 = vector.shape_cast %254 : vector<1x4x8xbf16> to vector<4x8xbf16>
    %cst_260 = arith.constant dense<0.000000e+00> : vector<9x8xf32>
    %256 = tpu.matmul %253, %255, %cst_260 {dimension_numbers = #tpu.dot_dimension_numbers<[1], [0], [0], [1], [0, 0, 1, 1], [], []>} : vector<9x4xbf16>, vector<4x8xbf16>, vector<9x8xf32> -> vector<9x8xf32>
    %257 = arith.addf %248, %256 : vector<9x8xf32>
    %c1_i32_261 = arith.constant 1 : i32
    %258 = arith.addi %0, %c1_i32_261 : i32
    %c1_i32_262 = arith.constant 1 : i32
    %259 = arith.addi %258, %c1_i32_262 : i32
    %c0_263 = arith.constant 0 : index
    %c1_264 = arith.constant 1 : index
    %260 = arith.index_cast %259 : i32 to index
    %c1_265 = arith.constant 1 : index
    %c0_266 = arith.constant 0 : index
    %261 = vector.load %arg3[%c0_263, %c1_264, %260, %c1_265, %c0_266] : memref<1x4x10x10x4xbf16, #tpu.memory_space<vmem>>, vector<1x1x1x9x4xbf16>
    %262 = vector.shape_cast %261 : vector<1x1x1x9x4xbf16> to vector<9x4xbf16>
    %c11_267 = arith.constant 11 : index
    %c0_268 = arith.constant 0 : index
    %c0_269 = arith.constant 0 : index
    %263 = vector.load %arg4[%c11_267, %c0_268, %c0_269] : memref<16x4x8xbf16, #tpu.memory_space<vmem>>, vector<1x4x8xbf16>
    %264 = vector.shape_cast %263 : vector<1x4x8xbf16> to vector<4x8xbf16>
    %cst_270 = arith.constant dense<0.000000e+00> : vector<9x8xf32>
    %265 = tpu.matmul %262, %264, %cst_270 {dimension_numbers = #tpu.dot_dimension_numbers<[1], [0], [0], [1], [0, 0, 1, 1], [], []>} : vector<9x4xbf16>, vector<4x8xbf16>, vector<9x8xf32> -> vector<9x8xf32>
    %266 = arith.addf %257, %265 : vector<9x8xf32>
    %c1_i32_271 = arith.constant 1 : i32
    %267 = arith.addi %0, %c1_i32_271 : i32
    %c1_i32_272 = arith.constant 1 : i32
    %268 = arith.addi %267, %c1_i32_272 : i32
    %c0_273 = arith.constant 0 : index
    %c2_274 = arith.constant 2 : index
    %269 = arith.index_cast %268 : i32 to index
    %c0_275 = arith.constant 0 : index
    %c0_276 = arith.constant 0 : index
    %270 = vector.load %arg3[%c0_273, %c2_274, %269, %c0_275, %c0_276] : memref<1x4x10x10x4xbf16, #tpu.memory_space<vmem>>, vector<1x1x1x9x4xbf16>
    %271 = vector.shape_cast %270 : vector<1x1x1x9x4xbf16> to vector<9x4xbf16>
    %c12_277 = arith.constant 12 : index
    %c0_278 = arith.constant 0 : index
    %c0_279 = arith.constant 0 : index
    %272 = vector.load %arg4[%c12_277, %c0_278, %c0_279] : memref<16x4x8xbf16, #tpu.memory_space<vmem>>, vector<1x4x8xbf16>
    %273 = vector.shape_cast %272 : vector<1x4x8xbf16> to vector<4x8xbf16>
    %cst_280 = arith.constant dense<0.000000e+00> : vector<9x8xf32>
    %274 = tpu.matmul %271, %273, %cst_280 {dimension_numbers = #tpu.dot_dimension_numbers<[1], [0], [0], [1], [0, 0, 1, 1], [], []>} : vector<9x4xbf16>, vector<4x8xbf16>, vector<9x8xf32> -> vector<9x8xf32>
    %275 = arith.addf %266, %274 : vector<9x8xf32>
    %c1_i32_281 = arith.constant 1 : i32
    %276 = arith.addi %0, %c1_i32_281 : i32
    %c1_i32_282 = arith.constant 1 : i32
    %277 = arith.addi %276, %c1_i32_282 : i32
    %c0_283 = arith.constant 0 : index
    %c3_284 = arith.constant 3 : index
    %278 = arith.index_cast %277 : i32 to index
    %c0_285 = arith.constant 0 : index
    %c0_286 = arith.constant 0 : index
    %279 = vector.load %arg3[%c0_283, %c3_284, %278, %c0_285, %c0_286] : memref<1x4x10x10x4xbf16, #tpu.memory_space<vmem>>, vector<1x1x1x9x4xbf16>
    %280 = vector.shape_cast %279 : vector<1x1x1x9x4xbf16> to vector<9x4xbf16>
    %c13_287 = arith.constant 13 : index
    %c0_288 = arith.constant 0 : index
    %c0_289 = arith.constant 0 : index
    %281 = vector.load %arg4[%c13_287, %c0_288, %c0_289] : memref<16x4x8xbf16, #tpu.memory_space<vmem>>, vector<1x4x8xbf16>
    %282 = vector.shape_cast %281 : vector<1x4x8xbf16> to vector<4x8xbf16>
    %cst_290 = arith.constant dense<0.000000e+00> : vector<9x8xf32>
    %283 = tpu.matmul %280, %282, %cst_290 {dimension_numbers = #tpu.dot_dimension_numbers<[1], [0], [0], [1], [0, 0, 1, 1], [], []>} : vector<9x4xbf16>, vector<4x8xbf16>, vector<9x8xf32> -> vector<9x8xf32>
    %284 = arith.addf %275, %283 : vector<9x8xf32>
    %c1_i32_291 = arith.constant 1 : i32
    %285 = arith.addi %0, %c1_i32_291 : i32
    %c1_i32_292 = arith.constant 1 : i32
    %286 = arith.addi %285, %c1_i32_292 : i32
    %c0_293 = arith.constant 0 : index
    %c2_294 = arith.constant 2 : index
    %287 = arith.index_cast %286 : i32 to index
    %c1_295 = arith.constant 1 : index
    %c0_296 = arith.constant 0 : index
    %288 = vector.load %arg3[%c0_293, %c2_294, %287, %c1_295, %c0_296] : memref<1x4x10x10x4xbf16, #tpu.memory_space<vmem>>, vector<1x1x1x9x4xbf16>
    %289 = vector.shape_cast %288 : vector<1x1x1x9x4xbf16> to vector<9x4xbf16>
    %c14_297 = arith.constant 14 : index
    %c0_298 = arith.constant 0 : index
    %c0_299 = arith.constant 0 : index
    %290 = vector.load %arg4[%c14_297, %c0_298, %c0_299] : memref<16x4x8xbf16, #tpu.memory_space<vmem>>, vector<1x4x8xbf16>
    %291 = vector.shape_cast %290 : vector<1x4x8xbf16> to vector<4x8xbf16>
    %cst_300 = arith.constant dense<0.000000e+00> : vector<9x8xf32>
    %292 = tpu.matmul %289, %291, %cst_300 {dimension_numbers = #tpu.dot_dimension_numbers<[1], [0], [0], [1], [0, 0, 1, 1], [], []>} : vector<9x4xbf16>, vector<4x8xbf16>, vector<9x8xf32> -> vector<9x8xf32>
    %293 = arith.addf %284, %292 : vector<9x8xf32>
    %c1_i32_301 = arith.constant 1 : i32
    %294 = arith.addi %0, %c1_i32_301 : i32
    %c1_i32_302 = arith.constant 1 : i32
    %295 = arith.addi %294, %c1_i32_302 : i32
    %c0_303 = arith.constant 0 : index
    %c3_304 = arith.constant 3 : index
    %296 = arith.index_cast %295 : i32 to index
    %c1_305 = arith.constant 1 : index
    %c0_306 = arith.constant 0 : index
    %297 = vector.load %arg3[%c0_303, %c3_304, %296, %c1_305, %c0_306] : memref<1x4x10x10x4xbf16, #tpu.memory_space<vmem>>, vector<1x1x1x9x4xbf16>
    %298 = vector.shape_cast %297 : vector<1x1x1x9x4xbf16> to vector<9x4xbf16>
    %c15_307 = arith.constant 15 : index
    %c0_308 = arith.constant 0 : index
    %c0_309 = arith.constant 0 : index
    %299 = vector.load %arg4[%c15_307, %c0_308, %c0_309] : memref<16x4x8xbf16, #tpu.memory_space<vmem>>, vector<1x4x8xbf16>
    %300 = vector.shape_cast %299 : vector<1x4x8xbf16> to vector<4x8xbf16>
    %cst_310 = arith.constant dense<0.000000e+00> : vector<9x8xf32>
    %301 = tpu.matmul %298, %300, %cst_310 {dimension_numbers = #tpu.dot_dimension_numbers<[1], [0], [0], [1], [0, 0, 1, 1], [], []>} : vector<9x4xbf16>, vector<4x8xbf16>, vector<9x8xf32> -> vector<9x8xf32>
    %302 = arith.addf %293, %301 : vector<9x8xf32>
    %303 = vector.broadcast %1 : vector<1x8xf32> to vector<9x8xf32>
    %304 = arith.addf %302, %303 : vector<9x8xf32>
    %cst_311 = arith.constant 0.000000e+00 : f32
    %305 = vector.broadcast %cst_311 : f32 to vector<9x8xf32>
    %306 = arith.cmpf oge, %304, %305 : vector<9x8xf32>
    %cst_312 = arith.constant 2.000000e-01 : f32
    %307 = vector.broadcast %cst_312 : f32 to vector<9x8xf32>
    %308 = arith.mulf %307, %304 : vector<9x8xf32>
    %309 = arith.select %306, %304, %308 : vector<9x8xi1>, vector<9x8xf32>
    %310 = arith.truncf %309 : vector<9x8xf32> to vector<9x8xbf16>
    %c0_313 = arith.constant 0 : index
    %c1_314 = arith.constant 1 : index
    %c0_315 = arith.constant 0 : index
    %c0_316 = arith.constant 0 : index
    %311 = vector.load %arg6[%c0_313, %c1_314, %c0_315, %c0_316] : memref<1x9x9x8xbf16, #tpu.memory_space<vmem>>, vector<1x1x9x8xbf16>
    %312 = vector.shape_cast %311 : vector<1x1x9x8xbf16> to vector<9x8xbf16>
    %313 = vector.shape_cast %310 : vector<9x8xbf16> to vector<1x1x9x8xbf16>
    tpu.vector_store %arg6[%c0_313, %c1_314, %c0_315, %c0_316], %313 {strides = array<i32>} : memref<1x9x9x8xbf16, #tpu.memory_space<vmem>>, vector<1x1x9x8xbf16>,
    %cst_317 = arith.constant 0.000000e+00 : f32
    %314 = vector.broadcast %cst_317 : f32 to vector<9x8xf32>
    %c2_i32 = arith.constant 2 : i32
    %315 = arith.addi %0, %c2_i32 : i32
    %c0_i32_318 = arith.constant 0 : i32
    %316 = arith.addi %315, %c0_i32_318 : i32
    %c0_319 = arith.constant 0 : index
    %c0_320 = arith.constant 0 : index
    %317 = arith.index_cast %316 : i32 to index
    %c0_321 = arith.constant 0 : index
    %c0_322 = arith.constant 0 : index
    %318 = vector.load %arg3[%c0_319, %c0_320, %317, %c0_321, %c0_322] : memref<1x4x10x10x4xbf16, #tpu.memory_space<vmem>>, vector<1x1x1x9x4xbf16>
    %319 = vector.shape_cast %318 : vector<1x1x1x9x4xbf16> to vector<9x4xbf16>
    %c0_323 = arith.constant 0 : index
    %c0_324 = arith.constant 0 : index
    %c0_325 = arith.constant 0 : index
    %320 = vector.load %arg4[%c0_323, %c0_324, %c0_325] : memref<16x4x8xbf16, #tpu.memory_space<vmem>>, vector<1x4x8xbf16>
    %321 = vector.shape_cast %320 : vector<1x4x8xbf16> to vector<4x8xbf16>
    %cst_326 = arith.constant dense<0.000000e+00> : vector<9x8xf32>
    %322 = tpu.matmul %319, %321, %cst_326 {dimension_numbers = #tpu.dot_dimension_numbers<[1], [0], [0], [1], [0, 0, 1, 1], [], []>} : vector<9x4xbf16>, vector<4x8xbf16>, vector<9x8xf32> -> vector<9x8xf32>
    %323 = arith.addf %314, %322 : vector<9x8xf32>
    %c2_i32_327 = arith.constant 2 : i32
    %324 = arith.addi %0, %c2_i32_327 : i32
    %c0_i32_328 = arith.constant 0 : i32
    %325 = arith.addi %324, %c0_i32_328 : i32
    %c0_329 = arith.constant 0 : index
    %c1_330 = arith.constant 1 : index
    %326 = arith.index_cast %325 : i32 to index
    %c0_331 = arith.constant 0 : index
    %c0_332 = arith.constant 0 : index
    %327 = vector.load %arg3[%c0_329, %c1_330, %326, %c0_331, %c0_332] : memref<1x4x10x10x4xbf16, #tpu.memory_space<vmem>>, vector<1x1x1x9x4xbf16>
    %328 = vector.shape_cast %327 : vector<1x1x1x9x4xbf16> to vector<9x4xbf16>
    %c1_333 = arith.constant 1 : index
    %c0_334 = arith.constant 0 : index
    %c0_335 = arith.constant 0 : index
    %329 = vector.load %arg4[%c1_333, %c0_334, %c0_335] : memref<16x4x8xbf16, #tpu.memory_space<vmem>>, vector<1x4x8xbf16>
    %330 = vector.shape_cast %329 : vector<1x4x8xbf16> to vector<4x8xbf16>
    %cst_336 = arith.constant dense<0.000000e+00> : vector<9x8xf32>
    %331 = tpu.matmul %328, %330, %cst_336 {dimension_numbers = #tpu.dot_dimension_numbers<[1], [0], [0], [1], [0, 0, 1, 1], [], []>} : vector<9x4xbf16>, vector<4x8xbf16>, vector<9x8xf32> -> vector<9x8xf32>
    %332 = arith.addf %323, %331 : vector<9x8xf32>
    %c2_i32_337 = arith.constant 2 : i32
    %333 = arith.addi %0, %c2_i32_337 : i32
    %c0_i32_338 = arith.constant 0 : i32
    %334 = arith.addi %333, %c0_i32_338 : i32
    %c0_339 = arith.constant 0 : index
    %c0_340 = arith.constant 0 : index
    %335 = arith.index_cast %334 : i32 to index
    %c1_341 = arith.constant 1 : index
    %c0_342 = arith.constant 0 : index
    %336 = vector.load %arg3[%c0_339, %c0_340, %335, %c1_341, %c0_342] : memref<1x4x10x10x4xbf16, #tpu.memory_space<vmem>>, vector<1x1x1x9x4xbf16>
    %337 = vector.shape_cast %336 : vector<1x1x1x9x4xbf16> to vector<9x4xbf16>
    %c2_343 = arith.constant 2 : index
    %c0_344 = arith.constant 0 : index
    %c0_345 = arith.constant 0 : index
    %338 = vector.load %arg4[%c2_343, %c0_344, %c0_345] : memref<16x4x8xbf16, #tpu.memory_space<vmem>>, vector<1x4x8xbf16>
    %339 = vector.shape_cast %338 : vector<1x4x8xbf16> to vector<4x8xbf16>
    %cst_346 = arith.constant dense<0.000000e+00> : vector<9x8xf32>
    %340 = tpu.matmul %337, %339, %cst_346 {dimension_numbers = #tpu.dot_dimension_numbers<[1], [0], [0], [1], [0, 0, 1, 1], [], []>} : vector<9x4xbf16>, vector<4x8xbf16>, vector<9x8xf32> -> vector<9x8xf32>
    %341 = arith.addf %332, %340 : vector<9x8xf32>
    %c2_i32_347 = arith.constant 2 : i32
    %342 = arith.addi %0, %c2_i32_347 : i32
    %c0_i32_348 = arith.constant 0 : i32
    %343 = arith.addi %342, %c0_i32_348 : i32
    %c0_349 = arith.constant 0 : index
    %c1_350 = arith.constant 1 : index
    %344 = arith.index_cast %343 : i32 to index
    %c1_351 = arith.constant 1 : index
    %c0_352 = arith.constant 0 : index
    %345 = vector.load %arg3[%c0_349, %c1_350, %344, %c1_351, %c0_352] : memref<1x4x10x10x4xbf16, #tpu.memory_space<vmem>>, vector<1x1x1x9x4xbf16>
    %346 = vector.shape_cast %345 : vector<1x1x1x9x4xbf16> to vector<9x4xbf16>
    %c3_353 = arith.constant 3 : index
    %c0_354 = arith.constant 0 : index
    %c0_355 = arith.constant 0 : index
    %347 = vector.load %arg4[%c3_353, %c0_354, %c0_355] : memref<16x4x8xbf16, #tpu.memory_space<vmem>>, vector<1x4x8xbf16>
    %348 = vector.shape_cast %347 : vector<1x4x8xbf16> to vector<4x8xbf16>
    %cst_356 = arith.constant dense<0.000000e+00> : vector<9x8xf32>
    %349 = tpu.matmul %346, %348, %cst_356 {dimension_numbers = #tpu.dot_dimension_numbers<[1], [0], [0], [1], [0, 0, 1, 1], [], []>} : vector<9x4xbf16>, vector<4x8xbf16>, vector<9x8xf32> -> vector<9x8xf32>
    %350 = arith.addf %341, %349 : vector<9x8xf32>
    %c2_i32_357 = arith.constant 2 : i32
    %351 = arith.addi %0, %c2_i32_357 : i32
    %c0_i32_358 = arith.constant 0 : i32
    %352 = arith.addi %351, %c0_i32_358 : i32
    %c0_359 = arith.constant 0 : index
    %c2_360 = arith.constant 2 : index
    %353 = arith.index_cast %352 : i32 to index
    %c0_361 = arith.constant 0 : index
    %c0_362 = arith.constant 0 : index
    %354 = vector.load %arg3[%c0_359, %c2_360, %353, %c0_361, %c0_362] : memref<1x4x10x10x4xbf16, #tpu.memory_space<vmem>>, vector<1x1x1x9x4xbf16>
    %355 = vector.shape_cast %354 : vector<1x1x1x9x4xbf16> to vector<9x4xbf16>
    %c4_363 = arith.constant 4 : index
    %c0_364 = arith.constant 0 : index
    %c0_365 = arith.constant 0 : index
    %356 = vector.load %arg4[%c4_363, %c0_364, %c0_365] : memref<16x4x8xbf16, #tpu.memory_space<vmem>>, vector<1x4x8xbf16>
    %357 = vector.shape_cast %356 : vector<1x4x8xbf16> to vector<4x8xbf16>
    %cst_366 = arith.constant dense<0.000000e+00> : vector<9x8xf32>
    %358 = tpu.matmul %355, %357, %cst_366 {dimension_numbers = #tpu.dot_dimension_numbers<[1], [0], [0], [1], [0, 0, 1, 1], [], []>} : vector<9x4xbf16>, vector<4x8xbf16>, vector<9x8xf32> -> vector<9x8xf32>
    %359 = arith.addf %350, %358 : vector<9x8xf32>
    %c2_i32_367 = arith.constant 2 : i32
    %360 = arith.addi %0, %c2_i32_367 : i32
    %c0_i32_368 = arith.constant 0 : i32
    %361 = arith.addi %360, %c0_i32_368 : i32
    %c0_369 = arith.constant 0 : index
    %c3_370 = arith.constant 3 : index
    %362 = arith.index_cast %361 : i32 to index
    %c0_371 = arith.constant 0 : index
    %c0_372 = arith.constant 0 : index
    %363 = vector.load %arg3[%c0_369, %c3_370, %362, %c0_371, %c0_372] : memref<1x4x10x10x4xbf16, #tpu.memory_space<vmem>>, vector<1x1x1x9x4xbf16>
    %364 = vector.shape_cast %363 : vector<1x1x1x9x4xbf16> to vector<9x4xbf16>
    %c5_373 = arith.constant 5 : index
    %c0_374 = arith.constant 0 : index
    %c0_375 = arith.constant 0 : index
    %365 = vector.load %arg4[%c5_373, %c0_374, %c0_375] : memref<16x4x8xbf16, #tpu.memory_space<vmem>>, vector<1x4x8xbf16>
    %366 = vector.shape_cast %365 : vector<1x4x8xbf16> to vector<4x8xbf16>
    %cst_376 = arith.constant dense<0.000000e+00> : vector<9x8xf32>
    %367 = tpu.matmul %364, %366, %cst_376 {dimension_numbers = #tpu.dot_dimension_numbers<[1], [0], [0], [1], [0, 0, 1, 1], [], []>} : vector<9x4xbf16>, vector<4x8xbf16>, vector<9x8xf32> -> vector<9x8xf32>
    %368 = arith.addf %359, %367 : vector<9x8xf32>
    %c2_i32_377 = arith.constant 2 : i32
    %369 = arith.addi %0, %c2_i32_377 : i32
    %c0_i32_378 = arith.constant 0 : i32
    %370 = arith.addi %369, %c0_i32_378 : i32
    %c0_379 = arith.constant 0 : index
    %c2_380 = arith.constant 2 : index
    %371 = arith.index_cast %370 : i32 to index
    %c1_381 = arith.constant 1 : index
    %c0_382 = arith.constant 0 : index
    %372 = vector.load %arg3[%c0_379, %c2_380, %371, %c1_381, %c0_382] : memref<1x4x10x10x4xbf16, #tpu.memory_space<vmem>>, vector<1x1x1x9x4xbf16>
    %373 = vector.shape_cast %372 : vector<1x1x1x9x4xbf16> to vector<9x4xbf16>
    %c6_383 = arith.constant 6 : index
    %c0_384 = arith.constant 0 : index
    %c0_385 = arith.constant 0 : index
    %374 = vector.load %arg4[%c6_383, %c0_384, %c0_385] : memref<16x4x8xbf16, #tpu.memory_space<vmem>>, vector<1x4x8xbf16>
    %375 = vector.shape_cast %374 : vector<1x4x8xbf16> to vector<4x8xbf16>
    %cst_386 = arith.constant dense<0.000000e+00> : vector<9x8xf32>
    %376 = tpu.matmul %373, %375, %cst_386 {dimension_numbers = #tpu.dot_dimension_numbers<[1], [0], [0], [1], [0, 0, 1, 1], [], []>} : vector<9x4xbf16>, vector<4x8xbf16>, vector<9x8xf32> -> vector<9x8xf32>
    %377 = arith.addf %368, %376 : vector<9x8xf32>
    %c2_i32_387 = arith.constant 2 : i32
    %378 = arith.addi %0, %c2_i32_387 : i32
    %c0_i32_388 = arith.constant 0 : i32
    %379 = arith.addi %378, %c0_i32_388 : i32
    %c0_389 = arith.constant 0 : index
    %c3_390 = arith.constant 3 : index
    %380 = arith.index_cast %379 : i32 to index
    %c1_391 = arith.constant 1 : index
    %c0_392 = arith.constant 0 : index
    %381 = vector.load %arg3[%c0_389, %c3_390, %380, %c1_391, %c0_392] : memref<1x4x10x10x4xbf16, #tpu.memory_space<vmem>>, vector<1x1x1x9x4xbf16>
    %382 = vector.shape_cast %381 : vector<1x1x1x9x4xbf16> to vector<9x4xbf16>
    %c7_393 = arith.constant 7 : index
    %c0_394 = arith.constant 0 : index
    %c0_395 = arith.constant 0 : index
    %383 = vector.load %arg4[%c7_393, %c0_394, %c0_395] : memref<16x4x8xbf16, #tpu.memory_space<vmem>>, vector<1x4x8xbf16>
    %384 = vector.shape_cast %383 : vector<1x4x8xbf16> to vector<4x8xbf16>
    %cst_396 = arith.constant dense<0.000000e+00> : vector<9x8xf32>
    %385 = tpu.matmul %382, %384, %cst_396 {dimension_numbers = #tpu.dot_dimension_numbers<[1], [0], [0], [1], [0, 0, 1, 1], [], []>} : vector<9x4xbf16>, vector<4x8xbf16>, vector<9x8xf32> -> vector<9x8xf32>
    %386 = arith.addf %377, %385 : vector<9x8xf32>
    %c2_i32_397 = arith.constant 2 : i32
    %387 = arith.addi %0, %c2_i32_397 : i32
    %c1_i32_398 = arith.constant 1 : i32
    %388 = arith.addi %387, %c1_i32_398 : i32
    %c0_399 = arith.constant 0 : index
    %c0_400 = arith.constant 0 : index
    %389 = arith.index_cast %388 : i32 to index
    %c0_401 = arith.constant 0 : index
    %c0_402 = arith.constant 0 : index
    %390 = vector.load %arg3[%c0_399, %c0_400, %389, %c0_401, %c0_402] : memref<1x4x10x10x4xbf16, #tpu.memory_space<vmem>>, vector<1x1x1x9x4xbf16>
    %391 = vector.shape_cast %390 : vector<1x1x1x9x4xbf16> to vector<9x4xbf16>
    %c8_403 = arith.constant 8 : index
    %c0_404 = arith.constant 0 : index
    %c0_405 = arith.constant 0 : index
    %392 = vector.load %arg4[%c8_403, %c0_404, %c0_405] : memref<16x4x8xbf16, #tpu.memory_space<vmem>>, vector<1x4x8xbf16>
    %393 = vector.shape_cast %392 : vector<1x4x8xbf16> to vector<4x8xbf16>
    %cst_406 = arith.constant dense<0.000000e+00> : vector<9x8xf32>
    %394 = tpu.matmul %391, %393, %cst_406 {dimension_numbers = #tpu.dot_dimension_numbers<[1], [0], [0], [1], [0, 0, 1, 1], [], []>} : vector<9x4xbf16>, vector<4x8xbf16>, vector<9x8xf32> -> vector<9x8xf32>
    %395 = arith.addf %386, %394 : vector<9x8xf32>
    %c2_i32_407 = arith.constant 2 : i32
    %396 = arith.addi %0, %c2_i32_407 : i32
    %c1_i32_408 = arith.constant 1 : i32
    %397 = arith.addi %396, %c1_i32_408 : i32
    %c0_409 = arith.constant 0 : index
    %c1_410 = arith.constant 1 : index
    %398 = arith.index_cast %397 : i32 to index
    %c0_411 = arith.constant 0 : index
    %c0_412 = arith.constant 0 : index
    %399 = vector.load %arg3[%c0_409, %c1_410, %398, %c0_411, %c0_412] : memref<1x4x10x10x4xbf16, #tpu.memory_space<vmem>>, vector<1x1x1x9x4xbf16>
    %400 = vector.shape_cast %399 : vector<1x1x1x9x4xbf16> to vector<9x4xbf16>
    %c9_413 = arith.constant 9 : index
    %c0_414 = arith.constant 0 : index
    %c0_415 = arith.constant 0 : index
    %401 = vector.load %arg4[%c9_413, %c0_414, %c0_415] : memref<16x4x8xbf16, #tpu.memory_space<vmem>>, vector<1x4x8xbf16>
    %402 = vector.shape_cast %401 : vector<1x4x8xbf16> to vector<4x8xbf16>
    %cst_416 = arith.constant dense<0.000000e+00> : vector<9x8xf32>
    %403 = tpu.matmul %400, %402, %cst_416 {dimension_numbers = #tpu.dot_dimension_numbers<[1], [0], [0], [1], [0, 0, 1, 1], [], []>} : vector<9x4xbf16>, vector<4x8xbf16>, vector<9x8xf32> -> vector<9x8xf32>
    %404 = arith.addf %395, %403 : vector<9x8xf32>
    %c2_i32_417 = arith.constant 2 : i32
    %405 = arith.addi %0, %c2_i32_417 : i32
    %c1_i32_418 = arith.constant 1 : i32
    %406 = arith.addi %405, %c1_i32_418 : i32
    %c0_419 = arith.constant 0 : index
    %c0_420 = arith.constant 0 : index
    %407 = arith.index_cast %406 : i32 to index
    %c1_421 = arith.constant 1 : index
    %c0_422 = arith.constant 0 : index
    %408 = vector.load %arg3[%c0_419, %c0_420, %407, %c1_421, %c0_422] : memref<1x4x10x10x4xbf16, #tpu.memory_space<vmem>>, vector<1x1x1x9x4xbf16>
    %409 = vector.shape_cast %408 : vector<1x1x1x9x4xbf16> to vector<9x4xbf16>
    %c10_423 = arith.constant 10 : index
    %c0_424 = arith.constant 0 : index
    %c0_425 = arith.constant 0 : index
    %410 = vector.load %arg4[%c10_423, %c0_424, %c0_425] : memref<16x4x8xbf16, #tpu.memory_space<vmem>>, vector<1x4x8xbf16>
    %411 = vector.shape_cast %410 : vector<1x4x8xbf16> to vector<4x8xbf16>
    %cst_426 = arith.constant dense<0.000000e+00> : vector<9x8xf32>
    %412 = tpu.matmul %409, %411, %cst_426 {dimension_numbers = #tpu.dot_dimension_numbers<[1], [0], [0], [1], [0, 0, 1, 1], [], []>} : vector<9x4xbf16>, vector<4x8xbf16>, vector<9x8xf32> -> vector<9x8xf32>
    %413 = arith.addf %404, %412 : vector<9x8xf32>
    %c2_i32_427 = arith.constant 2 : i32
    %414 = arith.addi %0, %c2_i32_427 : i32
    %c1_i32_428 = arith.constant 1 : i32
    %415 = arith.addi %414, %c1_i32_428 : i32
    %c0_429 = arith.constant 0 : index
    %c1_430 = arith.constant 1 : index
    %416 = arith.index_cast %415 : i32 to index
    %c1_431 = arith.constant 1 : index
    %c0_432 = arith.constant 0 : index
    %417 = vector.load %arg3[%c0_429, %c1_430, %416, %c1_431, %c0_432] : memref<1x4x10x10x4xbf16, #tpu.memory_space<vmem>>, vector<1x1x1x9x4xbf16>
    %418 = vector.shape_cast %417 : vector<1x1x1x9x4xbf16> to vector<9x4xbf16>
    %c11_433 = arith.constant 11 : index
    %c0_434 = arith.constant 0 : index
    %c0_435 = arith.constant 0 : index
    %419 = vector.load %arg4[%c11_433, %c0_434, %c0_435] : memref<16x4x8xbf16, #tpu.memory_space<vmem>>, vector<1x4x8xbf16>
    %420 = vector.shape_cast %419 : vector<1x4x8xbf16> to vector<4x8xbf16>
    %cst_436 = arith.constant dense<0.000000e+00> : vector<9x8xf32>
    %421 = tpu.matmul %418, %420, %cst_436 {dimension_numbers = #tpu.dot_dimension_numbers<[1], [0], [0], [1], [0, 0, 1, 1], [], []>} : vector<9x4xbf16>, vector<4x8xbf16>, vector<9x8xf32> -> vector<9x8xf32>
    %422 = arith.addf %413, %421 : vector<9x8xf32>
    %c2_i32_437 = arith.constant 2 : i32
    %423 = arith.addi %0, %c2_i32_437 : i32
    %c1_i32_438 = arith.constant 1 : i32
    %424 = arith.addi %423, %c1_i32_438 : i32
    %c0_439 = arith.constant 0 : index
    %c2_440 = arith.constant 2 : index
    %425 = arith.index_cast %424 : i32 to index
    %c0_441 = arith.constant 0 : index
    %c0_442 = arith.constant 0 : index
    %426 = vector.load %arg3[%c0_439, %c2_440, %425, %c0_441, %c0_442] : memref<1x4x10x10x4xbf16, #tpu.memory_space<vmem>>, vector<1x1x1x9x4xbf16>
    %427 = vector.shape_cast %426 : vector<1x1x1x9x4xbf16> to vector<9x4xbf16>
    %c12_443 = arith.constant 12 : index
    %c0_444 = arith.constant 0 : index
    %c0_445 = arith.constant 0 : index
    %428 = vector.load %arg4[%c12_443, %c0_444, %c0_445] : memref<16x4x8xbf16, #tpu.memory_space<vmem>>, vector<1x4x8xbf16>
    %429 = vector.shape_cast %428 : vector<1x4x8xbf16> to vector<4x8xbf16>
    %cst_446 = arith.constant dense<0.000000e+00> : vector<9x8xf32>
    %430 = tpu.matmul %427, %429, %cst_446 {dimension_numbers = #tpu.dot_dimension_numbers<[1], [0], [0], [1], [0, 0, 1, 1], [], []>} : vector<9x4xbf16>, vector<4x8xbf16>, vector<9x8xf32> -> vector<9x8xf32>
    %431 = arith.addf %422, %430 : vector<9x8xf32>
    %c2_i32_447 = arith.constant 2 : i32
    %432 = arith.addi %0, %c2_i32_447 : i32
    %c1_i32_448 = arith.constant 1 : i32
    %433 = arith.addi %432, %c1_i32_448 : i32
    %c0_449 = arith.constant 0 : index
    %c3_450 = arith.constant 3 : index
    %434 = arith.index_cast %433 : i32 to index
    %c0_451 = arith.constant 0 : index
    %c0_452 = arith.constant 0 : index
    %435 = vector.load %arg3[%c0_449, %c3_450, %434, %c0_451, %c0_452] : memref<1x4x10x10x4xbf16, #tpu.memory_space<vmem>>, vector<1x1x1x9x4xbf16>
    %436 = vector.shape_cast %435 : vector<1x1x1x9x4xbf16> to vector<9x4xbf16>
    %c13_453 = arith.constant 13 : index
    %c0_454 = arith.constant 0 : index
    %c0_455 = arith.constant 0 : index
    %437 = vector.load %arg4[%c13_453, %c0_454, %c0_455] : memref<16x4x8xbf16, #tpu.memory_space<vmem>>, vector<1x4x8xbf16>
    %438 = vector.shape_cast %437 : vector<1x4x8xbf16> to vector<4x8xbf16>
    %cst_456 = arith.constant dense<0.000000e+00> : vector<9x8xf32>
    %439 = tpu.matmul %436, %438, %cst_456 {dimension_numbers = #tpu.dot_dimension_numbers<[1], [0], [0], [1], [0, 0, 1, 1], [], []>} : vector<9x4xbf16>, vector<4x8xbf16>, vector<9x8xf32> -> vector<9x8xf32>
    %440 = arith.addf %431, %439 : vector<9x8xf32>
    %c2_i32_457 = arith.constant 2 : i32
    %441 = arith.addi %0, %c2_i32_457 : i32
    %c1_i32_458 = arith.constant 1 : i32
    %442 = arith.addi %441, %c1_i32_458 : i32
    %c0_459 = arith.constant 0 : index
    %c2_460 = arith.constant 2 : index
    %443 = arith.index_cast %442 : i32 to index
    %c1_461 = arith.constant 1 : index
    %c0_462 = arith.constant 0 : index
    %444 = vector.load %arg3[%c0_459, %c2_460, %443, %c1_461, %c0_462] : memref<1x4x10x10x4xbf16, #tpu.memory_space<vmem>>, vector<1x1x1x9x4xbf16>
    %445 = vector.shape_cast %444 : vector<1x1x1x9x4xbf16> to vector<9x4xbf16>
    %c14_463 = arith.constant 14 : index
    %c0_464 = arith.constant 0 : index
    %c0_465 = arith.constant 0 : index
    %446 = vector.load %arg4[%c14_463, %c0_464, %c0_465] : memref<16x4x8xbf16, #tpu.memory_space<vmem>>, vector<1x4x8xbf16>
    %447 = vector.shape_cast %446 : vector<1x4x8xbf16> to vector<4x8xbf16>
    %cst_466 = arith.constant dense<0.000000e+00> : vector<9x8xf32>
    %448 = tpu.matmul %445, %447, %cst_466 {dimension_numbers = #tpu.dot_dimension_numbers<[1], [0], [0], [1], [0, 0, 1, 1], [], []>} : vector<9x4xbf16>, vector<4x8xbf16>, vector<9x8xf32> -> vector<9x8xf32>
    %449 = arith.addf %440, %448 : vector<9x8xf32>
    %c2_i32_467 = arith.constant 2 : i32
    %450 = arith.addi %0, %c2_i32_467 : i32
    %c1_i32_468 = arith.constant 1 : i32
    %451 = arith.addi %450, %c1_i32_468 : i32
    %c0_469 = arith.constant 0 : index
    %c3_470 = arith.constant 3 : index
    %452 = arith.index_cast %451 : i32 to index
    %c1_471 = arith.constant 1 : index
    %c0_472 = arith.constant 0 : index
    %453 = vector.load %arg3[%c0_469, %c3_470, %452, %c1_471, %c0_472] : memref<1x4x10x10x4xbf16, #tpu.memory_space<vmem>>, vector<1x1x1x9x4xbf16>
    %454 = vector.shape_cast %453 : vector<1x1x1x9x4xbf16> to vector<9x4xbf16>
    %c15_473 = arith.constant 15 : index
    %c0_474 = arith.constant 0 : index
    %c0_475 = arith.constant 0 : index
    %455 = vector.load %arg4[%c15_473, %c0_474, %c0_475] : memref<16x4x8xbf16, #tpu.memory_space<vmem>>, vector<1x4x8xbf16>
    %456 = vector.shape_cast %455 : vector<1x4x8xbf16> to vector<4x8xbf16>
    %cst_476 = arith.constant dense<0.000000e+00> : vector<9x8xf32>
    %457 = tpu.matmul %454, %456, %cst_476 {dimension_numbers = #tpu.dot_dimension_numbers<[1], [0], [0], [1], [0, 0, 1, 1], [], []>} : vector<9x4xbf16>, vector<4x8xbf16>, vector<9x8xf32> -> vector<9x8xf32>
    %458 = arith.addf %449, %457 : vector<9x8xf32>
    %459 = vector.broadcast %1 : vector<1x8xf32> to vector<9x8xf32>
    %460 = arith.addf %458, %459 : vector<9x8xf32>
    %cst_477 = arith.constant 0.000000e+00 : f32
    %461 = vector.broadcast %cst_477 : f32 to vector<9x8xf32>
    %462 = arith.cmpf oge, %460, %461 : vector<9x8xf32>
    %cst_478 = arith.constant 2.000000e-01 : f32
    %463 = vector.broadcast %cst_478 : f32 to vector<9x8xf32>
    %464 = arith.mulf %463, %460 : vector<9x8xf32>
    %465 = arith.select %462, %460, %464 : vector<9x8xi1>, vector<9x8xf32>
    %466 = arith.truncf %465 : vector<9x8xf32> to vector<9x8xbf16>
    %c0_479 = arith.constant 0 : index
    %c2_480 = arith.constant 2 : index
    %c0_481 = arith.constant 0 : index
    %c0_482 = arith.constant 0 : index
    %467 = vector.load %arg6[%c0_479, %c2_480, %c0_481, %c0_482] : memref<1x9x9x8xbf16, #tpu.memory_space<vmem>>, vector<1x1x9x8xbf16>
    %468 = vector.shape_cast %467 : vector<1x1x9x8xbf16> to vector<9x8xbf16>
    %469 = vector.shape_cast %466 : vector<9x8xbf16> to vector<1x1x9x8xbf16>
    tpu.vector_store %arg6[%c0_479, %c2_480, %c0_481, %c0_482], %469 {strides = array<i32>} : memref<1x9x9x8xbf16, #tpu.memory_space<vmem>>, vector<1x1x9x8xbf16>,
    %cst_483 = arith.constant 0.000000e+00 : f32
    %470 = vector.broadcast %cst_483 : f32 to vector<9x8xf32>
    %c3_i32 = arith.constant 3 : i32
    %471 = arith.addi %0, %c3_i32 : i32
    %c0_i32_484 = arith.constant 0 : i32
    %472 = arith.addi %471, %c0_i32_484 : i32
    %c0_485 = arith.constant 0 : index
    %c0_486 = arith.constant 0 : index
    %473 = arith.index_cast %472 : i32 to index
    %c0_487 = arith.constant 0 : index
    %c0_488 = arith.constant 0 : index
    %474 = vector.load %arg3[%c0_485, %c0_486, %473, %c0_487, %c0_488] : memref<1x4x10x10x4xbf16, #tpu.memory_space<vmem>>, vector<1x1x1x9x4xbf16>
    %475 = vector.shape_cast %474 : vector<1x1x1x9x4xbf16> to vector<9x4xbf16>
    %c0_489 = arith.constant 0 : index
    %c0_490 = arith.constant 0 : index
    %c0_491 = arith.constant 0 : index
    %476 = vector.load %arg4[%c0_489, %c0_490, %c0_491] : memref<16x4x8xbf16, #tpu.memory_space<vmem>>, vector<1x4x8xbf16>
    %477 = vector.shape_cast %476 : vector<1x4x8xbf16> to vector<4x8xbf16>
    %cst_492 = arith.constant dense<0.000000e+00> : vector<9x8xf32>
    %478 = tpu.matmul %475, %477, %cst_492 {dimension_numbers = #tpu.dot_dimension_numbers<[1], [0], [0], [1], [0, 0, 1, 1], [], []>} : vector<9x4xbf16>, vector<4x8xbf16>, vector<9x8xf32> -> vector<9x8xf32>
    %479 = arith.addf %470, %478 : vector<9x8xf32>
    %c3_i32_493 = arith.constant 3 : i32
    %480 = arith.addi %0, %c3_i32_493 : i32
    %c0_i32_494 = arith.constant 0 : i32
    %481 = arith.addi %480, %c0_i32_494 : i32
    %c0_495 = arith.constant 0 : index
    %c1_496 = arith.constant 1 : index
    %482 = arith.index_cast %481 : i32 to index
    %c0_497 = arith.constant 0 : index
    %c0_498 = arith.constant 0 : index
    %483 = vector.load %arg3[%c0_495, %c1_496, %482, %c0_497, %c0_498] : memref<1x4x10x10x4xbf16, #tpu.memory_space<vmem>>, vector<1x1x1x9x4xbf16>
    %484 = vector.shape_cast %483 : vector<1x1x1x9x4xbf16> to vector<9x4xbf16>
    %c1_499 = arith.constant 1 : index
    %c0_500 = arith.constant 0 : index
    %c0_501 = arith.constant 0 : index
    %485 = vector.load %arg4[%c1_499, %c0_500, %c0_501] : memref<16x4x8xbf16, #tpu.memory_space<vmem>>, vector<1x4x8xbf16>
    %486 = vector.shape_cast %485 : vector<1x4x8xbf16> to vector<4x8xbf16>
    %cst_502 = arith.constant dense<0.000000e+00> : vector<9x8xf32>
    %487 = tpu.matmul %484, %486, %cst_502 {dimension_numbers = #tpu.dot_dimension_numbers<[1], [0], [0], [1], [0, 0, 1, 1], [], []>} : vector<9x4xbf16>, vector<4x8xbf16>, vector<9x8xf32> -> vector<9x8xf32>
    %488 = arith.addf %479, %487 : vector<9x8xf32>
    %c3_i32_503 = arith.constant 3 : i32
    %489 = arith.addi %0, %c3_i32_503 : i32
    %c0_i32_504 = arith.constant 0 : i32
    %490 = arith.addi %489, %c0_i32_504 : i32
    %c0_505 = arith.constant 0 : index
    %c0_506 = arith.constant 0 : index
    %491 = arith.index_cast %490 : i32 to index
    %c1_507 = arith.constant 1 : index
    %c0_508 = arith.constant 0 : index
    %492 = vector.load %arg3[%c0_505, %c0_506, %491, %c1_507, %c0_508] : memref<1x4x10x10x4xbf16, #tpu.memory_space<vmem>>, vector<1x1x1x9x4xbf16>
    %493 = vector.shape_cast %492 : vector<1x1x1x9x4xbf16> to vector<9x4xbf16>
    %c2_509 = arith.constant 2 : index
    %c0_510 = arith.constant 0 : index
    %c0_511 = arith.constant 0 : index
    %494 = vector.load %arg4[%c2_509, %c0_510, %c0_511] : memref<16x4x8xbf16, #tpu.memory_space<vmem>>, vector<1x4x8xbf16>
    %495 = vector.shape_cast %494 : vector<1x4x8xbf16> to vector<4x8xbf16>
    %cst_512 = arith.constant dense<0.000000e+00> : vector<9x8xf32>
    %496 = tpu.matmul %493, %495, %cst_512 {dimension_numbers = #tpu.dot_dimension_numbers<[1], [0], [0], [1], [0, 0, 1, 1], [], []>} : vector<9x4xbf16>, vector<4x8xbf16>, vector<9x8xf32> -> vector<9x8xf32>
    %497 = arith.addf %488, %496 : vector<9x8xf32>
    %c3_i32_513 = arith.constant 3 : i32
    %498 = arith.addi %0, %c3_i32_513 : i32
    %c0_i32_514 = arith.constant 0 : i32
    %499 = arith.addi %498, %c0_i32_514 : i32
    %c0_515 = arith.constant 0 : index
    %c1_516 = arith.constant 1 : index
    %500 = arith.index_cast %499 : i32 to index
    %c1_517 = arith.constant 1 : index
    %c0_518 = arith.constant 0 : index
    %501 = vector.load %arg3[%c0_515, %c1_516, %500, %c1_517, %c0_518] : memref<1x4x10x10x4xbf16, #tpu.memory_space<vmem>>, vector<1x1x1x9x4xbf16>
    %502 = vector.shape_cast %501 : vector<1x1x1x9x4xbf16> to vector<9x4xbf16>
    %c3_519 = arith.constant 3 : index
    %c0_520 = arith.constant 0 : index
    %c0_521 = arith.constant 0 : index
    %503 = vector.load %arg4[%c3_519, %c0_520, %c0_521] : memref<16x4x8xbf16, #tpu.memory_space<vmem>>, vector<1x4x8xbf16>
    %504 = vector.shape_cast %503 : vector<1x4x8xbf16> to vector<4x8xbf16>
    %cst_522 = arith.constant dense<0.000000e+00> : vector<9x8xf32>
    %505 = tpu.matmul %502, %504, %cst_522 {dimension_numbers = #tpu.dot_dimension_numbers<[1], [0], [0], [1], [0, 0, 1, 1], [], []>} : vector<9x4xbf16>, vector<4x8xbf16>, vector<9x8xf32> -> vector<9x8xf32>
    %506 = arith.addf %497, %505 : vector<9x8xf32>
    %c3_i32_523 = arith.constant 3 : i32
    %507 = arith.addi %0, %c3_i32_523 : i32
    %c0_i32_524 = arith.constant 0 : i32
    %508 = arith.addi %507, %c0_i32_524 : i32
    %c0_525 = arith.constant 0 : index
    %c2_526 = arith.constant 2 : index
    %509 = arith.index_cast %508 : i32 to index
    %c0_527 = arith.constant 0 : index
    %c0_528 = arith.constant 0 : index
    %510 = vector.load %arg3[%c0_525, %c2_526, %509, %c0_527, %c0_528] : memref<1x4x10x10x4xbf16, #tpu.memory_space<vmem>>, vector<1x1x1x9x4xbf16>
    %511 = vector.shape_cast %510 : vector<1x1x1x9x4xbf16> to vector<9x4xbf16>
    %c4_529 = arith.constant 4 : index
    %c0_530 = arith.constant 0 : index
    %c0_531 = arith.constant 0 : index
    %512 = vector.load %arg4[%c4_529, %c0_530, %c0_531] : memref<16x4x8xbf16, #tpu.memory_space<vmem>>, vector<1x4x8xbf16>
    %513 = vector.shape_cast %512 : vector<1x4x8xbf16> to vector<4x8xbf16>
    %cst_532 = arith.constant dense<0.000000e+00> : vector<9x8xf32>
    %514 = tpu.matmul %511, %513, %cst_532 {dimension_numbers = #tpu.dot_dimension_numbers<[1], [0], [0], [1], [0, 0, 1, 1], [], []>} : vector<9x4xbf16>, vector<4x8xbf16>, vector<9x8xf32> -> vector<9x8xf32>
    %515 = arith.addf %506, %514 : vector<9x8xf32>
    %c3_i32_533 = arith.constant 3 : i32
    %516 = arith.addi %0, %c3_i32_533 : i32
    %c0_i32_534 = arith.constant 0 : i32
    %517 = arith.addi %516, %c0_i32_534 : i32
    %c0_535 = arith.constant 0 : index
    %c3_536 = arith.constant 3 : index
    %518 = arith.index_cast %517 : i32 to index
    %c0_537 = arith.constant 0 : index
    %c0_538 = arith.constant 0 : index
    %519 = vector.load %arg3[%c0_535, %c3_536, %518, %c0_537, %c0_538] : memref<1x4x10x10x4xbf16, #tpu.memory_space<vmem>>, vector<1x1x1x9x4xbf16>
    %520 = vector.shape_cast %519 : vector<1x1x1x9x4xbf16> to vector<9x4xbf16>
    %c5_539 = arith.constant 5 : index
    %c0_540 = arith.constant 0 : index
    %c0_541 = arith.constant 0 : index
    %521 = vector.load %arg4[%c5_539, %c0_540, %c0_541] : memref<16x4x8xbf16, #tpu.memory_space<vmem>>, vector<1x4x8xbf16>
    %522 = vector.shape_cast %521 : vector<1x4x8xbf16> to vector<4x8xbf16>
    %cst_542 = arith.constant dense<0.000000e+00> : vector<9x8xf32>
    %523 = tpu.matmul %520, %522, %cst_542 {dimension_numbers = #tpu.dot_dimension_numbers<[1], [0], [0], [1], [0, 0, 1, 1], [], []>} : vector<9x4xbf16>, vector<4x8xbf16>, vector<9x8xf32> -> vector<9x8xf32>
    %524 = arith.addf %515, %523 : vector<9x8xf32>
    %c3_i32_543 = arith.constant 3 : i32
    %525 = arith.addi %0, %c3_i32_543 : i32
    %c0_i32_544 = arith.constant 0 : i32
    %526 = arith.addi %525, %c0_i32_544 : i32
    %c0_545 = arith.constant 0 : index
    %c2_546 = arith.constant 2 : index
    %527 = arith.index_cast %526 : i32 to index
    %c1_547 = arith.constant 1 : index
    %c0_548 = arith.constant 0 : index
    %528 = vector.load %arg3[%c0_545, %c2_546, %527, %c1_547, %c0_548] : memref<1x4x10x10x4xbf16, #tpu.memory_space<vmem>>, vector<1x1x1x9x4xbf16>
    %529 = vector.shape_cast %528 : vector<1x1x1x9x4xbf16> to vector<9x4xbf16>
    %c6_549 = arith.constant 6 : index
    %c0_550 = arith.constant 0 : index
    %c0_551 = arith.constant 0 : index
    %530 = vector.load %arg4[%c6_549, %c0_550, %c0_551] : memref<16x4x8xbf16, #tpu.memory_space<vmem>>, vector<1x4x8xbf16>
    %531 = vector.shape_cast %530 : vector<1x4x8xbf16> to vector<4x8xbf16>
    %cst_552 = arith.constant dense<0.000000e+00> : vector<9x8xf32>
    %532 = tpu.matmul %529, %531, %cst_552 {dimension_numbers = #tpu.dot_dimension_numbers<[1], [0], [0], [1], [0, 0, 1, 1], [], []>} : vector<9x4xbf16>, vector<4x8xbf16>, vector<9x8xf32> -> vector<9x8xf32>
    %533 = arith.addf %524, %532 : vector<9x8xf32>
    %c3_i32_553 = arith.constant 3 : i32
    %534 = arith.addi %0, %c3_i32_553 : i32
    %c0_i32_554 = arith.constant 0 : i32
    %535 = arith.addi %534, %c0_i32_554 : i32
    %c0_555 = arith.constant 0 : index
    %c3_556 = arith.constant 3 : index
    %536 = arith.index_cast %535 : i32 to index
    %c1_557 = arith.constant 1 : index
    %c0_558 = arith.constant 0 : index
    %537 = vector.load %arg3[%c0_555, %c3_556, %536, %c1_557, %c0_558] : memref<1x4x10x10x4xbf16, #tpu.memory_space<vmem>>, vector<1x1x1x9x4xbf16>
    %538 = vector.shape_cast %537 : vector<1x1x1x9x4xbf16> to vector<9x4xbf16>
    %c7_559 = arith.constant 7 : index
    %c0_560 = arith.constant 0 : index
    %c0_561 = arith.constant 0 : index
    %539 = vector.load %arg4[%c7_559, %c0_560, %c0_561] : memref<16x4x8xbf16, #tpu.memory_space<vmem>>, vector<1x4x8xbf16>
    %540 = vector.shape_cast %539 : vector<1x4x8xbf16> to vector<4x8xbf16>
    %cst_562 = arith.constant dense<0.000000e+00> : vector<9x8xf32>
    %541 = tpu.matmul %538, %540, %cst_562 {dimension_numbers = #tpu.dot_dimension_numbers<[1], [0], [0], [1], [0, 0, 1, 1], [], []>} : vector<9x4xbf16>, vector<4x8xbf16>, vector<9x8xf32> -> vector<9x8xf32>
    %542 = arith.addf %533, %541 : vector<9x8xf32>
    %c3_i32_563 = arith.constant 3 : i32
    %543 = arith.addi %0, %c3_i32_563 : i32
    %c1_i32_564 = arith.constant 1 : i32
    %544 = arith.addi %543, %c1_i32_564 : i32
    %c0_565 = arith.constant 0 : index
    %c0_566 = arith.constant 0 : index
    %545 = arith.index_cast %544 : i32 to index
    %c0_567 = arith.constant 0 : index
    %c0_568 = arith.constant 0 : index
    %546 = vector.load %arg3[%c0_565, %c0_566, %545, %c0_567, %c0_568] : memref<1x4x10x10x4xbf16, #tpu.memory_space<vmem>>, vector<1x1x1x9x4xbf16>
    %547 = vector.shape_cast %546 : vector<1x1x1x9x4xbf16> to vector<9x4xbf16>
    %c8_569 = arith.constant 8 : index
    %c0_570 = arith.constant 0 : index
    %c0_571 = arith.constant 0 : index
    %548 = vector.load %arg4[%c8_569, %c0_570, %c0_571] : memref<16x4x8xbf16, #tpu.memory_space<vmem>>, vector<1x4x8xbf16>
    %549 = vector.shape_cast %548 : vector<1x4x8xbf16> to vector<4x8xbf16>
    %cst_572 = arith.constant dense<0.000000e+00> : vector<9x8xf32>
    %550 = tpu.matmul %547, %549, %cst_572 {dimension_numbers = #tpu.dot_dimension_numbers<[1], [0], [0], [1], [0, 0, 1, 1], [], []>} : vector<9x4xbf16>, vector<4x8xbf16>, vector<9x8xf32> -> vector<9x8xf32>
    %551 = arith.addf %542, %550 : vector<9x8xf32>
    %c3_i32_573 = arith.constant 3 : i32
    %552 = arith.addi %0, %c3_i32_573 : i32
    %c1_i32_574 = arith.constant 1 : i32
    %553 = arith.addi %552, %c1_i32_574 : i32
    %c0_575 = arith.constant 0 : index
    %c1_576 = arith.constant 1 : index
    %554 = arith.index_cast %553 : i32 to index
    %c0_577 = arith.constant 0 : index
    %c0_578 = arith.constant 0 : index
    %555 = vector.load %arg3[%c0_575, %c1_576, %554, %c0_577, %c0_578] : memref<1x4x10x10x4xbf16, #tpu.memory_space<vmem>>, vector<1x1x1x9x4xbf16>
    %556 = vector.shape_cast %555 : vector<1x1x1x9x4xbf16> to vector<9x4xbf16>
    %c9_579 = arith.constant 9 : index
    %c0_580 = arith.constant 0 : index
    %c0_581 = arith.constant 0 : index
    %557 = vector.load %arg4[%c9_579, %c0_580, %c0_581] : memref<16x4x8xbf16, #tpu.memory_space<vmem>>, vector<1x4x8xbf16>
    %558 = vector.shape_cast %557 : vector<1x4x8xbf16> to vector<4x8xbf16>
    %cst_582 = arith.constant dense<0.000000e+00> : vector<9x8xf32>
    %559 = tpu.matmul %556, %558, %cst_582 {dimension_numbers = #tpu.dot_dimension_numbers<[1], [0], [0], [1], [0, 0, 1, 1], [], []>} : vector<9x4xbf16>, vector<4x8xbf16>, vector<9x8xf32> -> vector<9x8xf32>
    %560 = arith.addf %551, %559 : vector<9x8xf32>
    %c3_i32_583 = arith.constant 3 : i32
    %561 = arith.addi %0, %c3_i32_583 : i32
    %c1_i32_584 = arith.constant 1 : i32
    %562 = arith.addi %561, %c1_i32_584 : i32
    %c0_585 = arith.constant 0 : index
    %c0_586 = arith.constant 0 : index
    %563 = arith.index_cast %562 : i32 to index
    %c1_587 = arith.constant 1 : index
    %c0_588 = arith.constant 0 : index
    %564 = vector.load %arg3[%c0_585, %c0_586, %563, %c1_587, %c0_588] : memref<1x4x10x10x4xbf16, #tpu.memory_space<vmem>>, vector<1x1x1x9x4xbf16>
    %565 = vector.shape_cast %564 : vector<1x1x1x9x4xbf16> to vector<9x4xbf16>
    %c10_589 = arith.constant 10 : index
    %c0_590 = arith.constant 0 : index
    %c0_591 = arith.constant 0 : index
    %566 = vector.load %arg4[%c10_589, %c0_590, %c0_591] : memref<16x4x8xbf16, #tpu.memory_space<vmem>>, vector<1x4x8xbf16>
    %567 = vector.shape_cast %566 : vector<1x4x8xbf16> to vector<4x8xbf16>
    %cst_592 = arith.constant dense<0.000000e+00> : vector<9x8xf32>
    %568 = tpu.matmul %565, %567, %cst_592 {dimension_numbers = #tpu.dot_dimension_numbers<[1], [0], [0], [1], [0, 0, 1, 1], [], []>} : vector<9x4xbf16>, vector<4x8xbf16>, vector<9x8xf32> -> vector<9x8xf32>
    %569 = arith.addf %560, %568 : vector<9x8xf32>
    %c3_i32_593 = arith.constant 3 : i32
    %570 = arith.addi %0, %c3_i32_593 : i32
    %c1_i32_594 = arith.constant 1 : i32
    %571 = arith.addi %570, %c1_i32_594 : i32
    %c0_595 = arith.constant 0 : index
    %c1_596 = arith.constant 1 : index
    %572 = arith.index_cast %571 : i32 to index
    %c1_597 = arith.constant 1 : index
    %c0_598 = arith.constant 0 : index
    %573 = vector.load %arg3[%c0_595, %c1_596, %572, %c1_597, %c0_598] : memref<1x4x10x10x4xbf16, #tpu.memory_space<vmem>>, vector<1x1x1x9x4xbf16>
    %574 = vector.shape_cast %573 : vector<1x1x1x9x4xbf16> to vector<9x4xbf16>
    %c11_599 = arith.constant 11 : index
    %c0_600 = arith.constant 0 : index
    %c0_601 = arith.constant 0 : index
    %575 = vector.load %arg4[%c11_599, %c0_600, %c0_601] : memref<16x4x8xbf16, #tpu.memory_space<vmem>>, vector<1x4x8xbf16>
    %576 = vector.shape_cast %575 : vector<1x4x8xbf16> to vector<4x8xbf16>
    %cst_602 = arith.constant dense<0.000000e+00> : vector<9x8xf32>
    %577 = tpu.matmul %574, %576, %cst_602 {dimension_numbers = #tpu.dot_dimension_numbers<[1], [0], [0], [1], [0, 0, 1, 1], [], []>} : vector<9x4xbf16>, vector<4x8xbf16>, vector<9x8xf32> -> vector<9x8xf32>
    %578 = arith.addf %569, %577 : vector<9x8xf32>
    %c3_i32_603 = arith.constant 3 : i32
    %579 = arith.addi %0, %c3_i32_603 : i32
    %c1_i32_604 = arith.constant 1 : i32
    %580 = arith.addi %579, %c1_i32_604 : i32
    %c0_605 = arith.constant 0 : index
    %c2_606 = arith.constant 2 : index
    %581 = arith.index_cast %580 : i32 to index
    %c0_607 = arith.constant 0 : index
    %c0_608 = arith.constant 0 : index
    %582 = vector.load %arg3[%c0_605, %c2_606, %581, %c0_607, %c0_608] : memref<1x4x10x10x4xbf16, #tpu.memory_space<vmem>>, vector<1x1x1x9x4xbf16>
    %583 = vector.shape_cast %582 : vector<1x1x1x9x4xbf16> to vector<9x4xbf16>
    %c12_609 = arith.constant 12 : index
    %c0_610 = arith.constant 0 : index
    %c0_611 = arith.constant 0 : index
    %584 = vector.load %arg4[%c12_609, %c0_610, %c0_611] : memref<16x4x8xbf16, #tpu.memory_space<vmem>>, vector<1x4x8xbf16>
    %585 = vector.shape_cast %584 : vector<1x4x8xbf16> to vector<4x8xbf16>
    %cst_612 = arith.constant dense<0.000000e+00> : vector<9x8xf32>
    %586 = tpu.matmul %583, %585, %cst_612 {dimension_numbers = #tpu.dot_dimension_numbers<[1], [0], [0], [1], [0, 0, 1, 1], [], []>} : vector<9x4xbf16>, vector<4x8xbf16>, vector<9x8xf32> -> vector<9x8xf32>
    %587 = arith.addf %578, %586 : vector<9x8xf32>
    %c3_i32_613 = arith.constant 3 : i32
    %588 = arith.addi %0, %c3_i32_613 : i32
    %c1_i32_614 = arith.constant 1 : i32
    %589 = arith.addi %588, %c1_i32_614 : i32
    %c0_615 = arith.constant 0 : index
    %c3_616 = arith.constant 3 : index
    %590 = arith.index_cast %589 : i32 to index
    %c0_617 = arith.constant 0 : index
    %c0_618 = arith.constant 0 : index
    %591 = vector.load %arg3[%c0_615, %c3_616, %590, %c0_617, %c0_618] : memref<1x4x10x10x4xbf16, #tpu.memory_space<vmem>>, vector<1x1x1x9x4xbf16>
    %592 = vector.shape_cast %591 : vector<1x1x1x9x4xbf16> to vector<9x4xbf16>
    %c13_619 = arith.constant 13 : index
    %c0_620 = arith.constant 0 : index
    %c0_621 = arith.constant 0 : index
    %593 = vector.load %arg4[%c13_619, %c0_620, %c0_621] : memref<16x4x8xbf16, #tpu.memory_space<vmem>>, vector<1x4x8xbf16>
    %594 = vector.shape_cast %593 : vector<1x4x8xbf16> to vector<4x8xbf16>
    %cst_622 = arith.constant dense<0.000000e+00> : vector<9x8xf32>
    %595 = tpu.matmul %592, %594, %cst_622 {dimension_numbers = #tpu.dot_dimension_numbers<[1], [0], [0], [1], [0, 0, 1, 1], [], []>} : vector<9x4xbf16>, vector<4x8xbf16>, vector<9x8xf32> -> vector<9x8xf32>
    %596 = arith.addf %587, %595 : vector<9x8xf32>
    %c3_i32_623 = arith.constant 3 : i32
    %597 = arith.addi %0, %c3_i32_623 : i32
    %c1_i32_624 = arith.constant 1 : i32
    %598 = arith.addi %597, %c1_i32_624 : i32
    %c0_625 = arith.constant 0 : index
    %c2_626 = arith.constant 2 : index
    %599 = arith.index_cast %598 : i32 to index
    %c1_627 = arith.constant 1 : index
    %c0_628 = arith.constant 0 : index
    %600 = vector.load %arg3[%c0_625, %c2_626, %599, %c1_627, %c0_628] : memref<1x4x10x10x4xbf16, #tpu.memory_space<vmem>>, vector<1x1x1x9x4xbf16>
    %601 = vector.shape_cast %600 : vector<1x1x1x9x4xbf16> to vector<9x4xbf16>
    %c14_629 = arith.constant 14 : index
    %c0_630 = arith.constant 0 : index
    %c0_631 = arith.constant 0 : index
    %602 = vector.load %arg4[%c14_629, %c0_630, %c0_631] : memref<16x4x8xbf16, #tpu.memory_space<vmem>>, vector<1x4x8xbf16>
    %603 = vector.shape_cast %602 : vector<1x4x8xbf16> to vector<4x8xbf16>
    %cst_632 = arith.constant dense<0.000000e+00> : vector<9x8xf32>
    %604 = tpu.matmul %601, %603, %cst_632 {dimension_numbers = #tpu.dot_dimension_numbers<[1], [0], [0], [1], [0, 0, 1, 1], [], []>} : vector<9x4xbf16>, vector<4x8xbf16>, vector<9x8xf32> -> vector<9x8xf32>
    %605 = arith.addf %596, %604 : vector<9x8xf32>
    %c3_i32_633 = arith.constant 3 : i32
    %606 = arith.addi %0, %c3_i32_633 : i32
    %c1_i32_634 = arith.constant 1 : i32
    %607 = arith.addi %606, %c1_i32_634 : i32
    %c0_635 = arith.constant 0 : index
    %c3_636 = arith.constant 3 : index
    %608 = arith.index_cast %607 : i32 to index
    %c1_637 = arith.constant 1 : index
    %c0_638 = arith.constant 0 : index
    %609 = vector.load %arg3[%c0_635, %c3_636, %608, %c1_637, %c0_638] : memref<1x4x10x10x4xbf16, #tpu.memory_space<vmem>>, vector<1x1x1x9x4xbf16>
    %610 = vector.shape_cast %609 : vector<1x1x1x9x4xbf16> to vector<9x4xbf16>
    %c15_639 = arith.constant 15 : index
    %c0_640 = arith.constant 0 : index
    %c0_641 = arith.constant 0 : index
    %611 = vector.load %arg4[%c15_639, %c0_640, %c0_641] : memref<16x4x8xbf16, #tpu.memory_space<vmem>>, vector<1x4x8xbf16>
    %612 = vector.shape_cast %611 : vector<1x4x8xbf16> to vector<4x8xbf16>
    %cst_642 = arith.constant dense<0.000000e+00> : vector<9x8xf32>
    %613 = tpu.matmul %610, %612, %cst_642 {dimension_numbers = #tpu.dot_dimension_numbers<[1], [0], [0], [1], [0, 0, 1, 1], [], []>} : vector<9x4xbf16>, vector<4x8xbf16>, vector<9x8xf32> -> vector<9x8xf32>
    %614 = arith.addf %605, %613 : vector<9x8xf32>
    %615 = vector.broadcast %1 : vector<1x8xf32> to vector<9x8xf32>
    %616 = arith.addf %614, %615 : vector<9x8xf32>
    %cst_643 = arith.constant 0.000000e+00 : f32
    %617 = vector.broadcast %cst_643 : f32 to vector<9x8xf32>
    %618 = arith.cmpf oge, %616, %617 : vector<9x8xf32>
    %cst_644 = arith.constant 2.000000e-01 : f32
    %619 = vector.broadcast %cst_644 : f32 to vector<9x8xf32>
    %620 = arith.mulf %619, %616 : vector<9x8xf32>
    %621 = arith.select %618, %616, %620 : vector<9x8xi1>, vector<9x8xf32>
    %622 = arith.truncf %621 : vector<9x8xf32> to vector<9x8xbf16>
    %c0_645 = arith.constant 0 : index
    %c3_646 = arith.constant 3 : index
    %c0_647 = arith.constant 0 : index
    %c0_648 = arith.constant 0 : index
    %623 = vector.load %arg6[%c0_645, %c3_646, %c0_647, %c0_648] : memref<1x9x9x8xbf16, #tpu.memory_space<vmem>>, vector<1x1x9x8xbf16>
    %624 = vector.shape_cast %623 : vector<1x1x9x8xbf16> to vector<9x8xbf16>
    %625 = vector.shape_cast %622 : vector<9x8xbf16> to vector<1x1x9x8xbf16>
    tpu.vector_store %arg6[%c0_645, %c3_646, %c0_647, %c0_648], %625 {strides = array<i32>} : memref<1x9x9x8xbf16, #tpu.memory_space<vmem>>, vector<1x1x9x8xbf16>,
    %cst_649 = arith.constant 0.000000e+00 : f32
    %626 = vector.broadcast %cst_649 : f32 to vector<9x8xf32>
    %c4_i32 = arith.constant 4 : i32
    %627 = arith.addi %0, %c4_i32 : i32
    %c0_i32_650 = arith.constant 0 : i32
    %628 = arith.addi %627, %c0_i32_650 : i32
    %c0_651 = arith.constant 0 : index
    %c0_652 = arith.constant 0 : index
    %629 = arith.index_cast %628 : i32 to index
    %c0_653 = arith.constant 0 : index
    %c0_654 = arith.constant 0 : index
    %630 = vector.load %arg3[%c0_651, %c0_652, %629, %c0_653, %c0_654] : memref<1x4x10x10x4xbf16, #tpu.memory_space<vmem>>, vector<1x1x1x9x4xbf16>
    %631 = vector.shape_cast %630 : vector<1x1x1x9x4xbf16> to vector<9x4xbf16>
    %c0_655 = arith.constant 0 : index
    %c0_656 = arith.constant 0 : index
    %c0_657 = arith.constant 0 : index
    %632 = vector.load %arg4[%c0_655, %c0_656, %c0_657] : memref<16x4x8xbf16, #tpu.memory_space<vmem>>, vector<1x4x8xbf16>
    %633 = vector.shape_cast %632 : vector<1x4x8xbf16> to vector<4x8xbf16>
    %cst_658 = arith.constant dense<0.000000e+00> : vector<9x8xf32>
    %634 = tpu.matmul %631, %633, %cst_658 {dimension_numbers = #tpu.dot_dimension_numbers<[1], [0], [0], [1], [0, 0, 1, 1], [], []>} : vector<9x4xbf16>, vector<4x8xbf16>, vector<9x8xf32> -> vector<9x8xf32>
    %635 = arith.addf %626, %634 : vector<9x8xf32>
    %c4_i32_659 = arith.constant 4 : i32
    %636 = arith.addi %0, %c4_i32_659 : i32
    %c0_i32_660 = arith.constant 0 : i32
    %637 = arith.addi %636, %c0_i32_660 : i32
    %c0_661 = arith.constant 0 : index
    %c1_662 = arith.constant 1 : index
    %638 = arith.index_cast %637 : i32 to index
    %c0_663 = arith.constant 0 : index
    %c0_664 = arith.constant 0 : index
    %639 = vector.load %arg3[%c0_661, %c1_662, %638, %c0_663, %c0_664] : memref<1x4x10x10x4xbf16, #tpu.memory_space<vmem>>, vector<1x1x1x9x4xbf16>
    %640 = vector.shape_cast %639 : vector<1x1x1x9x4xbf16> to vector<9x4xbf16>
    %c1_665 = arith.constant 1 : index
    %c0_666 = arith.constant 0 : index
    %c0_667 = arith.constant 0 : index
    %641 = vector.load %arg4[%c1_665, %c0_666, %c0_667] : memref<16x4x8xbf16, #tpu.memory_space<vmem>>, vector<1x4x8xbf16>
    %642 = vector.shape_cast %641 : vector<1x4x8xbf16> to vector<4x8xbf16>
    %cst_668 = arith.constant dense<0.000000e+00> : vector<9x8xf32>
    %643 = tpu.matmul %640, %642, %cst_668 {dimension_numbers = #tpu.dot_dimension_numbers<[1], [0], [0], [1], [0, 0, 1, 1], [], []>} : vector<9x4xbf16>, vector<4x8xbf16>, vector<9x8xf32> -> vector<9x8xf32>
    %644 = arith.addf %635, %643 : vector<9x8xf32>
    %c4_i32_669 = arith.constant 4 : i32
    %645 = arith.addi %0, %c4_i32_669 : i32
    %c0_i32_670 = arith.constant 0 : i32
    %646 = arith.addi %645, %c0_i32_670 : i32
    %c0_671 = arith.constant 0 : index
    %c0_672 = arith.constant 0 : index
    %647 = arith.index_cast %646 : i32 to index
    %c1_673 = arith.constant 1 : index
    %c0_674 = arith.constant 0 : index
    %648 = vector.load %arg3[%c0_671, %c0_672, %647, %c1_673, %c0_674] : memref<1x4x10x10x4xbf16, #tpu.memory_space<vmem>>, vector<1x1x1x9x4xbf16>
    %649 = vector.shape_cast %648 : vector<1x1x1x9x4xbf16> to vector<9x4xbf16>
    %c2_675 = arith.constant 2 : index
    %c0_676 = arith.constant 0 : index
    %c0_677 = arith.constant 0 : index
    %650 = vector.load %arg4[%c2_675, %c0_676, %c0_677] : memref<16x4x8xbf16, #tpu.memory_space<vmem>>, vector<1x4x8xbf16>
    %651 = vector.shape_cast %650 : vector<1x4x8xbf16> to vector<4x8xbf16>
    %cst_678 = arith.constant dense<0.000000e+00> : vector<9x8xf32>
    %652 = tpu.matmul %649, %651, %cst_678 {dimension_numbers = #tpu.dot_dimension_numbers<[1], [0], [0], [1], [0, 0, 1, 1], [], []>} : vector<9x4xbf16>, vector<4x8xbf16>, vector<9x8xf32> -> vector<9x8xf32>
    %653 = arith.addf %644, %652 : vector<9x8xf32>
    %c4_i32_679 = arith.constant 4 : i32
    %654 = arith.addi %0, %c4_i32_679 : i32
    %c0_i32_680 = arith.constant 0 : i32
    %655 = arith.addi %654, %c0_i32_680 : i32
    %c0_681 = arith.constant 0 : index
    %c1_682 = arith.constant 1 : index
    %656 = arith.index_cast %655 : i32 to index
    %c1_683 = arith.constant 1 : index
    %c0_684 = arith.constant 0 : index
    %657 = vector.load %arg3[%c0_681, %c1_682, %656, %c1_683, %c0_684] : memref<1x4x10x10x4xbf16, #tpu.memory_space<vmem>>, vector<1x1x1x9x4xbf16>
    %658 = vector.shape_cast %657 : vector<1x1x1x9x4xbf16> to vector<9x4xbf16>
    %c3_685 = arith.constant 3 : index
    %c0_686 = arith.constant 0 : index
    %c0_687 = arith.constant 0 : index
    %659 = vector.load %arg4[%c3_685, %c0_686, %c0_687] : memref<16x4x8xbf16, #tpu.memory_space<vmem>>, vector<1x4x8xbf16>
    %660 = vector.shape_cast %659 : vector<1x4x8xbf16> to vector<4x8xbf16>
    %cst_688 = arith.constant dense<0.000000e+00> : vector<9x8xf32>
    %661 = tpu.matmul %658, %660, %cst_688 {dimension_numbers = #tpu.dot_dimension_numbers<[1], [0], [0], [1], [0, 0, 1, 1], [], []>} : vector<9x4xbf16>, vector<4x8xbf16>, vector<9x8xf32> -> vector<9x8xf32>
    %662 = arith.addf %653, %661 : vector<9x8xf32>
    %c4_i32_689 = arith.constant 4 : i32
    %663 = arith.addi %0, %c4_i32_689 : i32
    %c0_i32_690 = arith.constant 0 : i32
    %664 = arith.addi %663, %c0_i32_690 : i32
    %c0_691 = arith.constant 0 : index
    %c2_692 = arith.constant 2 : index
    %665 = arith.index_cast %664 : i32 to index
    %c0_693 = arith.constant 0 : index
    %c0_694 = arith.constant 0 : index
    %666 = vector.load %arg3[%c0_691, %c2_692, %665, %c0_693, %c0_694] : memref<1x4x10x10x4xbf16, #tpu.memory_space<vmem>>, vector<1x1x1x9x4xbf16>
    %667 = vector.shape_cast %666 : vector<1x1x1x9x4xbf16> to vector<9x4xbf16>
    %c4_695 = arith.constant 4 : index
    %c0_696 = arith.constant 0 : index
    %c0_697 = arith.constant 0 : index
    %668 = vector.load %arg4[%c4_695, %c0_696, %c0_697] : memref<16x4x8xbf16, #tpu.memory_space<vmem>>, vector<1x4x8xbf16>
    %669 = vector.shape_cast %668 : vector<1x4x8xbf16> to vector<4x8xbf16>
    %cst_698 = arith.constant dense<0.000000e+00> : vector<9x8xf32>
    %670 = tpu.matmul %667, %669, %cst_698 {dimension_numbers = #tpu.dot_dimension_numbers<[1], [0], [0], [1], [0, 0, 1, 1], [], []>} : vector<9x4xbf16>, vector<4x8xbf16>, vector<9x8xf32> -> vector<9x8xf32>
    %671 = arith.addf %662, %670 : vector<9x8xf32>
    %c4_i32_699 = arith.constant 4 : i32
    %672 = arith.addi %0, %c4_i32_699 : i32
    %c0_i32_700 = arith.constant 0 : i32
    %673 = arith.addi %672, %c0_i32_700 : i32
    %c0_701 = arith.constant 0 : index
    %c3_702 = arith.constant 3 : index
    %674 = arith.index_cast %673 : i32 to index
    %c0_703 = arith.constant 0 : index
    %c0_704 = arith.constant 0 : index
    %675 = vector.load %arg3[%c0_701, %c3_702, %674, %c0_703, %c0_704] : memref<1x4x10x10x4xbf16, #tpu.memory_space<vmem>>, vector<1x1x1x9x4xbf16>
    %676 = vector.shape_cast %675 : vector<1x1x1x9x4xbf16> to vector<9x4xbf16>
    %c5_705 = arith.constant 5 : index
    %c0_706 = arith.constant 0 : index
    %c0_707 = arith.constant 0 : index
    %677 = vector.load %arg4[%c5_705, %c0_706, %c0_707] : memref<16x4x8xbf16, #tpu.memory_space<vmem>>, vector<1x4x8xbf16>
    %678 = vector.shape_cast %677 : vector<1x4x8xbf16> to vector<4x8xbf16>
    %cst_708 = arith.constant dense<0.000000e+00> : vector<9x8xf32>
    %679 = tpu.matmul %676, %678, %cst_708 {dimension_numbers = #tpu.dot_dimension_numbers<[1], [0], [0], [1], [0, 0, 1, 1], [], []>} : vector<9x4xbf16>, vector<4x8xbf16>, vector<9x8xf32> -> vector<9x8xf32>
    %680 = arith.addf %671, %679 : vector<9x8xf32>
    %c4_i32_709 = arith.constant 4 : i32
    %681 = arith.addi %0, %c4_i32_709 : i32
    %c0_i32_710 = arith.constant 0 : i32
    %682 = arith.addi %681, %c0_i32_710 : i32
    %c0_711 = arith.constant 0 : index
    %c2_712 = arith.constant 2 : index
    %683 = arith.index_cast %682 : i32 to index
    %c1_713 = arith.constant 1 : index
    %c0_714 = arith.constant 0 : index
    %684 = vector.load %arg3[%c0_711, %c2_712, %683, %c1_713, %c0_714] : memref<1x4x10x10x4xbf16, #tpu.memory_space<vmem>>, vector<1x1x1x9x4xbf16>
    %685 = vector.shape_cast %684 : vector<1x1x1x9x4xbf16> to vector<9x4xbf16>
    %c6_715 = arith.constant 6 : index
    %c0_716 = arith.constant 0 : index
    %c0_717 = arith.constant 0 : index
    %686 = vector.load %arg4[%c6_715, %c0_716, %c0_717] : memref<16x4x8xbf16, #tpu.memory_space<vmem>>, vector<1x4x8xbf16>
    %687 = vector.shape_cast %686 : vector<1x4x8xbf16> to vector<4x8xbf16>
    %cst_718 = arith.constant dense<0.000000e+00> : vector<9x8xf32>
    %688 = tpu.matmul %685, %687, %cst_718 {dimension_numbers = #tpu.dot_dimension_numbers<[1], [0], [0], [1], [0, 0, 1, 1], [], []>} : vector<9x4xbf16>, vector<4x8xbf16>, vector<9x8xf32> -> vector<9x8xf32>
    %689 = arith.addf %680, %688 : vector<9x8xf32>
    %c4_i32_719 = arith.constant 4 : i32
    %690 = arith.addi %0, %c4_i32_719 : i32
    %c0_i32_720 = arith.constant 0 : i32
    %691 = arith.addi %690, %c0_i32_720 : i32
    %c0_721 = arith.constant 0 : index
    %c3_722 = arith.constant 3 : index
    %692 = arith.index_cast %691 : i32 to index
    %c1_723 = arith.constant 1 : index
    %c0_724 = arith.constant 0 : index
    %693 = vector.load %arg3[%c0_721, %c3_722, %692, %c1_723, %c0_724] : memref<1x4x10x10x4xbf16, #tpu.memory_space<vmem>>, vector<1x1x1x9x4xbf16>
    %694 = vector.shape_cast %693 : vector<1x1x1x9x4xbf16> to vector<9x4xbf16>
    %c7_725 = arith.constant 7 : index
    %c0_726 = arith.constant 0 : index
    %c0_727 = arith.constant 0 : index
    %695 = vector.load %arg4[%c7_725, %c0_726, %c0_727] : memref<16x4x8xbf16, #tpu.memory_space<vmem>>, vector<1x4x8xbf16>
    %696 = vector.shape_cast %695 : vector<1x4x8xbf16> to vector<4x8xbf16>
    %cst_728 = arith.constant dense<0.000000e+00> : vector<9x8xf32>
    %697 = tpu.matmul %694, %696, %cst_728 {dimension_numbers = #tpu.dot_dimension_numbers<[1], [0], [0], [1], [0, 0, 1, 1], [], []>} : vector<9x4xbf16>, vector<4x8xbf16>, vector<9x8xf32> -> vector<9x8xf32>
    %698 = arith.addf %689, %697 : vector<9x8xf32>
    %c4_i32_729 = arith.constant 4 : i32
    %699 = arith.addi %0, %c4_i32_729 : i32
    %c1_i32_730 = arith.constant 1 : i32
    %700 = arith.addi %699, %c1_i32_730 : i32
    %c0_731 = arith.constant 0 : index
    %c0_732 = arith.constant 0 : index
    %701 = arith.index_cast %700 : i32 to index
    %c0_733 = arith.constant 0 : index
    %c0_734 = arith.constant 0 : index
    %702 = vector.load %arg3[%c0_731, %c0_732, %701, %c0_733, %c0_734] : memref<1x4x10x10x4xbf16, #tpu.memory_space<vmem>>, vector<1x1x1x9x4xbf16>
    %703 = vector.shape_cast %702 : vector<1x1x1x9x4xbf16> to vector<9x4xbf16>
    %c8_735 = arith.constant 8 : index
    %c0_736 = arith.constant 0 : index
    %c0_737 = arith.constant 0 : index
    %704 = vector.load %arg4[%c8_735, %c0_736, %c0_737] : memref<16x4x8xbf16, #tpu.memory_space<vmem>>, vector<1x4x8xbf16>
    %705 = vector.shape_cast %704 : vector<1x4x8xbf16> to vector<4x8xbf16>
    %cst_738 = arith.constant dense<0.000000e+00> : vector<9x8xf32>
    %706 = tpu.matmul %703, %705, %cst_738 {dimension_numbers = #tpu.dot_dimension_numbers<[1], [0], [0], [1], [0, 0, 1, 1], [], []>} : vector<9x4xbf16>, vector<4x8xbf16>, vector<9x8xf32> -> vector<9x8xf32>
    %707 = arith.addf %698, %706 : vector<9x8xf32>
    %c4_i32_739 = arith.constant 4 : i32
    %708 = arith.addi %0, %c4_i32_739 : i32
    %c1_i32_740 = arith.constant 1 : i32
    %709 = arith.addi %708, %c1_i32_740 : i32
    %c0_741 = arith.constant 0 : index
    %c1_742 = arith.constant 1 : index
    %710 = arith.index_cast %709 : i32 to index
    %c0_743 = arith.constant 0 : index
    %c0_744 = arith.constant 0 : index
    %711 = vector.load %arg3[%c0_741, %c1_742, %710, %c0_743, %c0_744] : memref<1x4x10x10x4xbf16, #tpu.memory_space<vmem>>, vector<1x1x1x9x4xbf16>
    %712 = vector.shape_cast %711 : vector<1x1x1x9x4xbf16> to vector<9x4xbf16>
    %c9_745 = arith.constant 9 : index
    %c0_746 = arith.constant 0 : index
    %c0_747 = arith.constant 0 : index
    %713 = vector.load %arg4[%c9_745, %c0_746, %c0_747] : memref<16x4x8xbf16, #tpu.memory_space<vmem>>, vector<1x4x8xbf16>
    %714 = vector.shape_cast %713 : vector<1x4x8xbf16> to vector<4x8xbf16>
    %cst_748 = arith.constant dense<0.000000e+00> : vector<9x8xf32>
    %715 = tpu.matmul %712, %714, %cst_748 {dimension_numbers = #tpu.dot_dimension_numbers<[1], [0], [0], [1], [0, 0, 1, 1], [], []>} : vector<9x4xbf16>, vector<4x8xbf16>, vector<9x8xf32> -> vector<9x8xf32>
    %716 = arith.addf %707, %715 : vector<9x8xf32>
    %c4_i32_749 = arith.constant 4 : i32
    %717 = arith.addi %0, %c4_i32_749 : i32
    %c1_i32_750 = arith.constant 1 : i32
    %718 = arith.addi %717, %c1_i32_750 : i32
    %c0_751 = arith.constant 0 : index
    %c0_752 = arith.constant 0 : index
    %719 = arith.index_cast %718 : i32 to index
    %c1_753 = arith.constant 1 : index
    %c0_754 = arith.constant 0 : index
    %720 = vector.load %arg3[%c0_751, %c0_752, %719, %c1_753, %c0_754] : memref<1x4x10x10x4xbf16, #tpu.memory_space<vmem>>, vector<1x1x1x9x4xbf16>
    %721 = vector.shape_cast %720 : vector<1x1x1x9x4xbf16> to vector<9x4xbf16>
    %c10_755 = arith.constant 10 : index
    %c0_756 = arith.constant 0 : index
    %c0_757 = arith.constant 0 : index
    %722 = vector.load %arg4[%c10_755, %c0_756, %c0_757] : memref<16x4x8xbf16, #tpu.memory_space<vmem>>, vector<1x4x8xbf16>
    %723 = vector.shape_cast %722 : vector<1x4x8xbf16> to vector<4x8xbf16>
    %cst_758 = arith.constant dense<0.000000e+00> : vector<9x8xf32>
    %724 = tpu.matmul %721, %723, %cst_758 {dimension_numbers = #tpu.dot_dimension_numbers<[1], [0], [0], [1], [0, 0, 1, 1], [], []>} : vector<9x4xbf16>, vector<4x8xbf16>, vector<9x8xf32> -> vector<9x8xf32>
    %725 = arith.addf %716, %724 : vector<9x8xf32>
    %c4_i32_759 = arith.constant 4 : i32
    %726 = arith.addi %0, %c4_i32_759 : i32
    %c1_i32_760 = arith.constant 1 : i32
    %727 = arith.addi %726, %c1_i32_760 : i32
    %c0_761 = arith.constant 0 : index
    %c1_762 = arith.constant 1 : index
    %728 = arith.index_cast %727 : i32 to index
    %c1_763 = arith.constant 1 : index
    %c0_764 = arith.constant 0 : index
    %729 = vector.load %arg3[%c0_761, %c1_762, %728, %c1_763, %c0_764] : memref<1x4x10x10x4xbf16, #tpu.memory_space<vmem>>, vector<1x1x1x9x4xbf16>
    %730 = vector.shape_cast %729 : vector<1x1x1x9x4xbf16> to vector<9x4xbf16>
    %c11_765 = arith.constant 11 : index
    %c0_766 = arith.constant 0 : index
    %c0_767 = arith.constant 0 : index
    %731 = vector.load %arg4[%c11_765, %c0_766, %c0_767] : memref<16x4x8xbf16, #tpu.memory_space<vmem>>, vector<1x4x8xbf16>
    %732 = vector.shape_cast %731 : vector<1x4x8xbf16> to vector<4x8xbf16>
    %cst_768 = arith.constant dense<0.000000e+00> : vector<9x8xf32>
    %733 = tpu.matmul %730, %732, %cst_768 {dimension_numbers = #tpu.dot_dimension_numbers<[1], [0], [0], [1], [0, 0, 1, 1], [], []>} : vector<9x4xbf16>, vector<4x8xbf16>, vector<9x8xf32> -> vector<9x8xf32>
    %734 = arith.addf %725, %733 : vector<9x8xf32>
    %c4_i32_769 = arith.constant 4 : i32
    %735 = arith.addi %0, %c4_i32_769 : i32
    %c1_i32_770 = arith.constant 1 : i32
    %736 = arith.addi %735, %c1_i32_770 : i32
    %c0_771 = arith.constant 0 : index
    %c2_772 = arith.constant 2 : index
    %737 = arith.index_cast %736 : i32 to index
    %c0_773 = arith.constant 0 : index
    %c0_774 = arith.constant 0 : index
    %738 = vector.load %arg3[%c0_771, %c2_772, %737, %c0_773, %c0_774] : memref<1x4x10x10x4xbf16, #tpu.memory_space<vmem>>, vector<1x1x1x9x4xbf16>
    %739 = vector.shape_cast %738 : vector<1x1x1x9x4xbf16> to vector<9x4xbf16>
    %c12_775 = arith.constant 12 : index
    %c0_776 = arith.constant 0 : index
    %c0_777 = arith.constant 0 : index
    %740 = vector.load %arg4[%c12_775, %c0_776, %c0_777] : memref<16x4x8xbf16, #tpu.memory_space<vmem>>, vector<1x4x8xbf16>
    %741 = vector.shape_cast %740 : vector<1x4x8xbf16> to vector<4x8xbf16>
    %cst_778 = arith.constant dense<0.000000e+00> : vector<9x8xf32>
    %742 = tpu.matmul %739, %741, %cst_778 {dimension_numbers = #tpu.dot_dimension_numbers<[1], [0], [0], [1], [0, 0, 1, 1], [], []>} : vector<9x4xbf16>, vector<4x8xbf16>, vector<9x8xf32> -> vector<9x8xf32>
    %743 = arith.addf %734, %742 : vector<9x8xf32>
    %c4_i32_779 = arith.constant 4 : i32
    %744 = arith.addi %0, %c4_i32_779 : i32
    %c1_i32_780 = arith.constant 1 : i32
    %745 = arith.addi %744, %c1_i32_780 : i32
    %c0_781 = arith.constant 0 : index
    %c3_782 = arith.constant 3 : index
    %746 = arith.index_cast %745 : i32 to index
    %c0_783 = arith.constant 0 : index
    %c0_784 = arith.constant 0 : index
    %747 = vector.load %arg3[%c0_781, %c3_782, %746, %c0_783, %c0_784] : memref<1x4x10x10x4xbf16, #tpu.memory_space<vmem>>, vector<1x1x1x9x4xbf16>
    %748 = vector.shape_cast %747 : vector<1x1x1x9x4xbf16> to vector<9x4xbf16>
    %c13_785 = arith.constant 13 : index
    %c0_786 = arith.constant 0 : index
    %c0_787 = arith.constant 0 : index
    %749 = vector.load %arg4[%c13_785, %c0_786, %c0_787] : memref<16x4x8xbf16, #tpu.memory_space<vmem>>, vector<1x4x8xbf16>
    %750 = vector.shape_cast %749 : vector<1x4x8xbf16> to vector<4x8xbf16>
    %cst_788 = arith.constant dense<0.000000e+00> : vector<9x8xf32>
    %751 = tpu.matmul %748, %750, %cst_788 {dimension_numbers = #tpu.dot_dimension_numbers<[1], [0], [0], [1], [0, 0, 1, 1], [], []>} : vector<9x4xbf16>, vector<4x8xbf16>, vector<9x8xf32> -> vector<9x8xf32>
    %752 = arith.addf %743, %751 : vector<9x8xf32>
    %c4_i32_789 = arith.constant 4 : i32
    %753 = arith.addi %0, %c4_i32_789 : i32
    %c1_i32_790 = arith.constant 1 : i32
    %754 = arith.addi %753, %c1_i32_790 : i32
    %c0_791 = arith.constant 0 : index
    %c2_792 = arith.constant 2 : index
    %755 = arith.index_cast %754 : i32 to index
    %c1_793 = arith.constant 1 : index
    %c0_794 = arith.constant 0 : index
    %756 = vector.load %arg3[%c0_791, %c2_792, %755, %c1_793, %c0_794] : memref<1x4x10x10x4xbf16, #tpu.memory_space<vmem>>, vector<1x1x1x9x4xbf16>
    %757 = vector.shape_cast %756 : vector<1x1x1x9x4xbf16> to vector<9x4xbf16>
    %c14_795 = arith.constant 14 : index
    %c0_796 = arith.constant 0 : index
    %c0_797 = arith.constant 0 : index
    %758 = vector.load %arg4[%c14_795, %c0_796, %c0_797] : memref<16x4x8xbf16, #tpu.memory_space<vmem>>, vector<1x4x8xbf16>
    %759 = vector.shape_cast %758 : vector<1x4x8xbf16> to vector<4x8xbf16>
    %cst_798 = arith.constant dense<0.000000e+00> : vector<9x8xf32>
    %760 = tpu.matmul %757, %759, %cst_798 {dimension_numbers = #tpu.dot_dimension_numbers<[1], [0], [0], [1], [0, 0, 1, 1], [], []>} : vector<9x4xbf16>, vector<4x8xbf16>, vector<9x8xf32> -> vector<9x8xf32>
    %761 = arith.addf %752, %760 : vector<9x8xf32>
    %c4_i32_799 = arith.constant 4 : i32
    %762 = arith.addi %0, %c4_i32_799 : i32
    %c1_i32_800 = arith.constant 1 : i32
    %763 = arith.addi %762, %c1_i32_800 : i32
    %c0_801 = arith.constant 0 : index
    %c3_802 = arith.constant 3 : index
    %764 = arith.index_cast %763 : i32 to index
    %c1_803 = arith.constant 1 : index
    %c0_804 = arith.constant 0 : index
    %765 = vector.load %arg3[%c0_801, %c3_802, %764, %c1_803, %c0_804] : memref<1x4x10x10x4xbf16, #tpu.memory_space<vmem>>, vector<1x1x1x9x4xbf16>
    %766 = vector.shape_cast %765 : vector<1x1x1x9x4xbf16> to vector<9x4xbf16>
    %c15_805 = arith.constant 15 : index
    %c0_806 = arith.constant 0 : index
    %c0_807 = arith.constant 0 : index
    %767 = vector.load %arg4[%c15_805, %c0_806, %c0_807] : memref<16x4x8xbf16, #tpu.memory_space<vmem>>, vector<1x4x8xbf16>
    %768 = vector.shape_cast %767 : vector<1x4x8xbf16> to vector<4x8xbf16>
    %cst_808 = arith.constant dense<0.000000e+00> : vector<9x8xf32>
    %769 = tpu.matmul %766, %768, %cst_808 {dimension_numbers = #tpu.dot_dimension_numbers<[1], [0], [0], [1], [0, 0, 1, 1], [], []>} : vector<9x4xbf16>, vector<4x8xbf16>, vector<9x8xf32> -> vector<9x8xf32>
    %770 = arith.addf %761, %769 : vector<9x8xf32>
    %771 = vector.broadcast %1 : vector<1x8xf32> to vector<9x8xf32>
    %772 = arith.addf %770, %771 : vector<9x8xf32>
    %cst_809 = arith.constant 0.000000e+00 : f32
    %773 = vector.broadcast %cst_809 : f32 to vector<9x8xf32>
    %774 = arith.cmpf oge, %772, %773 : vector<9x8xf32>
    %cst_810 = arith.constant 2.000000e-01 : f32
    %775 = vector.broadcast %cst_810 : f32 to vector<9x8xf32>
    %776 = arith.mulf %775, %772 : vector<9x8xf32>
    %777 = arith.select %774, %772, %776 : vector<9x8xi1>, vector<9x8xf32>
    %778 = arith.truncf %777 : vector<9x8xf32> to vector<9x8xbf16>
    %c0_811 = arith.constant 0 : index
    %c4_812 = arith.constant 4 : index
    %c0_813 = arith.constant 0 : index
    %c0_814 = arith.constant 0 : index
    %779 = vector.load %arg6[%c0_811, %c4_812, %c0_813, %c0_814] : memref<1x9x9x8xbf16, #tpu.memory_space<vmem>>, vector<1x1x9x8xbf16>
    %780 = vector.shape_cast %779 : vector<1x1x9x8xbf16> to vector<9x8xbf16>
    %781 = vector.shape_cast %778 : vector<9x8xbf16> to vector<1x1x9x8xbf16>
    tpu.vector_store %arg6[%c0_811, %c4_812, %c0_813, %c0_814], %781 {strides = array<i32>} : memref<1x9x9x8xbf16, #tpu.memory_space<vmem>>, vector<1x1x9x8xbf16>,
    %cst_815 = arith.constant 0.000000e+00 : f32
    %782 = vector.broadcast %cst_815 : f32 to vector<9x8xf32>
    %c5_i32 = arith.constant 5 : i32
    %783 = arith.addi %0, %c5_i32 : i32
    %c0_i32_816 = arith.constant 0 : i32
    %784 = arith.addi %783, %c0_i32_816 : i32
    %c0_817 = arith.constant 0 : index
    %c0_818 = arith.constant 0 : index
    %785 = arith.index_cast %784 : i32 to index
    %c0_819 = arith.constant 0 : index
    %c0_820 = arith.constant 0 : index
    %786 = vector.load %arg3[%c0_817, %c0_818, %785, %c0_819, %c0_820] : memref<1x4x10x10x4xbf16, #tpu.memory_space<vmem>>, vector<1x1x1x9x4xbf16>
    %787 = vector.shape_cast %786 : vector<1x1x1x9x4xbf16> to vector<9x4xbf16>
    %c0_821 = arith.constant 0 : index
    %c0_822 = arith.constant 0 : index
    %c0_823 = arith.constant 0 : index
    %788 = vector.load %arg4[%c0_821, %c0_822, %c0_823] : memref<16x4x8xbf16, #tpu.memory_space<vmem>>, vector<1x4x8xbf16>
    %789 = vector.shape_cast %788 : vector<1x4x8xbf16> to vector<4x8xbf16>
    %cst_824 = arith.constant dense<0.000000e+00> : vector<9x8xf32>
    %790 = tpu.matmul %787, %789, %cst_824 {dimension_numbers = #tpu.dot_dimension_numbers<[1], [0], [0], [1], [0, 0, 1, 1], [], []>} : vector<9x4xbf16>, vector<4x8xbf16>, vector<9x8xf32> -> vector<9x8xf32>
    %791 = arith.addf %782, %790 : vector<9x8xf32>
    %c5_i32_825 = arith.constant 5 : i32
    %792 = arith.addi %0, %c5_i32_825 : i32
    %c0_i32_826 = arith.constant 0 : i32
    %793 = arith.addi %792, %c0_i32_826 : i32
    %c0_827 = arith.constant 0 : index
    %c1_828 = arith.constant 1 : index
    %794 = arith.index_cast %793 : i32 to index
    %c0_829 = arith.constant 0 : index
    %c0_830 = arith.constant 0 : index
    %795 = vector.load %arg3[%c0_827, %c1_828, %794, %c0_829, %c0_830] : memref<1x4x10x10x4xbf16, #tpu.memory_space<vmem>>, vector<1x1x1x9x4xbf16>
    %796 = vector.shape_cast %795 : vector<1x1x1x9x4xbf16> to vector<9x4xbf16>
    %c1_831 = arith.constant 1 : index
    %c0_832 = arith.constant 0 : index
    %c0_833 = arith.constant 0 : index
    %797 = vector.load %arg4[%c1_831, %c0_832, %c0_833] : memref<16x4x8xbf16, #tpu.memory_space<vmem>>, vector<1x4x8xbf16>
    %798 = vector.shape_cast %797 : vector<1x4x8xbf16> to vector<4x8xbf16>
    %cst_834 = arith.constant dense<0.000000e+00> : vector<9x8xf32>
    %799 = tpu.matmul %796, %798, %cst_834 {dimension_numbers = #tpu.dot_dimension_numbers<[1], [0], [0], [1], [0, 0, 1, 1], [], []>} : vector<9x4xbf16>, vector<4x8xbf16>, vector<9x8xf32> -> vector<9x8xf32>
    %800 = arith.addf %791, %799 : vector<9x8xf32>
    %c5_i32_835 = arith.constant 5 : i32
    %801 = arith.addi %0, %c5_i32_835 : i32
    %c0_i32_836 = arith.constant 0 : i32
    %802 = arith.addi %801, %c0_i32_836 : i32
    %c0_837 = arith.constant 0 : index
    %c0_838 = arith.constant 0 : index
    %803 = arith.index_cast %802 : i32 to index
    %c1_839 = arith.constant 1 : index
    %c0_840 = arith.constant 0 : index
    %804 = vector.load %arg3[%c0_837, %c0_838, %803, %c1_839, %c0_840] : memref<1x4x10x10x4xbf16, #tpu.memory_space<vmem>>, vector<1x1x1x9x4xbf16>
    %805 = vector.shape_cast %804 : vector<1x1x1x9x4xbf16> to vector<9x4xbf16>
    %c2_841 = arith.constant 2 : index
    %c0_842 = arith.constant 0 : index
    %c0_843 = arith.constant 0 : index
    %806 = vector.load %arg4[%c2_841, %c0_842, %c0_843] : memref<16x4x8xbf16, #tpu.memory_space<vmem>>, vector<1x4x8xbf16>
    %807 = vector.shape_cast %806 : vector<1x4x8xbf16> to vector<4x8xbf16>
    %cst_844 = arith.constant dense<0.000000e+00> : vector<9x8xf32>
    %808 = tpu.matmul %805, %807, %cst_844 {dimension_numbers = #tpu.dot_dimension_numbers<[1], [0], [0], [1], [0, 0, 1, 1], [], []>} : vector<9x4xbf16>, vector<4x8xbf16>, vector<9x8xf32> -> vector<9x8xf32>
    %809 = arith.addf %800, %808 : vector<9x8xf32>
    %c5_i32_845 = arith.constant 5 : i32
    %810 = arith.addi %0, %c5_i32_845 : i32
    %c0_i32_846 = arith.constant 0 : i32
    %811 = arith.addi %810, %c0_i32_846 : i32
    %c0_847 = arith.constant 0 : index
    %c1_848 = arith.constant 1 : index
    %812 = arith.index_cast %811 : i32 to index
    %c1_849 = arith.constant 1 : index
    %c0_850 = arith.constant 0 : index
    %813 = vector.load %arg3[%c0_847, %c1_848, %812, %c1_849, %c0_850] : memref<1x4x10x10x4xbf16, #tpu.memory_space<vmem>>, vector<1x1x1x9x4xbf16>
    %814 = vector.shape_cast %813 : vector<1x1x1x9x4xbf16> to vector<9x4xbf16>
    %c3_851 = arith.constant 3 : index
    %c0_852 = arith.constant 0 : index
    %c0_853 = arith.constant 0 : index
    %815 = vector.load %arg4[%c3_851, %c0_852, %c0_853] : memref<16x4x8xbf16, #tpu.memory_space<vmem>>, vector<1x4x8xbf16>
    %816 = vector.shape_cast %815 : vector<1x4x8xbf16> to vector<4x8xbf16>
    %cst_854 = arith.constant dense<0.000000e+00> : vector<9x8xf32>
    %817 = tpu.matmul %814, %816, %cst_854 {dimension_numbers = #tpu.dot_dimension_numbers<[1], [0], [0], [1], [0, 0, 1, 1], [], []>} : vector<9x4xbf16>, vector<4x8xbf16>, vector<9x8xf32> -> vector<9x8xf32>
    %818 = arith.addf %809, %817 : vector<9x8xf32>
    %c5_i32_855 = arith.constant 5 : i32
    %819 = arith.addi %0, %c5_i32_855 : i32
    %c0_i32_856 = arith.constant 0 : i32
    %820 = arith.addi %819, %c0_i32_856 : i32
    %c0_857 = arith.constant 0 : index
    %c2_858 = arith.constant 2 : index
    %821 = arith.index_cast %820 : i32 to index
    %c0_859 = arith.constant 0 : index
    %c0_860 = arith.constant 0 : index
    %822 = vector.load %arg3[%c0_857, %c2_858, %821, %c0_859, %c0_860] : memref<1x4x10x10x4xbf16, #tpu.memory_space<vmem>>, vector<1x1x1x9x4xbf16>
    %823 = vector.shape_cast %822 : vector<1x1x1x9x4xbf16> to vector<9x4xbf16>
    %c4_861 = arith.constant 4 : index
    %c0_862 = arith.constant 0 : index
    %c0_863 = arith.constant 0 : index
    %824 = vector.load %arg4[%c4_861, %c0_862, %c0_863] : memref<16x4x8xbf16, #tpu.memory_space<vmem>>, vector<1x4x8xbf16>
    %825 = vector.shape_cast %824 : vector<1x4x8xbf16> to vector<4x8xbf16>
    %cst_864 = arith.constant dense<0.000000e+00> : vector<9x8xf32>
    %826 = tpu.matmul %823, %825, %cst_864 {dimension_numbers = #tpu.dot_dimension_numbers<[1], [0], [0], [1], [0, 0, 1, 1], [], []>} : vector<9x4xbf16>, vector<4x8xbf16>, vector<9x8xf32> -> vector<9x8xf32>
    %827 = arith.addf %818, %826 : vector<9x8xf32>
    %c5_i32_865 = arith.constant 5 : i32
    %828 = arith.addi %0, %c5_i32_865 : i32
    %c0_i32_866 = arith.constant 0 : i32
    %829 = arith.addi %828, %c0_i32_866 : i32
    %c0_867 = arith.constant 0 : index
    %c3_868 = arith.constant 3 : index
    %830 = arith.index_cast %829 : i32 to index
    %c0_869 = arith.constant 0 : index
    %c0_870 = arith.constant 0 : index
    %831 = vector.load %arg3[%c0_867, %c3_868, %830, %c0_869, %c0_870] : memref<1x4x10x10x4xbf16, #tpu.memory_space<vmem>>, vector<1x1x1x9x4xbf16>
    %832 = vector.shape_cast %831 : vector<1x1x1x9x4xbf16> to vector<9x4xbf16>
    %c5_871 = arith.constant 5 : index
    %c0_872 = arith.constant 0 : index
    %c0_873 = arith.constant 0 : index
    %833 = vector.load %arg4[%c5_871, %c0_872, %c0_873] : memref<16x4x8xbf16, #tpu.memory_space<vmem>>, vector<1x4x8xbf16>
    %834 = vector.shape_cast %833 : vector<1x4x8xbf16> to vector<4x8xbf16>
    %cst_874 = arith.constant dense<0.000000e+00> : vector<9x8xf32>
    %835 = tpu.matmul %832, %834, %cst_874 {dimension_numbers = #tpu.dot_dimension_numbers<[1], [0], [0], [1], [0, 0, 1, 1], [], []>} : vector<9x4xbf16>, vector<4x8xbf16>, vector<9x8xf32> -> vector<9x8xf32>
    %836 = arith.addf %827, %835 : vector<9x8xf32>
    %c5_i32_875 = arith.constant 5 : i32
    %837 = arith.addi %0, %c5_i32_875 : i32
    %c0_i32_876 = arith.constant 0 : i32
    %838 = arith.addi %837, %c0_i32_876 : i32
    %c0_877 = arith.constant 0 : index
    %c2_878 = arith.constant 2 : index
    %839 = arith.index_cast %838 : i32 to index
    %c1_879 = arith.constant 1 : index
    %c0_880 = arith.constant 0 : index
    %840 = vector.load %arg3[%c0_877, %c2_878, %839, %c1_879, %c0_880] : memref<1x4x10x10x4xbf16, #tpu.memory_space<vmem>>, vector<1x1x1x9x4xbf16>
    %841 = vector.shape_cast %840 : vector<1x1x1x9x4xbf16> to vector<9x4xbf16>
    %c6_881 = arith.constant 6 : index
    %c0_882 = arith.constant 0 : index
    %c0_883 = arith.constant 0 : index
    %842 = vector.load %arg4[%c6_881, %c0_882, %c0_883] : memref<16x4x8xbf16, #tpu.memory_space<vmem>>, vector<1x4x8xbf16>
    %843 = vector.shape_cast %842 : vector<1x4x8xbf16> to vector<4x8xbf16>
    %cst_884 = arith.constant dense<0.000000e+00> : vector<9x8xf32>
    %844 = tpu.matmul %841, %843, %cst_884 {dimension_numbers = #tpu.dot_dimension_numbers<[1], [0], [0], [1], [0, 0, 1, 1], [], []>} : vector<9x4xbf16>, vector<4x8xbf16>, vector<9x8xf32> -> vector<9x8xf32>
    %845 = arith.addf %836, %844 : vector<9x8xf32>
    %c5_i32_885 = arith.constant 5 : i32
    %846 = arith.addi %0, %c5_i32_885 : i32
    %c0_i32_886 = arith.constant 0 : i32
    %847 = arith.addi %846, %c0_i32_886 : i32
    %c0_887 = arith.constant 0 : index
    %c3_888 = arith.constant 3 : index
    %848 = arith.index_cast %847 : i32 to index
    %c1_889 = arith.constant 1 : index
    %c0_890 = arith.constant 0 : index
    %849 = vector.load %arg3[%c0_887, %c3_888, %848, %c1_889, %c0_890] : memref<1x4x10x10x4xbf16, #tpu.memory_space<vmem>>, vector<1x1x1x9x4xbf16>
    %850 = vector.shape_cast %849 : vector<1x1x1x9x4xbf16> to vector<9x4xbf16>
    %c7_891 = arith.constant 7 : index
    %c0_892 = arith.constant 0 : index
    %c0_893 = arith.constant 0 : index
    %851 = vector.load %arg4[%c7_891, %c0_892, %c0_893] : memref<16x4x8xbf16, #tpu.memory_space<vmem>>, vector<1x4x8xbf16>
    %852 = vector.shape_cast %851 : vector<1x4x8xbf16> to vector<4x8xbf16>
    %cst_894 = arith.constant dense<0.000000e+00> : vector<9x8xf32>
    %853 = tpu.matmul %850, %852, %cst_894 {dimension_numbers = #tpu.dot_dimension_numbers<[1], [0], [0], [1], [0, 0, 1, 1], [], []>} : vector<9x4xbf16>, vector<4x8xbf16>, vector<9x8xf32> -> vector<9x8xf32>
    %854 = arith.addf %845, %853 : vector<9x8xf32>
    %c5_i32_895 = arith.constant 5 : i32
    %855 = arith.addi %0, %c5_i32_895 : i32
    %c1_i32_896 = arith.constant 1 : i32
    %856 = arith.addi %855, %c1_i32_896 : i32
    %c0_897 = arith.constant 0 : index
    %c0_898 = arith.constant 0 : index
    %857 = arith.index_cast %856 : i32 to index
    %c0_899 = arith.constant 0 : index
    %c0_900 = arith.constant 0 : index
    %858 = vector.load %arg3[%c0_897, %c0_898, %857, %c0_899, %c0_900] : memref<1x4x10x10x4xbf16, #tpu.memory_space<vmem>>, vector<1x1x1x9x4xbf16>
    %859 = vector.shape_cast %858 : vector<1x1x1x9x4xbf16> to vector<9x4xbf16>
    %c8_901 = arith.constant 8 : index
    %c0_902 = arith.constant 0 : index
    %c0_903 = arith.constant 0 : index
    %860 = vector.load %arg4[%c8_901, %c0_902, %c0_903] : memref<16x4x8xbf16, #tpu.memory_space<vmem>>, vector<1x4x8xbf16>
    %861 = vector.shape_cast %860 : vector<1x4x8xbf16> to vector<4x8xbf16>
    %cst_904 = arith.constant dense<0.000000e+00> : vector<9x8xf32>
    %862 = tpu.matmul %859, %861, %cst_904 {dimension_numbers = #tpu.dot_dimension_numbers<[1], [0], [0], [1], [0, 0, 1, 1], [], []>} : vector<9x4xbf16>, vector<4x8xbf16>, vector<9x8xf32> -> vector<9x8xf32>
    %863 = arith.addf %854, %862 : vector<9x8xf32>
    %c5_i32_905 = arith.constant 5 : i32
    %864 = arith.addi %0, %c5_i32_905 : i32
    %c1_i32_906 = arith.constant 1 : i32
    %865 = arith.addi %864, %c1_i32_906 : i32
    %c0_907 = arith.constant 0 : index
    %c1_908 = arith.constant 1 : index
    %866 = arith.index_cast %865 : i32 to index
    %c0_909 = arith.constant 0 : index
    %c0_910 = arith.constant 0 : index
    %867 = vector.load %arg3[%c0_907, %c1_908, %866, %c0_909, %c0_910] : memref<1x4x10x10x4xbf16, #tpu.memory_space<vmem>>, vector<1x1x1x9x4xbf16>
    %868 = vector.shape_cast %867 : vector<1x1x1x9x4xbf16> to vector<9x4xbf16>
    %c9_911 = arith.constant 9 : index
    %c0_912 = arith.constant 0 : index
    %c0_913 = arith.constant 0 : index
    %869 = vector.load %arg4[%c9_911, %c0_912, %c0_913] : memref<16x4x8xbf16, #tpu.memory_space<vmem>>, vector<1x4x8xbf16>
    %870 = vector.shape_cast %869 : vector<1x4x8xbf16> to vector<4x8xbf16>
    %cst_914 = arith.constant dense<0.000000e+00> : vector<9x8xf32>
    %871 = tpu.matmul %868, %870, %cst_914 {dimension_numbers = #tpu.dot_dimension_numbers<[1], [0], [0], [1], [0, 0, 1, 1], [], []>} : vector<9x4xbf16>, vector<4x8xbf16>, vector<9x8xf32> -> vector<9x8xf32>
    %872 = arith.addf %863, %871 : vector<9x8xf32>
    %c5_i32_915 = arith.constant 5 : i32
    %873 = arith.addi %0, %c5_i32_915 : i32
    %c1_i32_916 = arith.constant 1 : i32
    %874 = arith.addi %873, %c1_i32_916 : i32
    %c0_917 = arith.constant 0 : index
    %c0_918 = arith.constant 0 : index
    %875 = arith.index_cast %874 : i32 to index
    %c1_919 = arith.constant 1 : index
    %c0_920 = arith.constant 0 : index
    %876 = vector.load %arg3[%c0_917, %c0_918, %875, %c1_919, %c0_920] : memref<1x4x10x10x4xbf16, #tpu.memory_space<vmem>>, vector<1x1x1x9x4xbf16>
    %877 = vector.shape_cast %876 : vector<1x1x1x9x4xbf16> to vector<9x4xbf16>
    %c10_921 = arith.constant 10 : index
    %c0_922 = arith.constant 0 : index
    %c0_923 = arith.constant 0 : index
    %878 = vector.load %arg4[%c10_921, %c0_922, %c0_923] : memref<16x4x8xbf16, #tpu.memory_space<vmem>>, vector<1x4x8xbf16>
    %879 = vector.shape_cast %878 : vector<1x4x8xbf16> to vector<4x8xbf16>
    %cst_924 = arith.constant dense<0.000000e+00> : vector<9x8xf32>
    %880 = tpu.matmul %877, %879, %cst_924 {dimension_numbers = #tpu.dot_dimension_numbers<[1], [0], [0], [1], [0, 0, 1, 1], [], []>} : vector<9x4xbf16>, vector<4x8xbf16>, vector<9x8xf32> -> vector<9x8xf32>
    %881 = arith.addf %872, %880 : vector<9x8xf32>
    %c5_i32_925 = arith.constant 5 : i32
    %882 = arith.addi %0, %c5_i32_925 : i32
    %c1_i32_926 = arith.constant 1 : i32
    %883 = arith.addi %882, %c1_i32_926 : i32
    %c0_927 = arith.constant 0 : index
    %c1_928 = arith.constant 1 : index
    %884 = arith.index_cast %883 : i32 to index
    %c1_929 = arith.constant 1 : index
    %c0_930 = arith.constant 0 : index
    %885 = vector.load %arg3[%c0_927, %c1_928, %884, %c1_929, %c0_930] : memref<1x4x10x10x4xbf16, #tpu.memory_space<vmem>>, vector<1x1x1x9x4xbf16>
    %886 = vector.shape_cast %885 : vector<1x1x1x9x4xbf16> to vector<9x4xbf16>
    %c11_931 = arith.constant 11 : index
    %c0_932 = arith.constant 0 : index
    %c0_933 = arith.constant 0 : index
    %887 = vector.load %arg4[%c11_931, %c0_932, %c0_933] : memref<16x4x8xbf16, #tpu.memory_space<vmem>>, vector<1x4x8xbf16>
    %888 = vector.shape_cast %887 : vector<1x4x8xbf16> to vector<4x8xbf16>
    %cst_934 = arith.constant dense<0.000000e+00> : vector<9x8xf32>
    %889 = tpu.matmul %886, %888, %cst_934 {dimension_numbers = #tpu.dot_dimension_numbers<[1], [0], [0], [1], [0, 0, 1, 1], [], []>} : vector<9x4xbf16>, vector<4x8xbf16>, vector<9x8xf32> -> vector<9x8xf32>
    %890 = arith.addf %881, %889 : vector<9x8xf32>
    %c5_i32_935 = arith.constant 5 : i32
    %891 = arith.addi %0, %c5_i32_935 : i32
    %c1_i32_936 = arith.constant 1 : i32
    %892 = arith.addi %891, %c1_i32_936 : i32
    %c0_937 = arith.constant 0 : index
    %c2_938 = arith.constant 2 : index
    %893 = arith.index_cast %892 : i32 to index
    %c0_939 = arith.constant 0 : index
    %c0_940 = arith.constant 0 : index
    %894 = vector.load %arg3[%c0_937, %c2_938, %893, %c0_939, %c0_940] : memref<1x4x10x10x4xbf16, #tpu.memory_space<vmem>>, vector<1x1x1x9x4xbf16>
    %895 = vector.shape_cast %894 : vector<1x1x1x9x4xbf16> to vector<9x4xbf16>
    %c12_941 = arith.constant 12 : index
    %c0_942 = arith.constant 0 : index
    %c0_943 = arith.constant 0 : index
    %896 = vector.load %arg4[%c12_941, %c0_942, %c0_943] : memref<16x4x8xbf16, #tpu.memory_space<vmem>>, vector<1x4x8xbf16>
    %897 = vector.shape_cast %896 : vector<1x4x8xbf16> to vector<4x8xbf16>
    %cst_944 = arith.constant dense<0.000000e+00> : vector<9x8xf32>
    %898 = tpu.matmul %895, %897, %cst_944 {dimension_numbers = #tpu.dot_dimension_numbers<[1], [0], [0], [1], [0, 0, 1, 1], [], []>} : vector<9x4xbf16>, vector<4x8xbf16>, vector<9x8xf32> -> vector<9x8xf32>
    %899 = arith.addf %890, %898 : vector<9x8xf32>
    %c5_i32_945 = arith.constant 5 : i32
    %900 = arith.addi %0, %c5_i32_945 : i32
    %c1_i32_946 = arith.constant 1 : i32
    %901 = arith.addi %900, %c1_i32_946 : i32
    %c0_947 = arith.constant 0 : index
    %c3_948 = arith.constant 3 : index
    %902 = arith.index_cast %901 : i32 to index
    %c0_949 = arith.constant 0 : index
    %c0_950 = arith.constant 0 : index
    %903 = vector.load %arg3[%c0_947, %c3_948, %902, %c0_949, %c0_950] : memref<1x4x10x10x4xbf16, #tpu.memory_space<vmem>>, vector<1x1x1x9x4xbf16>
    %904 = vector.shape_cast %903 : vector<1x1x1x9x4xbf16> to vector<9x4xbf16>
    %c13_951 = arith.constant 13 : index
    %c0_952 = arith.constant 0 : index
    %c0_953 = arith.constant 0 : index
    %905 = vector.load %arg4[%c13_951, %c0_952, %c0_953] : memref<16x4x8xbf16, #tpu.memory_space<vmem>>, vector<1x4x8xbf16>
    %906 = vector.shape_cast %905 : vector<1x4x8xbf16> to vector<4x8xbf16>
    %cst_954 = arith.constant dense<0.000000e+00> : vector<9x8xf32>
    %907 = tpu.matmul %904, %906, %cst_954 {dimension_numbers = #tpu.dot_dimension_numbers<[1], [0], [0], [1], [0, 0, 1, 1], [], []>} : vector<9x4xbf16>, vector<4x8xbf16>, vector<9x8xf32> -> vector<9x8xf32>
    %908 = arith.addf %899, %907 : vector<9x8xf32>
    %c5_i32_955 = arith.constant 5 : i32
    %909 = arith.addi %0, %c5_i32_955 : i32
    %c1_i32_956 = arith.constant 1 : i32
    %910 = arith.addi %909, %c1_i32_956 : i32
    %c0_957 = arith.constant 0 : index
    %c2_958 = arith.constant 2 : index
    %911 = arith.index_cast %910 : i32 to index
    %c1_959 = arith.constant 1 : index
    %c0_960 = arith.constant 0 : index
    %912 = vector.load %arg3[%c0_957, %c2_958, %911, %c1_959, %c0_960] : memref<1x4x10x10x4xbf16, #tpu.memory_space<vmem>>, vector<1x1x1x9x4xbf16>
    %913 = vector.shape_cast %912 : vector<1x1x1x9x4xbf16> to vector<9x4xbf16>
    %c14_961 = arith.constant 14 : index
    %c0_962 = arith.constant 0 : index
    %c0_963 = arith.constant 0 : index
    %914 = vector.load %arg4[%c14_961, %c0_962, %c0_963] : memref<16x4x8xbf16, #tpu.memory_space<vmem>>, vector<1x4x8xbf16>
    %915 = vector.shape_cast %914 : vector<1x4x8xbf16> to vector<4x8xbf16>
    %cst_964 = arith.constant dense<0.000000e+00> : vector<9x8xf32>
    %916 = tpu.matmul %913, %915, %cst_964 {dimension_numbers = #tpu.dot_dimension_numbers<[1], [0], [0], [1], [0, 0, 1, 1], [], []>} : vector<9x4xbf16>, vector<4x8xbf16>, vector<9x8xf32> -> vector<9x8xf32>
    %917 = arith.addf %908, %916 : vector<9x8xf32>
    %c5_i32_965 = arith.constant 5 : i32
    %918 = arith.addi %0, %c5_i32_965 : i32
    %c1_i32_966 = arith.constant 1 : i32
    %919 = arith.addi %918, %c1_i32_966 : i32
    %c0_967 = arith.constant 0 : index
    %c3_968 = arith.constant 3 : index
    %920 = arith.index_cast %919 : i32 to index
    %c1_969 = arith.constant 1 : index
    %c0_970 = arith.constant 0 : index
    %921 = vector.load %arg3[%c0_967, %c3_968, %920, %c1_969, %c0_970] : memref<1x4x10x10x4xbf16, #tpu.memory_space<vmem>>, vector<1x1x1x9x4xbf16>
    %922 = vector.shape_cast %921 : vector<1x1x1x9x4xbf16> to vector<9x4xbf16>
    %c15_971 = arith.constant 15 : index
    %c0_972 = arith.constant 0 : index
    %c0_973 = arith.constant 0 : index
    %923 = vector.load %arg4[%c15_971, %c0_972, %c0_973] : memref<16x4x8xbf16, #tpu.memory_space<vmem>>, vector<1x4x8xbf16>
    %924 = vector.shape_cast %923 : vector<1x4x8xbf16> to vector<4x8xbf16>
    %cst_974 = arith.constant dense<0.000000e+00> : vector<9x8xf32>
    %925 = tpu.matmul %922, %924, %cst_974 {dimension_numbers = #tpu.dot_dimension_numbers<[1], [0], [0], [1], [0, 0, 1, 1], [], []>} : vector<9x4xbf16>, vector<4x8xbf16>, vector<9x8xf32> -> vector<9x8xf32>
    %926 = arith.addf %917, %925 : vector<9x8xf32>
    %927 = vector.broadcast %1 : vector<1x8xf32> to vector<9x8xf32>
    %928 = arith.addf %926, %927 : vector<9x8xf32>
    %cst_975 = arith.constant 0.000000e+00 : f32
    %929 = vector.broadcast %cst_975 : f32 to vector<9x8xf32>
    %930 = arith.cmpf oge, %928, %929 : vector<9x8xf32>
    %cst_976 = arith.constant 2.000000e-01 : f32
    %931 = vector.broadcast %cst_976 : f32 to vector<9x8xf32>
    %932 = arith.mulf %931, %928 : vector<9x8xf32>
    %933 = arith.select %930, %928, %932 : vector<9x8xi1>, vector<9x8xf32>
    %934 = arith.truncf %933 : vector<9x8xf32> to vector<9x8xbf16>
    %c0_977 = arith.constant 0 : index
    %c5_978 = arith.constant 5 : index
    %c0_979 = arith.constant 0 : index
    %c0_980 = arith.constant 0 : index
    %935 = vector.load %arg6[%c0_977, %c5_978, %c0_979, %c0_980] : memref<1x9x9x8xbf16, #tpu.memory_space<vmem>>, vector<1x1x9x8xbf16>
    %936 = vector.shape_cast %935 : vector<1x1x9x8xbf16> to vector<9x8xbf16>
    %937 = vector.shape_cast %934 : vector<9x8xbf16> to vector<1x1x9x8xbf16>
    tpu.vector_store %arg6[%c0_977, %c5_978, %c0_979, %c0_980], %937 {strides = array<i32>} : memref<1x9x9x8xbf16, #tpu.memory_space<vmem>>, vector<1x1x9x8xbf16>,
    %cst_981 = arith.constant 0.000000e+00 : f32
    %938 = vector.broadcast %cst_981 : f32 to vector<9x8xf32>
    %c6_i32 = arith.constant 6 : i32
    %939 = arith.addi %0, %c6_i32 : i32
    %c0_i32_982 = arith.constant 0 : i32
    %940 = arith.addi %939, %c0_i32_982 : i32
    %c0_983 = arith.constant 0 : index
    %c0_984 = arith.constant 0 : index
    %941 = arith.index_cast %940 : i32 to index
    %c0_985 = arith.constant 0 : index
    %c0_986 = arith.constant 0 : index
    %942 = vector.load %arg3[%c0_983, %c0_984, %941, %c0_985, %c0_986] : memref<1x4x10x10x4xbf16, #tpu.memory_space<vmem>>, vector<1x1x1x9x4xbf16>
    %943 = vector.shape_cast %942 : vector<1x1x1x9x4xbf16> to vector<9x4xbf16>
    %c0_987 = arith.constant 0 : index
    %c0_988 = arith.constant 0 : index
    %c0_989 = arith.constant 0 : index
    %944 = vector.load %arg4[%c0_987, %c0_988, %c0_989] : memref<16x4x8xbf16, #tpu.memory_space<vmem>>, vector<1x4x8xbf16>
    %945 = vector.shape_cast %944 : vector<1x4x8xbf16> to vector<4x8xbf16>
    %cst_990 = arith.constant dense<0.000000e+00> : vector<9x8xf32>
    %946 = tpu.matmul %943, %945, %cst_990 {dimension_numbers = #tpu.dot_dimension_numbers<[1], [0], [0], [1], [0, 0, 1, 1], [], []>} : vector<9x4xbf16>, vector<4x8xbf16>, vector<9x8xf32> -> vector<9x8xf32>
    %947 = arith.addf %938, %946 : vector<9x8xf32>
    %c6_i32_991 = arith.constant 6 : i32
    %948 = arith.addi %0, %c6_i32_991 : i32
    %c0_i32_992 = arith.constant 0 : i32
    %949 = arith.addi %948, %c0_i32_992 : i32
    %c0_993 = arith.constant 0 : index
    %c1_994 = arith.constant 1 : index
    %950 = arith.index_cast %949 : i32 to index
    %c0_995 = arith.constant 0 : index
    %c0_996 = arith.constant 0 : index
    %951 = vector.load %arg3[%c0_993, %c1_994, %950, %c0_995, %c0_996] : memref<1x4x10x10x4xbf16, #tpu.memory_space<vmem>>, vector<1x1x1x9x4xbf16>
    %952 = vector.shape_cast %951 : vector<1x1x1x9x4xbf16> to vector<9x4xbf16>
    %c1_997 = arith.constant 1 : index
    %c0_998 = arith.constant 0 : index
    %c0_999 = arith.constant 0 : index
    %953 = vector.load %arg4[%c1_997, %c0_998, %c0_999] : memref<16x4x8xbf16, #tpu.memory_space<vmem>>, vector<1x4x8xbf16>
    %954 = vector.shape_cast %953 : vector<1x4x8xbf16> to vector<4x8xbf16>
    %cst_1000 = arith.constant dense<0.000000e+00> : vector<9x8xf32>
    %955 = tpu.matmul %952, %954, %cst_1000 {dimension_numbers = #tpu.dot_dimension_numbers<[1], [0], [0], [1], [0, 0, 1, 1], [], []>} : vector<9x4xbf16>, vector<4x8xbf16>, vector<9x8xf32> -> vector<9x8xf32>
    %956 = arith.addf %947, %955 : vector<9x8xf32>
    %c6_i32_1001 = arith.constant 6 : i32
    %957 = arith.addi %0, %c6_i32_1001 : i32
    %c0_i32_1002 = arith.constant 0 : i32
    %958 = arith.addi %957, %c0_i32_1002 : i32
    %c0_1003 = arith.constant 0 : index
    %c0_1004 = arith.constant 0 : index
    %959 = arith.index_cast %958 : i32 to index
    %c1_1005 = arith.constant 1 : index
    %c0_1006 = arith.constant 0 : index
    %960 = vector.load %arg3[%c0_1003, %c0_1004, %959, %c1_1005, %c0_1006] : memref<1x4x10x10x4xbf16, #tpu.memory_space<vmem>>, vector<1x1x1x9x4xbf16>
    %961 = vector.shape_cast %960 : vector<1x1x1x9x4xbf16> to vector<9x4xbf16>
    %c2_1007 = arith.constant 2 : index
    %c0_1008 = arith.constant 0 : index
    %c0_1009 = arith.constant 0 : index
    %962 = vector.load %arg4[%c2_1007, %c0_1008, %c0_1009] : memref<16x4x8xbf16, #tpu.memory_space<vmem>>, vector<1x4x8xbf16>
    %963 = vector.shape_cast %962 : vector<1x4x8xbf16> to vector<4x8xbf16>
    %cst_1010 = arith.constant dense<0.000000e+00> : vector<9x8xf32>
    %964 = tpu.matmul %961, %963, %cst_1010 {dimension_numbers = #tpu.dot_dimension_numbers<[1], [0], [0], [1], [0, 0, 1, 1], [], []>} : vector<9x4xbf16>, vector<4x8xbf16>, vector<9x8xf32> -> vector<9x8xf32>
    %965 = arith.addf %956, %964 : vector<9x8xf32>
    %c6_i32_1011 = arith.constant 6 : i32
    %966 = arith.addi %0, %c6_i32_1011 : i32
    %c0_i32_1012 = arith.constant 0 : i32
    %967 = arith.addi %966, %c0_i32_1012 : i32
    %c0_1013 = arith.constant 0 : index
    %c1_1014 = arith.constant 1 : index
    %968 = arith.index_cast %967 : i32 to index
    %c1_1015 = arith.constant 1 : index
    %c0_1016 = arith.constant 0 : index
    %969 = vector.load %arg3[%c0_1013, %c1_1014, %968, %c1_1015, %c0_1016] : memref<1x4x10x10x4xbf16, #tpu.memory_space<vmem>>, vector<1x1x1x9x4xbf16>
    %970 = vector.shape_cast %969 : vector<1x1x1x9x4xbf16> to vector<9x4xbf16>
    %c3_1017 = arith.constant 3 : index
    %c0_1018 = arith.constant 0 : index
    %c0_1019 = arith.constant 0 : index
    %971 = vector.load %arg4[%c3_1017, %c0_1018, %c0_1019] : memref<16x4x8xbf16, #tpu.memory_space<vmem>>, vector<1x4x8xbf16>
    %972 = vector.shape_cast %971 : vector<1x4x8xbf16> to vector<4x8xbf16>
    %cst_1020 = arith.constant dense<0.000000e+00> : vector<9x8xf32>
    %973 = tpu.matmul %970, %972, %cst_1020 {dimension_numbers = #tpu.dot_dimension_numbers<[1], [0], [0], [1], [0, 0, 1, 1], [], []>} : vector<9x4xbf16>, vector<4x8xbf16>, vector<9x8xf32> -> vector<9x8xf32>
    %974 = arith.addf %965, %973 : vector<9x8xf32>
    %c6_i32_1021 = arith.constant 6 : i32
    %975 = arith.addi %0, %c6_i32_1021 : i32
    %c0_i32_1022 = arith.constant 0 : i32
    %976 = arith.addi %975, %c0_i32_1022 : i32
    %c0_1023 = arith.constant 0 : index
    %c2_1024 = arith.constant 2 : index
    %977 = arith.index_cast %976 : i32 to index
    %c0_1025 = arith.constant 0 : index
    %c0_1026 = arith.constant 0 : index
    %978 = vector.load %arg3[%c0_1023, %c2_1024, %977, %c0_1025, %c0_1026] : memref<1x4x10x10x4xbf16, #tpu.memory_space<vmem>>, vector<1x1x1x9x4xbf16>
    %979 = vector.shape_cast %978 : vector<1x1x1x9x4xbf16> to vector<9x4xbf16>
    %c4_1027 = arith.constant 4 : index
    %c0_1028 = arith.constant 0 : index
    %c0_1029 = arith.constant 0 : index
    %980 = vector.load %arg4[%c4_1027, %c0_1028, %c0_1029] : memref<16x4x8xbf16, #tpu.memory_space<vmem>>, vector<1x4x8xbf16>
    %981 = vector.shape_cast %980 : vector<1x4x8xbf16> to vector<4x8xbf16>
    %cst_1030 = arith.constant dense<0.000000e+00> : vector<9x8xf32>
    %982 = tpu.matmul %979, %981, %cst_1030 {dimension_numbers = #tpu.dot_dimension_numbers<[1], [0], [0], [1], [0, 0, 1, 1], [], []>} : vector<9x4xbf16>, vector<4x8xbf16>, vector<9x8xf32> -> vector<9x8xf32>
    %983 = arith.addf %974, %982 : vector<9x8xf32>
    %c6_i32_1031 = arith.constant 6 : i32
    %984 = arith.addi %0, %c6_i32_1031 : i32
    %c0_i32_1032 = arith.constant 0 : i32
    %985 = arith.addi %984, %c0_i32_1032 : i32
    %c0_1033 = arith.constant 0 : index
    %c3_1034 = arith.constant 3 : index
    %986 = arith.index_cast %985 : i32 to index
    %c0_1035 = arith.constant 0 : index
    %c0_1036 = arith.constant 0 : index
    %987 = vector.load %arg3[%c0_1033, %c3_1034, %986, %c0_1035, %c0_1036] : memref<1x4x10x10x4xbf16, #tpu.memory_space<vmem>>, vector<1x1x1x9x4xbf16>
    %988 = vector.shape_cast %987 : vector<1x1x1x9x4xbf16> to vector<9x4xbf16>
    %c5_1037 = arith.constant 5 : index
    %c0_1038 = arith.constant 0 : index
    %c0_1039 = arith.constant 0 : index
    %989 = vector.load %arg4[%c5_1037, %c0_1038, %c0_1039] : memref<16x4x8xbf16, #tpu.memory_space<vmem>>, vector<1x4x8xbf16>
    %990 = vector.shape_cast %989 : vector<1x4x8xbf16> to vector<4x8xbf16>
    %cst_1040 = arith.constant dense<0.000000e+00> : vector<9x8xf32>
    %991 = tpu.matmul %988, %990, %cst_1040 {dimension_numbers = #tpu.dot_dimension_numbers<[1], [0], [0], [1], [0, 0, 1, 1], [], []>} : vector<9x4xbf16>, vector<4x8xbf16>, vector<9x8xf32> -> vector<9x8xf32>
    %992 = arith.addf %983, %991 : vector<9x8xf32>
    %c6_i32_1041 = arith.constant 6 : i32
    %993 = arith.addi %0, %c6_i32_1041 : i32
    %c0_i32_1042 = arith.constant 0 : i32
    %994 = arith.addi %993, %c0_i32_1042 : i32
    %c0_1043 = arith.constant 0 : index
    %c2_1044 = arith.constant 2 : index
    %995 = arith.index_cast %994 : i32 to index
    %c1_1045 = arith.constant 1 : index
    %c0_1046 = arith.constant 0 : index
    %996 = vector.load %arg3[%c0_1043, %c2_1044, %995, %c1_1045, %c0_1046] : memref<1x4x10x10x4xbf16, #tpu.memory_space<vmem>>, vector<1x1x1x9x4xbf16>
    %997 = vector.shape_cast %996 : vector<1x1x1x9x4xbf16> to vector<9x4xbf16>
    %c6_1047 = arith.constant 6 : index
    %c0_1048 = arith.constant 0 : index
    %c0_1049 = arith.constant 0 : index
    %998 = vector.load %arg4[%c6_1047, %c0_1048, %c0_1049] : memref<16x4x8xbf16, #tpu.memory_space<vmem>>, vector<1x4x8xbf16>
    %999 = vector.shape_cast %998 : vector<1x4x8xbf16> to vector<4x8xbf16>
    %cst_1050 = arith.constant dense<0.000000e+00> : vector<9x8xf32>
    %1000 = tpu.matmul %997, %999, %cst_1050 {dimension_numbers = #tpu.dot_dimension_numbers<[1], [0], [0], [1], [0, 0, 1, 1], [], []>} : vector<9x4xbf16>, vector<4x8xbf16>, vector<9x8xf32> -> vector<9x8xf32>
    %1001 = arith.addf %992, %1000 : vector<9x8xf32>
    %c6_i32_1051 = arith.constant 6 : i32
    %1002 = arith.addi %0, %c6_i32_1051 : i32
    %c0_i32_1052 = arith.constant 0 : i32
    %1003 = arith.addi %1002, %c0_i32_1052 : i32
    %c0_1053 = arith.constant 0 : index
    %c3_1054 = arith.constant 3 : index
    %1004 = arith.index_cast %1003 : i32 to index
    %c1_1055 = arith.constant 1 : index
    %c0_1056 = arith.constant 0 : index
    %1005 = vector.load %arg3[%c0_1053, %c3_1054, %1004, %c1_1055, %c0_1056] : memref<1x4x10x10x4xbf16, #tpu.memory_space<vmem>>, vector<1x1x1x9x4xbf16>
    %1006 = vector.shape_cast %1005 : vector<1x1x1x9x4xbf16> to vector<9x4xbf16>
    %c7_1057 = arith.constant 7 : index
    %c0_1058 = arith.constant 0 : index
    %c0_1059 = arith.constant 0 : index
    %1007 = vector.load %arg4[%c7_1057, %c0_1058, %c0_1059] : memref<16x4x8xbf16, #tpu.memory_space<vmem>>, vector<1x4x8xbf16>
    %1008 = vector.shape_cast %1007 : vector<1x4x8xbf16> to vector<4x8xbf16>
    %cst_1060 = arith.constant dense<0.000000e+00> : vector<9x8xf32>
    %1009 = tpu.matmul %1006, %1008, %cst_1060 {dimension_numbers = #tpu.dot_dimension_numbers<[1], [0], [0], [1], [0, 0, 1, 1], [], []>} : vector<9x4xbf16>, vector<4x8xbf16>, vector<9x8xf32> -> vector<9x8xf32>
    %1010 = arith.addf %1001, %1009 : vector<9x8xf32>
    %c6_i32_1061 = arith.constant 6 : i32
    %1011 = arith.addi %0, %c6_i32_1061 : i32
    %c1_i32_1062 = arith.constant 1 : i32
    %1012 = arith.addi %1011, %c1_i32_1062 : i32
    %c0_1063 = arith.constant 0 : index
    %c0_1064 = arith.constant 0 : index
    %1013 = arith.index_cast %1012 : i32 to index
    %c0_1065 = arith.constant 0 : index
    %c0_1066 = arith.constant 0 : index
    %1014 = vector.load %arg3[%c0_1063, %c0_1064, %1013, %c0_1065, %c0_1066] : memref<1x4x10x10x4xbf16, #tpu.memory_space<vmem>>, vector<1x1x1x9x4xbf16>
    %1015 = vector.shape_cast %1014 : vector<1x1x1x9x4xbf16> to vector<9x4xbf16>
    %c8_1067 = arith.constant 8 : index
    %c0_1068 = arith.constant 0 : index
    %c0_1069 = arith.constant 0 : index
    %1016 = vector.load %arg4[%c8_1067, %c0_1068, %c0_1069] : memref<16x4x8xbf16, #tpu.memory_space<vmem>>, vector<1x4x8xbf16>
    %1017 = vector.shape_cast %1016 : vector<1x4x8xbf16> to vector<4x8xbf16>
    %cst_1070 = arith.constant dense<0.000000e+00> : vector<9x8xf32>
    %1018 = tpu.matmul %1015, %1017, %cst_1070 {dimension_numbers = #tpu.dot_dimension_numbers<[1], [0], [0], [1], [0, 0, 1, 1], [], []>} : vector<9x4xbf16>, vector<4x8xbf16>, vector<9x8xf32> -> vector<9x8xf32>
    %1019 = arith.addf %1010, %1018 : vector<9x8xf32>
    %c6_i32_1071 = arith.constant 6 : i32
    %1020 = arith.addi %0, %c6_i32_1071 : i32
    %c1_i32_1072 = arith.constant 1 : i32
    %1021 = arith.addi %1020, %c1_i32_1072 : i32
    %c0_1073 = arith.constant 0 : index
    %c1_1074 = arith.constant 1 : index
    %1022 = arith.index_cast %1021 : i32 to index
    %c0_1075 = arith.constant 0 : index
    %c0_1076 = arith.constant 0 : index
    %1023 = vector.load %arg3[%c0_1073, %c1_1074, %1022, %c0_1075, %c0_1076] : memref<1x4x10x10x4xbf16, #tpu.memory_space<vmem>>, vector<1x1x1x9x4xbf16>
    %1024 = vector.shape_cast %1023 : vector<1x1x1x9x4xbf16> to vector<9x4xbf16>
    %c9_1077 = arith.constant 9 : index
    %c0_1078 = arith.constant 0 : index
    %c0_1079 = arith.constant 0 : index
    %1025 = vector.load %arg4[%c9_1077, %c0_1078, %c0_1079] : memref<16x4x8xbf16, #tpu.memory_space<vmem>>, vector<1x4x8xbf16>
    %1026 = vector.shape_cast %1025 : vector<1x4x8xbf16> to vector<4x8xbf16>
    %cst_1080 = arith.constant dense<0.000000e+00> : vector<9x8xf32>
    %1027 = tpu.matmul %1024, %1026, %cst_1080 {dimension_numbers = #tpu.dot_dimension_numbers<[1], [0], [0], [1], [0, 0, 1, 1], [], []>} : vector<9x4xbf16>, vector<4x8xbf16>, vector<9x8xf32> -> vector<9x8xf32>
    %1028 = arith.addf %1019, %1027 : vector<9x8xf32>
    %c6_i32_1081 = arith.constant 6 : i32
    %1029 = arith.addi %0, %c6_i32_1081 : i32
    %c1_i32_1082 = arith.constant 1 : i32
    %1030 = arith.addi %1029, %c1_i32_1082 : i32
    %c0_1083 = arith.constant 0 : index
    %c0_1084 = arith.constant 0 : index
    %1031 = arith.index_cast %1030 : i32 to index
    %c1_1085 = arith.constant 1 : index
    %c0_1086 = arith.constant 0 : index
    %1032 = vector.load %arg3[%c0_1083, %c0_1084, %1031, %c1_1085, %c0_1086] : memref<1x4x10x10x4xbf16, #tpu.memory_space<vmem>>, vector<1x1x1x9x4xbf16>
    %1033 = vector.shape_cast %1032 : vector<1x1x1x9x4xbf16> to vector<9x4xbf16>
    %c10_1087 = arith.constant 10 : index
    %c0_1088 = arith.constant 0 : index
    %c0_1089 = arith.constant 0 : index
    %1034 = vector.load %arg4[%c10_1087, %c0_1088, %c0_1089] : memref<16x4x8xbf16, #tpu.memory_space<vmem>>, vector<1x4x8xbf16>
    %1035 = vector.shape_cast %1034 : vector<1x4x8xbf16> to vector<4x8xbf16>
    %cst_1090 = arith.constant dense<0.000000e+00> : vector<9x8xf32>
    %1036 = tpu.matmul %1033, %1035, %cst_1090 {dimension_numbers = #tpu.dot_dimension_numbers<[1], [0], [0], [1], [0, 0, 1, 1], [], []>} : vector<9x4xbf16>, vector<4x8xbf16>, vector<9x8xf32> -> vector<9x8xf32>
    %1037 = arith.addf %1028, %1036 : vector<9x8xf32>
    %c6_i32_1091 = arith.constant 6 : i32
    %1038 = arith.addi %0, %c6_i32_1091 : i32
    %c1_i32_1092 = arith.constant 1 : i32
    %1039 = arith.addi %1038, %c1_i32_1092 : i32
    %c0_1093 = arith.constant 0 : index
    %c1_1094 = arith.constant 1 : index
    %1040 = arith.index_cast %1039 : i32 to index
    %c1_1095 = arith.constant 1 : index
    %c0_1096 = arith.constant 0 : index
    %1041 = vector.load %arg3[%c0_1093, %c1_1094, %1040, %c1_1095, %c0_1096] : memref<1x4x10x10x4xbf16, #tpu.memory_space<vmem>>, vector<1x1x1x9x4xbf16>
    %1042 = vector.shape_cast %1041 : vector<1x1x1x9x4xbf16> to vector<9x4xbf16>
    %c11_1097 = arith.constant 11 : index
    %c0_1098 = arith.constant 0 : index
    %c0_1099 = arith.constant 0 : index
    %1043 = vector.load %arg4[%c11_1097, %c0_1098, %c0_1099] : memref<16x4x8xbf16, #tpu.memory_space<vmem>>, vector<1x4x8xbf16>
    %1044 = vector.shape_cast %1043 : vector<1x4x8xbf16> to vector<4x8xbf16>
    %cst_1100 = arith.constant dense<0.000000e+00> : vector<9x8xf32>
    %1045 = tpu.matmul %1042, %1044, %cst_1100 {dimension_numbers = #tpu.dot_dimension_numbers<[1], [0], [0], [1], [0, 0, 1, 1], [], []>} : vector<9x4xbf16>, vector<4x8xbf16>, vector<9x8xf32> -> vector<9x8xf32>
    %1046 = arith.addf %1037, %1045 : vector<9x8xf32>
    %c6_i32_1101 = arith.constant 6 : i32
    %1047 = arith.addi %0, %c6_i32_1101 : i32
    %c1_i32_1102 = arith.constant 1 : i32
    %1048 = arith.addi %1047, %c1_i32_1102 : i32
    %c0_1103 = arith.constant 0 : index
    %c2_1104 = arith.constant 2 : index
    %1049 = arith.index_cast %1048 : i32 to index
    %c0_1105 = arith.constant 0 : index
    %c0_1106 = arith.constant 0 : index
    %1050 = vector.load %arg3[%c0_1103, %c2_1104, %1049, %c0_1105, %c0_1106] : memref<1x4x10x10x4xbf16, #tpu.memory_space<vmem>>, vector<1x1x1x9x4xbf16>
    %1051 = vector.shape_cast %1050 : vector<1x1x1x9x4xbf16> to vector<9x4xbf16>
    %c12_1107 = arith.constant 12 : index
    %c0_1108 = arith.constant 0 : index
    %c0_1109 = arith.constant 0 : index
    %1052 = vector.load %arg4[%c12_1107, %c0_1108, %c0_1109] : memref<16x4x8xbf16, #tpu.memory_space<vmem>>, vector<1x4x8xbf16>
    %1053 = vector.shape_cast %1052 : vector<1x4x8xbf16> to vector<4x8xbf16>
    %cst_1110 = arith.constant dense<0.000000e+00> : vector<9x8xf32>
    %1054 = tpu.matmul %1051, %1053, %cst_1110 {dimension_numbers = #tpu.dot_dimension_numbers<[1], [0], [0], [1], [0, 0, 1, 1], [], []>} : vector<9x4xbf16>, vector<4x8xbf16>, vector<9x8xf32> -> vector<9x8xf32>
    %1055 = arith.addf %1046, %1054 : vector<9x8xf32>
    %c6_i32_1111 = arith.constant 6 : i32
    %1056 = arith.addi %0, %c6_i32_1111 : i32
    %c1_i32_1112 = arith.constant 1 : i32
    %1057 = arith.addi %1056, %c1_i32_1112 : i32
    %c0_1113 = arith.constant 0 : index
    %c3_1114 = arith.constant 3 : index
    %1058 = arith.index_cast %1057 : i32 to index
    %c0_1115 = arith.constant 0 : index
    %c0_1116 = arith.constant 0 : index
    %1059 = vector.load %arg3[%c0_1113, %c3_1114, %1058, %c0_1115, %c0_1116] : memref<1x4x10x10x4xbf16, #tpu.memory_space<vmem>>, vector<1x1x1x9x4xbf16>
    %1060 = vector.shape_cast %1059 : vector<1x1x1x9x4xbf16> to vector<9x4xbf16>
    %c13_1117 = arith.constant 13 : index
    %c0_1118 = arith.constant 0 : index
    %c0_1119 = arith.constant 0 : index
    %1061 = vector.load %arg4[%c13_1117, %c0_1118, %c0_1119] : memref<16x4x8xbf16, #tpu.memory_space<vmem>>, vector<1x4x8xbf16>
    %1062 = vector.shape_cast %1061 : vector<1x4x8xbf16> to vector<4x8xbf16>
    %cst_1120 = arith.constant dense<0.000000e+00> : vector<9x8xf32>
    %1063 = tpu.matmul %1060, %1062, %cst_1120 {dimension_numbers = #tpu.dot_dimension_numbers<[1], [0], [0], [1], [0, 0, 1, 1], [], []>} : vector<9x4xbf16>, vector<4x8xbf16>, vector<9x8xf32> -> vector<9x8xf32>
    %1064 = arith.addf %1055, %1063 : vector<9x8xf32>
    %c6_i32_1121 = arith.constant 6 : i32
    %1065 = arith.addi %0, %c6_i32_1121 : i32
    %c1_i32_1122 = arith.constant 1 : i32
    %1066 = arith.addi %1065, %c1_i32_1122 : i32
    %c0_1123 = arith.constant 0 : index
    %c2_1124 = arith.constant 2 : index
    %1067 = arith.index_cast %1066 : i32 to index
    %c1_1125 = arith.constant 1 : index
    %c0_1126 = arith.constant 0 : index
    %1068 = vector.load %arg3[%c0_1123, %c2_1124, %1067, %c1_1125, %c0_1126] : memref<1x4x10x10x4xbf16, #tpu.memory_space<vmem>>, vector<1x1x1x9x4xbf16>
    %1069 = vector.shape_cast %1068 : vector<1x1x1x9x4xbf16> to vector<9x4xbf16>
    %c14_1127 = arith.constant 14 : index
    %c0_1128 = arith.constant 0 : index
    %c0_1129 = arith.constant 0 : index
    %1070 = vector.load %arg4[%c14_1127, %c0_1128, %c0_1129] : memref<16x4x8xbf16, #tpu.memory_space<vmem>>, vector<1x4x8xbf16>
    %1071 = vector.shape_cast %1070 : vector<1x4x8xbf16> to vector<4x8xbf16>
    %cst_1130 = arith.constant dense<0.000000e+00> : vector<9x8xf32>
    %1072 = tpu.matmul %1069, %1071, %cst_1130 {dimension_numbers = #tpu.dot_dimension_numbers<[1], [0], [0], [1], [0, 0, 1, 1], [], []>} : vector<9x4xbf16>, vector<4x8xbf16>, vector<9x8xf32> -> vector<9x8xf32>
    %1073 = arith.addf %1064, %1072 : vector<9x8xf32>
    %c6_i32_1131 = arith.constant 6 : i32
    %1074 = arith.addi %0, %c6_i32_1131 : i32
    %c1_i32_1132 = arith.constant 1 : i32
    %1075 = arith.addi %1074, %c1_i32_1132 : i32
    %c0_1133 = arith.constant 0 : index
    %c3_1134 = arith.constant 3 : index
    %1076 = arith.index_cast %1075 : i32 to index
    %c1_1135 = arith.constant 1 : index
    %c0_1136 = arith.constant 0 : index
    %1077 = vector.load %arg3[%c0_1133, %c3_1134, %1076, %c1_1135, %c0_1136] : memref<1x4x10x10x4xbf16, #tpu.memory_space<vmem>>, vector<1x1x1x9x4xbf16>
    %1078 = vector.shape_cast %1077 : vector<1x1x1x9x4xbf16> to vector<9x4xbf16>
    %c15_1137 = arith.constant 15 : index
    %c0_1138 = arith.constant 0 : index
    %c0_1139 = arith.constant 0 : index
    %1079 = vector.load %arg4[%c15_1137, %c0_1138, %c0_1139] : memref<16x4x8xbf16, #tpu.memory_space<vmem>>, vector<1x4x8xbf16>
    %1080 = vector.shape_cast %1079 : vector<1x4x8xbf16> to vector<4x8xbf16>
    %cst_1140 = arith.constant dense<0.000000e+00> : vector<9x8xf32>
    %1081 = tpu.matmul %1078, %1080, %cst_1140 {dimension_numbers = #tpu.dot_dimension_numbers<[1], [0], [0], [1], [0, 0, 1, 1], [], []>} : vector<9x4xbf16>, vector<4x8xbf16>, vector<9x8xf32> -> vector<9x8xf32>
    %1082 = arith.addf %1073, %1081 : vector<9x8xf32>
    %1083 = vector.broadcast %1 : vector<1x8xf32> to vector<9x8xf32>
    %1084 = arith.addf %1082, %1083 : vector<9x8xf32>
    %cst_1141 = arith.constant 0.000000e+00 : f32
    %1085 = vector.broadcast %cst_1141 : f32 to vector<9x8xf32>
    %1086 = arith.cmpf oge, %1084, %1085 : vector<9x8xf32>
    %cst_1142 = arith.constant 2.000000e-01 : f32
    %1087 = vector.broadcast %cst_1142 : f32 to vector<9x8xf32>
    %1088 = arith.mulf %1087, %1084 : vector<9x8xf32>
    %1089 = arith.select %1086, %1084, %1088 : vector<9x8xi1>, vector<9x8xf32>
    %1090 = arith.truncf %1089 : vector<9x8xf32> to vector<9x8xbf16>
    %c0_1143 = arith.constant 0 : index
    %c6_1144 = arith.constant 6 : index
    %c0_1145 = arith.constant 0 : index
    %c0_1146 = arith.constant 0 : index
    %1091 = vector.load %arg6[%c0_1143, %c6_1144, %c0_1145, %c0_1146] : memref<1x9x9x8xbf16, #tpu.memory_space<vmem>>, vector<1x1x9x8xbf16>
    %1092 = vector.shape_cast %1091 : vector<1x1x9x8xbf16> to vector<9x8xbf16>
    %1093 = vector.shape_cast %1090 : vector<9x8xbf16> to vector<1x1x9x8xbf16>
    tpu.vector_store %arg6[%c0_1143, %c6_1144, %c0_1145, %c0_1146], %1093 {strides = array<i32>} : memref<1x9x9x8xbf16, #tpu.memory_space<vmem>>, vector<1x1x9x8xbf16>,
    %cst_1147 = arith.constant 0.000000e+00 : f32
    %1094 = vector.broadcast %cst_1147 : f32 to vector<9x8xf32>
    %c7_i32 = arith.constant 7 : i32
    %1095 = arith.addi %0, %c7_i32 : i32
    %c0_i32_1148 = arith.constant 0 : i32
    %1096 = arith.addi %1095, %c0_i32_1148 : i32
    %c0_1149 = arith.constant 0 : index
    %c0_1150 = arith.constant 0 : index
    %1097 = arith.index_cast %1096 : i32 to index
    %c0_1151 = arith.constant 0 : index
    %c0_1152 = arith.constant 0 : index
    %1098 = vector.load %arg3[%c0_1149, %c0_1150, %1097, %c0_1151, %c0_1152] : memref<1x4x10x10x4xbf16, #tpu.memory_space<vmem>>, vector<1x1x1x9x4xbf16>
    %1099 = vector.shape_cast %1098 : vector<1x1x1x9x4xbf16> to vector<9x4xbf16>
    %c0_1153 = arith.constant 0 : index
    %c0_1154 = arith.constant 0 : index
    %c0_1155 = arith.constant 0 : index
    %1100 = vector.load %arg4[%c0_1153, %c0_1154, %c0_1155] : memref<16x4x8xbf16, #tpu.memory_space<vmem>>, vector<1x4x8xbf16>
    %1101 = vector.shape_cast %1100 : vector<1x4x8xbf16> to vector<4x8xbf16>
    %cst_1156 = arith.constant dense<0.000000e+00> : vector<9x8xf32>
    %1102 = tpu.matmul %1099, %1101, %cst_1156 {dimension_numbers = #tpu.dot_dimension_numbers<[1], [0], [0], [1], [0, 0, 1, 1], [], []>} : vector<9x4xbf16>, vector<4x8xbf16>, vector<9x8xf32> -> vector<9x8xf32>
    %1103 = arith.addf %1094, %1102 : vector<9x8xf32>
    %c7_i32_1157 = arith.constant 7 : i32
    %1104 = arith.addi %0, %c7_i32_1157 : i32
    %c0_i32_1158 = arith.constant 0 : i32
    %1105 = arith.addi %1104, %c0_i32_1158 : i32
    %c0_1159 = arith.constant 0 : index
    %c1_1160 = arith.constant 1 : index
    %1106 = arith.index_cast %1105 : i32 to index
    %c0_1161 = arith.constant 0 : index
    %c0_1162 = arith.constant 0 : index
    %1107 = vector.load %arg3[%c0_1159, %c1_1160, %1106, %c0_1161, %c0_1162] : memref<1x4x10x10x4xbf16, #tpu.memory_space<vmem>>, vector<1x1x1x9x4xbf16>
    %1108 = vector.shape_cast %1107 : vector<1x1x1x9x4xbf16> to vector<9x4xbf16>
    %c1_1163 = arith.constant 1 : index
    %c0_1164 = arith.constant 0 : index
    %c0_1165 = arith.constant 0 : index
    %1109 = vector.load %arg4[%c1_1163, %c0_1164, %c0_1165] : memref<16x4x8xbf16, #tpu.memory_space<vmem>>, vector<1x4x8xbf16>
    %1110 = vector.shape_cast %1109 : vector<1x4x8xbf16> to vector<4x8xbf16>
    %cst_1166 = arith.constant dense<0.000000e+00> : vector<9x8xf32>
    %1111 = tpu.matmul %1108, %1110, %cst_1166 {dimension_numbers = #tpu.dot_dimension_numbers<[1], [0], [0], [1], [0, 0, 1, 1], [], []>} : vector<9x4xbf16>, vector<4x8xbf16>, vector<9x8xf32> -> vector<9x8xf32>
    %1112 = arith.addf %1103, %1111 : vector<9x8xf32>
    %c7_i32_1167 = arith.constant 7 : i32
    %1113 = arith.addi %0, %c7_i32_1167 : i32
    %c0_i32_1168 = arith.constant 0 : i32
    %1114 = arith.addi %1113, %c0_i32_1168 : i32
    %c0_1169 = arith.constant 0 : index
    %c0_1170 = arith.constant 0 : index
    %1115 = arith.index_cast %1114 : i32 to index
    %c1_1171 = arith.constant 1 : index
    %c0_1172 = arith.constant 0 : index
    %1116 = vector.load %arg3[%c0_1169, %c0_1170, %1115, %c1_1171, %c0_1172] : memref<1x4x10x10x4xbf16, #tpu.memory_space<vmem>>, vector<1x1x1x9x4xbf16>
    %1117 = vector.shape_cast %1116 : vector<1x1x1x9x4xbf16> to vector<9x4xbf16>
    %c2_1173 = arith.constant 2 : index
    %c0_1174 = arith.constant 0 : index
    %c0_1175 = arith.constant 0 : index
    %1118 = vector.load %arg4[%c2_1173, %c0_1174, %c0_1175] : memref<16x4x8xbf16, #tpu.memory_space<vmem>>, vector<1x4x8xbf16>
    %1119 = vector.shape_cast %1118 : vector<1x4x8xbf16> to vector<4x8xbf16>
    %cst_1176 = arith.constant dense<0.000000e+00> : vector<9x8xf32>
    %1120 = tpu.matmul %1117, %1119, %cst_1176 {dimension_numbers = #tpu.dot_dimension_numbers<[1], [0], [0], [1], [0, 0, 1, 1], [], []>} : vector<9x4xbf16>, vector<4x8xbf16>, vector<9x8xf32> -> vector<9x8xf32>
    %1121 = arith.addf %1112, %1120 : vector<9x8xf32>
    %c7_i32_1177 = arith.constant 7 : i32
    %1122 = arith.addi %0, %c7_i32_1177 : i32
    %c0_i32_1178 = arith.constant 0 : i32
    %1123 = arith.addi %1122, %c0_i32_1178 : i32
    %c0_1179 = arith.constant 0 : index
    %c1_1180 = arith.constant 1 : index
    %1124 = arith.index_cast %1123 : i32 to index
    %c1_1181 = arith.constant 1 : index
    %c0_1182 = arith.constant 0 : index
    %1125 = vector.load %arg3[%c0_1179, %c1_1180, %1124, %c1_1181, %c0_1182] : memref<1x4x10x10x4xbf16, #tpu.memory_space<vmem>>, vector<1x1x1x9x4xbf16>
    %1126 = vector.shape_cast %1125 : vector<1x1x1x9x4xbf16> to vector<9x4xbf16>
    %c3_1183 = arith.constant 3 : index
    %c0_1184 = arith.constant 0 : index
    %c0_1185 = arith.constant 0 : index
    %1127 = vector.load %arg4[%c3_1183, %c0_1184, %c0_1185] : memref<16x4x8xbf16, #tpu.memory_space<vmem>>, vector<1x4x8xbf16>
    %1128 = vector.shape_cast %1127 : vector<1x4x8xbf16> to vector<4x8xbf16>
    %cst_1186 = arith.constant dense<0.000000e+00> : vector<9x8xf32>
    %1129 = tpu.matmul %1126, %1128, %cst_1186 {dimension_numbers = #tpu.dot_dimension_numbers<[1], [0], [0], [1], [0, 0, 1, 1], [], []>} : vector<9x4xbf16>, vector<4x8xbf16>, vector<9x8xf32> -> vector<9x8xf32>
    %1130 = arith.addf %1121, %1129 : vector<9x8xf32>
    %c7_i32_1187 = arith.constant 7 : i32
    %1131 = arith.addi %0, %c7_i32_1187 : i32
    %c0_i32_1188 = arith.constant 0 : i32
    %1132 = arith.addi %1131, %c0_i32_1188 : i32
    %c0_1189 = arith.constant 0 : index
    %c2_1190 = arith.constant 2 : index
    %1133 = arith.index_cast %1132 : i32 to index
    %c0_1191 = arith.constant 0 : index
    %c0_1192 = arith.constant 0 : index
    %1134 = vector.load %arg3[%c0_1189, %c2_1190, %1133, %c0_1191, %c0_1192] : memref<1x4x10x10x4xbf16, #tpu.memory_space<vmem>>, vector<1x1x1x9x4xbf16>
    %1135 = vector.shape_cast %1134 : vector<1x1x1x9x4xbf16> to vector<9x4xbf16>
    %c4_1193 = arith.constant 4 : index
    %c0_1194 = arith.constant 0 : index
    %c0_1195 = arith.constant 0 : index
    %1136 = vector.load %arg4[%c4_1193, %c0_1194, %c0_1195] : memref<16x4x8xbf16, #tpu.memory_space<vmem>>, vector<1x4x8xbf16>
    %1137 = vector.shape_cast %1136 : vector<1x4x8xbf16> to vector<4x8xbf16>
    %cst_1196 = arith.constant dense<0.000000e+00> : vector<9x8xf32>
    %1138 = tpu.matmul %1135, %1137, %cst_1196 {dimension_numbers = #tpu.dot_dimension_numbers<[1], [0], [0], [1], [0, 0, 1, 1], [], []>} : vector<9x4xbf16>, vector<4x8xbf16>, vector<9x8xf32> -> vector<9x8xf32>
    %1139 = arith.addf %1130, %1138 : vector<9x8xf32>
    %c7_i32_1197 = arith.constant 7 : i32
    %1140 = arith.addi %0, %c7_i32_1197 : i32
    %c0_i32_1198 = arith.constant 0 : i32
    %1141 = arith.addi %1140, %c0_i32_1198 : i32
    %c0_1199 = arith.constant 0 : index
    %c3_1200 = arith.constant 3 : index
    %1142 = arith.index_cast %1141 : i32 to index
    %c0_1201 = arith.constant 0 : index
    %c0_1202 = arith.constant 0 : index
    %1143 = vector.load %arg3[%c0_1199, %c3_1200, %1142, %c0_1201, %c0_1202] : memref<1x4x10x10x4xbf16, #tpu.memory_space<vmem>>, vector<1x1x1x9x4xbf16>
    %1144 = vector.shape_cast %1143 : vector<1x1x1x9x4xbf16> to vector<9x4xbf16>
    %c5_1203 = arith.constant 5 : index
    %c0_1204 = arith.constant 0 : index
    %c0_1205 = arith.constant 0 : index
    %1145 = vector.load %arg4[%c5_1203, %c0_1204, %c0_1205] : memref<16x4x8xbf16, #tpu.memory_space<vmem>>, vector<1x4x8xbf16>
    %1146 = vector.shape_cast %1145 : vector<1x4x8xbf16> to vector<4x8xbf16>
    %cst_1206 = arith.constant dense<0.000000e+00> : vector<9x8xf32>
    %1147 = tpu.matmul %1144, %1146, %cst_1206 {dimension_numbers = #tpu.dot_dimension_numbers<[1], [0], [0], [1], [0, 0, 1, 1], [], []>} : vector<9x4xbf16>, vector<4x8xbf16>, vector<9x8xf32> -> vector<9x8xf32>
    %1148 = arith.addf %1139, %1147 : vector<9x8xf32>
    %c7_i32_1207 = arith.constant 7 : i32
    %1149 = arith.addi %0, %c7_i32_1207 : i32
    %c0_i32_1208 = arith.constant 0 : i32
    %1150 = arith.addi %1149, %c0_i32_1208 : i32
    %c0_1209 = arith.constant 0 : index
    %c2_1210 = arith.constant 2 : index
    %1151 = arith.index_cast %1150 : i32 to index
    %c1_1211 = arith.constant 1 : index
    %c0_1212 = arith.constant 0 : index
    %1152 = vector.load %arg3[%c0_1209, %c2_1210, %1151, %c1_1211, %c0_1212] : memref<1x4x10x10x4xbf16, #tpu.memory_space<vmem>>, vector<1x1x1x9x4xbf16>
    %1153 = vector.shape_cast %1152 : vector<1x1x1x9x4xbf16> to vector<9x4xbf16>
    %c6_1213 = arith.constant 6 : index
    %c0_1214 = arith.constant 0 : index
    %c0_1215 = arith.constant 0 : index
    %1154 = vector.load %arg4[%c6_1213, %c0_1214, %c0_1215] : memref<16x4x8xbf16, #tpu.memory_space<vmem>>, vector<1x4x8xbf16>
    %1155 = vector.shape_cast %1154 : vector<1x4x8xbf16> to vector<4x8xbf16>
    %cst_1216 = arith.constant dense<0.000000e+00> : vector<9x8xf32>
    %1156 = tpu.matmul %1153, %1155, %cst_1216 {dimension_numbers = #tpu.dot_dimension_numbers<[1], [0], [0], [1], [0, 0, 1, 1], [], []>} : vector<9x4xbf16>, vector<4x8xbf16>, vector<9x8xf32> -> vector<9x8xf32>
    %1157 = arith.addf %1148, %1156 : vector<9x8xf32>
    %c7_i32_1217 = arith.constant 7 : i32
    %1158 = arith.addi %0, %c7_i32_1217 : i32
    %c0_i32_1218 = arith.constant 0 : i32
    %1159 = arith.addi %1158, %c0_i32_1218 : i32
    %c0_1219 = arith.constant 0 : index
    %c3_1220 = arith.constant 3 : index
    %1160 = arith.index_cast %1159 : i32 to index
    %c1_1221 = arith.constant 1 : index
    %c0_1222 = arith.constant 0 : index
    %1161 = vector.load %arg3[%c0_1219, %c3_1220, %1160, %c1_1221, %c0_1222] : memref<1x4x10x10x4xbf16, #tpu.memory_space<vmem>>, vector<1x1x1x9x4xbf16>
    %1162 = vector.shape_cast %1161 : vector<1x1x1x9x4xbf16> to vector<9x4xbf16>
    %c7_1223 = arith.constant 7 : index
    %c0_1224 = arith.constant 0 : index
    %c0_1225 = arith.constant 0 : index
    %1163 = vector.load %arg4[%c7_1223, %c0_1224, %c0_1225] : memref<16x4x8xbf16, #tpu.memory_space<vmem>>, vector<1x4x8xbf16>
    %1164 = vector.shape_cast %1163 : vector<1x4x8xbf16> to vector<4x8xbf16>
    %cst_1226 = arith.constant dense<0.000000e+00> : vector<9x8xf32>
    %1165 = tpu.matmul %1162, %1164, %cst_1226 {dimension_numbers = #tpu.dot_dimension_numbers<[1], [0], [0], [1], [0, 0, 1, 1], [], []>} : vector<9x4xbf16>, vector<4x8xbf16>, vector<9x8xf32> -> vector<9x8xf32>
    %1166 = arith.addf %1157, %1165 : vector<9x8xf32>
    %c7_i32_1227 = arith.constant 7 : i32
    %1167 = arith.addi %0, %c7_i32_1227 : i32
    %c1_i32_1228 = arith.constant 1 : i32
    %1168 = arith.addi %1167, %c1_i32_1228 : i32
    %c0_1229 = arith.constant 0 : index
    %c0_1230 = arith.constant 0 : index
    %1169 = arith.index_cast %1168 : i32 to index
    %c0_1231 = arith.constant 0 : index
    %c0_1232 = arith.constant 0 : index
    %1170 = vector.load %arg3[%c0_1229, %c0_1230, %1169, %c0_1231, %c0_1232] : memref<1x4x10x10x4xbf16, #tpu.memory_space<vmem>>, vector<1x1x1x9x4xbf16>
    %1171 = vector.shape_cast %1170 : vector<1x1x1x9x4xbf16> to vector<9x4xbf16>
    %c8_1233 = arith.constant 8 : index
    %c0_1234 = arith.constant 0 : index
    %c0_1235 = arith.constant 0 : index
    %1172 = vector.load %arg4[%c8_1233, %c0_1234, %c0_1235] : memref<16x4x8xbf16, #tpu.memory_space<vmem>>, vector<1x4x8xbf16>
    %1173 = vector.shape_cast %1172 : vector<1x4x8xbf16> to vector<4x8xbf16>
    %cst_1236 = arith.constant dense<0.000000e+00> : vector<9x8xf32>
    %1174 = tpu.matmul %1171, %1173, %cst_1236 {dimension_numbers = #tpu.dot_dimension_numbers<[1], [0], [0], [1], [0, 0, 1, 1], [], []>} : vector<9x4xbf16>, vector<4x8xbf16>, vector<9x8xf32> -> vector<9x8xf32>
    %1175 = arith.addf %1166, %1174 : vector<9x8xf32>
    %c7_i32_1237 = arith.constant 7 : i32
    %1176 = arith.addi %0, %c7_i32_1237 : i32
    %c1_i32_1238 = arith.constant 1 : i32
    %1177 = arith.addi %1176, %c1_i32_1238 : i32
    %c0_1239 = arith.constant 0 : index
    %c1_1240 = arith.constant 1 : index
    %1178 = arith.index_cast %1177 : i32 to index
    %c0_1241 = arith.constant 0 : index
    %c0_1242 = arith.constant 0 : index
    %1179 = vector.load %arg3[%c0_1239, %c1_1240, %1178, %c0_1241, %c0_1242] : memref<1x4x10x10x4xbf16, #tpu.memory_space<vmem>>, vector<1x1x1x9x4xbf16>
    %1180 = vector.shape_cast %1179 : vector<1x1x1x9x4xbf16> to vector<9x4xbf16>
    %c9_1243 = arith.constant 9 : index
    %c0_1244 = arith.constant 0 : index
    %c0_1245 = arith.constant 0 : index
    %1181 = vector.load %arg4[%c9_1243, %c0_1244, %c0_1245] : memref<16x4x8xbf16, #tpu.memory_space<vmem>>, vector<1x4x8xbf16>
    %1182 = vector.shape_cast %1181 : vector<1x4x8xbf16> to vector<4x8xbf16>
    %cst_1246 = arith.constant dense<0.000000e+00> : vector<9x8xf32>
    %1183 = tpu.matmul %1180, %1182, %cst_1246 {dimension_numbers = #tpu.dot_dimension_numbers<[1], [0], [0], [1], [0, 0, 1, 1], [], []>} : vector<9x4xbf16>, vector<4x8xbf16>, vector<9x8xf32> -> vector<9x8xf32>
    %1184 = arith.addf %1175, %1183 : vector<9x8xf32>
    %c7_i32_1247 = arith.constant 7 : i32
    %1185 = arith.addi %0, %c7_i32_1247 : i32
    %c1_i32_1248 = arith.constant 1 : i32
    %1186 = arith.addi %1185, %c1_i32_1248 : i32
    %c0_1249 = arith.constant 0 : index
    %c0_1250 = arith.constant 0 : index
    %1187 = arith.index_cast %1186 : i32 to index
    %c1_1251 = arith.constant 1 : index
    %c0_1252 = arith.constant 0 : index
    %1188 = vector.load %arg3[%c0_1249, %c0_1250, %1187, %c1_1251, %c0_1252] : memref<1x4x10x10x4xbf16, #tpu.memory_space<vmem>>, vector<1x1x1x9x4xbf16>
    %1189 = vector.shape_cast %1188 : vector<1x1x1x9x4xbf16> to vector<9x4xbf16>
    %c10_1253 = arith.constant 10 : index
    %c0_1254 = arith.constant 0 : index
    %c0_1255 = arith.constant 0 : index
    %1190 = vector.load %arg4[%c10_1253, %c0_1254, %c0_1255] : memref<16x4x8xbf16, #tpu.memory_space<vmem>>, vector<1x4x8xbf16>
    %1191 = vector.shape_cast %1190 : vector<1x4x8xbf16> to vector<4x8xbf16>
    %cst_1256 = arith.constant dense<0.000000e+00> : vector<9x8xf32>
    %1192 = tpu.matmul %1189, %1191, %cst_1256 {dimension_numbers = #tpu.dot_dimension_numbers<[1], [0], [0], [1], [0, 0, 1, 1], [], []>} : vector<9x4xbf16>, vector<4x8xbf16>, vector<9x8xf32> -> vector<9x8xf32>
    %1193 = arith.addf %1184, %1192 : vector<9x8xf32>
    %c7_i32_1257 = arith.constant 7 : i32
    %1194 = arith.addi %0, %c7_i32_1257 : i32
    %c1_i32_1258 = arith.constant 1 : i32
    %1195 = arith.addi %1194, %c1_i32_1258 : i32
    %c0_1259 = arith.constant 0 : index
    %c1_1260 = arith.constant 1 : index
    %1196 = arith.index_cast %1195 : i32 to index
    %c1_1261 = arith.constant 1 : index
    %c0_1262 = arith.constant 0 : index
    %1197 = vector.load %arg3[%c0_1259, %c1_1260, %1196, %c1_1261, %c0_1262] : memref<1x4x10x10x4xbf16, #tpu.memory_space<vmem>>, vector<1x1x1x9x4xbf16>
    %1198 = vector.shape_cast %1197 : vector<1x1x1x9x4xbf16> to vector<9x4xbf16>
    %c11_1263 = arith.constant 11 : index
    %c0_1264 = arith.constant 0 : index
    %c0_1265 = arith.constant 0 : index
    %1199 = vector.load %arg4[%c11_1263, %c0_1264, %c0_1265] : memref<16x4x8xbf16, #tpu.memory_space<vmem>>, vector<1x4x8xbf16>
    %1200 = vector.shape_cast %1199 : vector<1x4x8xbf16> to vector<4x8xbf16>
    %cst_1266 = arith.constant dense<0.000000e+00> : vector<9x8xf32>
    %1201 = tpu.matmul %1198, %1200, %cst_1266 {dimension_numbers = #tpu.dot_dimension_numbers<[1], [0], [0], [1], [0, 0, 1, 1], [], []>} : vector<9x4xbf16>, vector<4x8xbf16>, vector<9x8xf32> -> vector<9x8xf32>
    %1202 = arith.addf %1193, %1201 : vector<9x8xf32>
    %c7_i32_1267 = arith.constant 7 : i32
    %1203 = arith.addi %0, %c7_i32_1267 : i32
    %c1_i32_1268 = arith.constant 1 : i32
    %1204 = arith.addi %1203, %c1_i32_1268 : i32
    %c0_1269 = arith.constant 0 : index
    %c2_1270 = arith.constant 2 : index
    %1205 = arith.index_cast %1204 : i32 to index
    %c0_1271 = arith.constant 0 : index
    %c0_1272 = arith.constant 0 : index
    %1206 = vector.load %arg3[%c0_1269, %c2_1270, %1205, %c0_1271, %c0_1272] : memref<1x4x10x10x4xbf16, #tpu.memory_space<vmem>>, vector<1x1x1x9x4xbf16>
    %1207 = vector.shape_cast %1206 : vector<1x1x1x9x4xbf16> to vector<9x4xbf16>
    %c12_1273 = arith.constant 12 : index
    %c0_1274 = arith.constant 0 : index
    %c0_1275 = arith.constant 0 : index
    %1208 = vector.load %arg4[%c12_1273, %c0_1274, %c0_1275] : memref<16x4x8xbf16, #tpu.memory_space<vmem>>, vector<1x4x8xbf16>
    %1209 = vector.shape_cast %1208 : vector<1x4x8xbf16> to vector<4x8xbf16>
    %cst_1276 = arith.constant dense<0.000000e+00> : vector<9x8xf32>
    %1210 = tpu.matmul %1207, %1209, %cst_1276 {dimension_numbers = #tpu.dot_dimension_numbers<[1], [0], [0], [1], [0, 0, 1, 1], [], []>} : vector<9x4xbf16>, vector<4x8xbf16>, vector<9x8xf32> -> vector<9x8xf32>
    %1211 = arith.addf %1202, %1210 : vector<9x8xf32>
    %c7_i32_1277 = arith.constant 7 : i32
    %1212 = arith.addi %0, %c7_i32_1277 : i32
    %c1_i32_1278 = arith.constant 1 : i32
    %1213 = arith.addi %1212, %c1_i32_1278 : i32
    %c0_1279 = arith.constant 0 : index
    %c3_1280 = arith.constant 3 : index
    %1214 = arith.index_cast %1213 : i32 to index
    %c0_1281 = arith.constant 0 : index
    %c0_1282 = arith.constant 0 : index
    %1215 = vector.load %arg3[%c0_1279, %c3_1280, %1214, %c0_1281, %c0_1282] : memref<1x4x10x10x4xbf16, #tpu.memory_space<vmem>>, vector<1x1x1x9x4xbf16>
    %1216 = vector.shape_cast %1215 : vector<1x1x1x9x4xbf16> to vector<9x4xbf16>
    %c13_1283 = arith.constant 13 : index
    %c0_1284 = arith.constant 0 : index
    %c0_1285 = arith.constant 0 : index
    %1217 = vector.load %arg4[%c13_1283, %c0_1284, %c0_1285] : memref<16x4x8xbf16, #tpu.memory_space<vmem>>, vector<1x4x8xbf16>
    %1218 = vector.shape_cast %1217 : vector<1x4x8xbf16> to vector<4x8xbf16>
    %cst_1286 = arith.constant dense<0.000000e+00> : vector<9x8xf32>
    %1219 = tpu.matmul %1216, %1218, %cst_1286 {dimension_numbers = #tpu.dot_dimension_numbers<[1], [0], [0], [1], [0, 0, 1, 1], [], []>} : vector<9x4xbf16>, vector<4x8xbf16>, vector<9x8xf32> -> vector<9x8xf32>
    %1220 = arith.addf %1211, %1219 : vector<9x8xf32>
    %c7_i32_1287 = arith.constant 7 : i32
    %1221 = arith.addi %0, %c7_i32_1287 : i32
    %c1_i32_1288 = arith.constant 1 : i32
    %1222 = arith.addi %1221, %c1_i32_1288 : i32
    %c0_1289 = arith.constant 0 : index
    %c2_1290 = arith.constant 2 : index
    %1223 = arith.index_cast %1222 : i32 to index
    %c1_1291 = arith.constant 1 : index
    %c0_1292 = arith.constant 0 : index
    %1224 = vector.load %arg3[%c0_1289, %c2_1290, %1223, %c1_1291, %c0_1292] : memref<1x4x10x10x4xbf16, #tpu.memory_space<vmem>>, vector<1x1x1x9x4xbf16>
    %1225 = vector.shape_cast %1224 : vector<1x1x1x9x4xbf16> to vector<9x4xbf16>
    %c14_1293 = arith.constant 14 : index
    %c0_1294 = arith.constant 0 : index
    %c0_1295 = arith.constant 0 : index
    %1226 = vector.load %arg4[%c14_1293, %c0_1294, %c0_1295] : memref<16x4x8xbf16, #tpu.memory_space<vmem>>, vector<1x4x8xbf16>
    %1227 = vector.shape_cast %1226 : vector<1x4x8xbf16> to vector<4x8xbf16>
    %cst_1296 = arith.constant dense<0.000000e+00> : vector<9x8xf32>
    %1228 = tpu.matmul %1225, %1227, %cst_1296 {dimension_numbers = #tpu.dot_dimension_numbers<[1], [0], [0], [1], [0, 0, 1, 1], [], []>} : vector<9x4xbf16>, vector<4x8xbf16>, vector<9x8xf32> -> vector<9x8xf32>
    %1229 = arith.addf %1220, %1228 : vector<9x8xf32>
    %c7_i32_1297 = arith.constant 7 : i32
    %1230 = arith.addi %0, %c7_i32_1297 : i32
    %c1_i32_1298 = arith.constant 1 : i32
    %1231 = arith.addi %1230, %c1_i32_1298 : i32
    %c0_1299 = arith.constant 0 : index
    %c3_1300 = arith.constant 3 : index
    %1232 = arith.index_cast %1231 : i32 to index
    %c1_1301 = arith.constant 1 : index
    %c0_1302 = arith.constant 0 : index
    %1233 = vector.load %arg3[%c0_1299, %c3_1300, %1232, %c1_1301, %c0_1302] : memref<1x4x10x10x4xbf16, #tpu.memory_space<vmem>>, vector<1x1x1x9x4xbf16>
    %1234 = vector.shape_cast %1233 : vector<1x1x1x9x4xbf16> to vector<9x4xbf16>
    %c15_1303 = arith.constant 15 : index
    %c0_1304 = arith.constant 0 : index
    %c0_1305 = arith.constant 0 : index
    %1235 = vector.load %arg4[%c15_1303, %c0_1304, %c0_1305] : memref<16x4x8xbf16, #tpu.memory_space<vmem>>, vector<1x4x8xbf16>
    %1236 = vector.shape_cast %1235 : vector<1x4x8xbf16> to vector<4x8xbf16>
    %cst_1306 = arith.constant dense<0.000000e+00> : vector<9x8xf32>
    %1237 = tpu.matmul %1234, %1236, %cst_1306 {dimension_numbers = #tpu.dot_dimension_numbers<[1], [0], [0], [1], [0, 0, 1, 1], [], []>} : vector<9x4xbf16>, vector<4x8xbf16>, vector<9x8xf32> -> vector<9x8xf32>
    %1238 = arith.addf %1229, %1237 : vector<9x8xf32>
    %1239 = vector.broadcast %1 : vector<1x8xf32> to vector<9x8xf32>
    %1240 = arith.addf %1238, %1239 : vector<9x8xf32>
    %cst_1307 = arith.constant 0.000000e+00 : f32
    %1241 = vector.broadcast %cst_1307 : f32 to vector<9x8xf32>
    %1242 = arith.cmpf oge, %1240, %1241 : vector<9x8xf32>
    %cst_1308 = arith.constant 2.000000e-01 : f32
    %1243 = vector.broadcast %cst_1308 : f32 to vector<9x8xf32>
    %1244 = arith.mulf %1243, %1240 : vector<9x8xf32>
    %1245 = arith.select %1242, %1240, %1244 : vector<9x8xi1>, vector<9x8xf32>
    %1246 = arith.truncf %1245 : vector<9x8xf32> to vector<9x8xbf16>
    %c0_1309 = arith.constant 0 : index
    %c7_1310 = arith.constant 7 : index
    %c0_1311 = arith.constant 0 : index
    %c0_1312 = arith.constant 0 : index
    %1247 = vector.load %arg6[%c0_1309, %c7_1310, %c0_1311, %c0_1312] : memref<1x9x9x8xbf16, #tpu.memory_space<vmem>>, vector<1x1x9x8xbf16>
    %1248 = vector.shape_cast %1247 : vector<1x1x9x8xbf16> to vector<9x8xbf16>
    %1249 = vector.shape_cast %1246 : vector<9x8xbf16> to vector<1x1x9x8xbf16>
    tpu.vector_store %arg6[%c0_1309, %c7_1310, %c0_1311, %c0_1312], %1249 {strides = array<i32>} : memref<1x9x9x8xbf16, #tpu.memory_space<vmem>>, vector<1x1x9x8xbf16>,
    %cst_1313 = arith.constant 0.000000e+00 : f32
    %1250 = vector.broadcast %cst_1313 : f32 to vector<9x8xf32>
    %c8_i32 = arith.constant 8 : i32
    %1251 = arith.addi %0, %c8_i32 : i32
    %c0_i32_1314 = arith.constant 0 : i32
    %1252 = arith.addi %1251, %c0_i32_1314 : i32
    %c0_1315 = arith.constant 0 : index
    %c0_1316 = arith.constant 0 : index
    %1253 = arith.index_cast %1252 : i32 to index
    %c0_1317 = arith.constant 0 : index
    %c0_1318 = arith.constant 0 : index
    %1254 = vector.load %arg3[%c0_1315, %c0_1316, %1253, %c0_1317, %c0_1318] : memref<1x4x10x10x4xbf16, #tpu.memory_space<vmem>>, vector<1x1x1x9x4xbf16>
    %1255 = vector.shape_cast %1254 : vector<1x1x1x9x4xbf16> to vector<9x4xbf16>
    %c0_1319 = arith.constant 0 : index
    %c0_1320 = arith.constant 0 : index
    %c0_1321 = arith.constant 0 : index
    %1256 = vector.load %arg4[%c0_1319, %c0_1320, %c0_1321] : memref<16x4x8xbf16, #tpu.memory_space<vmem>>, vector<1x4x8xbf16>
    %1257 = vector.shape_cast %1256 : vector<1x4x8xbf16> to vector<4x8xbf16>
    %cst_1322 = arith.constant dense<0.000000e+00> : vector<9x8xf32>
    %1258 = tpu.matmul %1255, %1257, %cst_1322 {dimension_numbers = #tpu.dot_dimension_numbers<[1], [0], [0], [1], [0, 0, 1, 1], [], []>} : vector<9x4xbf16>, vector<4x8xbf16>, vector<9x8xf32> -> vector<9x8xf32>
    %1259 = arith.addf %1250, %1258 : vector<9x8xf32>
    %c8_i32_1323 = arith.constant 8 : i32
    %1260 = arith.addi %0, %c8_i32_1323 : i32
    %c0_i32_1324 = arith.constant 0 : i32
    %1261 = arith.addi %1260, %c0_i32_1324 : i32
    %c0_1325 = arith.constant 0 : index
    %c1_1326 = arith.constant 1 : index
    %1262 = arith.index_cast %1261 : i32 to index
    %c0_1327 = arith.constant 0 : index
    %c0_1328 = arith.constant 0 : index
    %1263 = vector.load %arg3[%c0_1325, %c1_1326, %1262, %c0_1327, %c0_1328] : memref<1x4x10x10x4xbf16, #tpu.memory_space<vmem>>, vector<1x1x1x9x4xbf16>
    %1264 = vector.shape_cast %1263 : vector<1x1x1x9x4xbf16> to vector<9x4xbf16>
    %c1_1329 = arith.constant 1 : index
    %c0_1330 = arith.constant 0 : index
    %c0_1331 = arith.constant 0 : index
    %1265 = vector.load %arg4[%c1_1329, %c0_1330, %c0_1331] : memref<16x4x8xbf16, #tpu.memory_space<vmem>>, vector<1x4x8xbf16>
    %1266 = vector.shape_cast %1265 : vector<1x4x8xbf16> to vector<4x8xbf16>
    %cst_1332 = arith.constant dense<0.000000e+00> : vector<9x8xf32>
    %1267 = tpu.matmul %1264, %1266, %cst_1332 {dimension_numbers = #tpu.dot_dimension_numbers<[1], [0], [0], [1], [0, 0, 1, 1], [], []>} : vector<9x4xbf16>, vector<4x8xbf16>, vector<9x8xf32> -> vector<9x8xf32>
    %1268 = arith.addf %1259, %1267 : vector<9x8xf32>
    %c8_i32_1333 = arith.constant 8 : i32
    %1269 = arith.addi %0, %c8_i32_1333 : i32
    %c0_i32_1334 = arith.constant 0 : i32
    %1270 = arith.addi %1269, %c0_i32_1334 : i32
    %c0_1335 = arith.constant 0 : index
    %c0_1336 = arith.constant 0 : index
    %1271 = arith.index_cast %1270 : i32 to index
    %c1_1337 = arith.constant 1 : index
    %c0_1338 = arith.constant 0 : index
    %1272 = vector.load %arg3[%c0_1335, %c0_1336, %1271, %c1_1337, %c0_1338] : memref<1x4x10x10x4xbf16, #tpu.memory_space<vmem>>, vector<1x1x1x9x4xbf16>
    %1273 = vector.shape_cast %1272 : vector<1x1x1x9x4xbf16> to vector<9x4xbf16>
    %c2_1339 = arith.constant 2 : index
    %c0_1340 = arith.constant 0 : index
    %c0_1341 = arith.constant 0 : index
    %1274 = vector.load %arg4[%c2_1339, %c0_1340, %c0_1341] : memref<16x4x8xbf16, #tpu.memory_space<vmem>>, vector<1x4x8xbf16>
    %1275 = vector.shape_cast %1274 : vector<1x4x8xbf16> to vector<4x8xbf16>
    %cst_1342 = arith.constant dense<0.000000e+00> : vector<9x8xf32>
    %1276 = tpu.matmul %1273, %1275, %cst_1342 {dimension_numbers = #tpu.dot_dimension_numbers<[1], [0], [0], [1], [0, 0, 1, 1], [], []>} : vector<9x4xbf16>, vector<4x8xbf16>, vector<9x8xf32> -> vector<9x8xf32>
    %1277 = arith.addf %1268, %1276 : vector<9x8xf32>
    %c8_i32_1343 = arith.constant 8 : i32
    %1278 = arith.addi %0, %c8_i32_1343 : i32
    %c0_i32_1344 = arith.constant 0 : i32
    %1279 = arith.addi %1278, %c0_i32_1344 : i32
    %c0_1345 = arith.constant 0 : index
    %c1_1346 = arith.constant 1 : index
    %1280 = arith.index_cast %1279 : i32 to index
    %c1_1347 = arith.constant 1 : index
    %c0_1348 = arith.constant 0 : index
    %1281 = vector.load %arg3[%c0_1345, %c1_1346, %1280, %c1_1347, %c0_1348] : memref<1x4x10x10x4xbf16, #tpu.memory_space<vmem>>, vector<1x1x1x9x4xbf16>
    %1282 = vector.shape_cast %1281 : vector<1x1x1x9x4xbf16> to vector<9x4xbf16>
    %c3_1349 = arith.constant 3 : index
    %c0_1350 = arith.constant 0 : index
    %c0_1351 = arith.constant 0 : index
    %1283 = vector.load %arg4[%c3_1349, %c0_1350, %c0_1351] : memref<16x4x8xbf16, #tpu.memory_space<vmem>>, vector<1x4x8xbf16>
    %1284 = vector.shape_cast %1283 : vector<1x4x8xbf16> to vector<4x8xbf16>
    %cst_1352 = arith.constant dense<0.000000e+00> : vector<9x8xf32>
    %1285 = tpu.matmul %1282, %1284, %cst_1352 {dimension_numbers = #tpu.dot_dimension_numbers<[1], [0], [0], [1], [0, 0, 1, 1], [], []>} : vector<9x4xbf16>, vector<4x8xbf16>, vector<9x8xf32> -> vector<9x8xf32>
    %1286 = arith.addf %1277, %1285 : vector<9x8xf32>
    %c8_i32_1353 = arith.constant 8 : i32
    %1287 = arith.addi %0, %c8_i32_1353 : i32
    %c0_i32_1354 = arith.constant 0 : i32
    %1288 = arith.addi %1287, %c0_i32_1354 : i32
    %c0_1355 = arith.constant 0 : index
    %c2_1356 = arith.constant 2 : index
    %1289 = arith.index_cast %1288 : i32 to index
    %c0_1357 = arith.constant 0 : index
    %c0_1358 = arith.constant 0 : index
    %1290 = vector.load %arg3[%c0_1355, %c2_1356, %1289, %c0_1357, %c0_1358] : memref<1x4x10x10x4xbf16, #tpu.memory_space<vmem>>, vector<1x1x1x9x4xbf16>
    %1291 = vector.shape_cast %1290 : vector<1x1x1x9x4xbf16> to vector<9x4xbf16>
    %c4_1359 = arith.constant 4 : index
    %c0_1360 = arith.constant 0 : index
    %c0_1361 = arith.constant 0 : index
    %1292 = vector.load %arg4[%c4_1359, %c0_1360, %c0_1361] : memref<16x4x8xbf16, #tpu.memory_space<vmem>>, vector<1x4x8xbf16>
    %1293 = vector.shape_cast %1292 : vector<1x4x8xbf16> to vector<4x8xbf16>
    %cst_1362 = arith.constant dense<0.000000e+00> : vector<9x8xf32>
    %1294 = tpu.matmul %1291, %1293, %cst_1362 {dimension_numbers = #tpu.dot_dimension_numbers<[1], [0], [0], [1], [0, 0, 1, 1], [], []>} : vector<9x4xbf16>, vector<4x8xbf16>, vector<9x8xf32> -> vector<9x8xf32>
    %1295 = arith.addf %1286, %1294 : vector<9x8xf32>
    %c8_i32_1363 = arith.constant 8 : i32
    %1296 = arith.addi %0, %c8_i32_1363 : i32
    %c0_i32_1364 = arith.constant 0 : i32
    %1297 = arith.addi %1296, %c0_i32_1364 : i32
    %c0_1365 = arith.constant 0 : index
    %c3_1366 = arith.constant 3 : index
    %1298 = arith.index_cast %1297 : i32 to index
    %c0_1367 = arith.constant 0 : index
    %c0_1368 = arith.constant 0 : index
    %1299 = vector.load %arg3[%c0_1365, %c3_1366, %1298, %c0_1367, %c0_1368] : memref<1x4x10x10x4xbf16, #tpu.memory_space<vmem>>, vector<1x1x1x9x4xbf16>
    %1300 = vector.shape_cast %1299 : vector<1x1x1x9x4xbf16> to vector<9x4xbf16>
    %c5_1369 = arith.constant 5 : index
    %c0_1370 = arith.constant 0 : index
    %c0_1371 = arith.constant 0 : index
    %1301 = vector.load %arg4[%c5_1369, %c0_1370, %c0_1371] : memref<16x4x8xbf16, #tpu.memory_space<vmem>>, vector<1x4x8xbf16>
    %1302 = vector.shape_cast %1301 : vector<1x4x8xbf16> to vector<4x8xbf16>
    %cst_1372 = arith.constant dense<0.000000e+00> : vector<9x8xf32>
    %1303 = tpu.matmul %1300, %1302, %cst_1372 {dimension_numbers = #tpu.dot_dimension_numbers<[1], [0], [0], [1], [0, 0, 1, 1], [], []>} : vector<9x4xbf16>, vector<4x8xbf16>, vector<9x8xf32> -> vector<9x8xf32>
    %1304 = arith.addf %1295, %1303 : vector<9x8xf32>
    %c8_i32_1373 = arith.constant 8 : i32
    %1305 = arith.addi %0, %c8_i32_1373 : i32
    %c0_i32_1374 = arith.constant 0 : i32
    %1306 = arith.addi %1305, %c0_i32_1374 : i32
    %c0_1375 = arith.constant 0 : index
    %c2_1376 = arith.constant 2 : index
    %1307 = arith.index_cast %1306 : i32 to index
    %c1_1377 = arith.constant 1 : index
    %c0_1378 = arith.constant 0 : index
    %1308 = vector.load %arg3[%c0_1375, %c2_1376, %1307, %c1_1377, %c0_1378] : memref<1x4x10x10x4xbf16, #tpu.memory_space<vmem>>, vector<1x1x1x9x4xbf16>
    %1309 = vector.shape_cast %1308 : vector<1x1x1x9x4xbf16> to vector<9x4xbf16>
    %c6_1379 = arith.constant 6 : index
    %c0_1380 = arith.constant 0 : index
    %c0_1381 = arith.constant 0 : index
    %1310 = vector.load %arg4[%c6_1379, %c0_1380, %c0_1381] : memref<16x4x8xbf16, #tpu.memory_space<vmem>>, vector<1x4x8xbf16>
    %1311 = vector.shape_cast %1310 : vector<1x4x8xbf16> to vector<4x8xbf16>
    %cst_1382 = arith.constant dense<0.000000e+00> : vector<9x8xf32>
    %1312 = tpu.matmul %1309, %1311, %cst_1382 {dimension_numbers = #tpu.dot_dimension_numbers<[1], [0], [0], [1], [0, 0, 1, 1], [], []>} : vector<9x4xbf16>, vector<4x8xbf16>, vector<9x8xf32> -> vector<9x8xf32>
    %1313 = arith.addf %1304, %1312 : vector<9x8xf32>
    %c8_i32_1383 = arith.constant 8 : i32
    %1314 = arith.addi %0, %c8_i32_1383 : i32
    %c0_i32_1384 = arith.constant 0 : i32
    %1315 = arith.addi %1314, %c0_i32_1384 : i32
    %c0_1385 = arith.constant 0 : index
    %c3_1386 = arith.constant 3 : index
    %1316 = arith.index_cast %1315 : i32 to index
    %c1_1387 = arith.constant 1 : index
    %c0_1388 = arith.constant 0 : index
    %1317 = vector.load %arg3[%c0_1385, %c3_1386, %1316, %c1_1387, %c0_1388] : memref<1x4x10x10x4xbf16, #tpu.memory_space<vmem>>, vector<1x1x1x9x4xbf16>
    %1318 = vector.shape_cast %1317 : vector<1x1x1x9x4xbf16> to vector<9x4xbf16>
    %c7_1389 = arith.constant 7 : index
    %c0_1390 = arith.constant 0 : index
    %c0_1391 = arith.constant 0 : index
    %1319 = vector.load %arg4[%c7_1389, %c0_1390, %c0_1391] : memref<16x4x8xbf16, #tpu.memory_space<vmem>>, vector<1x4x8xbf16>
    %1320 = vector.shape_cast %1319 : vector<1x4x8xbf16> to vector<4x8xbf16>
    %cst_1392 = arith.constant dense<0.000000e+00> : vector<9x8xf32>
    %1321 = tpu.matmul %1318, %1320, %cst_1392 {dimension_numbers = #tpu.dot_dimension_numbers<[1], [0], [0], [1], [0, 0, 1, 1], [], []>} : vector<9x4xbf16>, vector<4x8xbf16>, vector<9x8xf32> -> vector<9x8xf32>
    %1322 = arith.addf %1313, %1321 : vector<9x8xf32>
    %c8_i32_1393 = arith.constant 8 : i32
    %1323 = arith.addi %0, %c8_i32_1393 : i32
    %c1_i32_1394 = arith.constant 1 : i32
    %1324 = arith.addi %1323, %c1_i32_1394 : i32
    %c0_1395 = arith.constant 0 : index
    %c0_1396 = arith.constant 0 : index
    %1325 = arith.index_cast %1324 : i32 to index
    %c0_1397 = arith.constant 0 : index
    %c0_1398 = arith.constant 0 : index
    %1326 = vector.load %arg3[%c0_1395, %c0_1396, %1325, %c0_1397, %c0_1398] : memref<1x4x10x10x4xbf16, #tpu.memory_space<vmem>>, vector<1x1x1x9x4xbf16>
    %1327 = vector.shape_cast %1326 : vector<1x1x1x9x4xbf16> to vector<9x4xbf16>
    %c8_1399 = arith.constant 8 : index
    %c0_1400 = arith.constant 0 : index
    %c0_1401 = arith.constant 0 : index
    %1328 = vector.load %arg4[%c8_1399, %c0_1400, %c0_1401] : memref<16x4x8xbf16, #tpu.memory_space<vmem>>, vector<1x4x8xbf16>
    %1329 = vector.shape_cast %1328 : vector<1x4x8xbf16> to vector<4x8xbf16>
    %cst_1402 = arith.constant dense<0.000000e+00> : vector<9x8xf32>
    %1330 = tpu.matmul %1327, %1329, %cst_1402 {dimension_numbers = #tpu.dot_dimension_numbers<[1], [0], [0], [1], [0, 0, 1, 1], [], []>} : vector<9x4xbf16>, vector<4x8xbf16>, vector<9x8xf32> -> vector<9x8xf32>
    %1331 = arith.addf %1322, %1330 : vector<9x8xf32>
    %c8_i32_1403 = arith.constant 8 : i32
    %1332 = arith.addi %0, %c8_i32_1403 : i32
    %c1_i32_1404 = arith.constant 1 : i32
    %1333 = arith.addi %1332, %c1_i32_1404 : i32
    %c0_1405 = arith.constant 0 : index
    %c1_1406 = arith.constant 1 : index
    %1334 = arith.index_cast %1333 : i32 to index
    %c0_1407 = arith.constant 0 : index
    %c0_1408 = arith.constant 0 : index
    %1335 = vector.load %arg3[%c0_1405, %c1_1406, %1334, %c0_1407, %c0_1408] : memref<1x4x10x10x4xbf16, #tpu.memory_space<vmem>>, vector<1x1x1x9x4xbf16>
    %1336 = vector.shape_cast %1335 : vector<1x1x1x9x4xbf16> to vector<9x4xbf16>
    %c9_1409 = arith.constant 9 : index
    %c0_1410 = arith.constant 0 : index
    %c0_1411 = arith.constant 0 : index
    %1337 = vector.load %arg4[%c9_1409, %c0_1410, %c0_1411] : memref<16x4x8xbf16, #tpu.memory_space<vmem>>, vector<1x4x8xbf16>
    %1338 = vector.shape_cast %1337 : vector<1x4x8xbf16> to vector<4x8xbf16>
    %cst_1412 = arith.constant dense<0.000000e+00> : vector<9x8xf32>
    %1339 = tpu.matmul %1336, %1338, %cst_1412 {dimension_numbers = #tpu.dot_dimension_numbers<[1], [0], [0], [1], [0, 0, 1, 1], [], []>} : vector<9x4xbf16>, vector<4x8xbf16>, vector<9x8xf32> -> vector<9x8xf32>
    %1340 = arith.addf %1331, %1339 : vector<9x8xf32>
    %c8_i32_1413 = arith.constant 8 : i32
    %1341 = arith.addi %0, %c8_i32_1413 : i32
    %c1_i32_1414 = arith.constant 1 : i32
    %1342 = arith.addi %1341, %c1_i32_1414 : i32
    %c0_1415 = arith.constant 0 : index
    %c0_1416 = arith.constant 0 : index
    %1343 = arith.index_cast %1342 : i32 to index
    %c1_1417 = arith.constant 1 : index
    %c0_1418 = arith.constant 0 : index
    %1344 = vector.load %arg3[%c0_1415, %c0_1416, %1343, %c1_1417, %c0_1418] : memref<1x4x10x10x4xbf16, #tpu.memory_space<vmem>>, vector<1x1x1x9x4xbf16>
    %1345 = vector.shape_cast %1344 : vector<1x1x1x9x4xbf16> to vector<9x4xbf16>
    %c10_1419 = arith.constant 10 : index
    %c0_1420 = arith.constant 0 : index
    %c0_1421 = arith.constant 0 : index
    %1346 = vector.load %arg4[%c10_1419, %c0_1420, %c0_1421] : memref<16x4x8xbf16, #tpu.memory_space<vmem>>, vector<1x4x8xbf16>
    %1347 = vector.shape_cast %1346 : vector<1x4x8xbf16> to vector<4x8xbf16>
    %cst_1422 = arith.constant dense<0.000000e+00> : vector<9x8xf32>
    %1348 = tpu.matmul %1345, %1347, %cst_1422 {dimension_numbers = #tpu.dot_dimension_numbers<[1], [0], [0], [1], [0, 0, 1, 1], [], []>} : vector<9x4xbf16>, vector<4x8xbf16>, vector<9x8xf32> -> vector<9x8xf32>
    %1349 = arith.addf %1340, %1348 : vector<9x8xf32>
    %c8_i32_1423 = arith.constant 8 : i32
    %1350 = arith.addi %0, %c8_i32_1423 : i32
    %c1_i32_1424 = arith.constant 1 : i32
    %1351 = arith.addi %1350, %c1_i32_1424 : i32
    %c0_1425 = arith.constant 0 : index
    %c1_1426 = arith.constant 1 : index
    %1352 = arith.index_cast %1351 : i32 to index
    %c1_1427 = arith.constant 1 : index
    %c0_1428 = arith.constant 0 : index
    %1353 = vector.load %arg3[%c0_1425, %c1_1426, %1352, %c1_1427, %c0_1428] : memref<1x4x10x10x4xbf16, #tpu.memory_space<vmem>>, vector<1x1x1x9x4xbf16>
    %1354 = vector.shape_cast %1353 : vector<1x1x1x9x4xbf16> to vector<9x4xbf16>
    %c11_1429 = arith.constant 11 : index
    %c0_1430 = arith.constant 0 : index
    %c0_1431 = arith.constant 0 : index
    %1355 = vector.load %arg4[%c11_1429, %c0_1430, %c0_1431] : memref<16x4x8xbf16, #tpu.memory_space<vmem>>, vector<1x4x8xbf16>
    %1356 = vector.shape_cast %1355 : vector<1x4x8xbf16> to vector<4x8xbf16>
    %cst_1432 = arith.constant dense<0.000000e+00> : vector<9x8xf32>
    %1357 = tpu.matmul %1354, %1356, %cst_1432 {dimension_numbers = #tpu.dot_dimension_numbers<[1], [0], [0], [1], [0, 0, 1, 1], [], []>} : vector<9x4xbf16>, vector<4x8xbf16>, vector<9x8xf32> -> vector<9x8xf32>
    %1358 = arith.addf %1349, %1357 : vector<9x8xf32>
    %c8_i32_1433 = arith.constant 8 : i32
    %1359 = arith.addi %0, %c8_i32_1433 : i32
    %c1_i32_1434 = arith.constant 1 : i32
    %1360 = arith.addi %1359, %c1_i32_1434 : i32
    %c0_1435 = arith.constant 0 : index
    %c2_1436 = arith.constant 2 : index
    %1361 = arith.index_cast %1360 : i32 to index
    %c0_1437 = arith.constant 0 : index
    %c0_1438 = arith.constant 0 : index
    %1362 = vector.load %arg3[%c0_1435, %c2_1436, %1361, %c0_1437, %c0_1438] : memref<1x4x10x10x4xbf16, #tpu.memory_space<vmem>>, vector<1x1x1x9x4xbf16>
    %1363 = vector.shape_cast %1362 : vector<1x1x1x9x4xbf16> to vector<9x4xbf16>
    %c12_1439 = arith.constant 12 : index
    %c0_1440 = arith.constant 0 : index
    %c0_1441 = arith.constant 0 : index
    %1364 = vector.load %arg4[%c12_1439, %c0_1440, %c0_1441] : memref<16x4x8xbf16, #tpu.memory_space<vmem>>, vector<1x4x8xbf16>
    %1365 = vector.shape_cast %1364 : vector<1x4x8xbf16> to vector<4x8xbf16>
    %cst_1442 = arith.constant dense<0.000000e+00> : vector<9x8xf32>
    %1366 = tpu.matmul %1363, %1365, %cst_1442 {dimension_numbers = #tpu.dot_dimension_numbers<[1], [0], [0], [1], [0, 0, 1, 1], [], []>} : vector<9x4xbf16>, vector<4x8xbf16>, vector<9x8xf32> -> vector<9x8xf32>
    %1367 = arith.addf %1358, %1366 : vector<9x8xf32>
    %c8_i32_1443 = arith.constant 8 : i32
    %1368 = arith.addi %0, %c8_i32_1443 : i32
    %c1_i32_1444 = arith.constant 1 : i32
    %1369 = arith.addi %1368, %c1_i32_1444 : i32
    %c0_1445 = arith.constant 0 : index
    %c3_1446 = arith.constant 3 : index
    %1370 = arith.index_cast %1369 : i32 to index
    %c0_1447 = arith.constant 0 : index
    %c0_1448 = arith.constant 0 : index
    %1371 = vector.load %arg3[%c0_1445, %c3_1446, %1370, %c0_1447, %c0_1448] : memref<1x4x10x10x4xbf16, #tpu.memory_space<vmem>>, vector<1x1x1x9x4xbf16>
    %1372 = vector.shape_cast %1371 : vector<1x1x1x9x4xbf16> to vector<9x4xbf16>
    %c13_1449 = arith.constant 13 : index
    %c0_1450 = arith.constant 0 : index
    %c0_1451 = arith.constant 0 : index
    %1373 = vector.load %arg4[%c13_1449, %c0_1450, %c0_1451] : memref<16x4x8xbf16, #tpu.memory_space<vmem>>, vector<1x4x8xbf16>
    %1374 = vector.shape_cast %1373 : vector<1x4x8xbf16> to vector<4x8xbf16>
    %cst_1452 = arith.constant dense<0.000000e+00> : vector<9x8xf32>
    %1375 = tpu.matmul %1372, %1374, %cst_1452 {dimension_numbers = #tpu.dot_dimension_numbers<[1], [0], [0], [1], [0, 0, 1, 1], [], []>} : vector<9x4xbf16>, vector<4x8xbf16>, vector<9x8xf32> -> vector<9x8xf32>
    %1376 = arith.addf %1367, %1375 : vector<9x8xf32>
    %c8_i32_1453 = arith.constant 8 : i32
    %1377 = arith.addi %0, %c8_i32_1453 : i32
    %c1_i32_1454 = arith.constant 1 : i32
    %1378 = arith.addi %1377, %c1_i32_1454 : i32
    %c0_1455 = arith.constant 0 : index
    %c2_1456 = arith.constant 2 : index
    %1379 = arith.index_cast %1378 : i32 to index
    %c1_1457 = arith.constant 1 : index
    %c0_1458 = arith.constant 0 : index
    %1380 = vector.load %arg3[%c0_1455, %c2_1456, %1379, %c1_1457, %c0_1458] : memref<1x4x10x10x4xbf16, #tpu.memory_space<vmem>>, vector<1x1x1x9x4xbf16>
    %1381 = vector.shape_cast %1380 : vector<1x1x1x9x4xbf16> to vector<9x4xbf16>
    %c14_1459 = arith.constant 14 : index
    %c0_1460 = arith.constant 0 : index
    %c0_1461 = arith.constant 0 : index
    %1382 = vector.load %arg4[%c14_1459, %c0_1460, %c0_1461] : memref<16x4x8xbf16, #tpu.memory_space<vmem>>, vector<1x4x8xbf16>
    %1383 = vector.shape_cast %1382 : vector<1x4x8xbf16> to vector<4x8xbf16>
    %cst_1462 = arith.constant dense<0.000000e+00> : vector<9x8xf32>
    %1384 = tpu.matmul %1381, %1383, %cst_1462 {dimension_numbers = #tpu.dot_dimension_numbers<[1], [0], [0], [1], [0, 0, 1, 1], [], []>} : vector<9x4xbf16>, vector<4x8xbf16>, vector<9x8xf32> -> vector<9x8xf32>
    %1385 = arith.addf %1376, %1384 : vector<9x8xf32>
    %c8_i32_1463 = arith.constant 8 : i32
    %1386 = arith.addi %0, %c8_i32_1463 : i32
    %c1_i32_1464 = arith.constant 1 : i32
    %1387 = arith.addi %1386, %c1_i32_1464 : i32
    %c0_1465 = arith.constant 0 : index
    %c3_1466 = arith.constant 3 : index
    %1388 = arith.index_cast %1387 : i32 to index
    %c1_1467 = arith.constant 1 : index
    %c0_1468 = arith.constant 0 : index
    %1389 = vector.load %arg3[%c0_1465, %c3_1466, %1388, %c1_1467, %c0_1468] : memref<1x4x10x10x4xbf16, #tpu.memory_space<vmem>>, vector<1x1x1x9x4xbf16>
    %1390 = vector.shape_cast %1389 : vector<1x1x1x9x4xbf16> to vector<9x4xbf16>
    %c15_1469 = arith.constant 15 : index
    %c0_1470 = arith.constant 0 : index
    %c0_1471 = arith.constant 0 : index
    %1391 = vector.load %arg4[%c15_1469, %c0_1470, %c0_1471] : memref<16x4x8xbf16, #tpu.memory_space<vmem>>, vector<1x4x8xbf16>
    %1392 = vector.shape_cast %1391 : vector<1x4x8xbf16> to vector<4x8xbf16>
    %cst_1472 = arith.constant dense<0.000000e+00> : vector<9x8xf32>
    %1393 = tpu.matmul %1390, %1392, %cst_1472 {dimension_numbers = #tpu.dot_dimension_numbers<[1], [0], [0], [1], [0, 0, 1, 1], [], []>} : vector<9x4xbf16>, vector<4x8xbf16>, vector<9x8xf32> -> vector<9x8xf32>
    %1394 = arith.addf %1385, %1393 : vector<9x8xf32>
    %1395 = vector.broadcast %1 : vector<1x8xf32> to vector<9x8xf32>
    %1396 = arith.addf %1394, %1395 : vector<9x8xf32>
    %cst_1473 = arith.constant 0.000000e+00 : f32
    %1397 = vector.broadcast %cst_1473 : f32 to vector<9x8xf32>
    %1398 = arith.cmpf oge, %1396, %1397 : vector<9x8xf32>
    %cst_1474 = arith.constant 2.000000e-01 : f32
    %1399 = vector.broadcast %cst_1474 : f32 to vector<9x8xf32>
    %1400 = arith.mulf %1399, %1396 : vector<9x8xf32>
    %1401 = arith.select %1398, %1396, %1400 : vector<9x8xi1>, vector<9x8xf32>
    %1402 = arith.truncf %1401 : vector<9x8xf32> to vector<9x8xbf16>
    %c0_1475 = arith.constant 0 : index
    %c8_1476 = arith.constant 8 : index
    %c0_1477 = arith.constant 0 : index
    %c0_1478 = arith.constant 0 : index
    %1403 = vector.load %arg6[%c0_1475, %c8_1476, %c0_1477, %c0_1478] : memref<1x9x9x8xbf16, #tpu.memory_space<vmem>>, vector<1x1x9x8xbf16>
    %1404 = vector.shape_cast %1403 : vector<1x1x9x8xbf16> to vector<9x8xbf16>
    %1405 = vector.shape_cast %1402 : vector<9x8xbf16> to vector<1x1x9x8xbf16>
    tpu.vector_store %arg6[%c0_1475, %c8_1476, %c0_1477, %c0_1478], %1405 {strides = array<i32>} : memref<1x9x9x8xbf16, #tpu.memory_space<vmem>>, vector<1x1x9x8xbf16>,
    return
  }
  func.func @transform_0(%arg0: i32, %arg1: i32, %arg2: i32) -> (i32, i32, i32, i32, i32) {
    %c0_i32 = arith.constant 0 : i32
    %c0_i32_0 = arith.constant 0 : i32
    %c0_i32_1 = arith.constant 0 : i32
    %c0_i32_2 = arith.constant 0 : i32
    %c0_i32_3 = arith.constant 0 : i32
    return %arg0, %c0_i32, %c0_i32_0, %c0_i32_1, %c0_i32_2 : i32, i32, i32, i32, i32
  }
  func.func @transform_1(%arg0: i32, %arg1: i32, %arg2: i32) -> (i32, i32, i32) {
    %c0_i32 = arith.constant 0 : i32
    %c0_i32_0 = arith.constant 0 : i32
    %c0_i32_1 = arith.constant 0 : i32
    return %c0_i32, %c0_i32_0, %arg1 : i32, i32, i32
  }
  func.func @transform_2(%arg0: i32, %arg1: i32, %arg2: i32) -> (i32, i32) {
    %c0_i32 = arith.constant 0 : i32
    %c0_i32_0 = arith.constant 0 : i32
    return %c0_i32, %arg1 : i32, i32
  }
  func.func @transform_3(%arg0: i32, %arg1: i32, %arg2: i32) -> (i32, i32, i32, i32) {
    %c0_i32 = arith.constant 0 : i32
    %c0_i32_0 = arith.constant 0 : i32
    return %arg0, %arg2, %c0_i32, %arg1 : i32, i32, i32, i32
  }
}

</mosaic_0001>

<bundles_post_ra>
// kernel: tpu_custom_call.1
= control target key start
LH: loop header
LB: loop body
LE: loop exit
PB: predicated region body
PF: predicated region fallthrough
CT: control target
= control target key end

     0   :  { %s10866_s12 = smov 0   ;;  %s10868_s13 = smov 0   ;;  %s12224_s0 = inlined_call_operand.vmem [shape: bf16[2,4,10,10,4], index: 0, kind: input, shape index: {}]   ;;  %s12225_s1 = inlined_call_operand.vmem [shape: bf16[16,4,8], index: 1, kind: input, shape index: {}]   ;;  %s12226_s2 = inlined_call_operand.vmem [shape: f32[1,8], index: 2, kind: input, shape index: {}]   ;;  %s12227_s3 = inlined_call_operand.vmem [shape: bf16[2,9,9,8], index: 3, kind: output, shape index: {}]  }
   0x1   :  { %s10870_s14 = smov 0  }
   0x2 LB: > { %s32_s15 = sadd.s32 1, %s10838_s13  ;;  %p9007_p0 = scmp.ge.s32.totalorder %s10842_s14, 1  ;;  %s10842_s14 = sphi %s10870_s14, %s13_s14   ;;  %s10838_s13 = sphi %s10868_s13, %s12231_s13   ;;  %s10834_s12 = sphi %s10866_s12, %s12230_s12  }
   0x3   : > { %p34_p1 = scmp.ge.s32.totalorder %s32_s15, 2  ;;  %p177_p2 = scmp.lt.s32.totalorder %s10842_s14, 3 }
   0x5   : > { %s12233_s15 = smov (%p34_p1, %s32_s15), 0  ;;  %p178_p3 = pnand %p9007_p0, %p177_p2 }
   0x6   : > { %v9012_v0 = vld [vmem:[%s12225_s1 + $0x2] sm:$0x3] (!%p178_p3)  ;;  %vm267_vm0 = vcmask (!%p178_p3), 1041408   ;;  %v250_v1 = vld [vmem:[%s12225_s1] sm:$0x3] (!%p178_p3)  ;;  %v10844_v2 = vmov (!%p178_p3), 0.0  }
   0x7   : > { %181 = sbr.rel (%p178_p3) target bundleno = 814 (0x32e), region = 32  ;;  %9854 = vmatprep.subr.bf16.mxu0 (!%p178_p3), %v10844_v2  ;;  %v269_v3 = vsel (!%p178_p3), %vm267_vm0, %v9012_v0, 0  ;;  %9860 = vmatprep.subr.bf16.mxu1 (!%p178_p3), %v10844_v2  ;;  %v321_v4 = vsel (!%p178_p3), %vm267_vm0, %v250_v1, 0  ;;  %p216_p4 = scmp.lt.s32.totalorder (!%p178_p3), %s10834_s12, 1  ;;  %vm10845_vm1 = vmmov (!%p178_p3), 0   ;;  %vm263_vm2 = vcmask (!%p178_p3), 31744  }
   0x8   : > { %9855 = vmatpush3.bf16.msra.mxu0 (!%p178_p3), %v269_v3  ;;  %9861 = vmatpush3.bf16.msra.mxu1 (!%p178_p3), %v321_v4  ;;  %v9017_v5 = vld [vmem:[%s12225_s1 + $0x4] sm:$0x3] (!%p178_p3)  ;;  %v9019_v6 = vld [vmem:[%s12225_s1 + $0x6] sm:$0x3] (!%p178_p3)  ;;  %v9023_v17 = vld [vmem:[%s12225_s1 + $0x8] sm:$0x3] (!%p178_p3) }
   0x9   : > { %9856 = vmatprep.mubr.msk.bf16.mxu0 (!%p178_p3), %vm10845_vm1, %v10844_v2  ;;  %9862 = vmatprep.mubr.msk.bf16.mxu1 (!%p178_p3), %vm10845_vm1, %v10844_v2  ;;  %v376_v7 = vsel (!%p178_p3), %vm267_vm0, %v9017_v5, 0  ;;  %v433_v8 = vsel (!%p178_p3), %vm267_vm0, %v9019_v6, 0  ;;  %v9028_v18 = vld [vmem:[%s12225_s1 + $0xa] sm:$0x3] (!%p178_p3)  ;;  %v494_v21 = vsel (!%p178_p3), %vm267_vm0, %v9023_v17, 0  ;;  %vm1209_vm3 = vcmask (!%p178_p3), 60416  }
   0xa   : > { %9866 = vmatprep.subr.bf16.mxu0 (!%p178_p3), %v10844_v2  ;;  %9872 = vmatprep.subr.bf16.mxu1 (!%p178_p3), %v10844_v2  ;;  %v555_v22 = vsel (!%p178_p3), %vm267_vm0, %v9028_v18, 0  ;;  %v9031_v25 = vld [vmem:[%s12225_s1 + $0xc] sm:$0x3] (!%p178_p3)  ;;  %v9033_v26 = vld [vmem:[%s12225_s1 + $0xe] sm:$0x3] (!%p178_p3)  ;;  %vm1211_vm6 = vcmask (!%p178_p3), 57344  }
   0xb   : > { %v612_v29 = vsel (!%p178_p3), %vm267_vm0, %v9031_v25, 0  ;;  %v669_v30 = vsel (!%p178_p3), %vm267_vm0, %v9033_v26, 0  ;;  %v9037_v35 = vld [vmem:[%s12225_s1 + $0x10] sm:$0x3] (!%p178_p3)  ;;  %v9042_v37 = vld [vmem:[%s12225_s1 + $0x12] sm:$0x3] (!%p178_p3) }
   0xc   : > { %v731_v39 = vsel (!%p178_p3), %vm267_vm0, %v9037_v35, 0  ;;  %v792_v40 = vsel (!%p178_p3), %vm267_vm0, %v9042_v37, 0  ;;  %v9045_v43 = vld [vmem:[%s12225_s1 + $0x14] sm:$0x3] (!%p178_p3)  ;;  %v9047_v44 = vld [vmem:[%s12225_s1 + $0x16] sm:$0x3] (!%p178_p3) }
   0xd   : > { %v849_v47 = vsel (!%p178_p3), %vm267_vm0, %v9045_v43, 0  ;;  %v906_v48 = vsel (!%p178_p3), %vm267_vm0, %v9047_v44, 0  ;;  %v9051_v53 = vld [vmem:[%s12225_s1 + $0x18] sm:$0x3] (!%p178_p3)  ;;  %v9056_v55 = vld [vmem:[%s12225_s1 + $0x1a] sm:$0x3] (!%p178_p3) }
   0xe   : > { %s12235_s12 = smov (!%p216_p4, %s10834_s12), 1  ;;  %v967_v57 = vsel %vm267_vm0, %v9051_v53, 0  ;;  %v1028_v58 = vsel %vm267_vm0, %v9056_v55, 0  ;;  %v9059_v61 = vld [vmem:[%s12225_s1 + $0x1c] sm:$0x3] }
   0xf   : > { %s10718_s24 = smul.u32 320, %s12235_s12  ;;  %v9061_v62 = vld [vmem:[%s12225_s1 + $0x1e] sm:$0x3]  ;;  %v1085_v1 = vsel %vm267_vm0, %v9059_v61, 0  ;;  %v9070_v6 = vld [vmem:[%s12225_s1 + $0x2] sm:$0x3] }
  0x10   : > { %v1142_v3 = vsel %vm267_vm0, %v9061_v62, 0  ;;  %v9081_v26 = vld [vmem:[%s12225_s1 + $0x8] sm:$0x3]  ;;  %v9091_v35 = vld [vmem:[%s12225_s1 + $0xe] sm:$0x3]  ;;  %s10719_s7 = smul.u32 72, %s12235_s12 }
  0x11   : > { %s10912_s27 = scalar_lea.vmem %s12224_s0, %s10718_s24  ;;  %v9095_v44 = vld [vmem:[%s12225_s1 + $0x10] sm:$0x3]  ;;  %v9105_v53 = vld [vmem:[%s12225_s1 + $0x16] sm:$0x3]  ;;  %v9109_v62 = vld [vmem:[%s12225_s1 + $0x18] sm:$0x3] }
  0x12   : > { %v10746_v9 = vld [vmem:[%s10912_s27 + $0x50] sm:$0x1f]   ;;  %v10747_v10 = vld [vmem:[%s10912_s27] sm:$0x1f]   ;;  %v10750_v41 = vld [vmem:[%s10912_s27 + $0x8] sm:$0x1f]   ;;  %s11511_s9 = scalar_lea.vmem %s12227_s3, %s10719_s7 }
  0x13   : > { %9857 = vmatmul.mubr.msk.bf16.vlgmr.msra.gmra.mrb[0].mxu0 %vm263_vm2, %v10746_v9  ;;  %v425_v11 = vshll.u32 %v10746_v9, 16  ;;  %v423_v12 = vshrl.u32 %v10746_v9, 16  ;;  %9863 = vmatmul.mubr.msk.bf16.vlgmr.msra.gmra.mrb[0].mxu1 %vm263_vm2, %v10747_v10  ;;  %v366_v13 = vshrl.u32 %v10747_v10, 16  ;;  %v368_v14 = vshll.u32 %v10747_v10, 16  ;;  %v10748_v23 = vld [vmem:[%s10912_s27 + $0xa0] sm:$0x1f]  }
  0x14   : > { %9867 = vmatpush3.bf16.msra.mxu0 %v376_v7  ;;  %9873 = vmatpush3.bf16.msra.mxu1 %v433_v8  ;;  %v10749_v24 = vld [vmem:[%s10912_s27 + $0xf0] sm:$0x1f]   ;;  %v604_v27 = vshll.u32 %v10748_v23, 16  ;;  %v602_v31 = vshrl.u32 %v10748_v23, 16  ;;  %v10751_v42 = vld [vmem:[%s10912_s27 + $0x58] sm:$0x1f]  }
  0x15   : > { %v427_v15 = vrot.slane %v425_v11, 1  ;;  %9868 = vmatprep.mubr.msk.bf16.mxu0 %vm10845_vm1, %v10844_v2  ;;  %v370_v16 = vrot.slane %v368_v14, 1  ;;  %9874 = vmatprep.mubr.msk.bf16.mxu1 %vm10845_vm1, %v10844_v2  ;;  %v661_v28 = vshll.u32 %v10749_v24, 16  ;;  %v659_v33 = vshrl.u32 %v10749_v24, 16  ;;  %v10752_v59 = vld [vmem:[%s10912_s27 + $0xa8] sm:$0x1f]  }
  0x16   : > { %9878 = vmatprep.subr.bf16.mxu0 %v10844_v2  ;;  %9884 = vmatprep.subr.bf16.mxu1 %v10844_v2  ;;  %v606_v32 = vrot.slane %v604_v27, 1  ;;  %v841_v45 = vshll.u32 %v10750_v41, 16  ;;  %v898_v46 = vshll.u32 %v10751_v42, 16  ;;  %v839_v49 = vshrl.u32 %v10750_v41, 16  ;;  %v10753_v60 = vld [vmem:[%s10912_s27 + $0xf8] sm:$0x1f]  }
  0x17   : > { %v371_v19 = vor.u32 %v370_v16, %v366_v13  ;;  %v428_v20 = vor.u32 %v427_v15, %v423_v12  ;;  %v663_v34 = vrot.slane %v661_v28, 1  ;;  %v896_v51 = vshrl.u32 %v10751_v42, 16  ;;  %v1219_v9 = vld [vmem:[%s12225_s1] sm:$0x3]  ;;  %v9075_v14 = vld [vmem:[%s12225_s1 + $0x4] sm:$0x3] }
  0x18   : > { %v607_v36 = vor.u32 %v606_v32, %v602_v31  ;;  %v843_v50 = vrot.slane %v841_v45, 1  ;;  %v900_v52 = vrot.slane %v898_v46, 1  ;;  %v1077_v63 = vshll.u32 %v10752_v59, 16  ;;  %v10754_v15 = vld [vmem:[%s10912_s27 + $0x58] sm:$0x1f]  }
  0x19   : > { %v664_v38 = vor.u32 %v663_v34, %v659_v33  ;;  %v1134_v0 = vshll.u32 %v10753_v60, 16  ;;  %v1075_v4 = vshrl.u32 %v10752_v59, 16  ;;  %v1132_v7 = vshrl.u32 %v10753_v60, 16  ;;  %v9077_v16 = vld [vmem:[%s12225_s1 + $0x6] sm:$0x3] }
  0x1a   : > { %v844_v54 = vor.u32 %v843_v50, %v839_v49  ;;  %v901_v56 = vor.u32 %v900_v52, %v896_v51  ;;  %v1079_v5 = vrot.slane %v1077_v63, 1  ;;  %v1232_v11 = vsel %vm267_vm0, %v9070_v6, 0  ;;  %v10755_v17 = vld [vmem:[%s10912_s27 + $0x8] sm:$0x1f]   ;;  %v10757_v34 = vld [vmem:[%s10912_s27 + $0xf8] sm:$0x1f]  }
  0x1b   : > { %9869 = vmatmul.mubr.msk.bf16.vlgmr.msra.gmra.mrb[4].mxu0 %vm263_vm2, %v371_v19  ;;  %9875 = vmatmul.mubr.msk.bf16.vlgmr.msra.gmra.mrb[4].mxu1 %vm263_vm2, %v428_v20  ;;  %v1136_v8 = vrot.slane %v1134_v0, 1  ;;  %v1284_v12 = vsel %vm267_vm0, %v1219_v9, 0  ;;  %v1338_v18 = vsel %vm267_vm0, %v9075_v14, 0  ;;  %v1386_v19 = vshll.u32 %v10754_v15, 16  ;;  %v9086_v27 = vld [vmem:[%s12225_s1 + $0xa] sm:$0x3] }
  0x1c   : > { %9879 = vmatpush3.bf16.msra.mxu0 %v494_v21  ;;  %9885 = vmatpush3.bf16.msra.mxu1 %v555_v22  ;;  %v1080_v10 = vor.u32 %v1079_v5, %v1075_v4  ;;  %v1394_v20 = vsel %vm267_vm0, %v9077_v16, 0  ;;  %v1330_v21 = vshll.u32 %v10755_v17, 16  ;;  %v1328_v22 = vshrl.u32 %v10755_v17, 16  ;;  %v10756_v32 = vld [vmem:[%s10912_s27 + $0xa8] sm:$0x1f]  }
  0x1d   : > { %9880 = vmatprep.mubr.msk.bf16.mxu0 %vm10845_vm1, %v10844_v2  ;;  %9886 = vmatprep.mubr.msk.bf16.mxu1 %vm10845_vm1, %v10844_v2  ;;  %v1137_v13 = vor.u32 %v1136_v8, %v1132_v7  ;;  %v1388_v25 = vrot.slane %v1386_v19, 1  ;;  %v1508_v31 = vsel %vm267_vm0, %v9086_v27, 0  ;;  %v9089_v33 = vld [vmem:[%s12225_s1 + $0xc] sm:$0x3]  ;;  %v1556_v37 = vshll.u32 %v10756_v32, 16 }
  0x1e   : > { %9890 = vmatprep.subr.bf16.mxu0 %v10844_v2  ;;  %9896 = vmatprep.subr.bf16.mxu1 %v10844_v2  ;;  %v9100_v45 = vld [vmem:[%s12225_s1 + $0x12] sm:$0x3]  ;;  %v10759_v51 = vld [vmem:[%s10912_s27 + $0x60] sm:$0x1f]   ;;  %v9103_v52 = vld [vmem:[%s12225_s1 + $0x14] sm:$0x3] }
  0x1f   : > { %v1741_v49 = vsel %vm267_vm0, %v9100_v45, 0  ;;  %v10758_v50 = vld [vmem:[%s10912_s27 + $0x10] sm:$0x1f]   ;;  %v1845_v55 = vshll.u32 %v10759_v51, 16  ;;  %v9114_v0 = vld [vmem:[%s12225_s1 + $0x1a] sm:$0x3] }
  0x20   : > { %v1973_v4 = vsel %vm267_vm0, %v9114_v0, 0  ;;  %v10760_v5 = vld [vmem:[%s10912_s27 + $0xb0] sm:$0x1f]   ;;  %v10761_v6 = vld [vmem:[%s10912_s27 + $0x100] sm:$0x1f]  }
  0x21   : > { %v1847_v61 = vrot.slane %v1845_v55, 1  ;;  %v9117_v7 = vld [vmem:[%s12225_s1 + $0x1c] sm:$0x3]  ;;  %v9119_v8 = vld [vmem:[%s12225_s1 + $0x1e] sm:$0x3]  ;;  %v2021_v9 = vshll.u32 %v10760_v5, 16 }
  0x22   : > { %v2153_v19 = vld [vmem:[%s12225_s1] sm:$0x3]  ;;  %v9160_v55 = vld [vmem:[%s12225_s1 + $0x12] sm:$0x3]  ;;  %vm1212_vm5 = vsmask.f32 256 }
  0x23   : > { %9881 = vmatmul.mubr.msk.bf16.vlgmr.msra.gmra.mrb[8].mxu0 %vm263_vm2, %v10748_v23  ;;  %9887 = vmatmul.mubr.msk.bf16.vlgmr.msra.gmra.mrb[8].mxu1 %vm263_vm2, %v10749_v24  ;;  %v1332_v23 = vrot.slane %v1330_v21, 1  ;;  %v1384_v24 = vshrl.u32 %v10754_v15, 16  ;;  %v2023_v14 = vrot.slane %v2021_v9, 1  ;;  %vm11525_vm8 = vmand %vm1211_vm6, %vm1212_vm5 }
  0x24   : > { %9891 = vmatpush3.bf16.msra.mxu0 %v612_v29  ;;  %9897 = vmatpush3.bf16.msra.mxu1 %v669_v30  ;;  %v1451_v30 = vsel %vm267_vm0, %v9081_v26, 0  ;;  %v9137_v26 = vld [vmem:[%s12225_s1 + $0x6] sm:$0x3] }
  0x25   : > { %9892 = vmatprep.mubr.msk.bf16.mxu0 %vm10845_vm1, %v10844_v2  ;;  %9898 = vmatprep.mubr.msk.bf16.mxu1 %vm10845_vm1, %v10844_v2  ;;  %v1333_v28 = vor.u32 %v1332_v23, %v1328_v22  ;;  %v1389_v29 = vor.u32 %v1388_v25, %v1384_v24  ;;  %v2218_v22 = vsel %vm267_vm0, %v2153_v19, 0  ;;  %v10763_v23 = vld [vmem:[%s10912_s27 + $0x10] sm:$0x1f]   ;;  %v10762_v24 = vld [vmem:[%s10912_s27 + $0x60] sm:$0x1f]  }
  0x26   : > { %9902 = vmatprep.subr.bf16.mxu0 %v10844_v2  ;;  %9908 = vmatprep.subr.bf16.mxu1 %v10844_v2  ;;  %v9135_v25 = vld [vmem:[%s12225_s1 + $0x4] sm:$0x3]  ;;  %v2264_v27 = vshll.u32 %v10763_v23, 16 }
  0x2b   : > { %9893 = vmatmul.mubr.msk.bf16.vlgmr.msra.gmra.mrb[12].mxu0 %vm263_vm2, %v607_v36  ;;  %9899 = vmatmul.mubr.msk.bf16.vlgmr.msra.gmra.mrb[12].mxu1 %vm263_vm2, %v664_v38  ;;  %v1554_v36 = vshrl.u32 %v10756_v32, 16  ;;  %v1564_v38 = vsel %vm267_vm0, %v9089_v33, 0  ;;  %v2318_v33 = vshrl.u32 %v10762_v24, 16 }
  0x2c   : > { %9903 = vmatpush3.bf16.msra.mxu0 %v731_v39  ;;  %9909 = vmatpush3.bf16.msra.mxu1 %v792_v40  ;;  %v1612_v39 = vshll.u32 %v10757_v34, 16  ;;  %v1620_v40 = vsel %vm267_vm0, %v9091_v35, 0  ;;  %v9141_v35 = vld [vmem:[%s12225_s1 + $0x8] sm:$0x3] }
  0x2d   : > { %9904 = vmatprep.mubr.msk.bf16.mxu0 %vm10845_vm1, %v10844_v2  ;;  %9910 = vmatprep.mubr.msk.bf16.mxu1 %vm10845_vm1, %v10844_v2 }
  0x2e   : > { %9914 = vmatprep.subr.bf16.mxu0 %v10844_v2  ;;  %9920 = vmatprep.subr.bf16.mxu1 %v10844_v2  ;;  %v1614_v43 = vrot.slane %v1612_v39, 1  ;;  %v2385_v39 = vsel %vm267_vm0, %v9141_v35, 0  ;;  %v9197_v35 = vld [vmem:[%s12225_s1 + $0x6] sm:$0x3] }
  0x33   : > { %9905 = vmatmul.mubr.msk.bf16.vlgmr.msra.gmra.mrb[16].mxu0 %vm263_vm2, %v10750_v41  ;;  %9911 = vmatmul.mubr.msk.bf16.vlgmr.msra.gmra.mrb[16].mxu1 %vm263_vm2, %v10751_v42  ;;  %v1558_v41 = vrot.slane %v1556_v37, 1  ;;  %v1610_v42 = vshrl.u32 %v10757_v34, 16  ;;  %v9146_v37 = vld [vmem:[%s12225_s1 + $0xa] sm:$0x3] }
  0x34   : > { %9915 = vmatpush3.bf16.msra.mxu0 %v849_v47  ;;  %9921 = vmatpush3.bf16.msra.mxu1 %v906_v48  ;;  %v1681_v48 = vsel %vm267_vm0, %v9095_v44, 0  ;;  %v9151_v44 = vld [vmem:[%s12225_s1 + $0xe] sm:$0x3] }
  0x35   : > { %9916 = vmatprep.mubr.msk.bf16.mxu0 %vm10845_vm1, %v10844_v2  ;;  %9922 = vmatprep.mubr.msk.bf16.mxu1 %vm10845_vm1, %v10844_v2  ;;  %v1559_v46 = vor.u32 %v1558_v41, %v1554_v36  ;;  %v1615_v47 = vor.u32 %v1614_v43, %v1610_v42  ;;  %v10764_v41 = vld [vmem:[%s10912_s27 + $0xb0] sm:$0x1f]   ;;  %v10765_v42 = vld [vmem:[%s10912_s27 + $0x100] sm:$0x1f]   ;;  %v9149_v43 = vld [vmem:[%s12225_s1 + $0xc] sm:$0x3] }
  0x36   : > { %9926 = vmatprep.subr.bf16.mxu0 %v10844_v2  ;;  %9932 = vmatprep.subr.bf16.mxu1 %v10844_v2  ;;  %v2490_v45 = vshll.u32 %v10764_v41, 16 }
  0x3b   : > { %9917 = vmatmul.mubr.msk.bf16.vlgmr.msra.gmra.mrb[20].mxu0 %vm263_vm2, %v844_v54  ;;  %9923 = vmatmul.mubr.msk.bf16.vlgmr.msra.gmra.mrb[20].mxu1 %vm263_vm2, %v901_v56  ;;  %v1789_v54 = vshll.u32 %v10758_v50, 16  ;;  %v1797_v56 = vsel %vm267_vm0, %v9103_v52, 0 }
  0x3c   : > { %9927 = vmatpush3.bf16.msra.mxu0 %v967_v57  ;;  %9933 = vmatpush3.bf16.msra.mxu1 %v1028_v58  ;;  %v1853_v57 = vsel %vm267_vm0, %v9105_v53, 0  ;;  %v1787_v58 = vshrl.u32 %v10758_v50, 16  ;;  %v9155_v53 = vld [vmem:[%s12225_s1 + $0x10] sm:$0x3] }
  0x3d   : > { %9928 = vmatprep.mubr.msk.bf16.mxu0 %vm10845_vm1, %v10844_v2  ;;  %9934 = vmatprep.mubr.msk.bf16.mxu1 %vm10845_vm1, %v10844_v2 }
  0x3e   : > { %9938 = vmatprep.subr.bf16.mxu0 %v10844_v2  ;;  %9944 = vmatprep.subr.bf16.mxu1 %v10844_v2 }
  0x43   : > { %9929 = vmatmul.mubr.msk.bf16.vlgmr.msra.gmra.mrb[24].mxu0 %vm263_vm2, %v10752_v59  ;;  %9935 = vmatmul.mubr.msk.bf16.vlgmr.msra.gmra.mrb[24].mxu1 %vm263_vm2, %v10753_v60  ;;  %v1791_v59 = vrot.slane %v1789_v54, 1  ;;  %v1843_v60 = vshrl.u32 %v10759_v51, 16 }
  0x44   : > { %9939 = vmatpush3.bf16.msra.mxu0 %v1085_v1  ;;  %9945 = vmatpush3.bf16.msra.mxu1 %v1142_v3  ;;  %v1913_v3 = vsel %vm267_vm0, %v9109_v62, 0  ;;  %v9165_v62 = vld [vmem:[%s12225_s1 + $0x16] sm:$0x3] }
  0x45   : > { %9940 = vmatprep.mubr.msk.bf16.mxu0 %vm10845_vm1, %v10844_v2  ;;  %9946 = vmatprep.mubr.msk.bf16.mxu1 %vm10845_vm1, %v10844_v2  ;;  %v1792_v63 = vor.u32 %v1791_v59, %v1787_v58  ;;  %v1848_v1 = vor.u32 %v1847_v61, %v1843_v60  ;;  %v2675_v58 = vsel %vm267_vm0, %v9160_v55, 0  ;;  %v10766_v59 = vld [vmem:[%s10912_s27 + $0x18] sm:$0x1f]   ;;  %v10767_v60 = vld [vmem:[%s10912_s27 + $0x68] sm:$0x1f]  }
  0x46   : > { %9950 = vmatprep.subr.bf16.mxu0 %v10844_v2  ;;  %9956 = vmatprep.subr.bf16.mxu1 %v10844_v2  ;;  %v9163_v61 = vld [vmem:[%s12225_s1 + $0x14] sm:$0x3]  ;;  %v2779_v0 = vshll.u32 %v10767_v60, 16 }
  0x4b   : > { %9941 = vmatmul.mubr.msk.bf16.vlgmr.msra.gmra.mrb[28].mxu0 %vm263_vm2, %v1080_v10  ;;  %9947 = vmatmul.mubr.msk.bf16.vlgmr.msra.gmra.mrb[28].mxu1 %vm263_vm2, %v1137_v13  ;;  %v2077_v10 = vshll.u32 %v10761_v6, 16  ;;  %v2019_v13 = vshrl.u32 %v10760_v5, 16 }
  0x4c   : > { %9951 = vmatpush3.bf16.msra.mxu0 %v1232_v11  ;;  %9957 = vmatpush3.bf16.msra.mxu1 %v1284_v12  ;;  %v2029_v11 = vsel %vm267_vm0, %v9117_v7, 0  ;;  %v2085_v12 = vsel %vm267_vm0, %v9119_v8, 0  ;;  %v2781_v7 = vrot.slane %v2779_v0, 1  ;;  %v9169_v8 = vld [vmem:[%s12225_s1 + $0x18] sm:$0x3] }
  0x4d   : > { %9952 = vmatprep.mubr.msk.bf16.mxu0 %vm10845_vm1, %v10844_v2  ;;  %9958 = vmatprep.mubr.msk.bf16.mxu1 %vm10845_vm1, %v10844_v2  ;;  %v2079_v16 = vrot.slane %v2077_v10, 1  ;;  %v9174_v10 = vld [vmem:[%s12225_s1 + $0x1a] sm:$0x3] }
  0x4e   : > { %9962 = vmatprep.subr.bf16.mxu0 %v10844_v2  ;;  %9968 = vmatprep.subr.bf16.mxu1 %v10844_v2 }
  0x53   : > { %9953 = vmatmul.mubr.msk.bf16.vlgmr.msra.gmra.mrb[32].mxu0 %vm263_vm2, %v10754_v15  ;;  %9959 = vmatmul.mubr.msk.bf16.vlgmr.msra.gmra.mrb[32].mxu1 %vm263_vm2, %v10755_v17  ;;  %v2075_v15 = vshrl.u32 %v10761_v6, 16  ;;  %v9130_v17 = vld [vmem:[%s12225_s1 + $0x2] sm:$0x3] }
  0x54   : > { %9963 = vmatpush3.bf16.msra.mxu0 %v1338_v18  ;;  %9969 = vmatpush3.bf16.msra.mxu1 %v1394_v20  ;;  %v2024_v18 = vor.u32 %v2023_v14, %v2019_v13  ;;  %v2166_v21 = vsel %vm267_vm0, %v9130_v17, 0  ;;  %v2907_v13 = vsel %vm267_vm0, %v9174_v10, 0  ;;  %v10768_v14 = vld [vmem:[%s10912_s27 + $0xb8] sm:$0x1f]   ;;  %v9179_v17 = vld [vmem:[%s12225_s1 + $0x1e] sm:$0x3] }
  0x55   : > { %9964 = vmatprep.mubr.msk.bf16.mxu0 %vm10845_vm1, %v10844_v2  ;;  %9970 = vmatprep.mubr.msk.bf16.mxu1 %vm10845_vm1, %v10844_v2  ;;  %v2080_v20 = vor.u32 %v2079_v16, %v2075_v15  ;;  %v10769_v15 = vld [vmem:[%s10912_s27 + $0x108] sm:$0x1f]   ;;  %v9177_v16 = vld [vmem:[%s12225_s1 + $0x1c] sm:$0x3] }
  0x56   : > { %9974 = vmatprep.subr.bf16.mxu0 %v10844_v2  ;;  %9980 = vmatprep.subr.bf16.mxu1 %v10844_v2  ;;  %v3011_v19 = vshll.u32 %v10769_v15, 16 }
  0x5b   : > { %9965 = vmatmul.mubr.msk.bf16.vlgmr.msra.gmra.mrb[36].mxu0 %vm263_vm2, %v1333_v28  ;;  %9971 = vmatmul.mubr.msk.bf16.vlgmr.msra.gmra.mrb[36].mxu1 %vm263_vm2, %v1389_v29  ;;  %v2320_v28 = vshll.u32 %v10762_v24, 16  ;;  %v2272_v29 = vsel %vm267_vm0, %v9135_v25, 0  ;;  %v3013_v25 = vrot.slane %v3011_v19, 1 }
  0x5c   : > { %9975 = vmatpush3.bf16.msra.mxu0 %v1451_v30  ;;  %9981 = vmatpush3.bf16.msra.mxu1 %v1508_v31  ;;  %v2328_v30 = vsel %vm267_vm0, %v9137_v26, 0  ;;  %v2262_v31 = vshrl.u32 %v10763_v23, 16  ;;  %v9190_v26 = vld [vmem:[%s12225_s1 + $0x2] sm:$0x3] }
  0x5d   : > { %9976 = vmatprep.mubr.msk.bf16.mxu0 %vm10845_vm1, %v10844_v2  ;;  %9982 = vmatprep.mubr.msk.bf16.mxu1 %vm10845_vm1, %v10844_v2 }
  0x5e   : > { %9986 = vmatprep.subr.bf16.mxu0 %v10844_v2  ;;  %9992 = vmatprep.subr.bf16.mxu1 %v10844_v2 }
  0x63   : > { %9977 = vmatmul.mubr.msk.bf16.vlgmr.msra.gmra.mrb[40].mxu0 %vm263_vm2, %v10756_v32  ;;  %9983 = vmatmul.mubr.msk.bf16.vlgmr.msra.gmra.mrb[40].mxu1 %vm263_vm2, %v10757_v34  ;;  %v2266_v32 = vrot.slane %v2264_v27, 1  ;;  %v2322_v34 = vrot.slane %v2320_v28, 1  ;;  %v3087_v28 = vld [vmem:[%s12225_s1] sm:$0x3] }
  0x64   : > { %9987 = vmatpush3.bf16.msra.mxu0 %v1564_v38  ;;  %9993 = vmatpush3.bf16.msra.mxu1 %v1620_v40  ;;  %v2442_v40 = vsel %vm267_vm0, %v9146_v37, 0 }
  0x65   : > { %9988 = vmatprep.mubr.msk.bf16.mxu0 %vm10845_vm1, %v10844_v2  ;;  %9994 = vmatprep.mubr.msk.bf16.mxu1 %vm10845_vm1, %v10844_v2  ;;  %v2267_v36 = vor.u32 %v2266_v32, %v2262_v31  ;;  %v2323_v38 = vor.u32 %v2322_v34, %v2318_v33  ;;  %v3152_v31 = vsel %vm267_vm0, %v3087_v28, 0  ;;  %v10771_v32 = vld [vmem:[%s10912_s27 + $0x18] sm:$0x1f]   ;;  %v10770_v33 = vld [vmem:[%s10912_s27 + $0x68] sm:$0x1f]  }
  0x66   : > { %9998 = vmatprep.subr.bf16.mxu0 %v10844_v2  ;;  %10004 = vmatprep.subr.bf16.mxu1 %v10844_v2  ;;  %v9195_v34 = vld [vmem:[%s12225_s1 + $0x4] sm:$0x3]  ;;  %v3254_v37 = vshll.u32 %v10770_v33, 16 }
  0x6b   : > { %9989 = vmatmul.mubr.msk.bf16.vlgmr.msra.gmra.mrb[44].mxu0 %vm263_vm2, %v1559_v46  ;;  %9995 = vmatmul.mubr.msk.bf16.vlgmr.msra.gmra.mrb[44].mxu1 %vm263_vm2, %v1615_v47  ;;  %v2546_v46 = vshll.u32 %v10765_v42, 16  ;;  %v2498_v47 = vsel %vm267_vm0, %v9149_v43, 0  ;;  %v3256_v43 = vrot.slane %v3254_v37, 1 }
  0x6c   : > { %9999 = vmatpush3.bf16.msra.mxu0 %v1681_v48  ;;  %10005 = vmatpush3.bf16.msra.mxu1 %v1741_v49  ;;  %v2554_v48 = vsel %vm267_vm0, %v9151_v44, 0  ;;  %v2488_v49 = vshrl.u32 %v10764_v41, 16  ;;  %v9201_v44 = vld [vmem:[%s12225_s1 + $0x8] sm:$0x3] }
  0x6d   : > { %10000 = vmatprep.mubr.msk.bf16.mxu0 %vm10845_vm1, %v10844_v2  ;;  %10006 = vmatprep.mubr.msk.bf16.mxu1 %vm10845_vm1, %v10844_v2  ;;  %v2548_v52 = vrot.slane %v2546_v46, 1  ;;  %v9206_v46 = vld [vmem:[%s12225_s1 + $0xa] sm:$0x3] }
  0x6e   : > { %10010 = vmatprep.subr.bf16.mxu0 %v10844_v2  ;;  %10016 = vmatprep.subr.bf16.mxu1 %v10844_v2 }
  0x73   : > { %10001 = vmatmul.mubr.msk.bf16.vlgmr.msra.gmra.mrb[48].mxu0 %vm263_vm2, %v10758_v50  ;;  %10007 = vmatmul.mubr.msk.bf16.vlgmr.msra.gmra.mrb[48].mxu1 %vm263_vm2, %v10759_v51  ;;  %v2492_v50 = vrot.slane %v2490_v45, 1  ;;  %v2544_v51 = vshrl.u32 %v10765_v42, 16 }
  0x74   : > { %10011 = vmatpush3.bf16.msra.mxu0 %v1797_v56  ;;  %10017 = vmatpush3.bf16.msra.mxu1 %v1853_v57  ;;  %v2615_v57 = vsel %vm267_vm0, %v9155_v53, 0  ;;  %v9211_v53 = vld [vmem:[%s12225_s1 + $0xe] sm:$0x3] }
  0x75   : > { %10012 = vmatprep.mubr.msk.bf16.mxu0 %vm10845_vm1, %v10844_v2  ;;  %10018 = vmatprep.mubr.msk.bf16.mxu1 %vm10845_vm1, %v10844_v2  ;;  %v2493_v54 = vor.u32 %v2492_v50, %v2488_v49  ;;  %v2549_v56 = vor.u32 %v2548_v52, %v2544_v51  ;;  %v3376_v49 = vsel %vm267_vm0, %v9206_v46, 0  ;;  %v10772_v50 = vld [vmem:[%s10912_s27 + $0xb8] sm:$0x1f]   ;;  %v10773_v51 = vld [vmem:[%s10912_s27 + $0x108] sm:$0x1f]  }
  0x76   : > { %10022 = vmatprep.subr.bf16.mxu0 %v10844_v2  ;;  %10028 = vmatprep.subr.bf16.mxu1 %v10844_v2  ;;  %v9209_v52 = vld [vmem:[%s12225_s1 + $0xc] sm:$0x3]  ;;  %v3480_v55 = vshll.u32 %v10773_v51, 16 }
  0x7b   : > { %10013 = vmatmul.mubr.msk.bf16.vlgmr.msra.gmra.mrb[52].mxu0 %vm263_vm2, %v1792_v63  ;;  %10019 = vmatmul.mubr.msk.bf16.vlgmr.msra.gmra.mrb[52].mxu1 %vm263_vm2, %v1848_v1  ;;  %v2723_v63 = vshll.u32 %v10766_v59, 16  ;;  %v2731_v1 = vsel %vm267_vm0, %v9163_v61, 0  ;;  %v3482_v61 = vrot.slane %v3480_v55, 1 }
  0x7c   : > { %10023 = vmatpush3.bf16.msra.mxu0 %v1913_v3  ;;  %10029 = vmatpush3.bf16.msra.mxu1 %v1973_v4  ;;  %v2787_v3 = vsel %vm267_vm0, %v9165_v62, 0  ;;  %v2721_v4 = vshrl.u32 %v10766_v59, 16 }
  0x7d   : > { %10024 = vmatprep.mubr.msk.bf16.mxu0 %vm10845_vm1, %v10844_v2  ;;  %10030 = vmatprep.mubr.msk.bf16.mxu1 %vm10845_vm1, %v10844_v2 }
  0x7e   : > { %10034 = vmatprep.subr.bf16.mxu0 %v10844_v2  ;;  %10040 = vmatprep.subr.bf16.mxu1 %v10844_v2 }
  0x83   : > { %10025 = vmatmul.mubr.msk.bf16.vlgmr.msra.gmra.mrb[56].mxu0 %vm263_vm2, %v10760_v5  ;;  %10031 = vmatmul.mubr.msk.bf16.vlgmr.msra.gmra.mrb[56].mxu1 %vm263_vm2, %v10761_v6  ;;  %v2725_v5 = vrot.slane %v2723_v63, 1  ;;  %v2777_v6 = vshrl.u32 %v10767_v60, 16  ;;  %v9215_v63 = vld [vmem:[%s12225_s1 + $0x10] sm:$0x3] }
  0x84   : > { %10035 = vmatpush3.bf16.msra.mxu0 %v2029_v11  ;;  %10041 = vmatpush3.bf16.msra.mxu1 %v2085_v12  ;;  %v2847_v12 = vsel %vm267_vm0, %v9169_v8, 0 }
  0x85   : > { %10036 = vmatprep.mubr.msk.bf16.mxu0 %vm10845_vm1, %v10844_v2  ;;  %10042 = vmatprep.mubr.msk.bf16.mxu1 %vm10845_vm1, %v10844_v2  ;;  %v2726_v9 = vor.u32 %v2725_v5, %v2721_v4  ;;  %v2782_v11 = vor.u32 %v2781_v7, %v2777_v6  ;;  %v9220_v4 = vld [vmem:[%s12225_s1 + $0x12] sm:$0x3] }
  0x86   : > { %10046 = vmatprep.subr.bf16.mxu0 %v10844_v2  ;;  %10052 = vmatprep.subr.bf16.mxu1 %v10844_v2 }
  0x8b   : > { %10037 = vmatmul.mubr.msk.bf16.vlgmr.msra.gmra.mrb[60].mxu0 %vm263_vm2, %v2024_v18  ;;  %10043 = vmatmul.mubr.msk.bf16.vlgmr.msra.gmra.mrb[60].mxu1 %vm263_vm2, %v2080_v20  ;;  %v2955_v18 = vshll.u32 %v10768_v14, 16  ;;  %v2963_v20 = vsel %vm267_vm0, %v9177_v16, 0 }
  0x8c   : > { %10047 = vmatpush3.bf16.msra.mxu0 %v2166_v21  ;;  %10053 = vmatpush3.bf16.msra.mxu1 %v2218_v22  ;;  %v3019_v21 = vsel %vm267_vm0, %v9179_v17, 0  ;;  %v2953_v22 = vshrl.u32 %v10768_v14, 16  ;;  %v10775_v17 = vld [vmem:[%s10912_s27 + $0x70] sm:$0x1f]  }
  0x8d   : > { %10048 = vmatprep.mubr.msk.bf16.mxu0 %vm10845_vm1, %v10844_v2  ;;  %10054 = vmatprep.mubr.msk.bf16.mxu1 %vm10845_vm1, %v10844_v2  ;;  %v3711_v37 = vshrl.u32 %v10775_v17, 16 }
  0x8e   : > { %10058 = vmatprep.subr.bf16.mxu0 %v10844_v2  ;;  %10064 = vmatprep.subr.bf16.mxu1 %v10844_v2 }
  0x93   : > { %10049 = vmatmul.mubr.msk.bf16.vlgmr.msra.gmra.mrb[64].mxu0 %vm263_vm2, %v10762_v24  ;;  %10055 = vmatmul.mubr.msk.bf16.vlgmr.msra.gmra.mrb[64].mxu1 %vm263_vm2, %v10763_v23  ;;  %v2957_v23 = vrot.slane %v2955_v18, 1  ;;  %v3009_v24 = vshrl.u32 %v10769_v15, 16  ;;  %v9223_v18 = vld [vmem:[%s12225_s1 + $0x14] sm:$0x3] }
  0x94   : > { %10059 = vmatpush3.bf16.msra.mxu0 %v2272_v29  ;;  %10065 = vmatpush3.bf16.msra.mxu1 %v2328_v30  ;;  %v3100_v30 = vsel %vm267_vm0, %v9190_v26, 0  ;;  %v3713_v26 = vshll.u32 %v10775_v17, 16 }
  0x95   : > { %10060 = vmatprep.mubr.msk.bf16.mxu0 %vm10845_vm1, %v10844_v2  ;;  %10066 = vmatprep.mubr.msk.bf16.mxu1 %vm10845_vm1, %v10844_v2  ;;  %v2958_v27 = vor.u32 %v2957_v23, %v2953_v22  ;;  %v3014_v29 = vor.u32 %v3013_v25, %v3009_v24  ;;  %v9225_v22 = vld [vmem:[%s12225_s1 + $0x16] sm:$0x3] }
  0x96   : > { %10070 = vmatprep.subr.bf16.mxu0 %v10844_v2  ;;  %10076 = vmatprep.subr.bf16.mxu1 %v10844_v2 }
  0x9b   : > { %10061 = vmatmul.mubr.msk.bf16.vlgmr.msra.gmra.mrb[68].mxu0 %vm263_vm2, %v2267_v36  ;;  %10067 = vmatmul.mubr.msk.bf16.vlgmr.msra.gmra.mrb[68].mxu1 %vm263_vm2, %v2323_v38  ;;  %v3198_v36 = vshll.u32 %v10771_v32, 16  ;;  %v3206_v38 = vsel %vm267_vm0, %v9195_v34, 0 }
  0x9c   : > { %10071 = vmatpush3.bf16.msra.mxu0 %v2385_v39  ;;  %10077 = vmatpush3.bf16.msra.mxu1 %v2442_v40  ;;  %v3262_v39 = vsel %vm267_vm0, %v9197_v35, 0  ;;  %v3196_v40 = vshrl.u32 %v10771_v32, 16 }
  0x9d   : > { %10072 = vmatprep.mubr.msk.bf16.mxu0 %vm10845_vm1, %v10844_v2  ;;  %10078 = vmatprep.mubr.msk.bf16.mxu1 %vm10845_vm1, %v10844_v2 }
  0x9e   : > { %10082 = vmatprep.subr.bf16.mxu0 %v10844_v2  ;;  %10088 = vmatprep.subr.bf16.mxu1 %v10844_v2 }
  0xa3   : > { %10073 = vmatmul.mubr.msk.bf16.vlgmr.msra.gmra.mrb[72].mxu0 %vm263_vm2, %v10764_v41  ;;  %10079 = vmatmul.mubr.msk.bf16.vlgmr.msra.gmra.mrb[72].mxu1 %vm263_vm2, %v10765_v42  ;;  %v3200_v41 = vrot.slane %v3198_v36, 1  ;;  %v3252_v42 = vshrl.u32 %v10770_v33, 16 }
  0xa4   : > { %10083 = vmatpush3.bf16.msra.mxu0 %v2498_v47  ;;  %10089 = vmatpush3.bf16.msra.mxu1 %v2554_v48  ;;  %v3319_v48 = vsel %vm267_vm0, %v9201_v44, 0 }
  0xa5   : > { %10084 = vmatprep.mubr.msk.bf16.mxu0 %vm10845_vm1, %v10844_v2  ;;  %10090 = vmatprep.mubr.msk.bf16.mxu1 %vm10845_vm1, %v10844_v2  ;;  %v3201_v45 = vor.u32 %v3200_v41, %v3196_v40  ;;  %v3257_v47 = vor.u32 %v3256_v43, %v3252_v42  ;;  %v9229_v40 = vld [vmem:[%s12225_s1 + $0x18] sm:$0x3] }
  0xa6   : > { %10094 = vmatprep.subr.bf16.mxu0 %v10844_v2  ;;  %10100 = vmatprep.subr.bf16.mxu1 %v10844_v2 }
  0xab   : > { %10085 = vmatmul.mubr.msk.bf16.vlgmr.msra.gmra.mrb[76].mxu0 %vm263_vm2, %v2493_v54  ;;  %10091 = vmatmul.mubr.msk.bf16.vlgmr.msra.gmra.mrb[76].mxu1 %vm263_vm2, %v2549_v56  ;;  %v3424_v54 = vshll.u32 %v10772_v50, 16  ;;  %v3432_v56 = vsel %vm267_vm0, %v9209_v52, 0 }
  0xac   : > { %10095 = vmatpush3.bf16.msra.mxu0 %v2615_v57  ;;  %10101 = vmatpush3.bf16.msra.mxu1 %v2675_v58  ;;  %v3488_v57 = vsel %vm267_vm0, %v9211_v53, 0  ;;  %v3422_v58 = vshrl.u32 %v10772_v50, 16  ;;  %v3781_v53 = vsel %vm267_vm0, %v9229_v40, 0 }
  0xad   : > { %10096 = vmatprep.mubr.msk.bf16.mxu0 %vm10845_vm1, %v10844_v2  ;;  %10102 = vmatprep.mubr.msk.bf16.mxu1 %vm10845_vm1, %v10844_v2 }
  0xae   : > { %10106 = vmatprep.subr.bf16.mxu0 %v10844_v2  ;;  %10112 = vmatprep.subr.bf16.mxu1 %v10844_v2 }
  0xb3   : > { %10097 = vmatmul.mubr.msk.bf16.vlgmr.msra.gmra.mrb[80].mxu0 %vm263_vm2, %v10766_v59  ;;  %10103 = vmatmul.mubr.msk.bf16.vlgmr.msra.gmra.mrb[80].mxu1 %vm263_vm2, %v10767_v60  ;;  %v3426_v59 = vrot.slane %v3424_v54, 1  ;;  %v3478_v60 = vshrl.u32 %v10773_v51, 16 }
  0xb4   : > { %10107 = vmatpush3.bf16.msra.mxu0 %v2731_v1  ;;  %10113 = vmatpush3.bf16.msra.mxu1 %v2787_v3 }
  0xb5   : > { %10108 = vmatprep.mubr.msk.bf16.mxu0 %vm10845_vm1, %v10844_v2  ;;  %10114 = vmatprep.mubr.msk.bf16.mxu1 %vm10845_vm1, %v10844_v2  ;;  %v3427_v3 = vor.u32 %v3426_v59, %v3422_v58  ;;  %v3483_v8 = vor.u32 %v3482_v61, %v3478_v60  ;;  %v10777_v59 = vld [vmem:[%s10912_s27 + $0x110] sm:$0x1f]   ;;  %v9237_v60 = vld [vmem:[%s12225_s1 + $0x1c] sm:$0x3] }
  0xb6   : > { %10118 = vmatprep.subr.bf16.mxu0 %v10844_v2  ;;  %10124 = vmatprep.subr.bf16.mxu1 %v10844_v2 }
  0xbb   : > { %10109 = vmatmul.mubr.msk.bf16.vlgmr.msra.gmra.mrb[84].mxu0 %vm263_vm2, %v2726_v9  ;;  %10115 = vmatmul.mubr.msk.bf16.vlgmr.msra.gmra.mrb[84].mxu1 %vm263_vm2, %v2782_v11  ;;  %v3549_v11 = vsel %vm267_vm0, %v9215_v63, 0 }
  0xbc   : > { %10119 = vmatpush3.bf16.msra.mxu0 %v2847_v12  ;;  %10125 = vmatpush3.bf16.msra.mxu1 %v2907_v13 }
  0xbd   : > { %10120 = vmatprep.mubr.msk.bf16.mxu0 %vm10845_vm1, %v10844_v2  ;;  %10126 = vmatprep.mubr.msk.bf16.mxu1 %vm10845_vm1, %v10844_v2 }
  0xbe   : > { %10130 = vmatprep.subr.bf16.mxu0 %v10844_v2  ;;  %10136 = vmatprep.subr.bf16.mxu1 %v10844_v2 }
  0xc3   : > { %10121 = vmatmul.mubr.msk.bf16.vlgmr.msra.gmra.mrb[88].mxu0 %vm263_vm2, %v10768_v14  ;;  %10127 = vmatmul.mubr.msk.bf16.vlgmr.msra.gmra.mrb[88].mxu1 %vm263_vm2, %v10769_v15  ;;  %v3609_v14 = vsel %vm267_vm0, %v9220_v4, 0  ;;  %v10774_v15 = vld [vmem:[%s10912_s27 + $0x20] sm:$0x1f]  }
  0xc4   : > { %10131 = vmatpush3.bf16.msra.mxu0 %v2963_v20  ;;  %10137 = vmatpush3.bf16.msra.mxu1 %v3019_v21  ;;  %v3657_v23 = vshll.u32 %v10774_v15, 16  ;;  %v3655_v35 = vshrl.u32 %v10774_v15, 16 }
  0xc5   : > { %10132 = vmatprep.mubr.msk.bf16.mxu0 %vm10845_vm1, %v10844_v2  ;;  %10138 = vmatprep.mubr.msk.bf16.mxu1 %vm10845_vm1, %v10844_v2 }
  0xc6   : > { %10142 = vmatprep.subr.bf16.mxu0 %v10844_v2  ;;  %10148 = vmatprep.subr.bf16.mxu1 %v10844_v2  ;;  %v3659_v36 = vrot.slane %v3657_v23, 1 }
  0xc8   : > { %v3660_v44 = vor.u32 %v3659_v36, %v3655_v35  ;;  %v10779_v36 = vld [vmem:[%s10912_s27 + $0x20] sm:$0x1f]  }
  0xcb   : > { %10133 = vmatmul.mubr.msk.bf16.vlgmr.msra.gmra.mrb[92].mxu0 %vm263_vm2, %v2958_v27  ;;  %10139 = vmatmul.mubr.msk.bf16.vlgmr.msra.gmra.mrb[92].mxu1 %vm263_vm2, %v3014_v29 }
  0xcc   : > { %10143 = vmatpush3.bf16.msra.mxu0 %v3100_v30  ;;  %10149 = vmatpush3.bf16.msra.mxu1 %v3152_v31  ;;  %v3665_v31 = vsel %vm267_vm0, %v9223_v18, 0 }
  0xcd   : > { %10144 = vmatprep.mubr.msk.bf16.mxu0 %vm10845_vm1, %v10844_v2  ;;  %10150 = vmatprep.mubr.msk.bf16.mxu1 %vm10845_vm1, %v10844_v2 }
  0xce   : > { %10154 = vmatprep.subr.bf16.mxu0 %v10844_v2  ;;  %10160 = vmatprep.subr.bf16.mxu1 %v10844_v2 }
  0xd3   : > { %10145 = vmatmul.mubr.msk.bf16.vlgmr.msra.gmra.mrb[96].mxu0 %vm263_vm2, %v10770_v33  ;;  %10151 = vmatmul.mubr.msk.bf16.vlgmr.msra.gmra.mrb[96].mxu1 %vm263_vm2, %v10771_v32  ;;  %v3721_v33 = vsel %vm267_vm0, %v9225_v22, 0 }
  0xd4   : > { %10155 = vmatpush3.bf16.msra.mxu0 %v3206_v38  ;;  %10161 = vmatpush3.bf16.msra.mxu1 %v3262_v39  ;;  %v3715_v38 = vrot.slane %v3713_v26, 1 }
  0xd5   : > { %10156 = vmatprep.mubr.msk.bf16.mxu0 %vm10845_vm1, %v10844_v2  ;;  %10162 = vmatprep.mubr.msk.bf16.mxu1 %vm10845_vm1, %v10844_v2 }
  0xd6   : > { %10166 = vmatprep.subr.bf16.mxu0 %v10844_v2  ;;  %10172 = vmatprep.subr.bf16.mxu1 %v10844_v2 }
  0xdb   : > { %10157 = vmatmul.mubr.msk.bf16.vlgmr.msra.gmra.mrb[100].mxu0 %vm263_vm2, %v3201_v45  ;;  %10163 = vmatmul.mubr.msk.bf16.vlgmr.msra.gmra.mrb[100].mxu1 %vm263_vm2, %v3257_v47  ;;  %v9234_v45 = vld [vmem:[%s12225_s1 + $0x1a] sm:$0x3] }
  0xdc   : > { %10167 = vmatpush3.bf16.msra.mxu0 %v3319_v48  ;;  %10173 = vmatpush3.bf16.msra.mxu1 %v3376_v49  ;;  %v3716_v48 = vor.u32 %v3715_v38, %v3711_v37  ;;  %v3841_v55 = vsel %vm267_vm0, %v9234_v45, 0  ;;  %v10778_v38 = vld [vmem:[%s10912_s27 + $0x70] sm:$0x1f]  }
  0xdd   : > { %10168 = vmatprep.mubr.msk.bf16.mxu0 %vm10845_vm1, %v10844_v2  ;;  %10174 = vmatprep.mubr.msk.bf16.mxu1 %vm10845_vm1, %v10844_v2 }
  0xde   : > { %10178 = vmatprep.subr.bf16.mxu0 %v10844_v2  ;;  %10184 = vmatprep.subr.bf16.mxu1 %v10844_v2 }
  0xe3   : > { %10169 = vmatmul.mubr.msk.bf16.vlgmr.msra.gmra.mrb[104].mxu0 %vm263_vm2, %v10772_v50  ;;  %10175 = vmatmul.mubr.msk.bf16.vlgmr.msra.gmra.mrb[104].mxu1 %vm263_vm2, %v10773_v51 }
  0xe4   : > { %10179 = vmatpush3.bf16.msra.mxu0 %v3432_v56  ;;  %10185 = vmatpush3.bf16.msra.mxu1 %v3488_v57  ;;  %v10776_v57 = vld [vmem:[%s10912_s27 + $0xc0] sm:$0x1f]  }
  0xe5   : > { %10180 = vmatprep.mubr.msk.bf16.mxu0 %vm10845_vm1, %v10844_v2  ;;  %10186 = vmatprep.mubr.msk.bf16.mxu1 %vm10845_vm1, %v10844_v2 }
  0xe6   : > { %v305_v62 = vpop.f32.mrb[0].mxu0  ;;  %10190 = vmatprep.subr.bf16.mxu0 %v10844_v2  ;;  %v357_v0 = vpop.f32.mrb[0].mxu1  ;;  %10196 = vmatprep.subr.bf16.mxu1 %v10844_v2 }
  0xe7   : > { %v9858_v1 = vpop.f32.mrb[1].mxu0  ;;  %v358_v5 = vadd.f32 %v357_v0, %v305_v62  ;;  %v9864_v6 = vpop.f32.mrb[1].mxu1  ;;  %v9239_v0 = vld [vmem:[%s12225_s1 + $0x1e] sm:$0x3] }
  0xe8   : > { %v308_v7 = vpop.f32.mrb[2].mxu0  ;;  %v360_v9 = vpop.f32.mrb[2].mxu1  ;;  %v3889_v1 = vshll.u32 %v10776_v57, 16 }
  0xe9   : > { %v9859_v10 = vpop.f32.mrb[3].mxu0  ;;  %v361_v12 = vadd.f32 %v360_v9, %v308_v7  ;;  %v9865_v13 = vpop.f32.mrb[3].mxu1 }
  0xea   : > { %v3897_v10 = vsel %vm267_vm0, %v9237_v60, 0 }
  0xeb   : > { %10181 = vmatmul.mubr.msk.bf16.vlgmr.msra.gmra.mrb[108].mxu0 %vm263_vm2, %v3427_v3  ;;  %10187 = vmatmul.mubr.msk.bf16.vlgmr.msra.gmra.mrb[108].mxu1 %vm263_vm2, %v3483_v8 }
  0xec   : > { %10191 = vmatpush3.bf16.msra.mxu0 %v3549_v11  ;;  %10197 = vmatpush3.bf16.msra.mxu1 %v3609_v14  ;;  %v3887_v14 = vshrl.u32 %v10776_v57, 16 }
  0xed   : > { %10192 = vmatprep.mubr.msk.bf16.mxu0 %vm10845_vm1, %v10844_v2  ;;  %10198 = vmatprep.mubr.msk.bf16.mxu1 %vm10845_vm1, %v10844_v2 }
  0xee   : > { %v412_v16 = vpop.f32.mrb[4].mxu0  ;;  %10202 = vmatprep.subr.bf16.mxu0 %v10844_v2  ;;  %v469_v20 = vpop.f32.mrb[4].mxu1  ;;  %10208 = vmatprep.subr.bf16.mxu1 %v10844_v2 }
  0xef   : > { %v419_v19 = vadd.f32 %v412_v16, %v358_v5  ;;  %v9870_v21 = vpop.f32.mrb[5].mxu0  ;;  %v9876_v24 = vpop.f32.mrb[5].mxu1  ;;  %v3945_v5 = vshll.u32 %v10777_v59, 16  ;;  %v3943_v16 = vshrl.u32 %v10777_v59, 16 }
  0xf0   : > { %v415_v25 = vpop.f32.mrb[6].mxu0  ;;  %v472_v29 = vpop.f32.mrb[6].mxu1  ;;  %v4021_v24 = vld [vmem:[%s12225_s1] sm:$0x3] }
  0xf1   : > { %v476_v27 = vadd.f32 %v469_v20, %v419_v19  ;;  %v420_v28 = vadd.f32 %v415_v25, %v361_v12  ;;  %v9871_v30 = vpop.f32.mrb[7].mxu0  ;;  %v9877_v32 = vpop.f32.mrb[7].mxu1  ;;  %v3953_v12 = vsel %vm267_vm0, %v9239_v0, 0  ;;  %v9250_v19 = vld [vmem:[%s12225_s1 + $0x2] sm:$0x3] }
  0xf2   : > { %v4034_v32 = vsel %vm267_vm0, %v9250_v19, 0 }
  0xf3   : > { %v477_v34 = vadd.f32 %v472_v29, %v420_v28  ;;  %10193 = vmatmul.mubr.msk.bf16.vlgmr.msra.gmra.mrb[112].mxu0 %vm263_vm2, %v10774_v15  ;;  %10199 = vmatmul.mubr.msk.bf16.vlgmr.msra.gmra.mrb[112].mxu1 %vm263_vm2, %v10775_v17  ;;  %v3891_v15 = vrot.slane %v3889_v1, 1  ;;  %v3947_v17 = vrot.slane %v3945_v5, 1 }
  0xf4   : > { %10203 = vmatpush3.bf16.msra.mxu0 %v3665_v31  ;;  %10209 = vmatpush3.bf16.msra.mxu1 %v3721_v33 }
  0xf5   : > { %10204 = vmatprep.mubr.msk.bf16.mxu0 %vm10845_vm1, %v10844_v2  ;;  %10210 = vmatprep.mubr.msk.bf16.mxu1 %vm10845_vm1, %v10844_v2  ;;  %v3892_v23 = vor.u32 %v3891_v15, %v3887_v14  ;;  %v10780_v15 = vld [vmem:[%s10912_s27 + $0xc0] sm:$0x1f]  }
  0xf6   : > { %v530_v39 = vpop.f32.mrb[8].mxu0  ;;  %10214 = vmatprep.subr.bf16.mxu0 %v10844_v2  ;;  %v591_v42 = vpop.f32.mrb[8].mxu1  ;;  %10220 = vmatprep.subr.bf16.mxu1 %v10844_v2 }
  0xf7   : > { %v537_v41 = vadd.f32 %v530_v39, %v476_v27  ;;  %v9882_v43 = vpop.f32.mrb[9].mxu0  ;;  %v9888_v46 = vpop.f32.mrb[9].mxu1  ;;  %v3948_v27 = vor.u32 %v3947_v17, %v3943_v16  ;;  %v9255_v39 = vld [vmem:[%s12225_s1 + $0x4] sm:$0x3]  ;;  %v10781_v17 = vld [vmem:[%s10912_s27 + $0x110] sm:$0x1f]  }
  0xf8   : > { %v533_v47 = vpop.f32.mrb[10].mxu0  ;;  %v594_v51 = vpop.f32.mrb[10].mxu1  ;;  %v9257_v43 = vld [vmem:[%s12225_s1 + $0x6] sm:$0x3] }
  0xf9   : > { %v598_v49 = vadd.f32 %v591_v42, %v537_v41  ;;  %v538_v50 = vadd.f32 %v533_v47, %v477_v34  ;;  %v9883_v52 = vpop.f32.mrb[11].mxu0  ;;  %v9889_v54 = vpop.f32.mrb[11].mxu1  ;;  %v4086_v34 = vsel %vm267_vm0, %v4021_v24, 0  ;;  %v4188_v47 = vshll.u32 %v10778_v38, 16  ;;  %v11497_v24 = vld [vmem:[%s12226_s2] ss:$0 sm:$0xff] }
  0xfa   : > { %v4140_v52 = vsel %vm267_vm0, %v9255_v39, 0  ;;  %v4196_v54 = vsel %vm267_vm0, %v9257_v43, 0  ;;  %v4412_v39 = vshrl.u32 %v10781_v17, 16 }
  0xfb   : > { %v599_v56 = vadd.f32 %v594_v51, %v538_v50  ;;  %10205 = vmatmul.mubr.msk.bf16.vlgmr.msra.gmra.mrb[116].mxu0 %vm263_vm2, %v3660_v44  ;;  %10211 = vmatmul.mubr.msk.bf16.vlgmr.msra.gmra.mrb[116].mxu1 %vm263_vm2, %v3716_v48  ;;  %v4132_v44 = vshll.u32 %v10779_v36, 16 }
  0xfc   : > { %10215 = vmatpush3.bf16.msra.mxu0 %v3781_v53  ;;  %10221 = vmatpush3.bf16.msra.mxu1 %v3841_v55 }
  0xfd   : > { %10216 = vmatprep.mubr.msk.bf16.mxu0 %vm10845_vm1, %v10844_v2  ;;  %10222 = vmatprep.mubr.msk.bf16.mxu1 %vm10845_vm1, %v10844_v2 }
  0xfe   : > { %v648_v58 = vpop.f32.mrb[12].mxu0  ;;  %10226 = vmatprep.subr.bf16.mxu0 %v10844_v2  ;;  %v705_v62 = vpop.f32.mrb[12].mxu1  ;;  %10232 = vmatprep.subr.bf16.mxu1 %v10844_v2 }
  0xff   : > { %v655_v61 = vadd.f32 %v648_v58, %v598_v49  ;;  %v9894_v63 = vpop.f32.mrb[13].mxu0  ;;  %v9900_v3 = vpop.f32.mrb[13].mxu1  ;;  %v4186_v58 = vshrl.u32 %v10778_v38, 16 }
 0x100   : > { %v651_v4 = vpop.f32.mrb[14].mxu0  ;;  %v708_v8 = vpop.f32.mrb[14].mxu1  ;;  %v9266_v3 = vld [vmem:[%s12225_s1 + $0xa] sm:$0x3] }
 0x101   : > { %v712_v6 = vadd.f32 %v705_v62, %v655_v61  ;;  %v656_v7 = vadd.f32 %v651_v4, %v599_v56  ;;  %v9895_v9 = vpop.f32.mrb[15].mxu0  ;;  %v9901_v11 = vpop.f32.mrb[15].mxu1  ;;  %v4130_v56 = vshrl.u32 %v10779_v36, 16  ;;  %v9261_v61 = vld [vmem:[%s12225_s1 + $0x8] sm:$0x3] }
 0x102   : > { %v4253_v11 = vsel %vm267_vm0, %v9261_v61, 0 }
 0x103   : > { %v713_v13 = vadd.f32 %v708_v8, %v656_v7  ;;  %10217 = vmatmul.mubr.msk.bf16.vlgmr.msra.gmra.mrb[120].mxu0 %vm263_vm2, %v10776_v57  ;;  %10223 = vmatmul.mubr.msk.bf16.vlgmr.msra.gmra.mrb[120].mxu1 %vm263_vm2, %v10777_v59  ;;  %v4134_v57 = vrot.slane %v4132_v44, 1  ;;  %v4190_v59 = vrot.slane %v4188_v47, 1  ;;  %v9275_v44 = vld [vmem:[%s12225_s1 + $0x10] sm:$0x3] }
 0x104   : > { %10227 = vmatpush3.bf16.msra.mxu0 %v3897_v10  ;;  %10233 = vmatpush3.bf16.msra.mxu1 %v3953_v12  ;;  %v4483_v61 = vsel %vm267_vm0, %v9275_v44, 0 }
 0x105   : > { %10228 = vmatprep.mubr.msk.bf16.mxu0 %vm10845_vm1, %v10844_v2  ;;  %10234 = vmatprep.mubr.msk.bf16.mxu1 %vm10845_vm1, %v10844_v2  ;;  %v4135_v1 = vor.u32 %v4134_v57, %v4130_v56 }
 0x106   : > { %v767_v18 = vpop.f32.mrb[16].mxu0  ;;  %10238 = vmatprep.subr.bf16.mxu0 %v10844_v2  ;;  %v828_v21 = vpop.f32.mrb[16].mxu1  ;;  %10244 = vmatprep.subr.bf16.mxu1 %v10844_v2 }
 0x107   : > { %v774_v20 = vadd.f32 %v767_v18, %v712_v6  ;;  %v9906_v22 = vpop.f32.mrb[17].mxu0  ;;  %v9912_v25 = vpop.f32.mrb[17].mxu1  ;;  %v4191_v6 = vor.u32 %v4190_v59, %v4186_v58  ;;  %v9269_v18 = vld [vmem:[%s12225_s1 + $0xc] sm:$0x3]  ;;  %v1214_v58 = vld [vmem:[%s11511_s9 + $0x4] sm:$0x1] }
 0x108   : > { %v770_v26 = vpop.f32.mrb[18].mxu0  ;;  %v831_v30 = vpop.f32.mrb[18].mxu1  ;;  %v9271_v22 = vld [vmem:[%s12225_s1 + $0xe] sm:$0x3] }
 0x109   : > { %v835_v28 = vadd.f32 %v828_v21, %v774_v20  ;;  %v775_v29 = vadd.f32 %v770_v26, %v713_v13  ;;  %v9907_v31 = vpop.f32.mrb[19].mxu0  ;;  %v9913_v33 = vpop.f32.mrb[19].mxu1  ;;  %v4310_v13 = vsel %vm267_vm0, %v9266_v3, 0 }
 0x10b   : > { %v836_v35 = vadd.f32 %v831_v30, %v775_v29  ;;  %10229 = vmatmul.mubr.msk.bf16.vlgmr.msra.gmra.mrb[124].mxu0 %vm263_vm2, %v3892_v23  ;;  %10235 = vmatmul.mubr.msk.bf16.vlgmr.msra.gmra.mrb[124].mxu1 %vm263_vm2, %v3948_v27  ;;  %v4358_v23 = vshll.u32 %v10780_v15, 16  ;;  %v4414_v27 = vshll.u32 %v10781_v17, 16 }
 0x10c   : > { %10239 = vmatpush3.bf16.msra.mxu0 %v4034_v32  ;;  %10245 = vmatpush3.bf16.msra.mxu1 %v4086_v34  ;;  %v4366_v32 = vsel %vm267_vm0, %v9269_v18, 0  ;;  %v4422_v34 = vsel %vm267_vm0, %v9271_v22, 0 }
 0x10d   : > { %10240 = vmatprep.mubr.msk.bf16.mxu0 %vm10845_vm1, %v10844_v2  ;;  %10246 = vmatprep.mubr.msk.bf16.mxu1 %vm10845_vm1, %v10844_v2 }
 0x10e   : > { %v885_v37 = vpop.f32.mrb[20].mxu0  ;;  %10250 = vmatprep.subr.bf16.mxu0 %v10844_v2  ;;  %v942_v41 = vpop.f32.mrb[20].mxu1  ;;  %10256 = vmatprep.subr.bf16.mxu1 %v10844_v2 }
 0x10f   : > { %v892_v40 = vadd.f32 %v885_v37, %v835_v28  ;;  %v9918_v42 = vpop.f32.mrb[21].mxu0  ;;  %v9924_v45 = vpop.f32.mrb[21].mxu1  ;;  %v4356_v37 = vshrl.u32 %v10780_v15, 16 }
 0x110   : > { %v888_v46 = vpop.f32.mrb[22].mxu0  ;;  %v945_v50 = vpop.f32.mrb[22].mxu1  ;;  %v9280_v45 = vld [vmem:[%s12225_s1 + $0x12] sm:$0x3] }
 0x111   : > { %v949_v48 = vadd.f32 %v942_v41, %v892_v40  ;;  %v893_v49 = vadd.f32 %v888_v46, %v836_v35  ;;  %v9919_v51 = vpop.f32.mrb[23].mxu0  ;;  %v9925_v53 = vpop.f32.mrb[23].mxu1  ;;  %v4416_v40 = vrot.slane %v4414_v27, 1 }
 0x113   : > { %v950_v55 = vadd.f32 %v945_v50, %v893_v49  ;;  %10241 = vmatmul.mubr.msk.bf16.vlgmr.msra.gmra.mrb[128].mxu0 %vm263_vm2, %v10778_v38  ;;  %10247 = vmatmul.mubr.msk.bf16.vlgmr.msra.gmra.mrb[128].mxu1 %vm263_vm2, %v10779_v36  ;;  %v4360_v38 = vrot.slane %v4358_v23, 1 }
 0x114   : > { %10251 = vmatpush3.bf16.msra.mxu0 %v4140_v52  ;;  %10257 = vmatpush3.bf16.msra.mxu1 %v4196_v54 }
 0x115   : > { %10252 = vmatprep.mubr.msk.bf16.mxu0 %vm10845_vm1, %v10844_v2  ;;  %10258 = vmatprep.mubr.msk.bf16.mxu1 %vm10845_vm1, %v10844_v2  ;;  %v4361_v50 = vor.u32 %v4360_v38, %v4356_v37 }
 0x116   : > { %v1003_v60 = vpop.f32.mrb[24].mxu0  ;;  %10262 = vmatprep.subr.bf16.mxu0 %v10844_v2  ;;  %v1064_v63 = vpop.f32.mrb[24].mxu1  ;;  %10268 = vmatprep.subr.bf16.mxu1 %v10844_v2 }
 0x117   : > { %v1010_v62 = vadd.f32 %v1003_v60, %v949_v48  ;;  %v9930_v0 = vpop.f32.mrb[25].mxu0  ;;  %v9936_v4 = vpop.f32.mrb[25].mxu1 }
 0x118   : > { %v1006_v5 = vpop.f32.mrb[26].mxu0  ;;  %v1067_v9 = vpop.f32.mrb[26].mxu1  ;;  %v10782_v4 = vld [vmem:[%s10912_s27 + $0x28] sm:$0x1f]  }
 0x119   : > { %v1071_v7 = vadd.f32 %v1064_v63, %v1010_v62  ;;  %v1011_v8 = vadd.f32 %v1006_v5, %v950_v55  ;;  %v9931_v10 = vpop.f32.mrb[27].mxu0  ;;  %v9937_v12 = vpop.f32.mrb[27].mxu1  ;;  %v4417_v55 = vor.u32 %v4416_v40, %v4412_v39 }
 0x11a   : > { %v4591_v12 = vshll.u32 %v10782_v4, 16 }
 0x11b   : > { %v1072_v14 = vadd.f32 %v1067_v9, %v1011_v8  ;;  %10253 = vmatmul.mubr.msk.bf16.vlgmr.msra.gmra.mrb[132].mxu0 %vm263_vm2, %v4135_v1  ;;  %10259 = vmatmul.mubr.msk.bf16.vlgmr.msra.gmra.mrb[132].mxu1 %vm263_vm2, %v4191_v6  ;;  %v4543_v1 = vsel %vm267_vm0, %v9280_v45, 0  ;;  %v10783_v6 = vld [vmem:[%s10912_s27 + $0x78] sm:$0x1f]  }
 0x11c   : > { %10263 = vmatpush3.bf16.msra.mxu0 %v4253_v11  ;;  %10269 = vmatpush3.bf16.msra.mxu1 %v4310_v13  ;;  %v9285_v11 = vld [vmem:[%s12225_s1 + $0x16] sm:$0x3]  ;;  %v4645_v27 = vshrl.u32 %v10783_v6, 16 }
 0x11d   : > { %10264 = vmatprep.mubr.msk.bf16.mxu0 %vm10845_vm1, %v10844_v2  ;;  %10270 = vmatprep.mubr.msk.bf16.mxu1 %vm10845_vm1, %v10844_v2  ;;  %v4655_v22 = vsel %vm267_vm0, %v9285_v11, 0 }
 0x11e   : > { %v1121_v16 = vpop.f32.mrb[28].mxu0  ;;  %10274 = vmatprep.subr.bf16.mxu0 %v10844_v2  ;;  %v1178_v20 = vpop.f32.mrb[28].mxu1  ;;  %10280 = vmatprep.subr.bf16.mxu1 %v10844_v2 }
 0x11f   : > { %v1128_v19 = vadd.f32 %v1121_v16, %v1071_v7  ;;  %v9942_v21 = vpop.f32.mrb[29].mxu0  ;;  %v9948_v25 = vpop.f32.mrb[29].mxu1  ;;  %v9283_v7 = vld [vmem:[%s12225_s1 + $0x14] sm:$0x3] }
 0x120   : > { %v1124_v26 = vpop.f32.mrb[30].mxu0  ;;  %v1181_v30 = vpop.f32.mrb[30].mxu1  ;;  %v4589_v25 = vshrl.u32 %v10782_v4, 16 }
 0x121   : > { %v1185_v28 = vadd.f32 %v1178_v20, %v1128_v19  ;;  %v1129_v29 = vadd.f32 %v1124_v26, %v1072_v14  ;;  %v9943_v31 = vpop.f32.mrb[31].mxu0  ;;  %v9949_v33 = vpop.f32.mrb[31].mxu1  ;;  %v4599_v20 = vsel %vm267_vm0, %v9283_v7, 0  ;;  %v4593_v26 = vrot.slane %v4591_v12, 1 }
 0x123   : > { %v1193_v35 = vadd.f32 %v11497_v24, %v1185_v28  ;;  %v1186_v36 = vadd.f32 %v1181_v30, %v1129_v29  ;;  %10265 = vmatmul.mubr.msk.bf16.vlgmr.msra.gmra.mrb[136].mxu0 %vm263_vm2, %v10780_v15  ;;  %10271 = vmatmul.mubr.msk.bf16.vlgmr.msra.gmra.mrb[136].mxu1 %vm263_vm2, %v10781_v17  ;;  %v4647_v15 = vshll.u32 %v10783_v6, 16  ;;  %v9289_v30 = vld [vmem:[%s12225_s1 + $0x18] sm:$0x3] }
 0x124   : > { %10275 = vmatpush3.bf16.msra.mxu0 %v4366_v32  ;;  %10281 = vmatpush3.bf16.msra.mxu1 %v4422_v34  ;;  %v4594_v34 = vor.u32 %v4593_v26, %v4589_v25 }
 0x125   : > { %vm1195_vm4 = vcmp.ge.f32.partialorder %v1193_v35, 0.0  ;;  %v1197_v41 = vmul.f32 0.2, %v1193_v35  ;;  %v1194_v42 = vadd.f32 %v11497_v24, %v1186_v36  ;;  %10276 = vmatprep.mubr.msk.bf16.mxu0 %vm10845_vm1, %v10844_v2  ;;  %10282 = vmatprep.mubr.msk.bf16.mxu1 %vm10845_vm1, %v10844_v2  ;;  %v4649_v28 = vrot.slane %v4647_v15, 1  ;;  %v4955_v15 = vld [vmem:[%s12225_s1] sm:$0x3] }
 0x126   : > { %v1268_v43 = vpop.f32.mrb[32].mxu0  ;;  %10286 = vmatprep.subr.bf16.mxu0 %v10844_v2  ;;  %v1320_v48 = vpop.f32.mrb[32].mxu1  ;;  %10292 = vmatprep.subr.bf16.mxu1 %v10844_v2  ;;  %v5020_v26 = vsel %vm267_vm0, %v4955_v15, 0  ;;  %v9331_v15 = vld [vmem:[%s12225_s1 + $0xe] sm:$0x3] }
 0x127   : > { %v1199_v46 = vsel %vm1195_vm4, %v1193_v35, %v1197_v41  ;;  %vm1196_vm7 = vcmp.ge.f32.partialorder %v1194_v42, 0.0  ;;  %v1198_v47 = vmul.f32 0.2, %v1194_v42  ;;  %v9954_v49 = vpop.f32.mrb[33].mxu0  ;;  %v1321_v52 = vadd.f32 %v1320_v48, %v1268_v43  ;;  %v9960_v53 = vpop.f32.mrb[33].mxu1 }
 0x128   : > { %v9548_v51 = vpack.c.bf16 %v1199_v46, %v1199_v46  ;;  %v1271_v54 = vpop.f32.mrb[34].mxu0  ;;  %v1323_v59 = vpop.f32.mrb[34].mxu1  ;;  %v9294_v35 = vld [vmem:[%s12225_s1 + $0x1a] sm:$0x3]  ;;  %v4650_v38 = vor.u32 %v4649_v28, %v4645_v27  ;;  %v4715_v43 = vsel %vm267_vm0, %v9289_v30, 0 }
 0x129   : > { %v1200_v56 = vsel %vm1196_vm7, %v1194_v42, %v1198_v47  ;;  %v9955_v60 = vpop.f32.mrb[35].mxu0  ;;  %v1324_v63 = vadd.f32 %v1323_v59, %v1271_v54  ;;  %v9961_v0 = vpop.f32.mrb[35].mxu1  ;;  %v4775_v45 = vsel %vm267_vm0, %v9294_v35, 0  ;;  %v10784_v47 = vld [vmem:[%s10912_s27 + $0xc8] sm:$0x1f]  }
 0x12a   : > { %1210 = vst.msk [vmem:[%s11511_s9] sm:$0xf] %vm1209_vm3, %v9548_v51  ;;  %v9549_v62 = vpack.c.bf16 %v1200_v56, %v1200_v56  ;;  %v10785_v49 = vld [vmem:[%s10912_s27 + $0x118] sm:$0x1f]   ;;  %v9299_v54 = vld [vmem:[%s12225_s1 + $0x1e] sm:$0x3] }
 0x12b   : > { %10277 = vmatmul.mubr.msk.bf16.vlgmr.msra.gmra.mrb[140].mxu0 %vm263_vm2, %v4361_v50  ;;  %10283 = vmatmul.mubr.msk.bf16.vlgmr.msra.gmra.mrb[140].mxu1 %vm263_vm2, %v4417_v55  ;;  %v9297_v50 = vld [vmem:[%s12225_s1 + $0x1c] sm:$0x3]  ;;  %v4823_v55 = vshll.u32 %v10784_v47, 16  ;;  %v4879_v59 = vshll.u32 %v10785_v49, 16  ;;  %v4877_v7 = vshrl.u32 %v10785_v49, 16 }
 0x12c   : > { %v1215_v3 = vsel %vm11525_vm8, %v9549_v62, %v1214_v58  ;;  %10287 = vmatpush3.bf16.msra.mxu0 %v4483_v61  ;;  %10293 = vmatpush3.bf16.msra.mxu1 %v4543_v1  ;;  %v4831_v0 = vsel %vm267_vm0, %v9297_v50, 0  ;;  %v10787_v28 = vld [vmem:[%s10912_s27 + $0x28] sm:$0x1f]   ;;  %v10786_v30 = vld [vmem:[%s10912_s27 + $0x78] sm:$0x1f]  }
 0x12d   : > { %1216 = vst [vmem:[%s11511_s9 + $0x4] sm:$0x1] %v1215_v3  ;;  %10288 = vmatprep.mubr.msk.bf16.mxu0 %vm10845_vm1, %v10844_v2  ;;  %10294 = vmatprep.mubr.msk.bf16.mxu1 %vm10845_vm1, %v10844_v2  ;;  %v4887_v3 = vsel %vm267_vm0, %v9299_v54, 0  ;;  %v9317_v35 = vld [vmem:[%s12225_s1 + $0x6] sm:$0x3]  ;;  %v5120_v50 = vshrl.u32 %v10786_v30, 16 }
 0x12e   : > { %v1374_v5 = vpop.f32.mrb[36].mxu0  ;;  %10298 = vmatprep.subr.bf16.mxu0 %v10844_v2  ;;  %v1430_v9 = vpop.f32.mrb[36].mxu1  ;;  %10304 = vmatprep.subr.bf16.mxu1 %v10844_v2 }
 0x12f   : > { %v1381_v8 = vadd.f32 %v1374_v5, %v1321_v52  ;;  %v9966_v10 = vpop.f32.mrb[37].mxu0  ;;  %v9972_v13 = vpop.f32.mrb[37].mxu1  ;;  %v4821_v5 = vshrl.u32 %v10784_v47, 16 }
 0x130   : > { %v1377_v14 = vpop.f32.mrb[38].mxu0  ;;  %v1433_v18 = vpop.f32.mrb[38].mxu1  ;;  %v9310_v10 = vld [vmem:[%s12225_s1 + $0x2] sm:$0x3] }
 0x131   : > { %v1437_v16 = vadd.f32 %v1430_v9, %v1381_v8  ;;  %v1382_v17 = vadd.f32 %v1377_v14, %v1324_v63  ;;  %v9967_v19 = vpop.f32.mrb[39].mxu0  ;;  %v9973_v21 = vpop.f32.mrb[39].mxu1  ;;  %v4881_v8 = vrot.slane %v4879_v59, 1  ;;  %v9326_v59 = vld [vmem:[%s12225_s1 + $0xa] sm:$0x3] }
 0x133   : > { %v1438_v23 = vadd.f32 %v1433_v18, %v1382_v17  ;;  %10289 = vmatmul.mubr.msk.bf16.vlgmr.msra.gmra.mrb[144].mxu0 %vm263_vm2, %v10782_v4  ;;  %10295 = vmatmul.mubr.msk.bf16.vlgmr.msra.gmra.mrb[144].mxu1 %vm263_vm2, %v10783_v6  ;;  %v4825_v6 = vrot.slane %v4823_v55, 1  ;;  %v4882_v18 = vor.u32 %v4881_v8, %v4877_v7  ;;  %v10788_v8 = vld [vmem:[%s10912_s27 + $0xc8] sm:$0x1f]  }
 0x134   : > { %10299 = vmatpush3.bf16.msra.mxu0 %v4599_v20  ;;  %10305 = vmatpush3.bf16.msra.mxu1 %v4655_v22 }
 0x135   : > { %10300 = vmatprep.mubr.msk.bf16.mxu0 %vm10845_vm1, %v10844_v2  ;;  %10306 = vmatprep.mubr.msk.bf16.mxu1 %vm10845_vm1, %v10844_v2  ;;  %v4826_v14 = vor.u32 %v4825_v6, %v4821_v5  ;;  %v5244_v6 = vsel %vm267_vm0, %v9326_v59, 0 }
 0x136   : > { %v1487_v29 = vpop.f32.mrb[40].mxu0  ;;  %10310 = vmatprep.subr.bf16.mxu0 %v10844_v2  ;;  %v1544_v32 = vpop.f32.mrb[40].mxu1  ;;  %10316 = vmatprep.subr.bf16.mxu1 %v10844_v2 }
 0x137   : > { %v1494_v31 = vadd.f32 %v1487_v29, %v1437_v16  ;;  %v9978_v33 = vpop.f32.mrb[41].mxu0  ;;  %v9984_v36 = vpop.f32.mrb[41].mxu1 }
 0x138   : > { %v1490_v37 = vpop.f32.mrb[42].mxu0  ;;  %v1547_v41 = vpop.f32.mrb[42].mxu1  ;;  %v5066_v36 = vshll.u32 %v10787_v28, 16 }
 0x139   : > { %v1551_v39 = vadd.f32 %v1544_v32, %v1494_v31  ;;  %v1495_v40 = vadd.f32 %v1490_v37, %v1438_v23  ;;  %v9979_v42 = vpop.f32.mrb[43].mxu0  ;;  %v9985_v44 = vpop.f32.mrb[43].mxu1  ;;  %v4968_v23 = vsel %vm267_vm0, %v9310_v10, 0  ;;  %v9315_v31 = vld [vmem:[%s12225_s1 + $0x4] sm:$0x3] }
 0x13a   : > { %v5074_v44 = vsel %vm267_vm0, %v9315_v31, 0  ;;  %v10789_v10 = vld [vmem:[%s10912_s27 + $0x118] sm:$0x1f]  }
 0x13b   : > { %v1552_v46 = vadd.f32 %v1547_v41, %v1495_v40  ;;  %10301 = vmatmul.mubr.msk.bf16.vlgmr.msra.gmra.mrb[148].mxu0 %vm263_vm2, %v4594_v34  ;;  %10307 = vmatmul.mubr.msk.bf16.vlgmr.msra.gmra.mrb[148].mxu1 %vm263_vm2, %v4650_v38 }
 0x13c   : > { %10311 = vmatpush3.bf16.msra.mxu0 %v4715_v43  ;;  %10317 = vmatpush3.bf16.msra.mxu1 %v4775_v45 }
 0x13d   : > { %10312 = vmatprep.mubr.msk.bf16.mxu0 %vm10845_vm1, %v10844_v2  ;;  %10318 = vmatprep.mubr.msk.bf16.mxu1 %vm10845_vm1, %v10844_v2 }
 0x13e   : > { %v1600_v48 = vpop.f32.mrb[44].mxu0  ;;  %10322 = vmatprep.subr.bf16.mxu0 %v10844_v2  ;;  %v1656_v52 = vpop.f32.mrb[44].mxu1  ;;  %10328 = vmatprep.subr.bf16.mxu1 %v10844_v2 }
 0x13f   : > { %v1607_v51 = vadd.f32 %v1600_v48, %v1551_v39  ;;  %v9990_v53 = vpop.f32.mrb[45].mxu0  ;;  %v9996_v56 = vpop.f32.mrb[45].mxu1  ;;  %v5122_v39 = vshll.u32 %v10786_v30, 16  ;;  %v5064_v48 = vshrl.u32 %v10787_v28, 16 }
 0x140   : > { %v1603_v58 = vpop.f32.mrb[46].mxu0  ;;  %v1659_v62 = vpop.f32.mrb[46].mxu1  ;;  %v9321_v53 = vld [vmem:[%s12225_s1 + $0x8] sm:$0x3] }
 0x141   : > { %v1663_v60 = vadd.f32 %v1656_v52, %v1607_v51  ;;  %v1608_v61 = vadd.f32 %v1603_v58, %v1552_v46  ;;  %v9991_v63 = vpop.f32.mrb[47].mxu0  ;;  %v9997_v1 = vpop.f32.mrb[47].mxu1  ;;  %v5130_v46 = vsel %vm267_vm0, %v9317_v35, 0  ;;  %v5124_v51 = vrot.slane %v5122_v39, 1 }
 0x143   : > { %v1664_v4 = vadd.f32 %v1659_v62, %v1608_v61  ;;  %10313 = vmatmul.mubr.msk.bf16.vlgmr.msra.gmra.mrb[152].mxu0 %vm263_vm2, %v10784_v47  ;;  %10319 = vmatmul.mubr.msk.bf16.vlgmr.msra.gmra.mrb[152].mxu1 %vm263_vm2, %v10785_v49  ;;  %v5068_v49 = vrot.slane %v5066_v36, 1  ;;  %v5125_v62 = vor.u32 %v5124_v51, %v5120_v50  ;;  %v9124_v50 = vld [vmem:[%s11511_s9 + $0xc] sm:$0x1] }
 0x144   : > { %10323 = vmatpush3.bf16.msra.mxu0 %v4831_v0  ;;  %10329 = vmatpush3.bf16.msra.mxu1 %v4887_v3 }
 0x145   : > { %10324 = vmatprep.mubr.msk.bf16.mxu0 %vm10845_vm1, %v10844_v2  ;;  %10330 = vmatprep.mubr.msk.bf16.mxu1 %vm10845_vm1, %v10844_v2  ;;  %v5069_v58 = vor.u32 %v5068_v49, %v5064_v48 }
 0x146   : > { %v1717_v9 = vpop.f32.mrb[48].mxu0  ;;  %10334 = vmatprep.subr.bf16.mxu0 %v10844_v2  ;;  %v1777_v12 = vpop.f32.mrb[48].mxu1  ;;  %10340 = vmatprep.subr.bf16.mxu1 %v10844_v2 }
 0x147   : > { %v1724_v11 = vadd.f32 %v1717_v9, %v1663_v60  ;;  %v10002_v13 = vpop.f32.mrb[49].mxu0  ;;  %v10008_v16 = vpop.f32.mrb[49].mxu1 }
 0x148   : > { %v1720_v17 = vpop.f32.mrb[50].mxu0  ;;  %v1780_v21 = vpop.f32.mrb[50].mxu1  ;;  %v5292_v16 = vshll.u32 %v10788_v8, 16 }
 0x149   : > { %v1784_v19 = vadd.f32 %v1777_v12, %v1724_v11  ;;  %v1725_v20 = vadd.f32 %v1720_v17, %v1664_v4  ;;  %v10003_v22 = vpop.f32.mrb[51].mxu0  ;;  %v10009_v25 = vpop.f32.mrb[51].mxu1  ;;  %v5187_v4 = vsel %vm267_vm0, %v9321_v53, 0  ;;  %v9329_v11 = vld [vmem:[%s12225_s1 + $0xc] sm:$0x3] }
 0x14a   : > { %v5300_v25 = vsel %vm267_vm0, %v9329_v11, 0  ;;  %v5294_v31 = vrot.slane %v5292_v16, 1 }
 0x14b   : > { %v1785_v27 = vadd.f32 %v1780_v21, %v1725_v20  ;;  %10325 = vmatmul.mubr.msk.bf16.vlgmr.msra.gmra.mrb[156].mxu0 %vm263_vm2, %v4826_v14  ;;  %10331 = vmatmul.mubr.msk.bf16.vlgmr.msra.gmra.mrb[156].mxu1 %vm263_vm2, %v4882_v18 }
 0x14c   : > { %10335 = vmatpush3.bf16.msra.mxu0 %v4968_v23  ;;  %10341 = vmatpush3.bf16.msra.mxu1 %v5020_v26 }
 0x14d   : > { %10336 = vmatprep.mubr.msk.bf16.mxu0 %vm10845_vm1, %v10844_v2  ;;  %10342 = vmatprep.mubr.msk.bf16.mxu1 %vm10845_vm1, %v10844_v2 }
 0x14e   : > { %v1833_v29 = vpop.f32.mrb[52].mxu0  ;;  %10346 = vmatprep.subr.bf16.mxu0 %v10844_v2  ;;  %v1889_v33 = vpop.f32.mrb[52].mxu1  ;;  %10352 = vmatprep.subr.bf16.mxu1 %v10844_v2 }
 0x14f   : > { %v1840_v32 = vadd.f32 %v1833_v29, %v1784_v19  ;;  %v10014_v34 = vpop.f32.mrb[53].mxu0  ;;  %v10020_v37 = vpop.f32.mrb[53].mxu1  ;;  %v5348_v19 = vshll.u32 %v10789_v10, 16 }
 0x150   : > { %v1836_v38 = vpop.f32.mrb[54].mxu0  ;;  %v1892_v42 = vpop.f32.mrb[54].mxu1  ;;  %v9335_v37 = vld [vmem:[%s12225_s1 + $0x10] sm:$0x3] }
 0x151   : > { %v1896_v40 = vadd.f32 %v1889_v33, %v1840_v32  ;;  %v1841_v41 = vadd.f32 %v1836_v38, %v1785_v27  ;;  %v10015_v43 = vpop.f32.mrb[55].mxu0  ;;  %v10021_v45 = vpop.f32.mrb[55].mxu1  ;;  %v5356_v27 = vsel %vm267_vm0, %v9331_v15, 0  ;;  %v5346_v32 = vshrl.u32 %v10789_v10, 16  ;;  %v9340_v38 = vld [vmem:[%s12225_s1 + $0x12] sm:$0x3] }
 0x152   : > { %v5350_v33 = vrot.slane %v5348_v19, 1  ;;  %v5417_v53 = vsel %vm267_vm0, %v9335_v37, 0 }
 0x153   : > { %v1897_v47 = vadd.f32 %v1892_v42, %v1841_v41  ;;  %10337 = vmatmul.mubr.msk.bf16.vlgmr.msra.gmra.mrb[160].mxu0 %vm263_vm2, %v10786_v30  ;;  %10343 = vmatmul.mubr.msk.bf16.vlgmr.msra.gmra.mrb[160].mxu1 %vm263_vm2, %v10787_v28  ;;  %v5290_v30 = vshrl.u32 %v10788_v8, 16 }
 0x154   : > { %10347 = vmatpush3.bf16.msra.mxu0 %v5074_v44  ;;  %10353 = vmatpush3.bf16.msra.mxu1 %v5130_v46  ;;  %v5351_v48 = vor.u32 %v5350_v33, %v5346_v32 }
 0x155   : > { %10348 = vmatprep.mubr.msk.bf16.mxu0 %vm10845_vm1, %v10844_v2  ;;  %10354 = vmatprep.mubr.msk.bf16.mxu1 %vm10845_vm1, %v10844_v2  ;;  %v5295_v43 = vor.u32 %v5294_v31, %v5290_v30 }
 0x156   : > { %v1949_v52 = vpop.f32.mrb[56].mxu0  ;;  %10358 = vmatprep.subr.bf16.mxu0 %v10844_v2  ;;  %v2009_v55 = vpop.f32.mrb[56].mxu1  ;;  %10364 = vmatprep.subr.bf16.mxu1 %v10844_v2 }
 0x157   : > { %v1956_v54 = vadd.f32 %v1949_v52, %v1896_v40  ;;  %v10026_v56 = vpop.f32.mrb[57].mxu0  ;;  %v10032_v60 = vpop.f32.mrb[57].mxu1 }
 0x158   : > { %v1952_v61 = vpop.f32.mrb[58].mxu0  ;;  %v2012_v1 = vpop.f32.mrb[58].mxu1  ;;  %v10790_v60 = vld [vmem:[%s10912_s27 + $0x30] sm:$0x1f]  }
 0x159   : > { %v2016_v63 = vadd.f32 %v2009_v55, %v1956_v54  ;;  %v1957_v0 = vadd.f32 %v1952_v61, %v1897_v47  ;;  %v10027_v3 = vpop.f32.mrb[59].mxu0  ;;  %v10033_v5 = vpop.f32.mrb[59].mxu1 }
 0x15a   : > { %v5525_v5 = vshll.u32 %v10790_v60, 16 }
 0x15b   : > { %v2017_v7 = vadd.f32 %v2012_v1, %v1957_v0  ;;  %10349 = vmatmul.mubr.msk.bf16.vlgmr.msra.gmra.mrb[164].mxu0 %vm263_vm2, %v5069_v58  ;;  %10355 = vmatmul.mubr.msk.bf16.vlgmr.msra.gmra.mrb[164].mxu1 %vm263_vm2, %v5125_v62  ;;  %v5477_v58 = vsel %vm267_vm0, %v9340_v38, 0  ;;  %v10791_v62 = vld [vmem:[%s10912_s27 + $0x80] sm:$0x1f]  }
 0x15c   : > { %10359 = vmatpush3.bf16.msra.mxu0 %v5187_v4  ;;  %10365 = vmatpush3.bf16.msra.mxu1 %v5244_v6  ;;  %v9345_v4 = vld [vmem:[%s12225_s1 + $0x16] sm:$0x3]  ;;  %v5579_v19 = vshrl.u32 %v10791_v62, 16 }
 0x15d   : > { %10360 = vmatprep.mubr.msk.bf16.mxu0 %vm10845_vm1, %v10844_v2  ;;  %10366 = vmatprep.mubr.msk.bf16.mxu1 %vm10845_vm1, %v10844_v2  ;;  %v5589_v15 = vsel %vm267_vm0, %v9345_v4, 0 }
 0x15e   : > { %v2065_v9 = vpop.f32.mrb[60].mxu0  ;;  %10370 = vmatprep.subr.bf16.mxu0 %v10844_v2  ;;  %v2121_v13 = vpop.f32.mrb[60].mxu1  ;;  %10376 = vmatprep.subr.bf16.mxu1 %v10844_v2 }
 0x15f   : > { %v2072_v12 = vadd.f32 %v2065_v9, %v2016_v63  ;;  %v10038_v14 = vpop.f32.mrb[61].mxu0  ;;  %v10044_v17 = vpop.f32.mrb[61].mxu1  ;;  %v9343_v63 = vld [vmem:[%s12225_s1 + $0x14] sm:$0x3] }
 0x160   : > { %v2068_v18 = vpop.f32.mrb[62].mxu0  ;;  %v2124_v22 = vpop.f32.mrb[62].mxu1  ;;  %v5523_v17 = vshrl.u32 %v10790_v60, 16 }
 0x161   : > { %v2128_v20 = vadd.f32 %v2121_v13, %v2072_v12  ;;  %v2073_v21 = vadd.f32 %v2068_v18, %v2017_v7  ;;  %v10039_v23 = vpop.f32.mrb[63].mxu0  ;;  %v10045_v26 = vpop.f32.mrb[63].mxu1  ;;  %v5533_v13 = vsel %vm267_vm0, %v9343_v63, 0  ;;  %v5527_v18 = vrot.slane %v5525_v5, 1 }
 0x163   : > { %v2130_v28 = vadd.f32 %v11497_v24, %v2128_v20  ;;  %v2129_v29 = vadd.f32 %v2124_v22, %v2073_v21  ;;  %10361 = vmatmul.mubr.msk.bf16.vlgmr.msra.gmra.mrb[168].mxu0 %vm263_vm2, %v10788_v8  ;;  %10367 = vmatmul.mubr.msk.bf16.vlgmr.msra.gmra.mrb[168].mxu1 %vm263_vm2, %v10789_v10  ;;  %v5581_v8 = vshll.u32 %v10791_v62, 16  ;;  %v9349_v22 = vld [vmem:[%s12225_s1 + $0x18] sm:$0x3] }
 0x164   : > { %10371 = vmatpush3.bf16.msra.mxu0 %v5300_v25  ;;  %10377 = vmatpush3.bf16.msra.mxu1 %v5356_v27  ;;  %v5528_v27 = vor.u32 %v5527_v18, %v5523_v17 }
 0x165   : > { %vm2132_vm9 = vcmp.ge.f32.partialorder %v2130_v28, 0.0  ;;  %v2134_v34 = vmul.f32 0.2, %v2130_v28  ;;  %v2131_v35 = vadd.f32 %v11497_v24, %v2129_v29  ;;  %10372 = vmatprep.mubr.msk.bf16.mxu0 %vm10845_vm1, %v10844_v2  ;;  %10378 = vmatprep.mubr.msk.bf16.mxu1 %vm10845_vm1, %v10844_v2  ;;  %v5583_v20 = vrot.slane %v5581_v8, 1  ;;  %v5889_v8 = vld [vmem:[%s12225_s1] sm:$0x3] }
 0x166   : > { %v2202_v36 = vpop.f32.mrb[64].mxu0  ;;  %10382 = vmatprep.subr.bf16.mxu0 %v10844_v2  ;;  %v2254_v41 = vpop.f32.mrb[64].mxu1  ;;  %10388 = vmatprep.subr.bf16.mxu1 %v10844_v2  ;;  %v5954_v18 = vsel %vm267_vm0, %v5889_v8, 0  ;;  %v9391_v8 = vld [vmem:[%s12225_s1 + $0xe] sm:$0x3] }
 0x167   : > { %v2136_v39 = vsel %vm2132_vm9, %v2130_v28, %v2134_v34  ;;  %vm2133_vm10 = vcmp.ge.f32.partialorder %v2131_v35, 0.0  ;;  %v2135_v40 = vmul.f32 0.2, %v2131_v35  ;;  %v10050_v42 = vpop.f32.mrb[65].mxu0  ;;  %v2255_v45 = vadd.f32 %v2254_v41, %v2202_v36  ;;  %v10056_v46 = vpop.f32.mrb[65].mxu1 }
 0x168   : > { %v9550_v44 = vpack.c.bf16 %v2136_v39, %v2136_v39  ;;  %v2205_v47 = vpop.f32.mrb[66].mxu0  ;;  %v2257_v51 = vpop.f32.mrb[66].mxu1  ;;  %v9354_v28 = vld [vmem:[%s12225_s1 + $0x1a] sm:$0x3]  ;;  %v5584_v31 = vor.u32 %v5583_v20, %v5579_v19  ;;  %v5649_v36 = vsel %vm267_vm0, %v9349_v22, 0 }
 0x169   : > { %v2137_v49 = vsel %vm2133_vm10, %v2131_v35, %v2135_v40  ;;  %v10051_v52 = vpop.f32.mrb[67].mxu0  ;;  %v2258_v55 = vadd.f32 %v2257_v51, %v2205_v47  ;;  %v10057_v56 = vpop.f32.mrb[67].mxu1  ;;  %v5709_v38 = vsel %vm267_vm0, %v9354_v28, 0  ;;  %v10792_v40 = vld [vmem:[%s10912_s27 + $0xd0] sm:$0x1f]  }
 0x16a   : > { %9123 = vst.msk [vmem:[%s11511_s9 + $0x8] sm:$0xf] %vm1209_vm3, %v9550_v44  ;;  %v9551_v54 = vpack.c.bf16 %v2137_v49, %v2137_v49  ;;  %v10793_v42 = vld [vmem:[%s10912_s27 + $0x120] sm:$0x1f]   ;;  %v9359_v47 = vld [vmem:[%s12225_s1 + $0x1e] sm:$0x3] }
 0x16b   : > { %10373 = vmatmul.mubr.msk.bf16.vlgmr.msra.gmra.mrb[172].mxu0 %vm263_vm2, %v5295_v43  ;;  %10379 = vmatmul.mubr.msk.bf16.vlgmr.msra.gmra.mrb[172].mxu1 %vm263_vm2, %v5351_v48  ;;  %v9357_v43 = vld [vmem:[%s12225_s1 + $0x1c] sm:$0x3]  ;;  %v5757_v48 = vshll.u32 %v10792_v40, 16  ;;  %v5813_v51 = vshll.u32 %v10793_v42, 16  ;;  %v5811_v63 = vshrl.u32 %v10793_v42, 16 }
 0x16c   : > { %v2149_v59 = vsel %vm11525_vm8, %v9551_v54, %v9124_v50  ;;  %10383 = vmatpush3.bf16.msra.mxu0 %v5417_v53  ;;  %10389 = vmatpush3.bf16.msra.mxu1 %v5477_v58  ;;  %v5765_v56 = vsel %vm267_vm0, %v9357_v43, 0  ;;  %v10795_v20 = vld [vmem:[%s10912_s27 + $0x30] sm:$0x1f]   ;;  %v10794_v22 = vld [vmem:[%s10912_s27 + $0x80] sm:$0x1f]  }
 0x16d   : > { %9125 = vst [vmem:[%s11511_s9 + $0xc] sm:$0x1] %v2149_v59  ;;  %10384 = vmatprep.mubr.msk.bf16.mxu0 %vm10845_vm1, %v10844_v2  ;;  %10390 = vmatprep.mubr.msk.bf16.mxu1 %vm10845_vm1, %v10844_v2  ;;  %v5821_v59 = vsel %vm267_vm0, %v9359_v47, 0  ;;  %v9377_v28 = vld [vmem:[%s12225_s1 + $0x6] sm:$0x3]  ;;  %v6054_v43 = vshrl.u32 %v10794_v22, 16 }
 0x16e   : > { %v2308_v61 = vpop.f32.mrb[68].mxu0  ;;  %10394 = vmatprep.subr.bf16.mxu0 %v10844_v2  ;;  %v2364_v1 = vpop.f32.mrb[68].mxu1  ;;  %10400 = vmatprep.subr.bf16.mxu1 %v10844_v2 }
 0x16f   : > { %v2315_v0 = vadd.f32 %v2308_v61, %v2255_v45  ;;  %v10062_v3 = vpop.f32.mrb[69].mxu0  ;;  %v10068_v6 = vpop.f32.mrb[69].mxu1  ;;  %v5755_v61 = vshrl.u32 %v10792_v40, 16 }
 0x170   : > { %v2311_v7 = vpop.f32.mrb[70].mxu0  ;;  %v2367_v11 = vpop.f32.mrb[70].mxu1  ;;  %v9370_v3 = vld [vmem:[%s12225_s1 + $0x2] sm:$0x3] }
 0x171   : > { %v2371_v9 = vadd.f32 %v2364_v1, %v2315_v0  ;;  %v2316_v10 = vadd.f32 %v2311_v7, %v2258_v55  ;;  %v10063_v12 = vpop.f32.mrb[71].mxu0  ;;  %v10069_v14 = vpop.f32.mrb[71].mxu1  ;;  %v5815_v0 = vrot.slane %v5813_v51, 1  ;;  %v9386_v51 = vld [vmem:[%s12225_s1 + $0xa] sm:$0x3] }
 0x173   : > { %v2372_v16 = vadd.f32 %v2367_v11, %v2316_v10  ;;  %10385 = vmatmul.mubr.msk.bf16.vlgmr.msra.gmra.mrb[176].mxu0 %vm263_vm2, %v10790_v60  ;;  %10391 = vmatmul.mubr.msk.bf16.vlgmr.msra.gmra.mrb[176].mxu1 %vm263_vm2, %v10791_v62  ;;  %v5759_v62 = vrot.slane %v5757_v48, 1  ;;  %v5816_v11 = vor.u32 %v5815_v0, %v5811_v63  ;;  %v10796_v0 = vld [vmem:[%s10912_s27 + $0xd0] sm:$0x1f]  }
 0x174   : > { %10395 = vmatpush3.bf16.msra.mxu0 %v5533_v13  ;;  %10401 = vmatpush3.bf16.msra.mxu1 %v5589_v15 }
 0x175   : > { %10396 = vmatprep.mubr.msk.bf16.mxu0 %vm10845_vm1, %v10844_v2  ;;  %10402 = vmatprep.mubr.msk.bf16.mxu1 %vm10845_vm1, %v10844_v2  ;;  %v5760_v7 = vor.u32 %v5759_v62, %v5755_v61  ;;  %v6178_v62 = vsel %vm267_vm0, %v9386_v51, 0 }
 0x176   : > { %v2421_v21 = vpop.f32.mrb[72].mxu0  ;;  %10406 = vmatprep.subr.bf16.mxu0 %v10844_v2  ;;  %v2478_v25 = vpop.f32.mrb[72].mxu1  ;;  %10412 = vmatprep.subr.bf16.mxu1 %v10844_v2 }
 0x177   : > { %v2428_v23 = vadd.f32 %v2421_v21, %v2371_v9  ;;  %v10074_v26 = vpop.f32.mrb[73].mxu0  ;;  %v10080_v29 = vpop.f32.mrb[73].mxu1 }
 0x178   : > { %v2424_v30 = vpop.f32.mrb[74].mxu0  ;;  %v2481_v34 = vpop.f32.mrb[74].mxu1  ;;  %v6000_v29 = vshll.u32 %v10795_v20, 16 }
 0x179   : > { %v2485_v32 = vadd.f32 %v2478_v25, %v2428_v23  ;;  %v2429_v33 = vadd.f32 %v2424_v30, %v2372_v16  ;;  %v10075_v35 = vpop.f32.mrb[75].mxu0  ;;  %v10081_v37 = vpop.f32.mrb[75].mxu1  ;;  %v5902_v16 = vsel %vm267_vm0, %v9370_v3, 0  ;;  %v9375_v23 = vld [vmem:[%s12225_s1 + $0x4] sm:$0x3] }
 0x17a   : > { %v6008_v37 = vsel %vm267_vm0, %v9375_v23, 0  ;;  %v10797_v3 = vld [vmem:[%s10912_s27 + $0x120] sm:$0x1f]  }
 0x17b   : > { %v2486_v39 = vadd.f32 %v2481_v34, %v2429_v33  ;;  %10397 = vmatmul.mubr.msk.bf16.vlgmr.msra.gmra.mrb[180].mxu0 %vm263_vm2, %v5528_v27  ;;  %10403 = vmatmul.mubr.msk.bf16.vlgmr.msra.gmra.mrb[180].mxu1 %vm263_vm2, %v5584_v31 }
 0x17c   : > { %10407 = vmatpush3.bf16.msra.mxu0 %v5649_v36  ;;  %10413 = vmatpush3.bf16.msra.mxu1 %v5709_v38 }
 0x17d   : > { %10408 = vmatprep.mubr.msk.bf16.mxu0 %vm10845_vm1, %v10844_v2  ;;  %10414 = vmatprep.mubr.msk.bf16.mxu1 %vm10845_vm1, %v10844_v2 }
 0x17e   : > { %v2534_v41 = vpop.f32.mrb[76].mxu0  ;;  %10418 = vmatprep.subr.bf16.mxu0 %v10844_v2  ;;  %v2590_v45 = vpop.f32.mrb[76].mxu1  ;;  %10424 = vmatprep.subr.bf16.mxu1 %v10844_v2 }
 0x17f   : > { %v2541_v44 = vadd.f32 %v2534_v41, %v2485_v32  ;;  %v10086_v46 = vpop.f32.mrb[77].mxu0  ;;  %v10092_v49 = vpop.f32.mrb[77].mxu1  ;;  %v6056_v32 = vshll.u32 %v10794_v22, 16  ;;  %v5998_v41 = vshrl.u32 %v10795_v20, 16 }
 0x180   : > { %v2537_v50 = vpop.f32.mrb[78].mxu0  ;;  %v2593_v54 = vpop.f32.mrb[78].mxu1  ;;  %v9381_v46 = vld [vmem:[%s12225_s1 + $0x8] sm:$0x3] }
 0x181   : > { %v2597_v52 = vadd.f32 %v2590_v45, %v2541_v44  ;;  %v2542_v53 = vadd.f32 %v2537_v50, %v2486_v39  ;;  %v10087_v55 = vpop.f32.mrb[79].mxu0  ;;  %v10093_v58 = vpop.f32.mrb[79].mxu1  ;;  %v6064_v39 = vsel %vm267_vm0, %v9377_v28, 0  ;;  %v6058_v44 = vrot.slane %v6056_v32, 1  ;;  %v11807_v28 = vld [vmem:[%s12226_s2] ss:$0 sm:$0xff] }
 0x183   : > { %v2598_v60 = vadd.f32 %v2593_v54, %v2542_v53  ;;  %10409 = vmatmul.mubr.msk.bf16.vlgmr.msra.gmra.mrb[184].mxu0 %vm263_vm2, %v10792_v40  ;;  %10415 = vmatmul.mubr.msk.bf16.vlgmr.msra.gmra.mrb[184].mxu1 %vm263_vm2, %v10793_v42  ;;  %v6002_v42 = vrot.slane %v6000_v29, 1  ;;  %v6059_v54 = vor.u32 %v6058_v44, %v6054_v43  ;;  %v9184_v43 = vld [vmem:[%s11511_s9 + $0x14] sm:$0x1] }
 0x184   : > { %10419 = vmatpush3.bf16.msra.mxu0 %v5765_v56  ;;  %10425 = vmatpush3.bf16.msra.mxu1 %v5821_v59 }
 0x185   : > { %10420 = vmatprep.mubr.msk.bf16.mxu0 %vm10845_vm1, %v10844_v2  ;;  %10426 = vmatprep.mubr.msk.bf16.mxu1 %vm10845_vm1, %v10844_v2  ;;  %v6003_v50 = vor.u32 %v6002_v42, %v5998_v41 }
 0x186   : > { %v2651_v1 = vpop.f32.mrb[80].mxu0  ;;  %10430 = vmatprep.subr.bf16.mxu0 %v10844_v2  ;;  %v2711_v5 = vpop.f32.mrb[80].mxu1  ;;  %10436 = vmatprep.subr.bf16.mxu1 %v10844_v2 }
 0x187   : > { %v2658_v4 = vadd.f32 %v2651_v1, %v2597_v52  ;;  %v10098_v6 = vpop.f32.mrb[81].mxu0  ;;  %v10104_v9 = vpop.f32.mrb[81].mxu1 }
 0x188   : > { %v2654_v10 = vpop.f32.mrb[82].mxu0  ;;  %v2714_v14 = vpop.f32.mrb[82].mxu1  ;;  %v6226_v9 = vshll.u32 %v10796_v0, 16 }
 0x189   : > { %v2718_v12 = vadd.f32 %v2711_v5, %v2658_v4  ;;  %v2659_v13 = vadd.f32 %v2654_v10, %v2598_v60  ;;  %v10099_v15 = vpop.f32.mrb[83].mxu0  ;;  %v10105_v17 = vpop.f32.mrb[83].mxu1  ;;  %v6121_v60 = vsel %vm267_vm0, %v9381_v46, 0  ;;  %v9389_v4 = vld [vmem:[%s12225_s1 + $0xc] sm:$0x3] }
 0x18a   : > { %v6234_v17 = vsel %vm267_vm0, %v9389_v4, 0  ;;  %v6228_v23 = vrot.slane %v6226_v9, 1 }
 0x18b   : > { %v2719_v19 = vadd.f32 %v2714_v14, %v2659_v13  ;;  %10421 = vmatmul.mubr.msk.bf16.vlgmr.msra.gmra.mrb[188].mxu0 %vm263_vm2, %v5760_v7  ;;  %10427 = vmatmul.mubr.msk.bf16.vlgmr.msra.gmra.mrb[188].mxu1 %vm263_vm2, %v5816_v11 }
 0x18c   : > { %10431 = vmatpush3.bf16.msra.mxu0 %v5902_v16  ;;  %10437 = vmatpush3.bf16.msra.mxu1 %v5954_v18 }
 0x18d   : > { %10432 = vmatprep.mubr.msk.bf16.mxu0 %vm10845_vm1, %v10844_v2  ;;  %10438 = vmatprep.mubr.msk.bf16.mxu1 %vm10845_vm1, %v10844_v2 }
 0x18e   : > { %v2767_v21 = vpop.f32.mrb[84].mxu0  ;;  %10442 = vmatprep.subr.bf16.mxu0 %v10844_v2  ;;  %v2823_v26 = vpop.f32.mrb[84].mxu1  ;;  %10448 = vmatprep.subr.bf16.mxu1 %v10844_v2 }
 0x18f   : > { %v2774_v25 = vadd.f32 %v2767_v21, %v2718_v12  ;;  %v10110_v27 = vpop.f32.mrb[85].mxu0  ;;  %v10116_v30 = vpop.f32.mrb[85].mxu1  ;;  %v6282_v12 = vshll.u32 %v10797_v3, 16 }
 0x190   : > { %v2770_v31 = vpop.f32.mrb[86].mxu0  ;;  %v2826_v35 = vpop.f32.mrb[86].mxu1  ;;  %v9395_v30 = vld [vmem:[%s12225_s1 + $0x10] sm:$0x3] }
 0x191   : > { %v2830_v33 = vadd.f32 %v2823_v26, %v2774_v25  ;;  %v2775_v34 = vadd.f32 %v2770_v31, %v2719_v19  ;;  %v10111_v36 = vpop.f32.mrb[87].mxu0  ;;  %v10117_v38 = vpop.f32.mrb[87].mxu1  ;;  %v6290_v19 = vsel %vm267_vm0, %v9391_v8, 0  ;;  %v6280_v25 = vshrl.u32 %v10797_v3, 16  ;;  %v9400_v31 = vld [vmem:[%s12225_s1 + $0x12] sm:$0x3] }
 0x192   : > { %v6284_v26 = vrot.slane %v6282_v12, 1  ;;  %v6351_v46 = vsel %vm267_vm0, %v9395_v30, 0 }
 0x193   : > { %v2831_v40 = vadd.f32 %v2826_v35, %v2775_v34  ;;  %10433 = vmatmul.mubr.msk.bf16.vlgmr.msra.gmra.mrb[192].mxu0 %vm263_vm2, %v10794_v22  ;;  %10439 = vmatmul.mubr.msk.bf16.vlgmr.msra.gmra.mrb[192].mxu1 %vm263_vm2, %v10795_v20  ;;  %v6224_v22 = vshrl.u32 %v10796_v0, 16 }
 0x194   : > { %10443 = vmatpush3.bf16.msra.mxu0 %v6008_v37  ;;  %10449 = vmatpush3.bf16.msra.mxu1 %v6064_v39  ;;  %v6285_v41 = vor.u32 %v6284_v26, %v6280_v25 }
 0x195   : > { %10444 = vmatprep.mubr.msk.bf16.mxu0 %vm10845_vm1, %v10844_v2  ;;  %10450 = vmatprep.mubr.msk.bf16.mxu1 %vm10845_vm1, %v10844_v2  ;;  %v6229_v36 = vor.u32 %v6228_v23, %v6224_v22 }
 0x196   : > { %v2883_v45 = vpop.f32.mrb[88].mxu0  ;;  %10454 = vmatprep.subr.bf16.mxu0 %v10844_v2  ;;  %v2943_v48 = vpop.f32.mrb[88].mxu1  ;;  %10460 = vmatprep.subr.bf16.mxu1 %v10844_v2 }
 0x197   : > { %v2890_v47 = vadd.f32 %v2883_v45, %v2830_v33  ;;  %v10122_v49 = vpop.f32.mrb[89].mxu0  ;;  %v10128_v52 = vpop.f32.mrb[89].mxu1 }
 0x198   : > { %v2886_v53 = vpop.f32.mrb[90].mxu0  ;;  %v2946_v58 = vpop.f32.mrb[90].mxu1  ;;  %v10798_v52 = vld [vmem:[%s10912_s27 + $0x38] sm:$0x1f]  }
 0x199   : > { %v2950_v55 = vadd.f32 %v2943_v48, %v2890_v47  ;;  %v2891_v56 = vadd.f32 %v2886_v53, %v2831_v40  ;;  %v10123_v59 = vpop.f32.mrb[91].mxu0  ;;  %v10129_v61 = vpop.f32.mrb[91].mxu1 }
 0x19a   : > { %v6459_v61 = vshll.u32 %v10798_v52, 16 }
 0x19b   : > { %v2951_v63 = vadd.f32 %v2946_v58, %v2891_v56  ;;  %10445 = vmatmul.mubr.msk.bf16.vlgmr.msra.gmra.mrb[196].mxu0 %vm263_vm2, %v6003_v50  ;;  %10451 = vmatmul.mubr.msk.bf16.vlgmr.msra.gmra.mrb[196].mxu1 %vm263_vm2, %v6059_v54  ;;  %v6411_v50 = vsel %vm267_vm0, %v9400_v31, 0  ;;  %v10799_v54 = vld [vmem:[%s10912_s27 + $0x88] sm:$0x1f]  }
 0x19c   : > { %10455 = vmatpush3.bf16.msra.mxu0 %v6121_v60  ;;  %10461 = vmatpush3.bf16.msra.mxu1 %v6178_v62  ;;  %v9405_v60 = vld [vmem:[%s12225_s1 + $0x16] sm:$0x3]  ;;  %v6513_v12 = vshrl.u32 %v10799_v54, 16 }
 0x19d   : > { %10456 = vmatprep.mubr.msk.bf16.mxu0 %vm10845_vm1, %v10844_v2  ;;  %10462 = vmatprep.mubr.msk.bf16.mxu1 %vm10845_vm1, %v10844_v2  ;;  %v6523_v8 = vsel %vm267_vm0, %v9405_v60, 0 }
 0x19e   : > { %v2999_v1 = vpop.f32.mrb[92].mxu0  ;;  %10466 = vmatprep.subr.bf16.mxu0 %v10844_v2  ;;  %v3055_v6 = vpop.f32.mrb[92].mxu1  ;;  %10472 = vmatprep.subr.bf16.mxu1 %v10844_v2 }
 0x19f   : > { %v3006_v5 = vadd.f32 %v2999_v1, %v2950_v55  ;;  %v10134_v7 = vpop.f32.mrb[93].mxu0  ;;  %v10140_v10 = vpop.f32.mrb[93].mxu1  ;;  %v9403_v55 = vld [vmem:[%s12225_s1 + $0x14] sm:$0x3] }
 0x1a0   : > { %v3002_v11 = vpop.f32.mrb[94].mxu0  ;;  %v3058_v15 = vpop.f32.mrb[94].mxu1  ;;  %v6457_v10 = vshrl.u32 %v10798_v52, 16 }
 0x1a1   : > { %v3062_v13 = vadd.f32 %v3055_v6, %v3006_v5  ;;  %v3007_v14 = vadd.f32 %v3002_v11, %v2951_v63  ;;  %v10135_v16 = vpop.f32.mrb[95].mxu0  ;;  %v10141_v18 = vpop.f32.mrb[95].mxu1  ;;  %v6467_v6 = vsel %vm267_vm0, %v9403_v55, 0  ;;  %v6461_v11 = vrot.slane %v6459_v61, 1 }
 0x1a3   : > { %v3064_v20 = vadd.f32 %v11497_v24, %v3062_v13  ;;  %v3063_v21 = vadd.f32 %v3058_v15, %v3007_v14  ;;  %10457 = vmatmul.mubr.msk.bf16.vlgmr.msra.gmra.mrb[200].mxu0 %vm263_vm2, %v10796_v0  ;;  %10463 = vmatmul.mubr.msk.bf16.vlgmr.msra.gmra.mrb[200].mxu1 %vm263_vm2, %v10797_v3  ;;  %v6515_v0 = vshll.u32 %v10799_v54, 16  ;;  %v9409_v15 = vld [vmem:[%s12225_s1 + $0x18] sm:$0x3] }
 0x1a4   : > { %10467 = vmatpush3.bf16.msra.mxu0 %v6234_v17  ;;  %10473 = vmatpush3.bf16.msra.mxu1 %v6290_v19  ;;  %v6462_v19 = vor.u32 %v6461_v11, %v6457_v10 }
 0x1a5   : > { %vm3066_vm11 = vcmp.ge.f32.partialorder %v3064_v20, 0.0  ;;  %v3068_v27 = vmul.f32 0.2, %v3064_v20  ;;  %v3065_v29 = vadd.f32 %v11807_v28, %v3063_v21  ;;  %10468 = vmatprep.mubr.msk.bf16.mxu0 %vm10845_vm1, %v10844_v2  ;;  %10474 = vmatprep.mubr.msk.bf16.mxu1 %vm10845_vm1, %v10844_v2  ;;  %v6517_v13 = vrot.slane %v6515_v0, 1  ;;  %v6823_v0 = vld [vmem:[%s12225_s1] sm:$0x3] }
 0x1a6   : > { %v3136_v24 = vpop.f32.mrb[96].mxu0  ;;  %10478 = vmatprep.subr.bf16.mxu0 %v10844_v2  ;;  %v3188_v34 = vpop.f32.mrb[96].mxu1  ;;  %10484 = vmatprep.subr.bf16.mxu1 %v10844_v2  ;;  %v6888_v11 = vsel %vm267_vm0, %v6823_v0, 0  ;;  %v9451_v0 = vld [vmem:[%s12225_s1 + $0xe] sm:$0x3] }
 0x1a7   : > { %v3070_v32 = vsel %vm3066_vm11, %v3064_v20, %v3068_v27  ;;  %vm3067_vm12 = vcmp.ge.f32.partialorder %v3065_v29, 0.0  ;;  %v3069_v33 = vmul.f32 0.2, %v3065_v29  ;;  %v10146_v35 = vpop.f32.mrb[97].mxu0  ;;  %v3189_v38 = vadd.f32 %v3188_v34, %v3136_v24  ;;  %v10152_v39 = vpop.f32.mrb[97].mxu1 }
 0x1a8   : > { %v9552_v37 = vpack.c.bf16 %v3070_v32, %v3070_v32  ;;  %v3139_v40 = vpop.f32.mrb[98].mxu0  ;;  %v3191_v44 = vpop.f32.mrb[98].mxu1  ;;  %v9414_v20 = vld [vmem:[%s12225_s1 + $0x1a] sm:$0x3]  ;;  %v6518_v23 = vor.u32 %v6517_v13, %v6513_v12  ;;  %v6583_v24 = vsel %vm267_vm0, %v9409_v15, 0 }
 0x1a9   : > { %v3071_v42 = vsel %vm3067_vm12, %v3065_v29, %v3069_v33  ;;  %v10147_v45 = vpop.f32.mrb[99].mxu0  ;;  %v3192_v48 = vadd.f32 %v3191_v44, %v3139_v40  ;;  %v10153_v49 = vpop.f32.mrb[99].mxu1  ;;  %v6643_v31 = vsel %vm267_vm0, %v9414_v20, 0  ;;  %v10800_v33 = vld [vmem:[%s10912_s27 + $0xd8] sm:$0x1f]  }
 0x1aa   : > { %9183 = vst.msk [vmem:[%s11511_s9 + $0x10] sm:$0xf] %vm1209_vm3, %v9552_v37  ;;  %v9553_v47 = vpack.c.bf16 %v3071_v42, %v3071_v42  ;;  %v10801_v35 = vld [vmem:[%s10912_s27 + $0x128] sm:$0x1f]   ;;  %v9419_v40 = vld [vmem:[%s12225_s1 + $0x1e] sm:$0x3] }
 0x1ab   : > { %10469 = vmatmul.mubr.msk.bf16.vlgmr.msra.gmra.mrb[204].mxu0 %vm263_vm2, %v6229_v36  ;;  %10475 = vmatmul.mubr.msk.bf16.vlgmr.msra.gmra.mrb[204].mxu1 %vm263_vm2, %v6285_v41  ;;  %v9417_v36 = vld [vmem:[%s12225_s1 + $0x1c] sm:$0x3]  ;;  %v6691_v41 = vshll.u32 %v10800_v33, 16  ;;  %v6747_v44 = vshll.u32 %v10801_v35, 16  ;;  %v6745_v55 = vshrl.u32 %v10801_v35, 16 }
 0x1ac   : > { %v3083_v51 = vsel %vm11525_vm8, %v9553_v47, %v9184_v43  ;;  %10479 = vmatpush3.bf16.msra.mxu0 %v6351_v46  ;;  %10485 = vmatpush3.bf16.msra.mxu1 %v6411_v50  ;;  %v6699_v49 = vsel %vm267_vm0, %v9417_v36, 0  ;;  %v10803_v13 = vld [vmem:[%s10912_s27 + $0x38] sm:$0x1f]   ;;  %v10802_v15 = vld [vmem:[%s10912_s27 + $0x88] sm:$0x1f]  }
 0x1ad   : > { %9185 = vst [vmem:[%s11511_s9 + $0x14] sm:$0x1] %v3083_v51  ;;  %10480 = vmatprep.mubr.msk.bf16.mxu0 %vm10845_vm1, %v10844_v2  ;;  %10486 = vmatprep.mubr.msk.bf16.mxu1 %vm10845_vm1, %v10844_v2  ;;  %v6755_v51 = vsel %vm267_vm0, %v9419_v40, 0  ;;  %v9437_v20 = vld [vmem:[%s12225_s1 + $0x6] sm:$0x3]  ;;  %v6988_v36 = vshrl.u32 %v10802_v15, 16 }
 0x1ae   : > { %v3242_v53 = vpop.f32.mrb[100].mxu0  ;;  %10490 = vmatprep.subr.bf16.mxu0 %v10844_v2  ;;  %v3298_v58 = vpop.f32.mrb[100].mxu1  ;;  %10496 = vmatprep.subr.bf16.mxu1 %v10844_v2 }
 0x1af   : > { %v3249_v56 = vadd.f32 %v3242_v53, %v3189_v38  ;;  %v10158_v59 = vpop.f32.mrb[101].mxu0  ;;  %v10164_v62 = vpop.f32.mrb[101].mxu1  ;;  %v6689_v53 = vshrl.u32 %v10800_v33, 16 }
 0x1b0   : > { %v3245_v63 = vpop.f32.mrb[102].mxu0  ;;  %v3301_v4 = vpop.f32.mrb[102].mxu1  ;;  %v9430_v59 = vld [vmem:[%s12225_s1 + $0x2] sm:$0x3] }
 0x1b1   : > { %v3305_v1 = vadd.f32 %v3298_v58, %v3249_v56  ;;  %v3250_v3 = vadd.f32 %v3245_v63, %v3192_v48  ;;  %v10159_v5 = vpop.f32.mrb[103].mxu0  ;;  %v10165_v7 = vpop.f32.mrb[103].mxu1  ;;  %v6749_v56 = vrot.slane %v6747_v44, 1  ;;  %v9446_v44 = vld [vmem:[%s12225_s1 + $0xa] sm:$0x3] }
 0x1b3   : > { %v3306_v9 = vadd.f32 %v3301_v4, %v3250_v3  ;;  %10481 = vmatmul.mubr.msk.bf16.vlgmr.msra.gmra.mrb[208].mxu0 %vm263_vm2, %v10798_v52  ;;  %10487 = vmatmul.mubr.msk.bf16.vlgmr.msra.gmra.mrb[208].mxu1 %vm263_vm2, %v10799_v54  ;;  %v6693_v54 = vrot.slane %v6691_v41, 1  ;;  %v6750_v4 = vor.u32 %v6749_v56, %v6745_v55  ;;  %v10804_v56 = vld [vmem:[%s10912_s27 + $0xd8] sm:$0x1f]  }
 0x1b4   : > { %10491 = vmatpush3.bf16.msra.mxu0 %v6467_v6  ;;  %10497 = vmatpush3.bf16.msra.mxu1 %v6523_v8 }
 0x1b5   : > { %10492 = vmatprep.mubr.msk.bf16.mxu0 %vm10845_vm1, %v10844_v2  ;;  %10498 = vmatprep.mubr.msk.bf16.mxu1 %vm10845_vm1, %v10844_v2  ;;  %v6694_v63 = vor.u32 %v6693_v54, %v6689_v53  ;;  %v7112_v54 = vsel %vm267_vm0, %v9446_v44, 0 }
 0x1b6   : > { %v3355_v14 = vpop.f32.mrb[104].mxu0  ;;  %10502 = vmatprep.subr.bf16.mxu0 %v10844_v2  ;;  %v3412_v17 = vpop.f32.mrb[104].mxu1  ;;  %10508 = vmatprep.subr.bf16.mxu1 %v10844_v2 }
 0x1b7   : > { %v3362_v16 = vadd.f32 %v3355_v14, %v3305_v1  ;;  %v10170_v18 = vpop.f32.mrb[105].mxu0  ;;  %v10176_v21 = vpop.f32.mrb[105].mxu1 }
 0x1b8   : > { %v3358_v22 = vpop.f32.mrb[106].mxu0  ;;  %v3415_v27 = vpop.f32.mrb[106].mxu1  ;;  %v6934_v21 = vshll.u32 %v10803_v13, 16 }
 0x1b9   : > { %v3419_v25 = vadd.f32 %v3412_v17, %v3362_v16  ;;  %v3363_v26 = vadd.f32 %v3358_v22, %v3306_v9  ;;  %v10171_v29 = vpop.f32.mrb[107].mxu0  ;;  %v10177_v30 = vpop.f32.mrb[107].mxu1  ;;  %v6836_v9 = vsel %vm267_vm0, %v9430_v59, 0  ;;  %v9435_v16 = vld [vmem:[%s12225_s1 + $0x4] sm:$0x3] }
 0x1ba   : > { %v6942_v30 = vsel %vm267_vm0, %v9435_v16, 0  ;;  %v10805_v59 = vld [vmem:[%s10912_s27 + $0x128] sm:$0x1f]  }
 0x1bb   : > { %v3420_v32 = vadd.f32 %v3415_v27, %v3363_v26  ;;  %10493 = vmatmul.mubr.msk.bf16.vlgmr.msra.gmra.mrb[212].mxu0 %vm263_vm2, %v6462_v19  ;;  %10499 = vmatmul.mubr.msk.bf16.vlgmr.msra.gmra.mrb[212].mxu1 %vm263_vm2, %v6518_v23 }
 0x1bc   : > { %10503 = vmatpush3.bf16.msra.mxu0 %v6583_v24  ;;  %10509 = vmatpush3.bf16.msra.mxu1 %v6643_v31 }
 0x1bd   : > { %10504 = vmatprep.mubr.msk.bf16.mxu0 %vm10845_vm1, %v10844_v2  ;;  %10510 = vmatprep.mubr.msk.bf16.mxu1 %vm10845_vm1, %v10844_v2 }
 0x1be   : > { %v3468_v34 = vpop.f32.mrb[108].mxu0  ;;  %10514 = vmatprep.subr.bf16.mxu0 %v10844_v2  ;;  %v3524_v38 = vpop.f32.mrb[108].mxu1  ;;  %10520 = vmatprep.subr.bf16.mxu1 %v10844_v2 }
 0x1bf   : > { %v3475_v37 = vadd.f32 %v3468_v34, %v3419_v25  ;;  %v10182_v39 = vpop.f32.mrb[109].mxu0  ;;  %v10188_v42 = vpop.f32.mrb[109].mxu1  ;;  %v6990_v25 = vshll.u32 %v10802_v15, 16  ;;  %v6932_v34 = vshrl.u32 %v10803_v13, 16 }
 0x1c0   : > { %v3471_v43 = vpop.f32.mrb[110].mxu0  ;;  %v3527_v47 = vpop.f32.mrb[110].mxu1  ;;  %v9441_v39 = vld [vmem:[%s12225_s1 + $0x8] sm:$0x3] }
 0x1c1   : > { %v3531_v45 = vadd.f32 %v3524_v38, %v3475_v37  ;;  %v3476_v46 = vadd.f32 %v3471_v43, %v3420_v32  ;;  %v10183_v48 = vpop.f32.mrb[111].mxu0  ;;  %v10189_v50 = vpop.f32.mrb[111].mxu1  ;;  %v6998_v32 = vsel %vm267_vm0, %v9437_v20, 0  ;;  %v6992_v37 = vrot.slane %v6990_v25, 1 }
 0x1c3   : > { %v3532_v52 = vadd.f32 %v3527_v47, %v3476_v46  ;;  %10505 = vmatmul.mubr.msk.bf16.vlgmr.msra.gmra.mrb[216].mxu0 %vm263_vm2, %v10800_v33  ;;  %10511 = vmatmul.mubr.msk.bf16.vlgmr.msra.gmra.mrb[216].mxu1 %vm263_vm2, %v10801_v35  ;;  %v6936_v35 = vrot.slane %v6934_v21, 1  ;;  %v6993_v47 = vor.u32 %v6992_v37, %v6988_v36  ;;  %v9244_v36 = vld [vmem:[%s11511_s9 + $0x1c] sm:$0x1] }
 0x1c4   : > { %10515 = vmatpush3.bf16.msra.mxu0 %v6699_v49  ;;  %10521 = vmatpush3.bf16.msra.mxu1 %v6755_v51 }
 0x1c5   : > { %10516 = vmatprep.mubr.msk.bf16.mxu0 %vm10845_vm1, %v10844_v2  ;;  %10522 = vmatprep.mubr.msk.bf16.mxu1 %vm10845_vm1, %v10844_v2  ;;  %v6937_v43 = vor.u32 %v6936_v35, %v6932_v34 }
 0x1c6   : > { %v3585_v58 = vpop.f32.mrb[112].mxu0  ;;  %10526 = vmatprep.subr.bf16.mxu0 %v10844_v2  ;;  %v3645_v61 = vpop.f32.mrb[112].mxu1  ;;  %10532 = vmatprep.subr.bf16.mxu1 %v10844_v2 }
 0x1c7   : > { %v3592_v60 = vadd.f32 %v3585_v58, %v3531_v45  ;;  %v10194_v62 = vpop.f32.mrb[113].mxu0  ;;  %v10200_v1 = vpop.f32.mrb[113].mxu1 }
 0x1c8   : > { %v3588_v3 = vpop.f32.mrb[114].mxu0  ;;  %v3648_v7 = vpop.f32.mrb[114].mxu1  ;;  %v7160_v1 = vshll.u32 %v10804_v56, 16 }
 0x1c9   : > { %v3652_v5 = vadd.f32 %v3645_v61, %v3592_v60  ;;  %v3593_v6 = vadd.f32 %v3588_v3, %v3532_v52  ;;  %v10195_v8 = vpop.f32.mrb[115].mxu0  ;;  %v10201_v10 = vpop.f32.mrb[115].mxu1  ;;  %v7055_v52 = vsel %vm267_vm0, %v9441_v39, 0  ;;  %v9449_v60 = vld [vmem:[%s12225_s1 + $0xc] sm:$0x3] }
 0x1ca   : > { %v7168_v10 = vsel %vm267_vm0, %v9449_v60, 0  ;;  %v7162_v16 = vrot.slane %v7160_v1, 1 }
 0x1cb   : > { %v3653_v12 = vadd.f32 %v3648_v7, %v3593_v6  ;;  %10517 = vmatmul.mubr.msk.bf16.vlgmr.msra.gmra.mrb[220].mxu0 %vm263_vm2, %v6694_v63  ;;  %10523 = vmatmul.mubr.msk.bf16.vlgmr.msra.gmra.mrb[220].mxu1 %vm263_vm2, %v6750_v4 }
 0x1cc   : > { %10527 = vmatpush3.bf16.msra.mxu0 %v6836_v9  ;;  %10533 = vmatpush3.bf16.msra.mxu1 %v6888_v11 }
 0x1cd   : > { %10528 = vmatprep.mubr.msk.bf16.mxu0 %vm10845_vm1, %v10844_v2  ;;  %10534 = vmatprep.mubr.msk.bf16.mxu1 %vm10845_vm1, %v10844_v2 }
 0x1ce   : > { %v3701_v14 = vpop.f32.mrb[116].mxu0  ;;  %10538 = vmatprep.subr.bf16.mxu0 %v10844_v2  ;;  %v3757_v18 = vpop.f32.mrb[116].mxu1  ;;  %10544 = vmatprep.subr.bf16.mxu1 %v10844_v2 }
 0x1cf   : > { %v3708_v17 = vadd.f32 %v3701_v14, %v3652_v5  ;;  %v10206_v19 = vpop.f32.mrb[117].mxu0  ;;  %v10212_v22 = vpop.f32.mrb[117].mxu1  ;;  %v7216_v5 = vshll.u32 %v10805_v59, 16 }
 0x1d0   : > { %v3704_v23 = vpop.f32.mrb[118].mxu0  ;;  %v3760_v29 = vpop.f32.mrb[118].mxu1  ;;  %v9455_v22 = vld [vmem:[%s12225_s1 + $0x10] sm:$0x3] }
 0x1d1   : > { %v3764_v26 = vadd.f32 %v3757_v18, %v3708_v17  ;;  %v3709_v27 = vadd.f32 %v3704_v23, %v3653_v12  ;;  %v10207_v24 = vpop.f32.mrb[119].mxu0  ;;  %v10213_v31 = vpop.f32.mrb[119].mxu1  ;;  %v7224_v12 = vsel %vm267_vm0, %v9451_v0, 0  ;;  %v7214_v17 = vshrl.u32 %v10805_v59, 16  ;;  %v9460_v23 = vld [vmem:[%s12225_s1 + $0x12] sm:$0x3] }
 0x1d2   : > { %v7218_v18 = vrot.slane %v7216_v5, 1  ;;  %v7285_v39 = vsel %vm267_vm0, %v9455_v22, 0 }
 0x1d3   : > { %v3765_v33 = vadd.f32 %v3760_v29, %v3709_v27  ;;  %10529 = vmatmul.mubr.msk.bf16.vlgmr.msra.gmra.mrb[224].mxu0 %vm263_vm2, %v10802_v15  ;;  %10535 = vmatmul.mubr.msk.bf16.vlgmr.msra.gmra.mrb[224].mxu1 %vm263_vm2, %v10803_v13  ;;  %v7158_v15 = vshrl.u32 %v10804_v56, 16 }
 0x1d4   : > { %10539 = vmatpush3.bf16.msra.mxu0 %v6942_v30  ;;  %10545 = vmatpush3.bf16.msra.mxu1 %v6998_v32  ;;  %v7219_v34 = vor.u32 %v7218_v18, %v7214_v17 }
 0x1d5   : > { %10540 = vmatprep.mubr.msk.bf16.mxu0 %vm10845_vm1, %v10844_v2  ;;  %10546 = vmatprep.mubr.msk.bf16.mxu1 %vm10845_vm1, %v10844_v2  ;;  %v7163_v24 = vor.u32 %v7162_v16, %v7158_v15 }
 0x1d6   : > { %v3817_v38 = vpop.f32.mrb[120].mxu0  ;;  %10550 = vmatprep.subr.bf16.mxu0 %v10844_v2  ;;  %v3877_v41 = vpop.f32.mrb[120].mxu1  ;;  %10556 = vmatprep.subr.bf16.mxu1 %v10844_v2 }
 0x1d7   : > { %v3824_v40 = vadd.f32 %v3817_v38, %v3764_v26  ;;  %v10218_v42 = vpop.f32.mrb[121].mxu0  ;;  %v10224_v45 = vpop.f32.mrb[121].mxu1 }
 0x1d8   : > { %v3820_v46 = vpop.f32.mrb[122].mxu0  ;;  %v3880_v50 = vpop.f32.mrb[122].mxu1  ;;  %v10806_v45 = vld [vmem:[%s10912_s27 + $0x40] sm:$0x1f]  }
 0x1d9   : > { %v3884_v48 = vadd.f32 %v3877_v41, %v3824_v40  ;;  %v3825_v49 = vadd.f32 %v3820_v46, %v3765_v33  ;;  %v10219_v51 = vpop.f32.mrb[123].mxu0  ;;  %v10225_v53 = vpop.f32.mrb[123].mxu1 }
 0x1da   : > { %v7393_v53 = vshll.u32 %v10806_v45, 16 }
 0x1db   : > { %v3885_v55 = vadd.f32 %v3880_v50, %v3825_v49  ;;  %10541 = vmatmul.mubr.msk.bf16.vlgmr.msra.gmra.mrb[228].mxu0 %vm263_vm2, %v6937_v43  ;;  %10547 = vmatmul.mubr.msk.bf16.vlgmr.msra.gmra.mrb[228].mxu1 %vm263_vm2, %v6993_v47  ;;  %v7345_v43 = vsel %vm267_vm0, %v9460_v23, 0  ;;  %v10807_v47 = vld [vmem:[%s10912_s27 + $0x90] sm:$0x1f]  }
 0x1dc   : > { %10551 = vmatpush3.bf16.msra.mxu0 %v7055_v52  ;;  %10557 = vmatpush3.bf16.msra.mxu1 %v7112_v54  ;;  %v9465_v52 = vld [vmem:[%s12225_s1 + $0x16] sm:$0x3]  ;;  %v7447_v5 = vshrl.u32 %v10807_v47, 16 }
 0x1dd   : > { %10552 = vmatprep.mubr.msk.bf16.mxu0 %vm10845_vm1, %v10844_v2  ;;  %10558 = vmatprep.mubr.msk.bf16.mxu1 %vm10845_vm1, %v10844_v2  ;;  %v7457_v0 = vsel %vm267_vm0, %v9465_v52, 0 }
 0x1de   : > { %v3933_v58 = vpop.f32.mrb[124].mxu0  ;;  %10562 = vmatprep.subr.bf16.mxu0 %v10844_v2  ;;  %v3989_v62 = vpop.f32.mrb[124].mxu1  ;;  %10568 = vmatprep.subr.bf16.mxu1 %v10844_v2 }
 0x1df   : > { %v3940_v61 = vadd.f32 %v3933_v58, %v3884_v48  ;;  %v10230_v63 = vpop.f32.mrb[125].mxu0  ;;  %v10236_v3 = vpop.f32.mrb[125].mxu1  ;;  %v9463_v48 = vld [vmem:[%s12225_s1 + $0x14] sm:$0x3] }
 0x1e0   : > { %v3936_v4 = vpop.f32.mrb[126].mxu0  ;;  %v3992_v8 = vpop.f32.mrb[126].mxu1  ;;  %v7391_v3 = vshrl.u32 %v10806_v45, 16 }
 0x1e1   : > { %v3996_v6 = vadd.f32 %v3989_v62, %v3940_v61  ;;  %v3941_v7 = vadd.f32 %v3936_v4, %v3885_v55  ;;  %v10231_v9 = vpop.f32.mrb[127].mxu0  ;;  %v10237_v11 = vpop.f32.mrb[127].mxu1  ;;  %v7401_v62 = vsel %vm267_vm0, %v9463_v48, 0  ;;  %v7395_v4 = vrot.slane %v7393_v53, 1 }
 0x1e3   : > { %v3998_v13 = vadd.f32 %v11807_v28, %v3996_v6  ;;  %v3997_v14 = vadd.f32 %v3992_v8, %v3941_v7  ;;  %10553 = vmatmul.mubr.msk.bf16.vlgmr.msra.gmra.mrb[232].mxu0 %vm263_vm2, %v10804_v56  ;;  %10559 = vmatmul.mubr.msk.bf16.vlgmr.msra.gmra.mrb[232].mxu1 %vm263_vm2, %v10805_v59  ;;  %v7449_v56 = vshll.u32 %v10807_v47, 16  ;;  %v9469_v8 = vld [vmem:[%s12225_s1 + $0x18] sm:$0x3] }
 0x1e4   : > { %10563 = vmatpush3.bf16.msra.mxu0 %v7168_v10  ;;  %10569 = vmatpush3.bf16.msra.mxu1 %v7224_v12  ;;  %v7396_v12 = vor.u32 %v7395_v4, %v7391_v3 }
 0x1e5   : > { %vm4000_vm13 = vcmp.ge.f32.partialorder %v3998_v13, 0.0  ;;  %v4002_v19 = vmul.f32 0.2, %v3998_v13  ;;  %v3999_v20 = vadd.f32 %v11807_v28, %v3997_v14  ;;  %10564 = vmatprep.mubr.msk.bf16.mxu0 %vm10845_vm1, %v10844_v2  ;;  %10570 = vmatprep.mubr.msk.bf16.mxu1 %vm10845_vm1, %v10844_v2  ;;  %v7451_v6 = vrot.slane %v7449_v56, 1  ;;  %v7757_v56 = vld [vmem:[%s12225_s1] sm:$0x3] }
 0x1e6   : > { %v4070_v21 = vpop.f32.mrb[128].mxu0  ;;  %10574 = vmatprep.subr.bf16.mxu0 %v10844_v2  ;;  %v4122_v27 = vpop.f32.mrb[128].mxu1  ;;  %10580 = vmatprep.subr.bf16.mxu1 %v10844_v2  ;;  %v7822_v4 = vsel %vm267_vm0, %v7757_v56, 0  ;;  %v9511_v56 = vld [vmem:[%s12225_s1 + $0xe] sm:$0x3] }
 0x1e7   : > { %v4004_v25 = vsel %vm4000_vm13, %v3998_v13, %v4002_v19  ;;  %vm4001_vm14 = vcmp.ge.f32.partialorder %v3999_v20, 0.0  ;;  %v4003_v26 = vmul.f32 0.2, %v3999_v20  ;;  %v10242_v29 = vpop.f32.mrb[129].mxu0  ;;  %v4123_v31 = vadd.f32 %v4122_v27, %v4070_v21  ;;  %v10248_v32 = vpop.f32.mrb[129].mxu1 }
 0x1e8   : > { %v9554_v30 = vpack.c.bf16 %v4004_v25, %v4004_v25  ;;  %v4073_v33 = vpop.f32.mrb[130].mxu0  ;;  %v4125_v37 = vpop.f32.mrb[130].mxu1  ;;  %v9474_v13 = vld [vmem:[%s12225_s1 + $0x1a] sm:$0x3]  ;;  %v7452_v16 = vor.u32 %v7451_v6, %v7447_v5  ;;  %v7517_v21 = vsel %vm267_vm0, %v9469_v8, 0 }
 0x1e9   : > { %v4005_v35 = vsel %vm4001_vm14, %v3999_v20, %v4003_v26  ;;  %v10243_v38 = vpop.f32.mrb[131].mxu0  ;;  %v4126_v41 = vadd.f32 %v4125_v37, %v4073_v33  ;;  %v10249_v42 = vpop.f32.mrb[131].mxu1  ;;  %v7577_v23 = vsel %vm267_vm0, %v9474_v13, 0  ;;  %v10808_v26 = vld [vmem:[%s10912_s27 + $0xe0] sm:$0x1f]  }
 0x1ea   : > { %9243 = vst.msk [vmem:[%s11511_s9 + $0x18] sm:$0xf] %vm1209_vm3, %v9554_v30  ;;  %v9555_v40 = vpack.c.bf16 %v4005_v35, %v4005_v35  ;;  %v10809_v29 = vld [vmem:[%s10912_s27 + $0x130] sm:$0x1f]   ;;  %v9479_v33 = vld [vmem:[%s12225_s1 + $0x1e] sm:$0x3] }
 0x1eb   : > { %10565 = vmatmul.mubr.msk.bf16.vlgmr.msra.gmra.mrb[236].mxu0 %vm263_vm2, %v7163_v24  ;;  %10571 = vmatmul.mubr.msk.bf16.vlgmr.msra.gmra.mrb[236].mxu1 %vm263_vm2, %v7219_v34  ;;  %v9477_v24 = vld [vmem:[%s12225_s1 + $0x1c] sm:$0x3]  ;;  %v7625_v34 = vshll.u32 %v10808_v26, 16  ;;  %v7681_v37 = vshll.u32 %v10809_v29, 16  ;;  %v7679_v48 = vshrl.u32 %v10809_v29, 16 }
 0x1ec   : > { %v4017_v44 = vsel %vm11525_vm8, %v9555_v40, %v9244_v36  ;;  %10575 = vmatpush3.bf16.msra.mxu0 %v7285_v39  ;;  %10581 = vmatpush3.bf16.msra.mxu1 %v7345_v43  ;;  %v7633_v42 = vsel %vm267_vm0, %v9477_v24, 0  ;;  %v10811_v6 = vld [vmem:[%s10912_s27 + $0x40] sm:$0x1f]   ;;  %v10810_v8 = vld [vmem:[%s10912_s27 + $0x90] sm:$0x1f]  }
 0x1ed   : > { %9245 = vst [vmem:[%s11511_s9 + $0x1c] sm:$0x1] %v4017_v44  ;;  %10576 = vmatprep.mubr.msk.bf16.mxu0 %vm10845_vm1, %v10844_v2  ;;  %10582 = vmatprep.mubr.msk.bf16.mxu1 %vm10845_vm1, %v10844_v2  ;;  %v7689_v44 = vsel %vm267_vm0, %v9479_v33, 0  ;;  %v9497_v13 = vld [vmem:[%s12225_s1 + $0x6] sm:$0x3]  ;;  %v7922_v24 = vshrl.u32 %v10810_v8, 16 }
 0x1ee   : > { %v4176_v46 = vpop.f32.mrb[132].mxu0  ;;  %10586 = vmatprep.subr.bf16.mxu0 %v10844_v2  ;;  %v4232_v50 = vpop.f32.mrb[132].mxu1  ;;  %10592 = vmatprep.subr.bf16.mxu1 %v10844_v2 }
 0x1ef   : > { %v4183_v49 = vadd.f32 %v4176_v46, %v4123_v31  ;;  %v10254_v51 = vpop.f32.mrb[133].mxu0  ;;  %v10260_v54 = vpop.f32.mrb[133].mxu1  ;;  %v7623_v46 = vshrl.u32 %v10808_v26, 16 }
 0x1f0   : > { %v4179_v55 = vpop.f32.mrb[134].mxu0  ;;  %v4235_v60 = vpop.f32.mrb[134].mxu1  ;;  %v9490_v51 = vld [vmem:[%s12225_s1 + $0x2] sm:$0x3] }
 0x1f1   : > { %v4239_v58 = vadd.f32 %v4232_v50, %v4183_v49  ;;  %v4184_v59 = vadd.f32 %v4179_v55, %v4126_v41  ;;  %v10255_v61 = vpop.f32.mrb[135].mxu0  ;;  %v10261_v63 = vpop.f32.mrb[135].mxu1  ;;  %v7683_v49 = vrot.slane %v7681_v37, 1  ;;  %v9506_v37 = vld [vmem:[%s12225_s1 + $0xa] sm:$0x3] }
 0x1f3   : > { %v4240_v1 = vadd.f32 %v4235_v60, %v4184_v59  ;;  %10577 = vmatmul.mubr.msk.bf16.vlgmr.msra.gmra.mrb[240].mxu0 %vm263_vm2, %v10806_v45  ;;  %10583 = vmatmul.mubr.msk.bf16.vlgmr.msra.gmra.mrb[240].mxu1 %vm263_vm2, %v10807_v47  ;;  %v7627_v47 = vrot.slane %v7625_v34, 1  ;;  %v7684_v60 = vor.u32 %v7683_v49, %v7679_v48  ;;  %v10812_v49 = vld [vmem:[%s10912_s27 + $0xe0] sm:$0x1f]  }
 0x1f4   : > { %10587 = vmatpush3.bf16.msra.mxu0 %v7401_v62  ;;  %10593 = vmatpush3.bf16.msra.mxu1 %v7457_v0 }
 0x1f5   : > { %10588 = vmatprep.mubr.msk.bf16.mxu0 %vm10845_vm1, %v10844_v2  ;;  %10594 = vmatprep.mubr.msk.bf16.mxu1 %vm10845_vm1, %v10844_v2  ;;  %v7628_v55 = vor.u32 %v7627_v47, %v7623_v46  ;;  %v8046_v47 = vsel %vm267_vm0, %v9506_v37, 0  ;;  %v10814_v37 = vld [vmem:[%s10912_s27 + $0x48] sm:$0x1f]  }
 0x1f6   : > { %v4289_v7 = vpop.f32.mrb[136].mxu0  ;;  %10598 = vmatprep.subr.bf16.mxu0 %v10844_v2  ;;  %v4346_v10 = vpop.f32.mrb[136].mxu1  ;;  %10604 = vmatprep.subr.bf16.mxu1 %v10844_v2 }
 0x1f7   : > { %v4296_v9 = vadd.f32 %v4289_v7, %v4239_v58  ;;  %v10266_v11 = vpop.f32.mrb[137].mxu0  ;;  %v10272_v14 = vpop.f32.mrb[137].mxu1 }
 0x1f8   : > { %v4292_v15 = vpop.f32.mrb[138].mxu0  ;;  %v4349_v19 = vpop.f32.mrb[138].mxu1  ;;  %v7868_v14 = vshll.u32 %v10811_v6, 16 }
 0x1f9   : > { %v4353_v17 = vadd.f32 %v4346_v10, %v4296_v9  ;;  %v4297_v18 = vadd.f32 %v4292_v15, %v4240_v1  ;;  %v10267_v20 = vpop.f32.mrb[139].mxu0  ;;  %v10273_v22 = vpop.f32.mrb[139].mxu1  ;;  %v7770_v1 = vsel %vm267_vm0, %v9490_v51, 0  ;;  %v9495_v9 = vld [vmem:[%s12225_s1 + $0x4] sm:$0x3] }
 0x1fa   : > { %v7876_v22 = vsel %vm267_vm0, %v9495_v9, 0  ;;  %v10813_v51 = vld [vmem:[%s10912_s27 + $0x130] sm:$0x1f]  }
 0x1fb   : > { %v4354_v25 = vadd.f32 %v4349_v19, %v4297_v18  ;;  %10589 = vmatmul.mubr.msk.bf16.vlgmr.msra.gmra.mrb[244].mxu0 %vm263_vm2, %v7396_v12  ;;  %10595 = vmatmul.mubr.msk.bf16.vlgmr.msra.gmra.mrb[244].mxu1 %vm263_vm2, %v7452_v16 }
 0x1fc   : > { %10599 = vmatpush3.bf16.msra.mxu0 %v7517_v21  ;;  %10605 = vmatpush3.bf16.msra.mxu1 %v7577_v23 }
 0x1fd   : > { %10600 = vmatprep.mubr.msk.bf16.mxu0 %vm10845_vm1, %v10844_v2  ;;  %10606 = vmatprep.mubr.msk.bf16.mxu1 %vm10845_vm1, %v10844_v2 }
 0x1fe   : > { %v4402_v27 = vpop.f32.mrb[140].mxu0  ;;  %10610 = vmatprep.subr.bf16.mxu0 %v10844_v2  ;;  %v4458_v31 = vpop.f32.mrb[140].mxu1  ;;  %10616 = vmatprep.subr.bf16.mxu1 %v10844_v2 }
 0x1ff   : > { %v4409_v30 = vadd.f32 %v4402_v27, %v4353_v17  ;;  %v10278_v32 = vpop.f32.mrb[141].mxu0  ;;  %v10284_v35 = vpop.f32.mrb[141].mxu1  ;;  %v7924_v17 = vshll.u32 %v10810_v8, 16  ;;  %v7866_v27 = vshrl.u32 %v10811_v6, 16 }
 0x200   : > { %v4405_v36 = vpop.f32.mrb[142].mxu0  ;;  %v4461_v40 = vpop.f32.mrb[142].mxu1  ;;  %v9501_v32 = vld [vmem:[%s12225_s1 + $0x8] sm:$0x3] }
 0x201   : > { %v4465_v38 = vadd.f32 %v4458_v31, %v4409_v30  ;;  %v4410_v39 = vadd.f32 %v4405_v36, %v4354_v25  ;;  %v10279_v41 = vpop.f32.mrb[143].mxu0  ;;  %v10285_v43 = vpop.f32.mrb[143].mxu1  ;;  %v7932_v25 = vsel %vm267_vm0, %v9497_v13, 0  ;;  %v7926_v30 = vrot.slane %v7924_v17, 1 }
 0x203   : > { %v4466_v45 = vadd.f32 %v4461_v40, %v4410_v39  ;;  %10601 = vmatmul.mubr.msk.bf16.vlgmr.msra.gmra.mrb[248].mxu0 %vm263_vm2, %v10808_v26  ;;  %10607 = vmatmul.mubr.msk.bf16.vlgmr.msra.gmra.mrb[248].mxu1 %vm263_vm2, %v10809_v29  ;;  %v7870_v29 = vrot.slane %v7868_v14, 1  ;;  %v7927_v40 = vor.u32 %v7926_v30, %v7922_v24 }
 0x204   : > { %10611 = vmatpush3.bf16.msra.mxu0 %v7633_v42  ;;  %10617 = vmatpush3.bf16.msra.mxu1 %v7689_v44 }
 0x205   : > { %10612 = vmatprep.mubr.msk.bf16.mxu0 %vm10845_vm1, %v10844_v2  ;;  %10618 = vmatprep.mubr.msk.bf16.mxu1 %vm10845_vm1, %v10844_v2  ;;  %v7871_v36 = vor.u32 %v7870_v29, %v7866_v27  ;;  %v9304_v29 = vld [vmem:[%s11511_s9 + $0x24] sm:$0x1] }
 0x206   : > { %v4519_v50 = vpop.f32.mrb[144].mxu0  ;;  %10622 = vmatprep.subr.bf16.mxu0 %v10844_v2  ;;  %v4579_v53 = vpop.f32.mrb[144].mxu1  ;;  %10628 = vmatprep.subr.bf16.mxu1 %v10844_v2 }
 0x207   : > { %v4526_v52 = vadd.f32 %v4519_v50, %v4465_v38  ;;  %v10290_v54 = vpop.f32.mrb[145].mxu0  ;;  %v10296_v58 = vpop.f32.mrb[145].mxu1 }
 0x208   : > { %v4522_v59 = vpop.f32.mrb[146].mxu0  ;;  %v4582_v63 = vpop.f32.mrb[146].mxu1  ;;  %v8094_v58 = vshll.u32 %v10812_v49, 16 }
 0x209   : > { %v4586_v61 = vadd.f32 %v4579_v53, %v4526_v52  ;;  %v4527_v62 = vadd.f32 %v4522_v59, %v4466_v45  ;;  %v10291_v0 = vpop.f32.mrb[147].mxu0  ;;  %v10297_v3 = vpop.f32.mrb[147].mxu1  ;;  %v7989_v45 = vsel %vm267_vm0, %v9501_v32, 0  ;;  %v9509_v52 = vld [vmem:[%s12225_s1 + $0xc] sm:$0x3] }
 0x20a   : > { %v8102_v3 = vsel %vm267_vm0, %v9509_v52, 0  ;;  %v8096_v9 = vrot.slane %v8094_v58, 1  ;;  %v8325_v58 = vshrl.u32 %v10814_v37, 16 }
 0x20b   : > { %v4587_v5 = vadd.f32 %v4582_v63, %v4527_v62  ;;  %10613 = vmatmul.mubr.msk.bf16.vlgmr.msra.gmra.mrb[252].mxu0 %vm263_vm2, %v7628_v55  ;;  %10619 = vmatmul.mubr.msk.bf16.vlgmr.msra.gmra.mrb[252].mxu1 %vm263_vm2, %v7684_v60 }
 0x20c   : > { %10623 = vmatpush3.bf16.msra.mxu0 %v7770_v1  ;;  %10629 = vmatpush3.bf16.msra.mxu1 %v7822_v4 }
 0x20d   : > { %10624 = vmatprep.mubr.msk.bf16.mxu0 %vm10845_vm1, %v10844_v2  ;;  %10630 = vmatprep.mubr.msk.bf16.mxu1 %vm10845_vm1, %v10844_v2 }
 0x20e   : > { %v4635_v7 = vpop.f32.mrb[148].mxu0  ;;  %10634 = vmatprep.subr.bf16.mxu0 %v10844_v2  ;;  %v4691_v11 = vpop.f32.mrb[148].mxu1  ;;  %10640 = vmatprep.subr.bf16.mxu1 %v10844_v2 }
 0x20f   : > { %v4642_v10 = vadd.f32 %v4635_v7, %v4586_v61  ;;  %v10302_v12 = vpop.f32.mrb[149].mxu0  ;;  %v10308_v15 = vpop.f32.mrb[149].mxu1  ;;  %v8150_v61 = vshll.u32 %v10813_v51, 16 }
 0x210   : > { %v4638_v16 = vpop.f32.mrb[150].mxu0  ;;  %v4694_v20 = vpop.f32.mrb[150].mxu1  ;;  %v9515_v15 = vld [vmem:[%s12225_s1 + $0x10] sm:$0x3] }
 0x211   : > { %v4698_v18 = vadd.f32 %v4691_v11, %v4642_v10  ;;  %v4643_v19 = vadd.f32 %v4638_v16, %v4587_v5  ;;  %v10303_v21 = vpop.f32.mrb[151].mxu0  ;;  %v10309_v23 = vpop.f32.mrb[151].mxu1  ;;  %v8158_v5 = vsel %vm267_vm0, %v9511_v56, 0  ;;  %v8148_v10 = vshrl.u32 %v10813_v51, 16  ;;  %v9520_v16 = vld [vmem:[%s12225_s1 + $0x12] sm:$0x3] }
 0x212   : > { %v8152_v11 = vrot.slane %v8150_v61, 1 }
 0x213   : > { %v4699_v26 = vadd.f32 %v4694_v20, %v4643_v19  ;;  %10625 = vmatmul.mubr.msk.bf16.vlgmr.msra.gmra.mrb[0].mxu0 %vm263_vm2, %v10810_v8  ;;  %10631 = vmatmul.mubr.msk.bf16.vlgmr.msra.gmra.mrb[0].mxu1 %vm263_vm2, %v10811_v6  ;;  %v8092_v8 = vshrl.u32 %v10812_v49, 16 }
 0x214   : > { %10635 = vmatpush3.bf16.msra.mxu0 %v7876_v22  ;;  %10641 = vmatpush3.bf16.msra.mxu1 %v7932_v25 }
 0x215   : > { %10636 = vmatprep.mubr.msk.bf16.mxu0 %vm10845_vm1, %v10844_v2  ;;  %10642 = vmatprep.mubr.msk.bf16.mxu1 %vm10845_vm1, %v10844_v2  ;;  %v8097_v20 = vor.u32 %v8096_v9, %v8092_v8 }
 0x216   : > { %v4751_v31 = vpop.f32.mrb[152].mxu0  ;;  %10646 = vmatprep.subr.bf16.mxu0 %v10844_v2  ;;  %v4811_v34 = vpop.f32.mrb[152].mxu1  ;;  %10652 = vmatprep.subr.bf16.mxu1 %v10844_v2 }
 0x217   : > { %v4758_v33 = vadd.f32 %v4751_v31, %v4698_v18  ;;  %v10314_v35 = vpop.f32.mrb[153].mxu0  ;;  %v10320_v38 = vpop.f32.mrb[153].mxu1  ;;  %v8219_v31 = vsel %vm267_vm0, %v9515_v15, 0 }
 0x218   : > { %v4754_v39 = vpop.f32.mrb[154].mxu0  ;;  %v4814_v43 = vpop.f32.mrb[154].mxu1  ;;  %v8279_v35 = vsel %vm267_vm0, %v9520_v16, 0 }
 0x219   : > { %v4818_v41 = vadd.f32 %v4811_v34, %v4758_v33  ;;  %v4759_v42 = vadd.f32 %v4754_v39, %v4699_v26  ;;  %v10315_v44 = vpop.f32.mrb[155].mxu0  ;;  %v10321_v46 = vpop.f32.mrb[155].mxu1  ;;  %v8153_v26 = vor.u32 %v8152_v11, %v8148_v10  ;;  %v10815_v39 = vld [vmem:[%s10912_s27 + $0x98] sm:$0x1f]  }
 0x21a   : > { %v9525_v44 = vld [vmem:[%s12225_s1 + $0x16] sm:$0x3] }
 0x21b   : > { %v4819_v48 = vadd.f32 %v4814_v43, %v4759_v42  ;;  %10637 = vmatmul.mubr.msk.bf16.vlgmr.msra.gmra.mrb[4].mxu0 %vm263_vm2, %v7871_v36  ;;  %10643 = vmatmul.mubr.msk.bf16.vlgmr.msra.gmra.mrb[4].mxu1 %vm263_vm2, %v7927_v40  ;;  %v9523_v40 = vld [vmem:[%s12225_s1 + $0x14] sm:$0x3] }
 0x21c   : > { %10647 = vmatpush3.bf16.msra.mxu0 %v7989_v45  ;;  %10653 = vmatpush3.bf16.msra.mxu1 %v8046_v47  ;;  %v8327_v45 = vshll.u32 %v10814_v37, 16 }
 0x21d   : > { %10648 = vmatprep.mubr.msk.bf16.mxu0 %vm10845_vm1, %v10844_v2  ;;  %10654 = vmatprep.mubr.msk.bf16.mxu1 %vm10845_vm1, %v10844_v2 }
 0x21e   : > { %v4867_v50 = vpop.f32.mrb[156].mxu0  ;;  %10658 = vmatprep.subr.bf16.mxu0 %v10844_v2  ;;  %v4923_v54 = vpop.f32.mrb[156].mxu1  ;;  %10664 = vmatprep.subr.bf16.mxu1 %v10844_v2 }
 0x21f   : > { %v4874_v53 = vadd.f32 %v4867_v50, %v4818_v41  ;;  %v10326_v55 = vpop.f32.mrb[157].mxu0  ;;  %v10332_v59 = vpop.f32.mrb[157].mxu1 }
 0x220   : > { %v4870_v60 = vpop.f32.mrb[158].mxu0  ;;  %v4926_v0 = vpop.f32.mrb[158].mxu1  ;;  %v8391_v55 = vsel %vm267_vm0, %v9525_v44, 0  ;;  %v8329_v59 = vrot.slane %v8327_v45, 1 }
 0x221   : > { %v4930_v62 = vadd.f32 %v4923_v54, %v4874_v53  ;;  %v4875_v63 = vadd.f32 %v4870_v60, %v4819_v48  ;;  %v10327_v1 = vpop.f32.mrb[159].mxu0  ;;  %v10333_v4 = vpop.f32.mrb[159].mxu1  ;;  %v8383_v48 = vshll.u32 %v10815_v39, 16  ;;  %v8335_v53 = vsel %vm267_vm0, %v9523_v40, 0 }
 0x222   : > { %v8381_v60 = vshrl.u32 %v10815_v39, 16  ;;  %v8330_v4 = vor.u32 %v8329_v59, %v8325_v58 }
 0x223   : > { %v4932_v6 = vadd.f32 %v11807_v28, %v4930_v62  ;;  %v4931_v7 = vadd.f32 %v4926_v0, %v4875_v63  ;;  %10649 = vmatmul.mubr.msk.bf16.vlgmr.msra.gmra.mrb[8].mxu0 %vm263_vm2, %v10812_v49  ;;  %10655 = vmatmul.mubr.msk.bf16.vlgmr.msra.gmra.mrb[8].mxu1 %vm263_vm2, %v10813_v51  ;;  %v8385_v61 = vrot.slane %v8383_v48, 1  ;;  %v9529_v63 = vld [vmem:[%s12225_s1 + $0x18] sm:$0x3] }
 0x224   : > { %10659 = vmatpush3.bf16.msra.mxu0 %v8102_v3  ;;  %10665 = vmatpush3.bf16.msra.mxu1 %v8158_v5  ;;  %v9534_v5 = vld [vmem:[%s12225_s1 + $0x1a] sm:$0x3] }
 0x225   : > { %vm4934_vm15 = vcmp.ge.f32.partialorder %v4932_v6, 0.0  ;;  %v4936_v12 = vmul.f32 0.2, %v4932_v6  ;;  %v4933_v13 = vadd.f32 %v11807_v28, %v4931_v7  ;;  %10660 = vmatprep.mubr.msk.bf16.mxu0 %vm10845_vm1, %v10844_v2  ;;  %10666 = vmatprep.mubr.msk.bf16.mxu1 %vm10845_vm1, %v10844_v2  ;;  %v8386_v8 = vor.u32 %v8385_v61, %v8381_v60 }
 0x226   : > { %v5004_v14 = vpop.f32.mrb[160].mxu0  ;;  %10670 = vmatprep.subr.bf16.mxu0 %v10844_v2  ;;  %v5056_v18 = vpop.f32.mrb[160].mxu1  ;;  %10676 = vmatprep.subr.bf16.mxu1 %v10844_v2  ;;  %v8511_v15 = vsel %vm267_vm0, %v9534_v5, 0 }
 0x227   : > { %v4938_v28 = vsel %vm4934_vm15, %v4932_v6, %v4936_v12  ;;  %vm4935_vm4 = vcmp.ge.f32.partialorder %v4933_v13, 0.0  ;;  %v4937_v17 = vmul.f32 0.2, %v4933_v13  ;;  %v10338_v19 = vpop.f32.mrb[161].mxu0  ;;  %v5057_v22 = vadd.f32 %v5056_v18, %v5004_v14  ;;  %v10344_v23 = vpop.f32.mrb[161].mxu1 }
 0x228   : > { %v9556_v21 = vpack.c.bf16 %v4938_v28, %v4938_v28  ;;  %v5007_v25 = vpop.f32.mrb[162].mxu0  ;;  %v5059_v24 = vpop.f32.mrb[162].mxu1  ;;  %v10816_v28 = vld [vmem:[%s10912_s27 + $0xe8] sm:$0x1f]   ;;  %v10817_v18 = vld [vmem:[%s10912_s27 + $0x138] sm:$0x1f]  }
 0x229   : > { %v4939_v27 = vsel %vm4935_vm4, %v4933_v13, %v4937_v17  ;;  %v10339_v30 = vpop.f32.mrb[163].mxu0  ;;  %v5060_v33 = vadd.f32 %v5059_v24, %v5007_v25  ;;  %v10345_v34 = vpop.f32.mrb[163].mxu1  ;;  %v8451_v13 = vsel %vm267_vm0, %v9529_v63, 0  ;;  %v9537_v19 = vld [vmem:[%s12225_s1 + $0x1c] sm:$0x3]  ;;  %v8559_v25 = vshll.u32 %v10816_v28, 16 }
 0x22a   : > { %9303 = vst.msk [vmem:[%s11511_s9 + $0x20] sm:$0xf] %vm1209_vm3, %v9556_v21  ;;  %v9557_v32 = vpack.c.bf16 %v4939_v27, %v4939_v27  ;;  %v9539_v23 = vld [vmem:[%s12225_s1 + $0x1e] sm:$0x3] }
 0x22b   : > { %10661 = vmatmul.mubr.msk.bf16.vlgmr.msra.gmra.mrb[12].mxu0 %vm263_vm2, %v8097_v20  ;;  %10667 = vmatmul.mubr.msk.bf16.vlgmr.msra.gmra.mrb[12].mxu1 %vm263_vm2, %v8153_v26 }
 0x22c   : > { %v4951_v36 = vsel %vm11525_vm8, %v9557_v32, %v9304_v29  ;;  %10671 = vmatpush3.bf16.msra.mxu0 %v8219_v31  ;;  %10677 = vmatpush3.bf16.msra.mxu1 %v8279_v35  ;;  %v8615_v29 = vshll.u32 %v10817_v18, 16  ;;  %v8623_v35 = vsel %vm267_vm0, %v9539_v23, 0 }
 0x22d   : > { %9305 = vst [vmem:[%s11511_s9 + $0x24] sm:$0x1] %v4951_v36  ;;  %10672 = vmatprep.mubr.msk.bf16.mxu0 %vm10845_vm1, %v10844_v2  ;;  %10678 = vmatprep.mubr.msk.bf16.mxu1 %vm10845_vm1, %v10844_v2 }
 0x22e   : > { %v5110_v38 = vpop.f32.mrb[164].mxu0  ;;  %10682 = vmatprep.subr.bf16.mxu0 %v10844_v2  ;;  %v5166_v42 = vpop.f32.mrb[164].mxu1  ;;  %10688 = vmatprep.subr.bf16.mxu1 %v10844_v2  ;;  %v8617_v40 = vrot.slane %v8615_v29, 1 }
 0x22f   : > { %v5117_v41 = vadd.f32 %v5110_v38, %v5057_v22  ;;  %v10350_v43 = vpop.f32.mrb[165].mxu0  ;;  %v10356_v46 = vpop.f32.mrb[165].mxu1  ;;  %v8561_v38 = vrot.slane %v8559_v25, 1 }
 0x230   : > { %v5113_v47 = vpop.f32.mrb[166].mxu0  ;;  %v5169_v51 = vpop.f32.mrb[166].mxu1 }
 0x231   : > { %v5173_v49 = vadd.f32 %v5166_v42, %v5117_v41  ;;  %v5118_v50 = vadd.f32 %v5113_v47, %v5060_v33  ;;  %v10351_v52 = vpop.f32.mrb[167].mxu0  ;;  %v10357_v54 = vpop.f32.mrb[167].mxu1  ;;  %v8567_v33 = vsel %vm267_vm0, %v9537_v19, 0 }
 0x233   : > { %v5174_v56 = vadd.f32 %v5169_v51, %v5118_v50  ;;  %10673 = vmatmul.mubr.msk.bf16.vlgmr.msra.gmra.mrb[16].mxu0 %vm263_vm2, %v10814_v37  ;;  %10679 = vmatmul.mubr.msk.bf16.vlgmr.msra.gmra.mrb[16].mxu1 %vm263_vm2, %v10815_v39  ;;  %v8557_v37 = vshrl.u32 %v10816_v28, 16  ;;  %v8613_v39 = vshrl.u32 %v10817_v18, 16 }
 0x234   : > { %10683 = vmatpush3.bf16.msra.mxu0 %v8335_v53  ;;  %10689 = vmatpush3.bf16.msra.mxu1 %v8391_v55 }
 0x235   : > { %10684 = vmatprep.mubr.msk.bf16.mxu0 %vm10845_vm1, %v10844_v2  ;;  %10690 = vmatprep.mubr.msk.bf16.mxu1 %vm10845_vm1, %v10844_v2  ;;  %v8562_v45 = vor.u32 %v8561_v38, %v8557_v37  ;;  %v8618_v48 = vor.u32 %v8617_v40, %v8613_v39 }
 0x236   : > { %v5223_v62 = vpop.f32.mrb[168].mxu0  ;;  %10694 = vmatprep.subr.bf16.mxu0 %v10844_v2  ;;  %v5280_v1 = vpop.f32.mrb[168].mxu1  ;;  %10700 = vmatprep.subr.bf16.mxu1 %v10844_v2 }
 0x237   : > { %v5230_v0 = vadd.f32 %v5223_v62, %v5173_v49  ;;  %v10362_v3 = vpop.f32.mrb[169].mxu0  ;;  %v10368_v6 = vpop.f32.mrb[169].mxu1 }
 0x238   : > { %v5226_v7 = vpop.f32.mrb[170].mxu0  ;;  %v5283_v11 = vpop.f32.mrb[170].mxu1 }
 0x239   : > { %v5287_v9 = vadd.f32 %v5280_v1, %v5230_v0  ;;  %v5231_v10 = vadd.f32 %v5226_v7, %v5174_v56  ;;  %v10363_v12 = vpop.f32.mrb[171].mxu0  ;;  %v10369_v14 = vpop.f32.mrb[171].mxu1 }
 0x23b   : > { %v5288_v16 = vadd.f32 %v5283_v11, %v5231_v10  ;;  %10685 = vmatmul.mubr.msk.bf16.vlgmr.msra.gmra.mrb[20].mxu0 %vm263_vm2, %v8330_v4  ;;  %10691 = vmatmul.mubr.msk.bf16.vlgmr.msra.gmra.mrb[20].mxu1 %vm263_vm2, %v8386_v8 }
 0x23c   : > { %10695 = vmatpush3.bf16.msra.mxu0 %v8451_v13  ;;  %10701 = vmatpush3.bf16.msra.mxu1 %v8511_v15 }
 0x23d   : > { %10696 = vmatprep.mubr.msk.bf16.mxu0 %vm10845_vm1, %v10844_v2  ;;  %10702 = vmatprep.mubr.msk.bf16.mxu1 %vm10845_vm1, %v10844_v2 }
 0x23e   : > { %v5336_v17 = vpop.f32.mrb[172].mxu0  ;;  %10706 = vmatprep.subr.bf16.mxu0 %v10844_v2  ;;  %v5392_v21 = vpop.f32.mrb[172].mxu1  ;;  %10712 = vmatprep.subr.bf16.mxu1 %v10844_v2 }
 0x23f   : > { %v5343_v20 = vadd.f32 %v5336_v17, %v5287_v9  ;;  %v10374_v22 = vpop.f32.mrb[173].mxu0  ;;  %v10380_v26 = vpop.f32.mrb[173].mxu1 }
 0x240   : > { %v5339_v27 = vpop.f32.mrb[174].mxu0  ;;  %v5395_v31 = vpop.f32.mrb[174].mxu1 }
 0x241   : > { %v5399_v24 = vadd.f32 %v5392_v21, %v5343_v20  ;;  %v5344_v30 = vadd.f32 %v5339_v27, %v5288_v16  ;;  %v10375_v32 = vpop.f32.mrb[175].mxu0  ;;  %v10381_v34 = vpop.f32.mrb[175].mxu1  ;;  %v12181_v27 = vld [vmem:[%s12226_s2] ss:$0 sm:$0xff] }
 0x243   : > { %v5400_v36 = vadd.f32 %v5395_v31, %v5344_v30  ;;  %10697 = vmatmul.mubr.msk.bf16.vlgmr.msra.gmra.mrb[24].mxu0 %vm263_vm2, %v10816_v28  ;;  %10703 = vmatmul.mubr.msk.bf16.vlgmr.msra.gmra.mrb[24].mxu1 %vm263_vm2, %v10817_v18 }
 0x244   : > { %10707 = vmatpush3.bf16.msra.mxu0 %v8567_v33  ;;  %10713 = vmatpush3.bf16.msra.mxu1 %v8623_v35 }
 0x245   : > { %10708 = vmatprep.mubr.msk.bf16.mxu0 %vm10845_vm1, %v10844_v2  ;;  %10714 = vmatprep.mubr.msk.bf16.mxu1 %vm10845_vm1, %v10844_v2 }
 0x246   : > { %v5453_v41 = vpop.f32.mrb[176].mxu0  ;;  %v5513_v43 = vpop.f32.mrb[176].mxu1 }
 0x247   : > { %v5460_v42 = vadd.f32 %v5453_v41, %v5399_v24  ;;  %v10386_v44 = vpop.f32.mrb[177].mxu0  ;;  %v10392_v46 = vpop.f32.mrb[177].mxu1 }
 0x248   : > { %v5456_v47 = vpop.f32.mrb[178].mxu0  ;;  %v5516_v51 = vpop.f32.mrb[178].mxu1 }
 0x249   : > { %v5520_v49 = vadd.f32 %v5513_v43, %v5460_v42  ;;  %v5461_v50 = vadd.f32 %v5456_v47, %v5400_v36  ;;  %v10387_v52 = vpop.f32.mrb[179].mxu0  ;;  %v10393_v53 = vpop.f32.mrb[179].mxu1  ;;  %v9364_v42 = vld [vmem:[%s11511_s9 + $0x2c] sm:$0x1] }
 0x24b   : > { %v5521_v54 = vadd.f32 %v5516_v51, %v5461_v50  ;;  %10709 = vmatmul.mubr.msk.bf16.vlgmr.msra.gmra.mrb[28].mxu0 %vm263_vm2, %v8562_v45  ;;  %10715 = vmatmul.mubr.msk.bf16.vlgmr.msra.gmra.mrb[28].mxu1 %vm263_vm2, %v8618_v48 }
 0x24e   : > { %v5569_v55 = vpop.f32.mrb[180].mxu0  ;;  %v5625_v2 = vpop.f32.mrb[180].mxu1 }
 0x24f   : > { %v5576_v56 = vadd.f32 %v5569_v55, %v5520_v49  ;;  %v10398_v58 = vpop.f32.mrb[181].mxu0  ;;  %v10404_v59 = vpop.f32.mrb[181].mxu1 }
 0x250   : > { %v5572_v60 = vpop.f32.mrb[182].mxu0  ;;  %v5628_v63 = vpop.f32.mrb[182].mxu1 }
 0x251   : > { %v5632_v61 = vadd.f32 %v5625_v2, %v5576_v56  ;;  %v5577_v62 = vadd.f32 %v5572_v60, %v5521_v54  ;;  %v10399_v0 = vpop.f32.mrb[183].mxu0  ;;  %v10405_v1 = vpop.f32.mrb[183].mxu1 }
 0x253   : > { %v5633_v3 = vadd.f32 %v5628_v63, %v5577_v62 }
 0x256   : > { %v5685_v4 = vpop.f32.mrb[184].mxu0  ;;  %v5745_v6 = vpop.f32.mrb[184].mxu1 }
 0x257   : > { %v5692_v5 = vadd.f32 %v5685_v4, %v5632_v61  ;;  %v10410_v7 = vpop.f32.mrb[185].mxu0  ;;  %v10416_v8 = vpop.f32.mrb[185].mxu1 }
 0x258   : > { %v5688_v9 = vpop.f32.mrb[186].mxu0  ;;  %v5748_v12 = vpop.f32.mrb[186].mxu1 }
 0x259   : > { %v5752_v10 = vadd.f32 %v5745_v6, %v5692_v5  ;;  %v5693_v11 = vadd.f32 %v5688_v9, %v5633_v3  ;;  %v10411_v13 = vpop.f32.mrb[187].mxu0  ;;  %v10417_v14 = vpop.f32.mrb[187].mxu1 }
 0x25b   : > { %v5753_v15 = vadd.f32 %v5748_v12, %v5693_v11 }
 0x25e   : > { %v5801_v16 = vpop.f32.mrb[188].mxu0  ;;  %v5857_v17 = vpop.f32.mrb[188].mxu1 }
 0x25f   : > { %v5808_v28 = vadd.f32 %v5801_v16, %v5752_v10  ;;  %v10422_v18 = vpop.f32.mrb[189].mxu0  ;;  %v10428_v19 = vpop.f32.mrb[189].mxu1 }
 0x260   : > { %v5804_v20 = vpop.f32.mrb[190].mxu0  ;;  %v5860_v23 = vpop.f32.mrb[190].mxu1 }
 0x261   : > { %v5864_v21 = vadd.f32 %v5857_v17, %v5808_v28  ;;  %v5809_v22 = vadd.f32 %v5804_v20, %v5753_v15  ;;  %v10423_v25 = vpop.f32.mrb[191].mxu0  ;;  %v10429_v26 = vpop.f32.mrb[191].mxu1 }
 0x263   : > { %v5866_v29 = vadd.f32 %v12181_v27, %v5864_v21  ;;  %v5865_v24 = vadd.f32 %v5860_v23, %v5809_v22 }
 0x265   : > { %vm5868_vm0 = vcmp.ge.f32.partialorder %v5866_v29, 0.0  ;;  %v5870_v30 = vmul.f32 0.2, %v5866_v29  ;;  %v5867_v31 = vadd.f32 %v12181_v27, %v5865_v24 }
 0x266   : > { %v5938_v32 = vpop.f32.mrb[192].mxu0  ;;  %v5990_v35 = vpop.f32.mrb[192].mxu1 }
 0x267   : > { %v5872_v33 = vsel %vm5868_vm0, %v5866_v29, %v5870_v30  ;;  %vm5869_vm1 = vcmp.ge.f32.partialorder %v5867_v31, 0.0  ;;  %v5871_v34 = vmul.f32 0.2, %v5867_v31  ;;  %v10434_v36 = vpop.f32.mrb[193].mxu0  ;;  %v5991_v38 = vadd.f32 %v5990_v35, %v5938_v32  ;;  %v10440_v39 = vpop.f32.mrb[193].mxu1 }
 0x268   : > { %v9558_v37 = vpack.c.bf16 %v5872_v33, %v5872_v33  ;;  %v5941_v40 = vpop.f32.mrb[194].mxu0  ;;  %v5993_v43 = vpop.f32.mrb[194].mxu1 }
 0x269   : > { %v5873_v41 = vsel %vm5869_vm1, %v5867_v31, %v5871_v34  ;;  %v10435_v44 = vpop.f32.mrb[195].mxu0  ;;  %v5994_v46 = vadd.f32 %v5993_v43, %v5941_v40  ;;  %v10441_v47 = vpop.f32.mrb[195].mxu1 }
 0x26a   : > { %9363 = vst.msk [vmem:[%s11511_s9 + $0x28] sm:$0xf] %vm1209_vm3, %v9558_v37  ;;  %v9559_v45 = vpack.c.bf16 %v5873_v41, %v5873_v41 }
 0x26c   : > { %v5885_v48 = vsel %vm11525_vm8, %v9559_v45, %v9364_v42 }
 0x26d   : > { %9365 = vst [vmem:[%s11511_s9 + $0x2c] sm:$0x1] %v5885_v48 }
 0x26e   : > { %v6044_v49 = vpop.f32.mrb[196].mxu0  ;;  %v6100_v51 = vpop.f32.mrb[196].mxu1 }
 0x26f   : > { %v6051_v50 = vadd.f32 %v6044_v49, %v5991_v38  ;;  %v10446_v52 = vpop.f32.mrb[197].mxu0  ;;  %v10452_v53 = vpop.f32.mrb[197].mxu1 }
 0x270   : > { %v6047_v54 = vpop.f32.mrb[198].mxu0  ;;  %v6103_v2 = vpop.f32.mrb[198].mxu1 }
 0x271   : > { %v6107_v55 = vadd.f32 %v6100_v51, %v6051_v50  ;;  %v6052_v56 = vadd.f32 %v6047_v54, %v5994_v46  ;;  %v10447_v58 = vpop.f32.mrb[199].mxu0  ;;  %v10453_v59 = vpop.f32.mrb[199].mxu1 }
 0x273   : > { %v6108_v60 = vadd.f32 %v6103_v2, %v6052_v56 }
 0x276   : > { %v6157_v61 = vpop.f32.mrb[200].mxu0  ;;  %v6214_v63 = vpop.f32.mrb[200].mxu1 }
 0x277   : > { %v6164_v62 = vadd.f32 %v6157_v61, %v6107_v55  ;;  %v10458_v0 = vpop.f32.mrb[201].mxu0  ;;  %v10464_v1 = vpop.f32.mrb[201].mxu1 }
 0x278   : > { %v6160_v3 = vpop.f32.mrb[202].mxu0  ;;  %v6217_v6 = vpop.f32.mrb[202].mxu1 }
 0x279   : > { %v6221_v4 = vadd.f32 %v6214_v63, %v6164_v62  ;;  %v6165_v5 = vadd.f32 %v6160_v3, %v6108_v60  ;;  %v10459_v7 = vpop.f32.mrb[203].mxu0  ;;  %v10465_v8 = vpop.f32.mrb[203].mxu1 }
 0x27b   : > { %v6222_v9 = vadd.f32 %v6217_v6, %v6165_v5 }
 0x27e   : > { %v6270_v10 = vpop.f32.mrb[204].mxu0  ;;  %v6326_v12 = vpop.f32.mrb[204].mxu1 }
 0x27f   : > { %v6277_v11 = vadd.f32 %v6270_v10, %v6221_v4  ;;  %v10470_v13 = vpop.f32.mrb[205].mxu0  ;;  %v10476_v14 = vpop.f32.mrb[205].mxu1 }
 0x280   : > { %v6273_v15 = vpop.f32.mrb[206].mxu0  ;;  %v6329_v17 = vpop.f32.mrb[206].mxu1 }
 0x281   : > { %v6333_v16 = vadd.f32 %v6326_v12, %v6277_v11  ;;  %v6278_v28 = vadd.f32 %v6273_v15, %v6222_v9  ;;  %v10471_v18 = vpop.f32.mrb[207].mxu0  ;;  %v10477_v19 = vpop.f32.mrb[207].mxu1 }
 0x283   : > { %v6334_v20 = vadd.f32 %v6329_v17, %v6278_v28 }
 0x286   : > { %v6387_v21 = vpop.f32.mrb[208].mxu0  ;;  %v6447_v23 = vpop.f32.mrb[208].mxu1 }
 0x287   : > { %v6394_v22 = vadd.f32 %v6387_v21, %v6333_v16  ;;  %v10482_v25 = vpop.f32.mrb[209].mxu0  ;;  %v10488_v26 = vpop.f32.mrb[209].mxu1 }
 0x288   : > { %v6390_v29 = vpop.f32.mrb[210].mxu0  ;;  %v6450_v31 = vpop.f32.mrb[210].mxu1 }
 0x289   : > { %v6454_v24 = vadd.f32 %v6447_v23, %v6394_v22  ;;  %v6395_v30 = vadd.f32 %v6390_v29, %v6334_v20  ;;  %v10483_v32 = vpop.f32.mrb[211].mxu0  ;;  %v10489_v33 = vpop.f32.mrb[211].mxu1  ;;  %v9424_v20 = vld [vmem:[%s11511_s9 + $0x34] sm:$0x1] }
 0x28b   : > { %v6455_v34 = vadd.f32 %v6450_v31, %v6395_v30 }
 0x28e   : > { %v6503_v35 = vpop.f32.mrb[212].mxu0  ;;  %v6559_v37 = vpop.f32.mrb[212].mxu1 }
 0x28f   : > { %v6510_v36 = vadd.f32 %v6503_v35, %v6454_v24  ;;  %v10494_v38 = vpop.f32.mrb[213].mxu0  ;;  %v10500_v39 = vpop.f32.mrb[213].mxu1 }
 0x290   : > { %v6506_v40 = vpop.f32.mrb[214].mxu0  ;;  %v6562_v43 = vpop.f32.mrb[214].mxu1 }
 0x291   : > { %v6566_v41 = vadd.f32 %v6559_v37, %v6510_v36  ;;  %v6511_v42 = vadd.f32 %v6506_v40, %v6455_v34  ;;  %v10495_v44 = vpop.f32.mrb[215].mxu0  ;;  %v10501_v45 = vpop.f32.mrb[215].mxu1 }
 0x293   : > { %v6567_v46 = vadd.f32 %v6562_v43, %v6511_v42 }
 0x296   : > { %v6619_v47 = vpop.f32.mrb[216].mxu0  ;;  %v6679_v49 = vpop.f32.mrb[216].mxu1 }
 0x297   : > { %v6626_v48 = vadd.f32 %v6619_v47, %v6566_v41  ;;  %v10506_v50 = vpop.f32.mrb[217].mxu0  ;;  %v10512_v51 = vpop.f32.mrb[217].mxu1 }
 0x298   : > { %v6622_v52 = vpop.f32.mrb[218].mxu0  ;;  %v6682_v55 = vpop.f32.mrb[218].mxu1 }
 0x299   : > { %v6686_v53 = vadd.f32 %v6679_v49, %v6626_v48  ;;  %v6627_v54 = vadd.f32 %v6622_v52, %v6567_v46  ;;  %v10507_v56 = vpop.f32.mrb[219].mxu0  ;;  %v10513_v2 = vpop.f32.mrb[219].mxu1 }
 0x29b   : > { %v6687_v58 = vadd.f32 %v6682_v55, %v6627_v54 }
 0x29e   : > { %v6735_v59 = vpop.f32.mrb[220].mxu0  ;;  %v6791_v61 = vpop.f32.mrb[220].mxu1 }
 0x29f   : > { %v6742_v60 = vadd.f32 %v6735_v59, %v6686_v53  ;;  %v10518_v62 = vpop.f32.mrb[221].mxu0  ;;  %v10524_v63 = vpop.f32.mrb[221].mxu1 }
 0x2a0   : > { %v6738_v0 = vpop.f32.mrb[222].mxu0  ;;  %v6794_v4 = vpop.f32.mrb[222].mxu1 }
 0x2a1   : > { %v6798_v1 = vadd.f32 %v6791_v61, %v6742_v60  ;;  %v6743_v3 = vadd.f32 %v6738_v0, %v6687_v58  ;;  %v10519_v5 = vpop.f32.mrb[223].mxu0  ;;  %v10525_v6 = vpop.f32.mrb[223].mxu1 }
 0x2a3   : > { %v6800_v7 = vadd.f32 %v12181_v27, %v6798_v1  ;;  %v6799_v8 = vadd.f32 %v6794_v4, %v6743_v3 }
 0x2a5   : > { %vm6802_vm2 = vcmp.ge.f32.partialorder %v6800_v7, 0.0  ;;  %v6804_v9 = vmul.f32 0.2, %v6800_v7  ;;  %v6801_v10 = vadd.f32 %v12181_v27, %v6799_v8 }
 0x2a6   : > { %v6872_v11 = vpop.f32.mrb[224].mxu0  ;;  %v6924_v14 = vpop.f32.mrb[224].mxu1 }
 0x2a7   : > { %v6806_v12 = vsel %vm6802_vm2, %v6800_v7, %v6804_v9  ;;  %vm6803_vm5 = vcmp.ge.f32.partialorder %v6801_v10, 0.0  ;;  %v6805_v13 = vmul.f32 0.2, %v6801_v10  ;;  %v10530_v15 = vpop.f32.mrb[225].mxu0  ;;  %v6925_v28 = vadd.f32 %v6924_v14, %v6872_v11  ;;  %v10536_v17 = vpop.f32.mrb[225].mxu1 }
 0x2a8   : > { %v9560_v16 = vpack.c.bf16 %v6806_v12, %v6806_v12  ;;  %v6875_v18 = vpop.f32.mrb[226].mxu0  ;;  %v6927_v21 = vpop.f32.mrb[226].mxu1 }
 0x2a9   : > { %v6807_v19 = vsel %vm6803_vm5, %v6801_v10, %v6805_v13  ;;  %v10531_v22 = vpop.f32.mrb[227].mxu0  ;;  %v6928_v25 = vadd.f32 %v6927_v21, %v6875_v18  ;;  %v10537_v26 = vpop.f32.mrb[227].mxu1 }
 0x2aa   : > { %9423 = vst.msk [vmem:[%s11511_s9 + $0x30] sm:$0xf] %vm1209_vm3, %v9560_v16  ;;  %v9561_v23 = vpack.c.bf16 %v6807_v19, %v6807_v19 }
 0x2ac   : > { %v6819_v29 = vsel %vm11525_vm8, %v9561_v23, %v9424_v20 }
 0x2ad   : > { %9425 = vst [vmem:[%s11511_s9 + $0x34] sm:$0x1] %v6819_v29 }
 0x2ae   : > { %v6978_v24 = vpop.f32.mrb[228].mxu0  ;;  %v7034_v31 = vpop.f32.mrb[228].mxu1 }
 0x2af   : > { %v6985_v30 = vadd.f32 %v6978_v24, %v6925_v28  ;;  %v10542_v32 = vpop.f32.mrb[229].mxu0  ;;  %v10548_v33 = vpop.f32.mrb[229].mxu1 }
 0x2b0   : > { %v6981_v34 = vpop.f32.mrb[230].mxu0  ;;  %v7037_v37 = vpop.f32.mrb[230].mxu1 }
 0x2b1   : > { %v7041_v35 = vadd.f32 %v7034_v31, %v6985_v30  ;;  %v6986_v36 = vadd.f32 %v6981_v34, %v6928_v25  ;;  %v10543_v38 = vpop.f32.mrb[231].mxu0  ;;  %v10549_v39 = vpop.f32.mrb[231].mxu1 }
 0x2b3   : > { %v7042_v40 = vadd.f32 %v7037_v37, %v6986_v36 }
 0x2b6   : > { %v7091_v41 = vpop.f32.mrb[232].mxu0  ;;  %v7148_v43 = vpop.f32.mrb[232].mxu1 }
 0x2b7   : > { %v7098_v42 = vadd.f32 %v7091_v41, %v7041_v35  ;;  %v10554_v44 = vpop.f32.mrb[233].mxu0  ;;  %v10560_v45 = vpop.f32.mrb[233].mxu1 }
 0x2b8   : > { %v7094_v46 = vpop.f32.mrb[234].mxu0  ;;  %v7151_v49 = vpop.f32.mrb[234].mxu1 }
 0x2b9   : > { %v7155_v47 = vadd.f32 %v7148_v43, %v7098_v42  ;;  %v7099_v48 = vadd.f32 %v7094_v46, %v7042_v40  ;;  %v10555_v50 = vpop.f32.mrb[235].mxu0  ;;  %v10561_v51 = vpop.f32.mrb[235].mxu1 }
 0x2bb   : > { %v7156_v52 = vadd.f32 %v7151_v49, %v7099_v48 }
 0x2be   : > { %v7204_v53 = vpop.f32.mrb[236].mxu0  ;;  %v7260_v55 = vpop.f32.mrb[236].mxu1 }
 0x2bf   : > { %v7211_v54 = vadd.f32 %v7204_v53, %v7155_v47  ;;  %v10566_v56 = vpop.f32.mrb[237].mxu0  ;;  %v10572_v2 = vpop.f32.mrb[237].mxu1 }
 0x2c0   : > { %v7207_v58 = vpop.f32.mrb[238].mxu0  ;;  %v7263_v61 = vpop.f32.mrb[238].mxu1 }
 0x2c1   : > { %v7267_v59 = vadd.f32 %v7260_v55, %v7211_v54  ;;  %v7212_v60 = vadd.f32 %v7207_v58, %v7156_v52  ;;  %v10567_v62 = vpop.f32.mrb[239].mxu0  ;;  %v10573_v63 = vpop.f32.mrb[239].mxu1 }
 0x2c3   : > { %v7268_v0 = vadd.f32 %v7263_v61, %v7212_v60 }
 0x2c6   : > { %v7321_v1 = vpop.f32.mrb[240].mxu0  ;;  %v7381_v4 = vpop.f32.mrb[240].mxu1 }
 0x2c7   : > { %v7328_v3 = vadd.f32 %v7321_v1, %v7267_v59  ;;  %v10578_v5 = vpop.f32.mrb[241].mxu0  ;;  %v10584_v6 = vpop.f32.mrb[241].mxu1 }
 0x2c8   : > { %v7324_v7 = vpop.f32.mrb[242].mxu0  ;;  %v7384_v10 = vpop.f32.mrb[242].mxu1 }
 0x2c9   : > { %v7388_v8 = vadd.f32 %v7381_v4, %v7328_v3  ;;  %v7329_v9 = vadd.f32 %v7324_v7, %v7268_v0  ;;  %v10579_v11 = vpop.f32.mrb[243].mxu0  ;;  %v10585_v12 = vpop.f32.mrb[243].mxu1  ;;  %v9484_v0 = vld [vmem:[%s11511_s9 + $0x3c] sm:$0x1] }
 0x2cb   : > { %v7389_v13 = vadd.f32 %v7384_v10, %v7329_v9 }
 0x2ce   : > { %v7437_v14 = vpop.f32.mrb[244].mxu0  ;;  %v7493_v16 = vpop.f32.mrb[244].mxu1 }
 0x2cf   : > { %v7444_v15 = vadd.f32 %v7437_v14, %v7388_v8  ;;  %v10590_v28 = vpop.f32.mrb[245].mxu0  ;;  %v10596_v17 = vpop.f32.mrb[245].mxu1 }
 0x2d0   : > { %v7440_v18 = vpop.f32.mrb[246].mxu0  ;;  %v7496_v21 = vpop.f32.mrb[246].mxu1 }
 0x2d1   : > { %v7500_v19 = vadd.f32 %v7493_v16, %v7444_v15  ;;  %v7445_v20 = vadd.f32 %v7440_v18, %v7389_v13  ;;  %v10591_v22 = vpop.f32.mrb[247].mxu0  ;;  %v10597_v23 = vpop.f32.mrb[247].mxu1 }
 0x2d3   : > { %v7501_v25 = vadd.f32 %v7496_v21, %v7445_v20 }
 0x2d6   : > { %v7553_v26 = vpop.f32.mrb[248].mxu0  ;;  %v7613_v24 = vpop.f32.mrb[248].mxu1 }
 0x2d7   : > { %v7560_v29 = vadd.f32 %v7553_v26, %v7500_v19  ;;  %v10602_v30 = vpop.f32.mrb[249].mxu0  ;;  %v10608_v31 = vpop.f32.mrb[249].mxu1 }
 0x2d8   : > { %v7556_v32 = vpop.f32.mrb[250].mxu0  ;;  %v7616_v35 = vpop.f32.mrb[250].mxu1 }
 0x2d9   : > { %v7620_v33 = vadd.f32 %v7613_v24, %v7560_v29  ;;  %v7561_v34 = vadd.f32 %v7556_v32, %v7501_v25  ;;  %v10603_v36 = vpop.f32.mrb[251].mxu0  ;;  %v10609_v37 = vpop.f32.mrb[251].mxu1 }
 0x2db   : > { %v7621_v38 = vadd.f32 %v7616_v35, %v7561_v34 }
 0x2de   : > { %v7669_v39 = vpop.f32.mrb[252].mxu0  ;;  %v7725_v41 = vpop.f32.mrb[252].mxu1 }
 0x2df   : > { %v7676_v40 = vadd.f32 %v7669_v39, %v7620_v33  ;;  %v10614_v42 = vpop.f32.mrb[253].mxu0  ;;  %v10620_v43 = vpop.f32.mrb[253].mxu1 }
 0x2e0   : > { %v7672_v44 = vpop.f32.mrb[254].mxu0  ;;  %v7728_v47 = vpop.f32.mrb[254].mxu1 }
 0x2e1   : > { %v7732_v45 = vadd.f32 %v7725_v41, %v7676_v40  ;;  %v7677_v46 = vadd.f32 %v7672_v44, %v7621_v38  ;;  %v10615_v48 = vpop.f32.mrb[255].mxu0  ;;  %v10621_v49 = vpop.f32.mrb[255].mxu1 }
 0x2e3   : > { %v7734_v50 = vadd.f32 %v12181_v27, %v7732_v45  ;;  %v7733_v51 = vadd.f32 %v7728_v47, %v7677_v46 }
 0x2e5   : > { %vm7736_vm6 = vcmp.ge.f32.partialorder %v7734_v50, 0.0  ;;  %v7738_v52 = vmul.f32 0.2, %v7734_v50  ;;  %v7735_v53 = vadd.f32 %v12181_v27, %v7733_v51 }
 0x2e6   : > { %v7806_v54 = vpop.f32.mrb[0].mxu0  ;;  %v7858_v2 = vpop.f32.mrb[0].mxu1 }
 0x2e7   : > { %v7740_v55 = vsel %vm7736_vm6, %v7734_v50, %v7738_v52  ;;  %vm7737_vm7 = vcmp.ge.f32.partialorder %v7735_v53, 0.0  ;;  %v7739_v56 = vmul.f32 0.2, %v7735_v53  ;;  %v10626_v58 = vpop.f32.mrb[1].mxu0  ;;  %v7859_v60 = vadd.f32 %v7858_v2, %v7806_v54  ;;  %v10632_v61 = vpop.f32.mrb[1].mxu1 }
 0x2e8   : > { %v9562_v59 = vpack.c.bf16 %v7740_v55, %v7740_v55  ;;  %v7809_v62 = vpop.f32.mrb[2].mxu0  ;;  %v7861_v1 = vpop.f32.mrb[2].mxu1 }
 0x2e9   : > { %v7741_v63 = vsel %vm7737_vm7, %v7735_v53, %v7739_v56  ;;  %v10627_v3 = vpop.f32.mrb[3].mxu0  ;;  %v7862_v5 = vadd.f32 %v7861_v1, %v7809_v62  ;;  %v10633_v6 = vpop.f32.mrb[3].mxu1 }
 0x2ea   : > { %9483 = vst.msk [vmem:[%s11511_s9 + $0x38] sm:$0xf] %vm1209_vm3, %v9562_v59  ;;  %v9563_v4 = vpack.c.bf16 %v7741_v63, %v7741_v63 }
 0x2ec   : > { %v7753_v7 = vsel %vm11525_vm8, %v9563_v4, %v9484_v0 }
 0x2ed   : > { %9485 = vst [vmem:[%s11511_s9 + $0x3c] sm:$0x1] %v7753_v7 }
 0x2ee   : > { %v7912_v8 = vpop.f32.mrb[4].mxu0  ;;  %v7968_v10 = vpop.f32.mrb[4].mxu1 }
 0x2ef   : > { %v7919_v9 = vadd.f32 %v7912_v8, %v7859_v60  ;;  %v10638_v11 = vpop.f32.mrb[5].mxu0  ;;  %v10644_v12 = vpop.f32.mrb[5].mxu1 }
 0x2f0   : > { %v7915_v13 = vpop.f32.mrb[6].mxu0  ;;  %v7971_v16 = vpop.f32.mrb[6].mxu1 }
 0x2f1   : > { %v7975_v14 = vadd.f32 %v7968_v10, %v7919_v9  ;;  %v7920_v15 = vadd.f32 %v7915_v13, %v7862_v5  ;;  %v10639_v28 = vpop.f32.mrb[7].mxu0  ;;  %v10645_v17 = vpop.f32.mrb[7].mxu1 }
 0x2f3   : > { %v7976_v18 = vadd.f32 %v7971_v16, %v7920_v15 }
 0x2f6   : > { %v8025_v19 = vpop.f32.mrb[8].mxu0  ;;  %v8082_v21 = vpop.f32.mrb[8].mxu1 }
 0x2f7   : > { %v8032_v20 = vadd.f32 %v8025_v19, %v7975_v14  ;;  %v10650_v22 = vpop.f32.mrb[9].mxu0  ;;  %v10656_v23 = vpop.f32.mrb[9].mxu1 }
 0x2f8   : > { %v8028_v25 = vpop.f32.mrb[10].mxu0  ;;  %v8085_v24 = vpop.f32.mrb[10].mxu1 }
 0x2f9   : > { %v8089_v26 = vadd.f32 %v8082_v21, %v8032_v20  ;;  %v8033_v29 = vadd.f32 %v8028_v25, %v7976_v18  ;;  %v10651_v30 = vpop.f32.mrb[11].mxu0  ;;  %v10657_v31 = vpop.f32.mrb[11].mxu1 }
 0x2fb   : > { %v8090_v32 = vadd.f32 %v8085_v24, %v8033_v29 }
 0x2fe   : > { %v8138_v33 = vpop.f32.mrb[12].mxu0  ;;  %v8194_v35 = vpop.f32.mrb[12].mxu1 }
 0x2ff   : > { %v8145_v34 = vadd.f32 %v8138_v33, %v8089_v26  ;;  %v10662_v36 = vpop.f32.mrb[13].mxu0  ;;  %v10668_v37 = vpop.f32.mrb[13].mxu1 }
 0x300   : > { %v8141_v38 = vpop.f32.mrb[14].mxu0  ;;  %v8197_v41 = vpop.f32.mrb[14].mxu1 }
 0x301   : > { %v8201_v39 = vadd.f32 %v8194_v35, %v8145_v34  ;;  %v8146_v40 = vadd.f32 %v8141_v38, %v8090_v32  ;;  %v10663_v42 = vpop.f32.mrb[15].mxu0  ;;  %v10669_v43 = vpop.f32.mrb[15].mxu1  ;;  %v9544_v38 = vld [vmem:[%s11511_s9 + $0x44] sm:$0x1] }
 0x303   : > { %v8202_v44 = vadd.f32 %v8197_v41, %v8146_v40 }
 0x306   : > { %v8255_v45 = vpop.f32.mrb[16].mxu0  ;;  %v8315_v47 = vpop.f32.mrb[16].mxu1 }
 0x307   : > { %v8262_v46 = vadd.f32 %v8255_v45, %v8201_v39  ;;  %v10674_v48 = vpop.f32.mrb[17].mxu0  ;;  %v10680_v49 = vpop.f32.mrb[17].mxu1 }
 0x308   : > { %v8258_v50 = vpop.f32.mrb[18].mxu0  ;;  %v8318_v53 = vpop.f32.mrb[18].mxu1 }
 0x309   : > { %v8322_v51 = vadd.f32 %v8315_v47, %v8262_v46  ;;  %v8263_v52 = vadd.f32 %v8258_v50, %v8202_v44  ;;  %v10675_v54 = vpop.f32.mrb[19].mxu0  ;;  %v10681_v55 = vpop.f32.mrb[19].mxu1 }
 0x30b   : > { %v8323_v56 = vadd.f32 %v8318_v53, %v8263_v52 }
 0x30e   : > { %v8371_v2 = vpop.f32.mrb[20].mxu0  ;;  %v8427_v59 = vpop.f32.mrb[20].mxu1 }
 0x30f   : > { %v8378_v58 = vadd.f32 %v8371_v2, %v8322_v51  ;;  %v10686_v60 = vpop.f32.mrb[21].mxu0  ;;  %v10692_v61 = vpop.f32.mrb[21].mxu1 }
 0x310   : > { %v8374_v62 = vpop.f32.mrb[22].mxu0  ;;  %v8430_v1 = vpop.f32.mrb[22].mxu1 }
 0x311   : > { %v8434_v63 = vadd.f32 %v8427_v59, %v8378_v58  ;;  %v8379_v0 = vadd.f32 %v8374_v62, %v8323_v56  ;;  %v10687_v3 = vpop.f32.mrb[23].mxu0  ;;  %v10693_v4 = vpop.f32.mrb[23].mxu1 }
 0x313   : > { %v8435_v5 = vadd.f32 %v8430_v1, %v8379_v0 }
 0x316   : > { %v8487_v6 = vpop.f32.mrb[24].mxu0  ;;  %v8547_v8 = vpop.f32.mrb[24].mxu1 }
 0x317   : > { %v8494_v7 = vadd.f32 %v8487_v6, %v8434_v63  ;;  %v10698_v9 = vpop.f32.mrb[25].mxu0  ;;  %v10704_v10 = vpop.f32.mrb[25].mxu1 }
 0x318   : > { %v8490_v11 = vpop.f32.mrb[26].mxu0  ;;  %v8550_v14 = vpop.f32.mrb[26].mxu1 }
 0x319   : > { %v8554_v12 = vadd.f32 %v8547_v8, %v8494_v7  ;;  %v8495_v13 = vadd.f32 %v8490_v11, %v8435_v5  ;;  %v10699_v15 = vpop.f32.mrb[27].mxu0  ;;  %v10705_v16 = vpop.f32.mrb[27].mxu1 }
 0x31b   : > { %v8555_v28 = vadd.f32 %v8550_v14, %v8495_v13 }
 0x31e   : > { %v8603_v17 = vpop.f32.mrb[28].mxu0  ;;  %v8659_v19 = vpop.f32.mrb[28].mxu1 }
 0x31f   : > { %v8610_v18 = vadd.f32 %v8603_v17, %v8554_v12  ;;  %v10710_v20 = vpop.f32.mrb[29].mxu0  ;;  %v10716_v21 = vpop.f32.mrb[29].mxu1 }
 0x320   : > { %v8606_v22 = vpop.f32.mrb[30].mxu0  ;;  %v8662_v26 = vpop.f32.mrb[30].mxu1 }
 0x321   : > { %v8666_v23 = vadd.f32 %v8659_v19, %v8610_v18  ;;  %v8611_v25 = vadd.f32 %v8606_v22, %v8555_v28  ;;  %v10711_v29 = vpop.f32.mrb[31].mxu0  ;;  %v10717_v24 = vpop.f32.mrb[31].mxu1 }
 0x323   : > { %v8668_v30 = vadd.f32 %v12181_v27, %v8666_v23  ;;  %v8667_v31 = vadd.f32 %v8662_v26, %v8611_v25 }
 0x325   : > { %vm8670_vm9 = vcmp.ge.f32.partialorder %v8668_v30, 0.0  ;;  %v8672_v32 = vmul.f32 0.2, %v8668_v30  ;;  %v8669_v33 = vadd.f32 %v12181_v27, %v8667_v31 }
 0x327   : > { %v8674_v34 = vsel %vm8670_vm9, %v8668_v30, %v8672_v32  ;;  %vm8671_vm10 = vcmp.ge.f32.partialorder %v8669_v33, 0.0  ;;  %v8673_v35 = vmul.f32 0.2, %v8669_v33 }
 0x328   : > { %v9564_v36 = vpack.c.bf16 %v8674_v34, %v8674_v34 }
 0x329   : > { %v8675_v37 = vsel %vm8671_vm10, %v8669_v33, %v8673_v35 }
 0x32a   : > { %9543 = vst.msk [vmem:[%s11511_s9 + $0x40] sm:$0xf] %vm1209_vm3, %v9564_v36  ;;  %v9565_v39 = vpack.c.bf16 %v8675_v37, %v8675_v37 }
 0x32c   : > { %v8687_v40 = vsel %vm11525_vm8, %v9565_v39, %v9544_v38 }
 0x32d   : > { %9545 = vst [vmem:[%s11511_s9 + $0x44] sm:$0x1] %v8687_v40 }
 0x32e PF: > { %s13_s14 = sadd.s32 1, %s10842_s14   ;;  %s12230_s12 = smov %s10838_s13 }
 0x32f   : > { %p10_p5 = scmp.ge.s32.totalorder %s13_s14, 4   ;;  %s12231_s13 = smov %s12233_s15 }
 0x331   :  { %12 = sbr.rel (!%p10_p5) target bundleno = 2 (0x2), region = 131 }

</bundles_post_ra>
